<compile_context>
chip_gen: v7x
topology: tpu7x:2x2x1
jax: 0.10.0
libtpu: 0.0.40
codegen_flags: <defaults>
</compile_context>

<pallas_src>
import jax
import jax.numpy as jnp
from jax.experimental import pallas as pl
from jax.experimental.pallas import tpu as pltpu

BN_EPS = 1e-5
Z_SIZE = 8        # latent_dim
NUM_FLOWS = 6
QZ_DIM = 32       # q_z_output_dim
# fixed architecture: x (B,1,32,4) -conv(3,4)->(32,30,1) -conv(5,1)->(16,26,1) -conv(7,1)->(8,20,1)
# flatten(+y) -> 161 -> dense1(32) -> heads(118) -> flows -> dense3(32) -> dense4(161->160)
# -> (8,20,1) -deconv(7,1)->(16,26,1) -deconv(5,1)->(32,30,1) -deconv(3,4)->(1,32,4)


# ----------------------------------------------------------------------------
# Fused full-forward kernel
# ----------------------------------------------------------------------------
def _make_kernel(batch):
    Z, NF = Z_SIZE, NUM_FLOWS

    def mm(a, w_ref):
        # bf16 MXU operands, f32 accumulation
        return jnp.dot(a.astype(jnp.bfloat16), w_ref[...],
                       preferred_element_type=jnp.float32)

    def bias_bn_relu(y, pk, relu=True):
        # pk rows: [bias, gamma, beta]; training-mode BN over rows, single-pass stats.
        bias, gamma, beta = pk[0:1, :], pk[1:2, :], pk[2:3, :]
        y = y + bias
        inv_n = 1.0 / y.shape[0]
        s = jnp.sum(y, axis=0, keepdims=True)
        ss = jnp.sum(y * y, axis=0, keepdims=True)
        mean = s * inv_n
        var = ss * inv_n - mean * mean
        y = (y - mean) * jax.lax.rsqrt(var + BN_EPS) * gamma + beta
        if relu:
            y = jnp.maximum(y, 0.0)
        return y

    def kernel(x_ref, y_ref, eps_ref,
               w1_ref, pk1_ref, w2_ref, pk2_ref, w3_ref, pk3_ref,
               wd1_ref, pkd1_ref, wh_ref, bh_ref,
               wd3_ref, pkd3_ref, wd4_ref, pkd4_ref,
               wt1_ref, pkt1_ref, wt2_ref, pkt2_ref, wt3_ref, bt3_ref,
               lat_ref, xdec_ref,
               p1_s, p2_s, p3_s, enc_s, pd1_s, p4_s, pd2_s, p5_s, pd3_s, p6_s):
        x = x_ref[...]                                    # (B*32, 4) f32

        # ---------------- encoder conv1: Conv2d(1,32,(3,4)) + BN + ReLU ----------------
        for bb in range(batch):
            for kh in range(3):
                p1_s[bb * 30:(bb + 1) * 30, kh * 4:(kh + 1) * 4] = \
                    x[bb * 32 + kh: bb * 32 + kh + 30, :]
        h1 = bias_bn_relu(mm(p1_s[...], w1_ref), pk1_ref[...])          # (B*30, 32)

        # ---------------- conv2: Conv2d(32,16,(5,1)) + BN + ReLU ----------------
        for bb in range(batch):
            for kh in range(5):
                p2_s[bb * 26:(bb + 1) * 26, kh * 32:(kh + 1) * 32] = \
                    h1[bb * 30 + kh: bb * 30 + kh + 26, :]
        h2 = bias_bn_relu(mm(p2_s[...], w2_ref), pk2_ref[...])          # (B*26, 16)

        # ---------------- conv3: Conv2d(16,8,(7,1)) + BN + ReLU ----------------
        for bb in range(batch):
            for kh in range(7):
                p3_s[bb * 20:(bb + 1) * 20, kh * 16:(kh + 1) * 16] = \
                    h2[bb * 26 + kh: bb * 26 + kh + 20, :]
        h3 = bias_bn_relu(mm(p3_s[...], w3_ref), pk3_ref[...])          # (B*20, 8)

        # ---------------- flatten (torch channel-major order folded into wd1) + cat(y) ----------------
        for bb in range(batch):
            for hh in range(20):
                enc_s[bb:bb + 1, hh * 8:(hh + 1) * 8] = \
                    h3[bb * 20 + hh: bb * 20 + hh + 1, :]
        enc_s[:, 160:161] = y_ref[...]
        hd = bias_bn_relu(mm(enc_s[...], wd1_ref), pkd1_ref[...])       # (B, 32)

        # ---------------- merged heads: [mean | logvar | u | w | b_flow] ----------------
        heads = mm(hd, wh_ref) + bh_ref[...]                            # (B, 118)
        mean = heads[:, 0:Z]
        logvar = heads[:, Z:2 * Z]
        u_all = heads[:, 2 * Z:2 * Z + NF * Z]
        w_all = heads[:, 2 * Z + NF * Z:2 * Z + 2 * NF * Z]
        b_all = heads[:, 2 * Z + 2 * NF * Z:2 * Z + 2 * NF * Z + NF]

        # ---------------- reparameterize + 6 planar flows ----------------
        z = mean + eps_ref[...] * jnp.exp(0.5 * logvar)
        z0 = z
        logdet = jnp.zeros((batch, 1), jnp.float32)
        for k in range(NF):
            u_k = u_all[:, k * Z:(k + 1) * Z]
            w_k = w_all[:, k * Z:(k + 1) * Z]
            b_k = b_all[:, k:k + 1]
            uw = jnp.sum(w_k * u_k, axis=1, keepdims=True)
            m_uw = -1.0 + jax.nn.softplus(uw)
            w_norm_sq = jnp.sum(w_k * w_k, axis=1, keepdims=True)
            u_hat = u_k + (m_uw - uw) * w_k / w_norm_sq
            wzb = jnp.sum(w_k * z, axis=1, keepdims=True) + b_k
            t = jnp.tanh(wzb)
            z = z + u_hat * t
            psi_u = (1.0 - t * t) * jnp.sum(w_k * u_hat, axis=1, keepdims=True)
            logdet = logdet + jnp.log(jnp.abs(1.0 + psi_u))

        # packed latent outputs: [mean | logvar | z0 | z_k | log_det_j]
        lat_ref[:, 0:Z] = mean
        lat_ref[:, Z:2 * Z] = logvar
        lat_ref[:, 2 * Z:3 * Z] = z0
        lat_ref[:, 3 * Z:4 * Z] = z
        lat_ref[:, 4 * Z:4 * Z + 1] = logdet

        # ---------------- decoder dense3 / dense4 (+ BN + ReLU) ----------------
        d3 = bias_bn_relu(mm(z, wd3_ref), pkd3_ref[...])                # (B, 32)
        d4 = bias_bn_relu(mm(d3, wd4_ref), pkd4_ref[...])               # (B, 160), (h,c)-ordered cols

        # ---------------- unflatten + pad for deconv t1 (ConvTranspose2d(8,16,(7,1))) ----------------
        pd1_s[...] = jnp.zeros_like(pd1_s)
        for bb in range(batch):
            for hh in range(20):
                pd1_s[bb * 32 + 6 + hh: bb * 32 + 7 + hh, :] = \
                    d4[bb:bb + 1, hh * 8:(hh + 1) * 8]
        pd1 = pd1_s[...]
        for bb in range(batch):
            for kh in range(7):
                p4_s[bb * 26:(bb + 1) * 26, kh * 8:(kh + 1) * 8] = \
                    pd1[bb * 32 + kh: bb * 32 + kh + 26, :]
        s1 = bias_bn_relu(mm(p4_s[...], wt1_ref), pkt1_ref[...])        # (B*26, 16)

        # ---------------- deconv t2: ConvTranspose2d(16,32,(5,1)) + BN + ReLU ----------------
        pd2_s[...] = jnp.zeros_like(pd2_s)
        for bb in range(batch):
            pd2_s[bb * 34 + 4: bb * 34 + 30, :] = s1[bb * 26:(bb + 1) * 26, :]
        pd2 = pd2_s[...]
        for bb in range(batch):
            for kh in range(5):
                p5_s[bb * 30:(bb + 1) * 30, kh * 16:(kh + 1) * 16] = \
                    pd2[bb * 34 + kh: bb * 34 + kh + 30, :]
        s2 = bias_bn_relu(mm(p5_s[...], wt2_ref), pkt2_ref[...])        # (B*30, 32)

        # ---------------- deconv t3: ConvTranspose2d(32,1,(3,4)) (no BN / ReLU) ----------------
        pd3_s[...] = jnp.zeros_like(pd3_s)
        for bb in range(batch):
            pd3_s[bb * 34 + 2: bb * 34 + 32, :] = s2[bb * 30:(bb + 1) * 30, :]
        pd3 = pd3_s[...]
        for bb in range(batch):
            for kh in range(3):
                p6_s[bb * 32:(bb + 1) * 32, kh * 32:(kh + 1) * 32] = \
                    pd3[bb * 34 + kh: bb * 34 + kh + 32, :]
        xdec_ref[...] = mm(p6_s[...], wt3_ref) + bt3_ref[...]           # (B*32, 4)

    return kernel


# ----------------------------------------------------------------------------
# Host-side parameter packing (PyTorch layouts -> kernel-ready matmul layouts)
# ----------------------------------------------------------------------------
def _pack_params(P):
    f32, bf16 = jnp.float32, jnp.bfloat16

    def pk(bias, gamma, beta):                      # (3, N): [bias; gamma; beta]
        return jnp.stack([bias, gamma, beta], axis=0).astype(f32)

    # conv weights -> (kh*C_in, C_out), rows ordered (kh, c_in) to match in-kernel im2col
    w1 = P["c1_w"].reshape(32, 12).T.astype(bf16)                                   # (12, 32)
    w2 = jnp.transpose(P["c2_w"][:, :, :, 0], (2, 1, 0)).reshape(5 * 32, 16).astype(bf16)
    w3 = jnp.transpose(P["c3_w"][:, :, :, 0], (2, 1, 0)).reshape(7 * 16, 8).astype(bf16)

    # dense1: torch flat index is c*20+h; kernel builds the input row in (h, c) order,
    # so permute the first 160 input rows accordingly (row 160 is the y feature).
    d1_main = jnp.transpose(P["d1_w"][:, :160].reshape(32, 8, 20), (2, 1, 0)).reshape(160, 32)
    wd1 = jnp.concatenate([d1_main, P["d1_w"][:, 160:].T], axis=0).astype(bf16)     # (161, 32)

    # merged latent heads: [q_z_mean | q_z_logvar | amor_u | amor_w | amor_b]
    wh = jnp.concatenate([P["qm_w"], P["qv_w"], P["au_w"], P["aw_w"], P["ab_w"]],
                         axis=0).T.astype(bf16)                                     # (32, 118)
    bh = jnp.concatenate([P["qm_b"], P["qv_b"], P["au_b"], P["aw_b"], P["ab_b"]],
                         axis=0)[None, :].astype(f32)                               # (1, 118)

    wd3 = P["d3_w"].T.astype(bf16)                                                  # (8, 32)

    # dense4: drop output feature 160 (torch: out[:, :-1]) and permute the remaining 160
    # output columns to (h, c) order; permute bias / BN params identically.
    def perm_hc(v):                                  # (161,) -> (160,) in (h, c) order
        return jnp.transpose(v[:160].reshape(8, 20)).reshape(160)

    wd4 = jnp.transpose(P["d4_w"][:160, :].reshape(8, 20, 32),
                        (1, 0, 2)).reshape(160, 32).T.astype(bf16)                  # (32, 160)
    pk4 = jnp.stack([perm_hc(P["d4_b"]), perm_hc(P["dnn_bn4_g"]),
                     perm_hc(P["dnn_bn4_b"])], axis=0).astype(f32)                  # (3, 160)

    # ConvTranspose as full correlation: flip kernel, swap in/out channels,
    # rows ordered (kh, c_in) to match in-kernel im2col of the padded slab.
    wt1 = jnp.transpose(jnp.flip(P["t1_w"][:, :, :, 0], axis=2),
                        (2, 0, 1)).reshape(7 * 8, 16).astype(bf16)                  # (56, 16)
    wt2 = jnp.transpose(jnp.flip(P["t2_w"][:, :, :, 0], axis=2),
                        (2, 0, 1)).reshape(5 * 16, 32).astype(bf16)                 # (80, 32)
    wt3 = jnp.transpose(jnp.flip(P["t3_w"][:, 0, :, :], axis=1),
                        (1, 0, 2)).reshape(3 * 32, 4).astype(bf16)                  # (96, 4)
    bt3 = P["t3_b"].reshape(1, 1).astype(f32)

    return (w1, pk(P["c1_b"], P["bn1_g"], P["bn1_b"]),
            w2, pk(P["c2_b"], P["bn2_g"], P["bn2_b"]),
            w3, pk(P["c3_b"], P["bn3_g"], P["bn3_b"]),
            wd1, pk(P["d1_b"], P["dnn_bn1_g"], P["dnn_bn1_b"]),
            wh, bh,
            wd3, pk(P["d3_b"], P["dnn_bn3_g"], P["dnn_bn3_b"]),
            wd4, pk4,
            wt1, pk(P["t1_b"], P["tbn1_g"], P["tbn1_b"]),
            wt2, pk(P["t2_b"], P["tbn2_g"], P["tbn2_b"]),
            wt3, bt3)


# ----------------------------------------------------------------------------
# Forward pass wrapper (single pallas_call)
# ----------------------------------------------------------------------------
def planar_vae_forward(P, x, y, eps):
    """x: (B,1,32,4) NCHW, y: (B,1), eps: (B,8) (stand-in for torch.randn_like).
    Returns (x_decoded, z_mu, z_logvar, log_det_j, z0, z_k) like PlanarVAE.forward."""
    Bn = x.shape[0]
    Z = Z_SIZE
    x2d = x.reshape(Bn * 32, 4).astype(jnp.float32)
    ins = (x2d, y.astype(jnp.float32), eps.astype(jnp.float32)) + _pack_params(P)

    lat, xdec = pl.pallas_call(
        _make_kernel(Bn),
        out_shape=(jax.ShapeDtypeStruct((Bn, 4 * Z + 1), jnp.float32),
                   jax.ShapeDtypeStruct((Bn * 32, 4), jnp.float32)),
        grid=(1,),
        in_specs=[pl.BlockSpec(a.shape, lambda i: (0, 0)) for a in ins],
        out_specs=(pl.BlockSpec((Bn, 4 * Z + 1), lambda i: (0, 0)),
                   pl.BlockSpec((Bn * 32, 4), lambda i: (0, 0))),
        scratch_shapes=[
            pltpu.VMEM((Bn * 30, 12), jnp.float32),    # conv1 im2col
            pltpu.VMEM((Bn * 26, 160), jnp.float32),   # conv2 im2col
            pltpu.VMEM((Bn * 20, 112), jnp.float32),   # conv3 im2col
            pltpu.VMEM((Bn, 161), jnp.float32),        # flattened encoder vector (+y)
            pltpu.VMEM((Bn * 32, 8), jnp.float32),     # padded decoder input (deconv1)
            pltpu.VMEM((Bn * 26, 56), jnp.float32),    # deconv1 im2col
            pltpu.VMEM((Bn * 34, 16), jnp.float32),    # padded deconv2 input
            pltpu.VMEM((Bn * 30, 80), jnp.float32),    # deconv2 im2col
            pltpu.VMEM((Bn * 34, 32), jnp.float32),    # padded deconv3 input
            pltpu.VMEM((Bn * 32, 96), jnp.float32),    # deconv3 im2col
        ],
        compiler_params=pltpu.CompilerParams(dimension_semantics=("arbitrary",)),
    )(*ins)

    x_dec = xdec.reshape(Bn, 1, 32, 4)
    mean, logvar = lat[:, 0:Z], lat[:, Z:2 * Z]
    z0, zk, logdet = lat[:, 2 * Z:3 * Z], lat[:, 3 * Z:4 * Z], lat[:, 4 * Z]
    return x_dec, mean, logvar, logdet, z0, zk


# ----------------------------------------------------------------------------
# Deterministic synthetic parameters (PyTorch-native layouts)
# ----------------------------------------------------------------------------
def init_params(key, latent_dim=Z_SIZE, q_z_output_dim=QZ_DIM, num_flows=NUM_FLOWS):
    ks = iter(jax.random.split(key, 32))
    f32 = jnp.float32

    def rnd(*shape):
        return 0.05 * jax.random.normal(next(ks), shape, f32)

    def ones(n):
        return jnp.ones((n,), f32)

    def zeros(n):
        return jnp.zeros((n,), f32)

    P = {}
    # encoder q_z_nn
    P["c1_w"], P["c1_b"], P["bn1_g"], P["bn1_b"] = rnd(32, 1, 3, 4), rnd(32), ones(32), zeros(32)
    P["c2_w"], P["c2_b"], P["bn2_g"], P["bn2_b"] = rnd(16, 32, 5, 1), rnd(16), ones(16), zeros(16)
    P["c3_w"], P["c3_b"], P["bn3_g"], P["bn3_b"] = rnd(8, 16, 7, 1), rnd(8), ones(8), zeros(8)
    # dense encoder head
    P["d1_w"], P["d1_b"] = rnd(q_z_output_dim, 161), rnd(q_z_output_dim)
    P["dnn_bn1_g"], P["dnn_bn1_b"] = ones(q_z_output_dim), zeros(q_z_output_dim)
    P["qm_w"], P["qm_b"] = rnd(latent_dim, q_z_output_dim), rnd(latent_dim)
    P["qv_w"], P["qv_b"] = rnd(latent_dim, q_z_output_dim), rnd(latent_dim)
    # amortized flow parameters
    P["au_w"], P["au_b"] = rnd(num_flows * latent_dim, q_z_output_dim), rnd(num_flows * latent_dim)
    P["aw_w"], P["aw_b"] = rnd(num_flows * latent_dim, q_z_output_dim), rnd(num_flows * latent_dim)
    P["ab_w"], P["ab_b"] = rnd(num_flows, q_z_output_dim), rnd(num_flows)
    # decoder dense
    P["d3_w"], P["d3_b"] = rnd(q_z_output_dim, latent_dim), rnd(q_z_output_dim)
    P["dnn_bn3_g"], P["dnn_bn3_b"] = ones(q_z_output_dim), zeros(q_z_output_dim)
    P["d4_w"], P["d4_b"] = rnd(161, q_z_output_dim), rnd(161)
    P["dnn_bn4_g"], P["dnn_bn4_b"] = ones(161), zeros(161)
    # decoder p_x_nn (ConvTranspose2d weights: (C_in, C_out, kh, kw))
    P["t1_w"], P["t1_b"], P["tbn1_g"], P["tbn1_b"] = rnd(8, 16, 7, 1), rnd(16), ones(16), zeros(16)
    P["t2_w"], P["t2_b"], P["tbn2_g"], P["tbn2_b"] = rnd(16, 32, 5, 1), rnd(32), ones(32), zeros(32)
    P["t3_w"], P["t3_b"] = rnd(32, 1, 3, 4), rnd(1)
    return P


if __name__ == "__main__":
    key = jax.random.PRNGKey(0)
    k_param, k_x, k_y, k_eps = jax.random.split(key, 4)

    B = 2
    x = jax.random.normal(k_x, (B, 1, 32, 4), jnp.float32)   # NCHW input
    y = jax.random.normal(k_y, (B, 1), jnp.float32)          # conditioning scalar
    eps = jax.random.normal(k_eps, (B, Z_SIZE), jnp.float32)  # torch.randn_like(mean)

    params = init_params(k_param)
    fwd = jax.jit(planar_vae_forward)
    outs = fwd(params, x, y, eps)
    outs = jax.block_until_ready(outs)

    x_dec, z_mu, z_logvar, log_det_j, z0, zk = outs
    assert x_dec.shape == (B, 1, 32, 4)
    assert z_mu.shape == (B, Z_SIZE) and z_logvar.shape == (B, Z_SIZE)
    assert log_det_j.shape == (B,) and z0.shape == (B, Z_SIZE) and zk.shape == (B, Z_SIZE)
    assert all(bool(jnp.all(jnp.isfinite(o))) for o in outs)
    print("KERNEL_OK")
</pallas_src>

<mosaic_0001>
module attributes {stable_mosaic.version = 11 : i64} {
  func.func @kernel(%arg0: i32, %arg1: memref<64x4xf32, #tpu.memory_space<vmem>>, %arg2: memref<2x1xf32, #tpu.memory_space<vmem>>, %arg3: memref<2x8xf32, #tpu.memory_space<vmem>>, %arg4: memref<12x32xbf16, #tpu.memory_space<vmem>>, %arg5: memref<3x32xf32, #tpu.memory_space<vmem>>, %arg6: memref<160x16xbf16, #tpu.memory_space<vmem>>, %arg7: memref<3x16xf32, #tpu.memory_space<vmem>>, %arg8: memref<112x8xbf16, #tpu.memory_space<vmem>>, %arg9: memref<3x8xf32, #tpu.memory_space<vmem>>, %arg10: memref<161x32xbf16, #tpu.memory_space<vmem>>, %arg11: memref<3x32xf32, #tpu.memory_space<vmem>>, %arg12: memref<32x118xbf16, #tpu.memory_space<vmem>>, %arg13: memref<1x118xf32, #tpu.memory_space<vmem>>, %arg14: memref<8x32xbf16, #tpu.memory_space<vmem>>, %arg15: memref<3x32xf32, #tpu.memory_space<vmem>>, %arg16: memref<32x160xbf16, #tpu.memory_space<vmem>>, %arg17: memref<3x160xf32, #tpu.memory_space<vmem>>, %arg18: memref<56x16xbf16, #tpu.memory_space<vmem>>, %arg19: memref<3x16xf32, #tpu.memory_space<vmem>>, %arg20: memref<80x32xbf16, #tpu.memory_space<vmem>>, %arg21: memref<3x32xf32, #tpu.memory_space<vmem>>, %arg22: memref<96x4xbf16, #tpu.memory_space<vmem>>, %arg23: memref<1x1xf32, #tpu.memory_space<vmem>>, %arg24: memref<2x33xf32, #tpu.memory_space<vmem>>, %arg25: memref<64x4xf32, #tpu.memory_space<vmem>>, %arg26: memref<60x12xf32, #tpu.memory_space<vmem>>, %arg27: memref<52x160xf32, #tpu.memory_space<vmem>>, %arg28: memref<40x112xf32, #tpu.memory_space<vmem>>, %arg29: memref<2x161xf32, #tpu.memory_space<vmem>>, %arg30: memref<64x8xf32, #tpu.memory_space<vmem>>, %arg31: memref<52x56xf32, #tpu.memory_space<vmem>>, %arg32: memref<68x16xf32, #tpu.memory_space<vmem>>, %arg33: memref<60x80xf32, #tpu.memory_space<vmem>>, %arg34: memref<68x32xf32, #tpu.memory_space<vmem>>, %arg35: memref<64x96xf32, #tpu.memory_space<vmem>>) attributes {dimension_semantics = [#tpu.dimension_semantics<arbitrary>], iteration_bounds = array<i64: 1>, scalar_prefetch = 0 : i64, scratch_operands = 10 : i64, tpu.core_type = #tpu.core_type<tc>, window_params = [{pipeline_mode = #tpu.pipeline_mode<synchronous>, transform_indices = @transform_0, window_bounds = array<i64: 64, 4>}, {pipeline_mode = #tpu.pipeline_mode<synchronous>, transform_indices = @transform_1, window_bounds = array<i64: 2, 1>}, {pipeline_mode = #tpu.pipeline_mode<synchronous>, transform_indices = @transform_2, window_bounds = array<i64: 2, 8>}, {pipeline_mode = #tpu.pipeline_mode<synchronous>, transform_indices = @transform_3, window_bounds = array<i64: 12, 32>}, {pipeline_mode = #tpu.pipeline_mode<synchronous>, transform_indices = @transform_4, window_bounds = array<i64: 3, 32>}, {pipeline_mode = #tpu.pipeline_mode<synchronous>, transform_indices = @transform_5, window_bounds = array<i64: 160, 16>}, {pipeline_mode = #tpu.pipeline_mode<synchronous>, transform_indices = @transform_6, window_bounds = array<i64: 3, 16>}, {pipeline_mode = #tpu.pipeline_mode<synchronous>, transform_indices = @transform_7, window_bounds = array<i64: 112, 8>}, {pipeline_mode = #tpu.pipeline_mode<synchronous>, transform_indices = @transform_8, window_bounds = array<i64: 3, 8>}, {pipeline_mode = #tpu.pipeline_mode<synchronous>, transform_indices = @transform_9, window_bounds = array<i64: 161, 32>}, {pipeline_mode = #tpu.pipeline_mode<synchronous>, transform_indices = @transform_10, window_bounds = array<i64: 3, 32>}, {pipeline_mode = #tpu.pipeline_mode<synchronous>, transform_indices = @transform_11, window_bounds = array<i64: 32, 118>}, {pipeline_mode = #tpu.pipeline_mode<synchronous>, transform_indices = @transform_12, window_bounds = array<i64: 1, 118>}, {pipeline_mode = #tpu.pipeline_mode<synchronous>, transform_indices = @transform_13, window_bounds = array<i64: 8, 32>}, {pipeline_mode = #tpu.pipeline_mode<synchronous>, transform_indices = @transform_14, window_bounds = array<i64: 3, 32>}, {pipeline_mode = #tpu.pipeline_mode<synchronous>, transform_indices = @transform_15, window_bounds = array<i64: 32, 160>}, {pipeline_mode = #tpu.pipeline_mode<synchronous>, transform_indices = @transform_16, window_bounds = array<i64: 3, 160>}, {pipeline_mode = #tpu.pipeline_mode<synchronous>, transform_indices = @transform_17, window_bounds = array<i64: 56, 16>}, {pipeline_mode = #tpu.pipeline_mode<synchronous>, transform_indices = @transform_18, window_bounds = array<i64: 3, 16>}, {pipeline_mode = #tpu.pipeline_mode<synchronous>, transform_indices = @transform_19, window_bounds = array<i64: 80, 32>}, {pipeline_mode = #tpu.pipeline_mode<synchronous>, transform_indices = @transform_20, window_bounds = array<i64: 3, 32>}, {pipeline_mode = #tpu.pipeline_mode<synchronous>, transform_indices = @transform_21, window_bounds = array<i64: 96, 4>}, {pipeline_mode = #tpu.pipeline_mode<synchronous>, transform_indices = @transform_22, window_bounds = array<i64: 1, 1>}, {pipeline_mode = #tpu.pipeline_mode<synchronous>, transform_indices = @transform_23, window_bounds = array<i64: 2, 33>}, {pipeline_mode = #tpu.pipeline_mode<synchronous>, transform_indices = @transform_24, window_bounds = array<i64: 64, 4>}]} {
    %c0 = arith.constant 0 : index
    %c0_0 = arith.constant 0 : index
    %0 = vector.load %arg1[%c0, %c0_0] : memref<64x4xf32, #tpu.memory_space<vmem>>, vector<64x4xf32>
    %1 = vector.extract_strided_slice %0 {offsets = [0, 0], sizes = [30, 4], strides = [1, 1]} : vector<64x4xf32> to vector<30x4xf32>
    %c0_1 = arith.constant 0 : index
    %c0_2 = arith.constant 0 : index
    %2 = vector.load %arg26[%c0_1, %c0_2] : memref<60x12xf32, #tpu.memory_space<vmem>>, vector<30x4xf32>
    tpu.vector_store %arg26[%c0_1, %c0_2], %1 {strides = array<i32>} : memref<60x12xf32, #tpu.memory_space<vmem>>, vector<30x4xf32>,
    %3 = vector.extract_strided_slice %0 {offsets = [1, 0], sizes = [30, 4], strides = [1, 1]} : vector<64x4xf32> to vector<30x4xf32>
    %c0_3 = arith.constant 0 : index
    %c4 = arith.constant 4 : index
    %4 = vector.load %arg26[%c0_3, %c4] : memref<60x12xf32, #tpu.memory_space<vmem>>, vector<30x4xf32>
    tpu.vector_store %arg26[%c0_3, %c4], %3 {strides = array<i32>} : memref<60x12xf32, #tpu.memory_space<vmem>>, vector<30x4xf32>,
    %5 = vector.extract_strided_slice %0 {offsets = [2, 0], sizes = [30, 4], strides = [1, 1]} : vector<64x4xf32> to vector<30x4xf32>
    %c0_4 = arith.constant 0 : index
    %c8 = arith.constant 8 : index
    %6 = vector.load %arg26[%c0_4, %c8] : memref<60x12xf32, #tpu.memory_space<vmem>>, vector<30x4xf32>
    tpu.vector_store %arg26[%c0_4, %c8], %5 {strides = array<i32>} : memref<60x12xf32, #tpu.memory_space<vmem>>, vector<30x4xf32>,
    %7 = vector.extract_strided_slice %0 {offsets = [32, 0], sizes = [30, 4], strides = [1, 1]} : vector<64x4xf32> to vector<30x4xf32>
    %c30 = arith.constant 30 : index
    %c0_5 = arith.constant 0 : index
    %8 = vector.load %arg26[%c30, %c0_5] : memref<60x12xf32, #tpu.memory_space<vmem>>, vector<30x4xf32>
    tpu.vector_store %arg26[%c30, %c0_5], %7 {strides = array<i32>} : memref<60x12xf32, #tpu.memory_space<vmem>>, vector<30x4xf32>,
    %9 = vector.extract_strided_slice %0 {offsets = [33, 0], sizes = [30, 4], strides = [1, 1]} : vector<64x4xf32> to vector<30x4xf32>
    %c30_6 = arith.constant 30 : index
    %c4_7 = arith.constant 4 : index
    %10 = vector.load %arg26[%c30_6, %c4_7] : memref<60x12xf32, #tpu.memory_space<vmem>>, vector<30x4xf32>
    tpu.vector_store %arg26[%c30_6, %c4_7], %9 {strides = array<i32>} : memref<60x12xf32, #tpu.memory_space<vmem>>, vector<30x4xf32>,
    %11 = vector.extract_strided_slice %0 {offsets = [34, 0], sizes = [30, 4], strides = [1, 1]} : vector<64x4xf32> to vector<30x4xf32>
    %c30_8 = arith.constant 30 : index
    %c8_9 = arith.constant 8 : index
    %12 = vector.load %arg26[%c30_8, %c8_9] : memref<60x12xf32, #tpu.memory_space<vmem>>, vector<30x4xf32>
    tpu.vector_store %arg26[%c30_8, %c8_9], %11 {strides = array<i32>} : memref<60x12xf32, #tpu.memory_space<vmem>>, vector<30x4xf32>,
    %c0_10 = arith.constant 0 : index
    %c0_11 = arith.constant 0 : index
    %13 = vector.load %arg26[%c0_10, %c0_11] : memref<60x12xf32, #tpu.memory_space<vmem>>, vector<60x12xf32>
    %14 = arith.truncf %13 : vector<60x12xf32> to vector<60x12xbf16>
    %c0_12 = arith.constant 0 : index
    %c0_13 = arith.constant 0 : index
    %15 = vector.load %arg4[%c0_12, %c0_13] : memref<12x32xbf16, #tpu.memory_space<vmem>>, vector<12x32xbf16>
    %cst = arith.constant dense<0.000000e+00> : vector<60x32xf32>
    %16 = tpu.matmul %14, %15, %cst {dimension_numbers = #tpu.dot_dimension_numbers<[1], [0], [0], [1], [0, 0, 1, 1], [], []>} : vector<60x12xbf16>, vector<12x32xbf16>, vector<60x32xf32> -> vector<60x32xf32>
    %c0_14 = arith.constant 0 : index
    %c0_15 = arith.constant 0 : index
    %17 = vector.load %arg5[%c0_14, %c0_15] : memref<3x32xf32, #tpu.memory_space<vmem>>, vector<3x32xf32>
    %18 = vector.extract_strided_slice %17 {offsets = [0, 0], sizes = [1, 32], strides = [1, 1]} : vector<3x32xf32> to vector<1x32xf32>
    %19 = vector.extract_strided_slice %17 {offsets = [1, 0], sizes = [1, 32], strides = [1, 1]} : vector<3x32xf32> to vector<1x32xf32>
    %20 = vector.extract_strided_slice %17 {offsets = [2, 0], sizes = [1, 32], strides = [1, 1]} : vector<3x32xf32> to vector<1x32xf32>
    %21 = vector.broadcast %18 : vector<1x32xf32> to vector<60x32xf32>
    %22 = arith.addf %16, %21 : vector<60x32xf32>
    %cst_16 = arith.constant dense<0.000000e+00> : vector<32xf32>
    %23 = vector.multi_reduction <add>, %22, %cst_16 [0] : vector<60x32xf32> to vector<32xf32>
    %24 = vector.shape_cast %23 : vector<32xf32> to vector<1x32xf32>
    %25 = arith.mulf %22, %22 : vector<60x32xf32>
    %cst_17 = arith.constant dense<0.000000e+00> : vector<32xf32>
    %26 = vector.multi_reduction <add>, %25, %cst_17 [0] : vector<60x32xf32> to vector<32xf32>
    %27 = vector.shape_cast %26 : vector<32xf32> to vector<1x32xf32>
    %cst_18 = arith.constant 0.0166666675 : f32
    %28 = vector.broadcast %cst_18 : f32 to vector<1x32xf32>
    %29 = arith.mulf %24, %28 : vector<1x32xf32>
    %cst_19 = arith.constant 0.0166666675 : f32
    %30 = vector.broadcast %cst_19 : f32 to vector<1x32xf32>
    %31 = arith.mulf %27, %30 : vector<1x32xf32>
    %32 = arith.mulf %29, %29 : vector<1x32xf32>
    %33 = arith.subf %31, %32 : vector<1x32xf32>
    %34 = vector.broadcast %29 : vector<1x32xf32> to vector<60x32xf32>
    %35 = arith.subf %22, %34 : vector<60x32xf32>
    %cst_20 = arith.constant 9.99999974E-6 : f32
    %36 = vector.broadcast %cst_20 : f32 to vector<1x32xf32>
    %37 = arith.addf %33, %36 : vector<1x32xf32>
    %38 = math.rsqrt %37 : vector<1x32xf32>
    %39 = vector.broadcast %38 : vector<1x32xf32> to vector<60x32xf32>
    %40 = arith.mulf %35, %39 : vector<60x32xf32>
    %41 = vector.broadcast %19 : vector<1x32xf32> to vector<60x32xf32>
    %42 = arith.mulf %40, %41 : vector<60x32xf32>
    %43 = vector.broadcast %20 : vector<1x32xf32> to vector<60x32xf32>
    %44 = arith.addf %42, %43 : vector<60x32xf32>
    %cst_21 = arith.constant 0.000000e+00 : f32
    %45 = vector.broadcast %cst_21 : f32 to vector<60x32xf32>
    %46 = arith.maximumf %44, %45 : vector<60x32xf32>
    %47 = vector.extract_strided_slice %46 {offsets = [0, 0], sizes = [26, 32], strides = [1, 1]} : vector<60x32xf32> to vector<26x32xf32>
    %c0_22 = arith.constant 0 : index
    %c0_23 = arith.constant 0 : index
    %48 = vector.load %arg27[%c0_22, %c0_23] : memref<52x160xf32, #tpu.memory_space<vmem>>, vector<26x32xf32>
    tpu.vector_store %arg27[%c0_22, %c0_23], %47 {strides = array<i32>} : memref<52x160xf32, #tpu.memory_space<vmem>>, vector<26x32xf32>,
    %49 = vector.extract_strided_slice %46 {offsets = [1, 0], sizes = [26, 32], strides = [1, 1]} : vector<60x32xf32> to vector<26x32xf32>
    %c0_24 = arith.constant 0 : index
    %c32 = arith.constant 32 : index
    %50 = vector.load %arg27[%c0_24, %c32] : memref<52x160xf32, #tpu.memory_space<vmem>>, vector<26x32xf32>
    tpu.vector_store %arg27[%c0_24, %c32], %49 {strides = array<i32>} : memref<52x160xf32, #tpu.memory_space<vmem>>, vector<26x32xf32>,
    %51 = vector.extract_strided_slice %46 {offsets = [2, 0], sizes = [26, 32], strides = [1, 1]} : vector<60x32xf32> to vector<26x32xf32>
    %c0_25 = arith.constant 0 : index
    %c64 = arith.constant 64 : index
    %52 = vector.load %arg27[%c0_25, %c64] : memref<52x160xf32, #tpu.memory_space<vmem>>, vector<26x32xf32>
    tpu.vector_store %arg27[%c0_25, %c64], %51 {strides = array<i32>} : memref<52x160xf32, #tpu.memory_space<vmem>>, vector<26x32xf32>,
    %53 = vector.extract_strided_slice %46 {offsets = [3, 0], sizes = [26, 32], strides = [1, 1]} : vector<60x32xf32> to vector<26x32xf32>
    %c0_26 = arith.constant 0 : index
    %c96 = arith.constant 96 : index
    %54 = vector.load %arg27[%c0_26, %c96] : memref<52x160xf32, #tpu.memory_space<vmem>>, vector<26x32xf32>
    tpu.vector_store %arg27[%c0_26, %c96], %53 {strides = array<i32>} : memref<52x160xf32, #tpu.memory_space<vmem>>, vector<26x32xf32>,
    %55 = vector.extract_strided_slice %46 {offsets = [4, 0], sizes = [26, 32], strides = [1, 1]} : vector<60x32xf32> to vector<26x32xf32>
    %c0_27 = arith.constant 0 : index
    %c128 = arith.constant 128 : index
    %56 = vector.load %arg27[%c0_27, %c128] : memref<52x160xf32, #tpu.memory_space<vmem>>, vector<26x32xf32>
    tpu.vector_store %arg27[%c0_27, %c128], %55 {strides = array<i32>} : memref<52x160xf32, #tpu.memory_space<vmem>>, vector<26x32xf32>,
    %57 = vector.extract_strided_slice %46 {offsets = [30, 0], sizes = [26, 32], strides = [1, 1]} : vector<60x32xf32> to vector<26x32xf32>
    %c26 = arith.constant 26 : index
    %c0_28 = arith.constant 0 : index
    %58 = vector.load %arg27[%c26, %c0_28] : memref<52x160xf32, #tpu.memory_space<vmem>>, vector<26x32xf32>
    tpu.vector_store %arg27[%c26, %c0_28], %57 {strides = array<i32>} : memref<52x160xf32, #tpu.memory_space<vmem>>, vector<26x32xf32>,
    %59 = vector.extract_strided_slice %46 {offsets = [31, 0], sizes = [26, 32], strides = [1, 1]} : vector<60x32xf32> to vector<26x32xf32>
    %c26_29 = arith.constant 26 : index
    %c32_30 = arith.constant 32 : index
    %60 = vector.load %arg27[%c26_29, %c32_30] : memref<52x160xf32, #tpu.memory_space<vmem>>, vector<26x32xf32>
    tpu.vector_store %arg27[%c26_29, %c32_30], %59 {strides = array<i32>} : memref<52x160xf32, #tpu.memory_space<vmem>>, vector<26x32xf32>,
    %61 = vector.extract_strided_slice %46 {offsets = [32, 0], sizes = [26, 32], strides = [1, 1]} : vector<60x32xf32> to vector<26x32xf32>
    %c26_31 = arith.constant 26 : index
    %c64_32 = arith.constant 64 : index
    %62 = vector.load %arg27[%c26_31, %c64_32] : memref<52x160xf32, #tpu.memory_space<vmem>>, vector<26x32xf32>
    tpu.vector_store %arg27[%c26_31, %c64_32], %61 {strides = array<i32>} : memref<52x160xf32, #tpu.memory_space<vmem>>, vector<26x32xf32>,
    %63 = vector.extract_strided_slice %46 {offsets = [33, 0], sizes = [26, 32], strides = [1, 1]} : vector<60x32xf32> to vector<26x32xf32>
    %c26_33 = arith.constant 26 : index
    %c96_34 = arith.constant 96 : index
    %64 = vector.load %arg27[%c26_33, %c96_34] : memref<52x160xf32, #tpu.memory_space<vmem>>, vector<26x32xf32>
    tpu.vector_store %arg27[%c26_33, %c96_34], %63 {strides = array<i32>} : memref<52x160xf32, #tpu.memory_space<vmem>>, vector<26x32xf32>,
    %65 = vector.extract_strided_slice %46 {offsets = [34, 0], sizes = [26, 32], strides = [1, 1]} : vector<60x32xf32> to vector<26x32xf32>
    %c26_35 = arith.constant 26 : index
    %c128_36 = arith.constant 128 : index
    %66 = vector.load %arg27[%c26_35, %c128_36] : memref<52x160xf32, #tpu.memory_space<vmem>>, vector<26x32xf32>
    tpu.vector_store %arg27[%c26_35, %c128_36], %65 {strides = array<i32>} : memref<52x160xf32, #tpu.memory_space<vmem>>, vector<26x32xf32>,
    %c0_37 = arith.constant 0 : index
    %c0_38 = arith.constant 0 : index
    %67 = vector.load %arg27[%c0_37, %c0_38] : memref<52x160xf32, #tpu.memory_space<vmem>>, vector<52x160xf32>
    %68 = arith.truncf %67 : vector<52x160xf32> to vector<52x160xbf16>
    %c0_39 = arith.constant 0 : index
    %c0_40 = arith.constant 0 : index
    %69 = vector.load %arg6[%c0_39, %c0_40] : memref<160x16xbf16, #tpu.memory_space<vmem>>, vector<160x16xbf16>
    %cst_41 = arith.constant dense<0.000000e+00> : vector<52x16xf32>
    %70 = tpu.matmul %68, %69, %cst_41 {dimension_numbers = #tpu.dot_dimension_numbers<[1], [0], [0], [1], [0, 0, 1, 1], [], []>} : vector<52x160xbf16>, vector<160x16xbf16>, vector<52x16xf32> -> vector<52x16xf32>
    %c0_42 = arith.constant 0 : index
    %c0_43 = arith.constant 0 : index
    %71 = vector.load %arg7[%c0_42, %c0_43] : memref<3x16xf32, #tpu.memory_space<vmem>>, vector<3x16xf32>
    %72 = vector.extract_strided_slice %71 {offsets = [0, 0], sizes = [1, 16], strides = [1, 1]} : vector<3x16xf32> to vector<1x16xf32>
    %73 = vector.extract_strided_slice %71 {offsets = [1, 0], sizes = [1, 16], strides = [1, 1]} : vector<3x16xf32> to vector<1x16xf32>
    %74 = vector.extract_strided_slice %71 {offsets = [2, 0], sizes = [1, 16], strides = [1, 1]} : vector<3x16xf32> to vector<1x16xf32>
    %75 = vector.broadcast %72 : vector<1x16xf32> to vector<52x16xf32>
    %76 = arith.addf %70, %75 : vector<52x16xf32>
    %cst_44 = arith.constant dense<0.000000e+00> : vector<16xf32>
    %77 = vector.multi_reduction <add>, %76, %cst_44 [0] : vector<52x16xf32> to vector<16xf32>
    %78 = vector.shape_cast %77 : vector<16xf32> to vector<1x16xf32>
    %79 = arith.mulf %76, %76 : vector<52x16xf32>
    %cst_45 = arith.constant dense<0.000000e+00> : vector<16xf32>
    %80 = vector.multi_reduction <add>, %79, %cst_45 [0] : vector<52x16xf32> to vector<16xf32>
    %81 = vector.shape_cast %80 : vector<16xf32> to vector<1x16xf32>
    %cst_46 = arith.constant 0.0192307699 : f32
    %82 = vector.broadcast %cst_46 : f32 to vector<1x16xf32>
    %83 = arith.mulf %78, %82 : vector<1x16xf32>
    %cst_47 = arith.constant 0.0192307699 : f32
    %84 = vector.broadcast %cst_47 : f32 to vector<1x16xf32>
    %85 = arith.mulf %81, %84 : vector<1x16xf32>
    %86 = arith.mulf %83, %83 : vector<1x16xf32>
    %87 = arith.subf %85, %86 : vector<1x16xf32>
    %88 = vector.broadcast %83 : vector<1x16xf32> to vector<52x16xf32>
    %89 = arith.subf %76, %88 : vector<52x16xf32>
    %cst_48 = arith.constant 9.99999974E-6 : f32
    %90 = vector.broadcast %cst_48 : f32 to vector<1x16xf32>
    %91 = arith.addf %87, %90 : vector<1x16xf32>
    %92 = math.rsqrt %91 : vector<1x16xf32>
    %93 = vector.broadcast %92 : vector<1x16xf32> to vector<52x16xf32>
    %94 = arith.mulf %89, %93 : vector<52x16xf32>
    %95 = vector.broadcast %73 : vector<1x16xf32> to vector<52x16xf32>
    %96 = arith.mulf %94, %95 : vector<52x16xf32>
    %97 = vector.broadcast %74 : vector<1x16xf32> to vector<52x16xf32>
    %98 = arith.addf %96, %97 : vector<52x16xf32>
    %cst_49 = arith.constant 0.000000e+00 : f32
    %99 = vector.broadcast %cst_49 : f32 to vector<52x16xf32>
    %100 = arith.maximumf %98, %99 : vector<52x16xf32>
    %101 = vector.extract_strided_slice %100 {offsets = [0, 0], sizes = [20, 16], strides = [1, 1]} : vector<52x16xf32> to vector<20x16xf32>
    %c0_50 = arith.constant 0 : index
    %c0_51 = arith.constant 0 : index
    %102 = vector.load %arg28[%c0_50, %c0_51] : memref<40x112xf32, #tpu.memory_space<vmem>>, vector<20x16xf32>
    tpu.vector_store %arg28[%c0_50, %c0_51], %101 {strides = array<i32>} : memref<40x112xf32, #tpu.memory_space<vmem>>, vector<20x16xf32>,
    %103 = vector.extract_strided_slice %100 {offsets = [1, 0], sizes = [20, 16], strides = [1, 1]} : vector<52x16xf32> to vector<20x16xf32>
    %c0_52 = arith.constant 0 : index
    %c16 = arith.constant 16 : index
    %104 = vector.load %arg28[%c0_52, %c16] : memref<40x112xf32, #tpu.memory_space<vmem>>, vector<20x16xf32>
    tpu.vector_store %arg28[%c0_52, %c16], %103 {strides = array<i32>} : memref<40x112xf32, #tpu.memory_space<vmem>>, vector<20x16xf32>,
    %105 = vector.extract_strided_slice %100 {offsets = [2, 0], sizes = [20, 16], strides = [1, 1]} : vector<52x16xf32> to vector<20x16xf32>
    %c0_53 = arith.constant 0 : index
    %c32_54 = arith.constant 32 : index
    %106 = vector.load %arg28[%c0_53, %c32_54] : memref<40x112xf32, #tpu.memory_space<vmem>>, vector<20x16xf32>
    tpu.vector_store %arg28[%c0_53, %c32_54], %105 {strides = array<i32>} : memref<40x112xf32, #tpu.memory_space<vmem>>, vector<20x16xf32>,
    %107 = vector.extract_strided_slice %100 {offsets = [3, 0], sizes = [20, 16], strides = [1, 1]} : vector<52x16xf32> to vector<20x16xf32>
    %c0_55 = arith.constant 0 : index
    %c48 = arith.constant 48 : index
    %108 = vector.load %arg28[%c0_55, %c48] : memref<40x112xf32, #tpu.memory_space<vmem>>, vector<20x16xf32>
    tpu.vector_store %arg28[%c0_55, %c48], %107 {strides = array<i32>} : memref<40x112xf32, #tpu.memory_space<vmem>>, vector<20x16xf32>,
    %109 = vector.extract_strided_slice %100 {offsets = [4, 0], sizes = [20, 16], strides = [1, 1]} : vector<52x16xf32> to vector<20x16xf32>
    %c0_56 = arith.constant 0 : index
    %c64_57 = arith.constant 64 : index
    %110 = vector.load %arg28[%c0_56, %c64_57] : memref<40x112xf32, #tpu.memory_space<vmem>>, vector<20x16xf32>
    tpu.vector_store %arg28[%c0_56, %c64_57], %109 {strides = array<i32>} : memref<40x112xf32, #tpu.memory_space<vmem>>, vector<20x16xf32>,
    %111 = vector.extract_strided_slice %100 {offsets = [5, 0], sizes = [20, 16], strides = [1, 1]} : vector<52x16xf32> to vector<20x16xf32>
    %c0_58 = arith.constant 0 : index
    %c80 = arith.constant 80 : index
    %112 = vector.load %arg28[%c0_58, %c80] : memref<40x112xf32, #tpu.memory_space<vmem>>, vector<20x16xf32>
    tpu.vector_store %arg28[%c0_58, %c80], %111 {strides = array<i32>} : memref<40x112xf32, #tpu.memory_space<vmem>>, vector<20x16xf32>,
    %113 = vector.extract_strided_slice %100 {offsets = [6, 0], sizes = [20, 16], strides = [1, 1]} : vector<52x16xf32> to vector<20x16xf32>
    %c0_59 = arith.constant 0 : index
    %c96_60 = arith.constant 96 : index
    %114 = vector.load %arg28[%c0_59, %c96_60] : memref<40x112xf32, #tpu.memory_space<vmem>>, vector<20x16xf32>
    tpu.vector_store %arg28[%c0_59, %c96_60], %113 {strides = array<i32>} : memref<40x112xf32, #tpu.memory_space<vmem>>, vector<20x16xf32>,
    %115 = vector.extract_strided_slice %100 {offsets = [26, 0], sizes = [20, 16], strides = [1, 1]} : vector<52x16xf32> to vector<20x16xf32>
    %c20 = arith.constant 20 : index
    %c0_61 = arith.constant 0 : index
    %116 = vector.load %arg28[%c20, %c0_61] : memref<40x112xf32, #tpu.memory_space<vmem>>, vector<20x16xf32>
    tpu.vector_store %arg28[%c20, %c0_61], %115 {strides = array<i32>} : memref<40x112xf32, #tpu.memory_space<vmem>>, vector<20x16xf32>,
    %117 = vector.extract_strided_slice %100 {offsets = [27, 0], sizes = [20, 16], strides = [1, 1]} : vector<52x16xf32> to vector<20x16xf32>
    %c20_62 = arith.constant 20 : index
    %c16_63 = arith.constant 16 : index
    %118 = vector.load %arg28[%c20_62, %c16_63] : memref<40x112xf32, #tpu.memory_space<vmem>>, vector<20x16xf32>
    tpu.vector_store %arg28[%c20_62, %c16_63], %117 {strides = array<i32>} : memref<40x112xf32, #tpu.memory_space<vmem>>, vector<20x16xf32>,
    %119 = vector.extract_strided_slice %100 {offsets = [28, 0], sizes = [20, 16], strides = [1, 1]} : vector<52x16xf32> to vector<20x16xf32>
    %c20_64 = arith.constant 20 : index
    %c32_65 = arith.constant 32 : index
    %120 = vector.load %arg28[%c20_64, %c32_65] : memref<40x112xf32, #tpu.memory_space<vmem>>, vector<20x16xf32>
    tpu.vector_store %arg28[%c20_64, %c32_65], %119 {strides = array<i32>} : memref<40x112xf32, #tpu.memory_space<vmem>>, vector<20x16xf32>,
    %121 = vector.extract_strided_slice %100 {offsets = [29, 0], sizes = [20, 16], strides = [1, 1]} : vector<52x16xf32> to vector<20x16xf32>
    %c20_66 = arith.constant 20 : index
    %c48_67 = arith.constant 48 : index
    %122 = vector.load %arg28[%c20_66, %c48_67] : memref<40x112xf32, #tpu.memory_space<vmem>>, vector<20x16xf32>
    tpu.vector_store %arg28[%c20_66, %c48_67], %121 {strides = array<i32>} : memref<40x112xf32, #tpu.memory_space<vmem>>, vector<20x16xf32>,
    %123 = vector.extract_strided_slice %100 {offsets = [30, 0], sizes = [20, 16], strides = [1, 1]} : vector<52x16xf32> to vector<20x16xf32>
    %c20_68 = arith.constant 20 : index
    %c64_69 = arith.constant 64 : index
    %124 = vector.load %arg28[%c20_68, %c64_69] : memref<40x112xf32, #tpu.memory_space<vmem>>, vector<20x16xf32>
    tpu.vector_store %arg28[%c20_68, %c64_69], %123 {strides = array<i32>} : memref<40x112xf32, #tpu.memory_space<vmem>>, vector<20x16xf32>,
    %125 = vector.extract_strided_slice %100 {offsets = [31, 0], sizes = [20, 16], strides = [1, 1]} : vector<52x16xf32> to vector<20x16xf32>
    %c20_70 = arith.constant 20 : index
    %c80_71 = arith.constant 80 : index
    %126 = vector.load %arg28[%c20_70, %c80_71] : memref<40x112xf32, #tpu.memory_space<vmem>>, vector<20x16xf32>
    tpu.vector_store %arg28[%c20_70, %c80_71], %125 {strides = array<i32>} : memref<40x112xf32, #tpu.memory_space<vmem>>, vector<20x16xf32>,
    %127 = vector.extract_strided_slice %100 {offsets = [32, 0], sizes = [20, 16], strides = [1, 1]} : vector<52x16xf32> to vector<20x16xf32>
    %c20_72 = arith.constant 20 : index
    %c96_73 = arith.constant 96 : index
    %128 = vector.load %arg28[%c20_72, %c96_73] : memref<40x112xf32, #tpu.memory_space<vmem>>, vector<20x16xf32>
    tpu.vector_store %arg28[%c20_72, %c96_73], %127 {strides = array<i32>} : memref<40x112xf32, #tpu.memory_space<vmem>>, vector<20x16xf32>,
    %c0_74 = arith.constant 0 : index
    %c0_75 = arith.constant 0 : index
    %129 = vector.load %arg28[%c0_74, %c0_75] : memref<40x112xf32, #tpu.memory_space<vmem>>, vector<40x112xf32>
    %130 = arith.truncf %129 : vector<40x112xf32> to vector<40x112xbf16>
    %c0_76 = arith.constant 0 : index
    %c0_77 = arith.constant 0 : index
    %131 = vector.load %arg8[%c0_76, %c0_77] : memref<112x8xbf16, #tpu.memory_space<vmem>>, vector<112x8xbf16>
    %cst_78 = arith.constant dense<0.000000e+00> : vector<40x8xf32>
    %132 = tpu.matmul %130, %131, %cst_78 {dimension_numbers = #tpu.dot_dimension_numbers<[1], [0], [0], [1], [0, 0, 1, 1], [], []>} : vector<40x112xbf16>, vector<112x8xbf16>, vector<40x8xf32> -> vector<40x8xf32>
    %c0_79 = arith.constant 0 : index
    %c0_80 = arith.constant 0 : index
    %133 = vector.load %arg9[%c0_79, %c0_80] : memref<3x8xf32, #tpu.memory_space<vmem>>, vector<3x8xf32>
    %134 = vector.extract_strided_slice %133 {offsets = [0, 0], sizes = [1, 8], strides = [1, 1]} : vector<3x8xf32> to vector<1x8xf32>
    %135 = vector.extract_strided_slice %133 {offsets = [1, 0], sizes = [1, 8], strides = [1, 1]} : vector<3x8xf32> to vector<1x8xf32>
    %136 = vector.extract_strided_slice %133 {offsets = [2, 0], sizes = [1, 8], strides = [1, 1]} : vector<3x8xf32> to vector<1x8xf32>
    %137 = vector.broadcast %134 : vector<1x8xf32> to vector<40x8xf32>
    %138 = arith.addf %132, %137 : vector<40x8xf32>
    %cst_81 = arith.constant dense<0.000000e+00> : vector<8xf32>
    %139 = vector.multi_reduction <add>, %138, %cst_81 [0] : vector<40x8xf32> to vector<8xf32>
    %140 = vector.shape_cast %139 : vector<8xf32> to vector<1x8xf32>
    %141 = arith.mulf %138, %138 : vector<40x8xf32>
    %cst_82 = arith.constant dense<0.000000e+00> : vector<8xf32>
    %142 = vector.multi_reduction <add>, %141, %cst_82 [0] : vector<40x8xf32> to vector<8xf32>
    %143 = vector.shape_cast %142 : vector<8xf32> to vector<1x8xf32>
    %cst_83 = arith.constant 2.500000e-02 : f32
    %144 = vector.broadcast %cst_83 : f32 to vector<1x8xf32>
    %145 = arith.mulf %140, %144 : vector<1x8xf32>
    %cst_84 = arith.constant 2.500000e-02 : f32
    %146 = vector.broadcast %cst_84 : f32 to vector<1x8xf32>
    %147 = arith.mulf %143, %146 : vector<1x8xf32>
    %148 = arith.mulf %145, %145 : vector<1x8xf32>
    %149 = arith.subf %147, %148 : vector<1x8xf32>
    %150 = vector.broadcast %145 : vector<1x8xf32> to vector<40x8xf32>
    %151 = arith.subf %138, %150 : vector<40x8xf32>
    %cst_85 = arith.constant 9.99999974E-6 : f32
    %152 = vector.broadcast %cst_85 : f32 to vector<1x8xf32>
    %153 = arith.addf %149, %152 : vector<1x8xf32>
    %154 = math.rsqrt %153 : vector<1x8xf32>
    %155 = vector.broadcast %154 : vector<1x8xf32> to vector<40x8xf32>
    %156 = arith.mulf %151, %155 : vector<40x8xf32>
    %157 = vector.broadcast %135 : vector<1x8xf32> to vector<40x8xf32>
    %158 = arith.mulf %156, %157 : vector<40x8xf32>
    %159 = vector.broadcast %136 : vector<1x8xf32> to vector<40x8xf32>
    %160 = arith.addf %158, %159 : vector<40x8xf32>
    %cst_86 = arith.constant 0.000000e+00 : f32
    %161 = vector.broadcast %cst_86 : f32 to vector<40x8xf32>
    %162 = arith.maximumf %160, %161 : vector<40x8xf32>
    %163 = vector.extract_strided_slice %162 {offsets = [0, 0], sizes = [1, 8], strides = [1, 1]} : vector<40x8xf32> to vector<1x8xf32>
    %c0_87 = arith.constant 0 : index
    %c0_88 = arith.constant 0 : index
    %164 = vector.load %arg29[%c0_87, %c0_88] : memref<2x161xf32, #tpu.memory_space<vmem>>, vector<1x8xf32>
    tpu.vector_store %arg29[%c0_87, %c0_88], %163 {strides = array<i32>} : memref<2x161xf32, #tpu.memory_space<vmem>>, vector<1x8xf32>,
    %165 = vector.extract_strided_slice %162 {offsets = [1, 0], sizes = [1, 8], strides = [1, 1]} : vector<40x8xf32> to vector<1x8xf32>
    %c0_89 = arith.constant 0 : index
    %c8_90 = arith.constant 8 : index
    %166 = vector.load %arg29[%c0_89, %c8_90] : memref<2x161xf32, #tpu.memory_space<vmem>>, vector<1x8xf32>
    tpu.vector_store %arg29[%c0_89, %c8_90], %165 {strides = array<i32>} : memref<2x161xf32, #tpu.memory_space<vmem>>, vector<1x8xf32>,
    %167 = vector.extract_strided_slice %162 {offsets = [2, 0], sizes = [1, 8], strides = [1, 1]} : vector<40x8xf32> to vector<1x8xf32>
    %c0_91 = arith.constant 0 : index
    %c16_92 = arith.constant 16 : index
    %168 = vector.load %arg29[%c0_91, %c16_92] : memref<2x161xf32, #tpu.memory_space<vmem>>, vector<1x8xf32>
    tpu.vector_store %arg29[%c0_91, %c16_92], %167 {strides = array<i32>} : memref<2x161xf32, #tpu.memory_space<vmem>>, vector<1x8xf32>,
    %169 = vector.extract_strided_slice %162 {offsets = [3, 0], sizes = [1, 8], strides = [1, 1]} : vector<40x8xf32> to vector<1x8xf32>
    %c0_93 = arith.constant 0 : index
    %c24 = arith.constant 24 : index
    %170 = vector.load %arg29[%c0_93, %c24] : memref<2x161xf32, #tpu.memory_space<vmem>>, vector<1x8xf32>
    tpu.vector_store %arg29[%c0_93, %c24], %169 {strides = array<i32>} : memref<2x161xf32, #tpu.memory_space<vmem>>, vector<1x8xf32>,
    %171 = vector.extract_strided_slice %162 {offsets = [4, 0], sizes = [1, 8], strides = [1, 1]} : vector<40x8xf32> to vector<1x8xf32>
    %c0_94 = arith.constant 0 : index
    %c32_95 = arith.constant 32 : index
    %172 = vector.load %arg29[%c0_94, %c32_95] : memref<2x161xf32, #tpu.memory_space<vmem>>, vector<1x8xf32>
    tpu.vector_store %arg29[%c0_94, %c32_95], %171 {strides = array<i32>} : memref<2x161xf32, #tpu.memory_space<vmem>>, vector<1x8xf32>,
    %173 = vector.extract_strided_slice %162 {offsets = [5, 0], sizes = [1, 8], strides = [1, 1]} : vector<40x8xf32> to vector<1x8xf32>
    %c0_96 = arith.constant 0 : index
    %c40 = arith.constant 40 : index
    %174 = vector.load %arg29[%c0_96, %c40] : memref<2x161xf32, #tpu.memory_space<vmem>>, vector<1x8xf32>
    tpu.vector_store %arg29[%c0_96, %c40], %173 {strides = array<i32>} : memref<2x161xf32, #tpu.memory_space<vmem>>, vector<1x8xf32>,
    %175 = vector.extract_strided_slice %162 {offsets = [6, 0], sizes = [1, 8], strides = [1, 1]} : vector<40x8xf32> to vector<1x8xf32>
    %c0_97 = arith.constant 0 : index
    %c48_98 = arith.constant 48 : index
    %176 = vector.load %arg29[%c0_97, %c48_98] : memref<2x161xf32, #tpu.memory_space<vmem>>, vector<1x8xf32>
    tpu.vector_store %arg29[%c0_97, %c48_98], %175 {strides = array<i32>} : memref<2x161xf32, #tpu.memory_space<vmem>>, vector<1x8xf32>,
    %177 = vector.extract_strided_slice %162 {offsets = [7, 0], sizes = [1, 8], strides = [1, 1]} : vector<40x8xf32> to vector<1x8xf32>
    %c0_99 = arith.constant 0 : index
    %c56 = arith.constant 56 : index
    %178 = vector.load %arg29[%c0_99, %c56] : memref<2x161xf32, #tpu.memory_space<vmem>>, vector<1x8xf32>
    tpu.vector_store %arg29[%c0_99, %c56], %177 {strides = array<i32>} : memref<2x161xf32, #tpu.memory_space<vmem>>, vector<1x8xf32>,
    %179 = vector.extract_strided_slice %162 {offsets = [8, 0], sizes = [1, 8], strides = [1, 1]} : vector<40x8xf32> to vector<1x8xf32>
    %c0_100 = arith.constant 0 : index
    %c64_101 = arith.constant 64 : index
    %180 = vector.load %arg29[%c0_100, %c64_101] : memref<2x161xf32, #tpu.memory_space<vmem>>, vector<1x8xf32>
    tpu.vector_store %arg29[%c0_100, %c64_101], %179 {strides = array<i32>} : memref<2x161xf32, #tpu.memory_space<vmem>>, vector<1x8xf32>,
    %181 = vector.extract_strided_slice %162 {offsets = [9, 0], sizes = [1, 8], strides = [1, 1]} : vector<40x8xf32> to vector<1x8xf32>
    %c0_102 = arith.constant 0 : index
    %c72 = arith.constant 72 : index
    %182 = vector.load %arg29[%c0_102, %c72] : memref<2x161xf32, #tpu.memory_space<vmem>>, vector<1x8xf32>
    tpu.vector_store %arg29[%c0_102, %c72], %181 {strides = array<i32>} : memref<2x161xf32, #tpu.memory_space<vmem>>, vector<1x8xf32>,
    %183 = vector.extract_strided_slice %162 {offsets = [10, 0], sizes = [1, 8], strides = [1, 1]} : vector<40x8xf32> to vector<1x8xf32>
    %c0_103 = arith.constant 0 : index
    %c80_104 = arith.constant 80 : index
    %184 = vector.load %arg29[%c0_103, %c80_104] : memref<2x161xf32, #tpu.memory_space<vmem>>, vector<1x8xf32>
    tpu.vector_store %arg29[%c0_103, %c80_104], %183 {strides = array<i32>} : memref<2x161xf32, #tpu.memory_space<vmem>>, vector<1x8xf32>,
    %185 = vector.extract_strided_slice %162 {offsets = [11, 0], sizes = [1, 8], strides = [1, 1]} : vector<40x8xf32> to vector<1x8xf32>
    %c0_105 = arith.constant 0 : index
    %c88 = arith.constant 88 : index
    %186 = vector.load %arg29[%c0_105, %c88] : memref<2x161xf32, #tpu.memory_space<vmem>>, vector<1x8xf32>
    tpu.vector_store %arg29[%c0_105, %c88], %185 {strides = array<i32>} : memref<2x161xf32, #tpu.memory_space<vmem>>, vector<1x8xf32>,
    %187 = vector.extract_strided_slice %162 {offsets = [12, 0], sizes = [1, 8], strides = [1, 1]} : vector<40x8xf32> to vector<1x8xf32>
    %c0_106 = arith.constant 0 : index
    %c96_107 = arith.constant 96 : index
    %188 = vector.load %arg29[%c0_106, %c96_107] : memref<2x161xf32, #tpu.memory_space<vmem>>, vector<1x8xf32>
    tpu.vector_store %arg29[%c0_106, %c96_107], %187 {strides = array<i32>} : memref<2x161xf32, #tpu.memory_space<vmem>>, vector<1x8xf32>,
    %189 = vector.extract_strided_slice %162 {offsets = [13, 0], sizes = [1, 8], strides = [1, 1]} : vector<40x8xf32> to vector<1x8xf32>
    %c0_108 = arith.constant 0 : index
    %c104 = arith.constant 104 : index
    %190 = vector.load %arg29[%c0_108, %c104] : memref<2x161xf32, #tpu.memory_space<vmem>>, vector<1x8xf32>
    tpu.vector_store %arg29[%c0_108, %c104], %189 {strides = array<i32>} : memref<2x161xf32, #tpu.memory_space<vmem>>, vector<1x8xf32>,
    %191 = vector.extract_strided_slice %162 {offsets = [14, 0], sizes = [1, 8], strides = [1, 1]} : vector<40x8xf32> to vector<1x8xf32>
    %c0_109 = arith.constant 0 : index
    %c112 = arith.constant 112 : index
    %192 = vector.load %arg29[%c0_109, %c112] : memref<2x161xf32, #tpu.memory_space<vmem>>, vector<1x8xf32>
    tpu.vector_store %arg29[%c0_109, %c112], %191 {strides = array<i32>} : memref<2x161xf32, #tpu.memory_space<vmem>>, vector<1x8xf32>,
    %193 = vector.extract_strided_slice %162 {offsets = [15, 0], sizes = [1, 8], strides = [1, 1]} : vector<40x8xf32> to vector<1x8xf32>
    %c0_110 = arith.constant 0 : index
    %c120 = arith.constant 120 : index
    %194 = vector.load %arg29[%c0_110, %c120] : memref<2x161xf32, #tpu.memory_space<vmem>>, vector<1x8xf32>
    tpu.vector_store %arg29[%c0_110, %c120], %193 {strides = array<i32>} : memref<2x161xf32, #tpu.memory_space<vmem>>, vector<1x8xf32>,
    %195 = vector.extract_strided_slice %162 {offsets = [16, 0], sizes = [1, 8], strides = [1, 1]} : vector<40x8xf32> to vector<1x8xf32>
    %c0_111 = arith.constant 0 : index
    %c128_112 = arith.constant 128 : index
    %196 = vector.load %arg29[%c0_111, %c128_112] : memref<2x161xf32, #tpu.memory_space<vmem>>, vector<1x8xf32>
    tpu.vector_store %arg29[%c0_111, %c128_112], %195 {strides = array<i32>} : memref<2x161xf32, #tpu.memory_space<vmem>>, vector<1x8xf32>,
    %197 = vector.extract_strided_slice %162 {offsets = [17, 0], sizes = [1, 8], strides = [1, 1]} : vector<40x8xf32> to vector<1x8xf32>
    %c0_113 = arith.constant 0 : index
    %c136 = arith.constant 136 : index
    %198 = vector.load %arg29[%c0_113, %c136] : memref<2x161xf32, #tpu.memory_space<vmem>>, vector<1x8xf32>
    tpu.vector_store %arg29[%c0_113, %c136], %197 {strides = array<i32>} : memref<2x161xf32, #tpu.memory_space<vmem>>, vector<1x8xf32>,
    %199 = vector.extract_strided_slice %162 {offsets = [18, 0], sizes = [1, 8], strides = [1, 1]} : vector<40x8xf32> to vector<1x8xf32>
    %c0_114 = arith.constant 0 : index
    %c144 = arith.constant 144 : index
    %200 = vector.load %arg29[%c0_114, %c144] : memref<2x161xf32, #tpu.memory_space<vmem>>, vector<1x8xf32>
    tpu.vector_store %arg29[%c0_114, %c144], %199 {strides = array<i32>} : memref<2x161xf32, #tpu.memory_space<vmem>>, vector<1x8xf32>,
    %201 = vector.extract_strided_slice %162 {offsets = [19, 0], sizes = [1, 8], strides = [1, 1]} : vector<40x8xf32> to vector<1x8xf32>
    %c0_115 = arith.constant 0 : index
    %c152 = arith.constant 152 : index
    %202 = vector.load %arg29[%c0_115, %c152] : memref<2x161xf32, #tpu.memory_space<vmem>>, vector<1x8xf32>
    tpu.vector_store %arg29[%c0_115, %c152], %201 {strides = array<i32>} : memref<2x161xf32, #tpu.memory_space<vmem>>, vector<1x8xf32>,
    %203 = vector.extract_strided_slice %162 {offsets = [20, 0], sizes = [1, 8], strides = [1, 1]} : vector<40x8xf32> to vector<1x8xf32>
    %c1 = arith.constant 1 : index
    %c0_116 = arith.constant 0 : index
    %204 = vector.load %arg29[%c1, %c0_116] : memref<2x161xf32, #tpu.memory_space<vmem>>, vector<1x8xf32>
    tpu.vector_store %arg29[%c1, %c0_116], %203 {strides = array<i32>} : memref<2x161xf32, #tpu.memory_space<vmem>>, vector<1x8xf32>,
    %205 = vector.extract_strided_slice %162 {offsets = [21, 0], sizes = [1, 8], strides = [1, 1]} : vector<40x8xf32> to vector<1x8xf32>
    %c1_117 = arith.constant 1 : index
    %c8_118 = arith.constant 8 : index
    %206 = vector.load %arg29[%c1_117, %c8_118] : memref<2x161xf32, #tpu.memory_space<vmem>>, vector<1x8xf32>
    tpu.vector_store %arg29[%c1_117, %c8_118], %205 {strides = array<i32>} : memref<2x161xf32, #tpu.memory_space<vmem>>, vector<1x8xf32>,
    %207 = vector.extract_strided_slice %162 {offsets = [22, 0], sizes = [1, 8], strides = [1, 1]} : vector<40x8xf32> to vector<1x8xf32>
    %c1_119 = arith.constant 1 : index
    %c16_120 = arith.constant 16 : index
    %208 = vector.load %arg29[%c1_119, %c16_120] : memref<2x161xf32, #tpu.memory_space<vmem>>, vector<1x8xf32>
    tpu.vector_store %arg29[%c1_119, %c16_120], %207 {strides = array<i32>} : memref<2x161xf32, #tpu.memory_space<vmem>>, vector<1x8xf32>,
    %209 = vector.extract_strided_slice %162 {offsets = [23, 0], sizes = [1, 8], strides = [1, 1]} : vector<40x8xf32> to vector<1x8xf32>
    %c1_121 = arith.constant 1 : index
    %c24_122 = arith.constant 24 : index
    %210 = vector.load %arg29[%c1_121, %c24_122] : memref<2x161xf32, #tpu.memory_space<vmem>>, vector<1x8xf32>
    tpu.vector_store %arg29[%c1_121, %c24_122], %209 {strides = array<i32>} : memref<2x161xf32, #tpu.memory_space<vmem>>, vector<1x8xf32>,
    %211 = vector.extract_strided_slice %162 {offsets = [24, 0], sizes = [1, 8], strides = [1, 1]} : vector<40x8xf32> to vector<1x8xf32>
    %c1_123 = arith.constant 1 : index
    %c32_124 = arith.constant 32 : index
    %212 = vector.load %arg29[%c1_123, %c32_124] : memref<2x161xf32, #tpu.memory_space<vmem>>, vector<1x8xf32>
    tpu.vector_store %arg29[%c1_123, %c32_124], %211 {strides = array<i32>} : memref<2x161xf32, #tpu.memory_space<vmem>>, vector<1x8xf32>,
    %213 = vector.extract_strided_slice %162 {offsets = [25, 0], sizes = [1, 8], strides = [1, 1]} : vector<40x8xf32> to vector<1x8xf32>
    %c1_125 = arith.constant 1 : index
    %c40_126 = arith.constant 40 : index
    %214 = vector.load %arg29[%c1_125, %c40_126] : memref<2x161xf32, #tpu.memory_space<vmem>>, vector<1x8xf32>
    tpu.vector_store %arg29[%c1_125, %c40_126], %213 {strides = array<i32>} : memref<2x161xf32, #tpu.memory_space<vmem>>, vector<1x8xf32>,
    %215 = vector.extract_strided_slice %162 {offsets = [26, 0], sizes = [1, 8], strides = [1, 1]} : vector<40x8xf32> to vector<1x8xf32>
    %c1_127 = arith.constant 1 : index
    %c48_128 = arith.constant 48 : index
    %216 = vector.load %arg29[%c1_127, %c48_128] : memref<2x161xf32, #tpu.memory_space<vmem>>, vector<1x8xf32>
    tpu.vector_store %arg29[%c1_127, %c48_128], %215 {strides = array<i32>} : memref<2x161xf32, #tpu.memory_space<vmem>>, vector<1x8xf32>,
    %217 = vector.extract_strided_slice %162 {offsets = [27, 0], sizes = [1, 8], strides = [1, 1]} : vector<40x8xf32> to vector<1x8xf32>
    %c1_129 = arith.constant 1 : index
    %c56_130 = arith.constant 56 : index
    %218 = vector.load %arg29[%c1_129, %c56_130] : memref<2x161xf32, #tpu.memory_space<vmem>>, vector<1x8xf32>
    tpu.vector_store %arg29[%c1_129, %c56_130], %217 {strides = array<i32>} : memref<2x161xf32, #tpu.memory_space<vmem>>, vector<1x8xf32>,
    %219 = vector.extract_strided_slice %162 {offsets = [28, 0], sizes = [1, 8], strides = [1, 1]} : vector<40x8xf32> to vector<1x8xf32>
    %c1_131 = arith.constant 1 : index
    %c64_132 = arith.constant 64 : index
    %220 = vector.load %arg29[%c1_131, %c64_132] : memref<2x161xf32, #tpu.memory_space<vmem>>, vector<1x8xf32>
    tpu.vector_store %arg29[%c1_131, %c64_132], %219 {strides = array<i32>} : memref<2x161xf32, #tpu.memory_space<vmem>>, vector<1x8xf32>,
    %221 = vector.extract_strided_slice %162 {offsets = [29, 0], sizes = [1, 8], strides = [1, 1]} : vector<40x8xf32> to vector<1x8xf32>
    %c1_133 = arith.constant 1 : index
    %c72_134 = arith.constant 72 : index
    %222 = vector.load %arg29[%c1_133, %c72_134] : memref<2x161xf32, #tpu.memory_space<vmem>>, vector<1x8xf32>
    tpu.vector_store %arg29[%c1_133, %c72_134], %221 {strides = array<i32>} : memref<2x161xf32, #tpu.memory_space<vmem>>, vector<1x8xf32>,
    %223 = vector.extract_strided_slice %162 {offsets = [30, 0], sizes = [1, 8], strides = [1, 1]} : vector<40x8xf32> to vector<1x8xf32>
    %c1_135 = arith.constant 1 : index
    %c80_136 = arith.constant 80 : index
    %224 = vector.load %arg29[%c1_135, %c80_136] : memref<2x161xf32, #tpu.memory_space<vmem>>, vector<1x8xf32>
    tpu.vector_store %arg29[%c1_135, %c80_136], %223 {strides = array<i32>} : memref<2x161xf32, #tpu.memory_space<vmem>>, vector<1x8xf32>,
    %225 = vector.extract_strided_slice %162 {offsets = [31, 0], sizes = [1, 8], strides = [1, 1]} : vector<40x8xf32> to vector<1x8xf32>
    %c1_137 = arith.constant 1 : index
    %c88_138 = arith.constant 88 : index
    %226 = vector.load %arg29[%c1_137, %c88_138] : memref<2x161xf32, #tpu.memory_space<vmem>>, vector<1x8xf32>
    tpu.vector_store %arg29[%c1_137, %c88_138], %225 {strides = array<i32>} : memref<2x161xf32, #tpu.memory_space<vmem>>, vector<1x8xf32>,
    %227 = vector.extract_strided_slice %162 {offsets = [32, 0], sizes = [1, 8], strides = [1, 1]} : vector<40x8xf32> to vector<1x8xf32>
    %c1_139 = arith.constant 1 : index
    %c96_140 = arith.constant 96 : index
    %228 = vector.load %arg29[%c1_139, %c96_140] : memref<2x161xf32, #tpu.memory_space<vmem>>, vector<1x8xf32>
    tpu.vector_store %arg29[%c1_139, %c96_140], %227 {strides = array<i32>} : memref<2x161xf32, #tpu.memory_space<vmem>>, vector<1x8xf32>,
    %229 = vector.extract_strided_slice %162 {offsets = [33, 0], sizes = [1, 8], strides = [1, 1]} : vector<40x8xf32> to vector<1x8xf32>
    %c1_141 = arith.constant 1 : index
    %c104_142 = arith.constant 104 : index
    %230 = vector.load %arg29[%c1_141, %c104_142] : memref<2x161xf32, #tpu.memory_space<vmem>>, vector<1x8xf32>
    tpu.vector_store %arg29[%c1_141, %c104_142], %229 {strides = array<i32>} : memref<2x161xf32, #tpu.memory_space<vmem>>, vector<1x8xf32>,
    %231 = vector.extract_strided_slice %162 {offsets = [34, 0], sizes = [1, 8], strides = [1, 1]} : vector<40x8xf32> to vector<1x8xf32>
    %c1_143 = arith.constant 1 : index
    %c112_144 = arith.constant 112 : index
    %232 = vector.load %arg29[%c1_143, %c112_144] : memref<2x161xf32, #tpu.memory_space<vmem>>, vector<1x8xf32>
    tpu.vector_store %arg29[%c1_143, %c112_144], %231 {strides = array<i32>} : memref<2x161xf32, #tpu.memory_space<vmem>>, vector<1x8xf32>,
    %233 = vector.extract_strided_slice %162 {offsets = [35, 0], sizes = [1, 8], strides = [1, 1]} : vector<40x8xf32> to vector<1x8xf32>
    %c1_145 = arith.constant 1 : index
    %c120_146 = arith.constant 120 : index
    %234 = vector.load %arg29[%c1_145, %c120_146] : memref<2x161xf32, #tpu.memory_space<vmem>>, vector<1x8xf32>
    tpu.vector_store %arg29[%c1_145, %c120_146], %233 {strides = array<i32>} : memref<2x161xf32, #tpu.memory_space<vmem>>, vector<1x8xf32>,
    %235 = vector.extract_strided_slice %162 {offsets = [36, 0], sizes = [1, 8], strides = [1, 1]} : vector<40x8xf32> to vector<1x8xf32>
    %c1_147 = arith.constant 1 : index
    %c128_148 = arith.constant 128 : index
    %236 = vector.load %arg29[%c1_147, %c128_148] : memref<2x161xf32, #tpu.memory_space<vmem>>, vector<1x8xf32>
    tpu.vector_store %arg29[%c1_147, %c128_148], %235 {strides = array<i32>} : memref<2x161xf32, #tpu.memory_space<vmem>>, vector<1x8xf32>,
    %237 = vector.extract_strided_slice %162 {offsets = [37, 0], sizes = [1, 8], strides = [1, 1]} : vector<40x8xf32> to vector<1x8xf32>
    %c1_149 = arith.constant 1 : index
    %c136_150 = arith.constant 136 : index
    %238 = vector.load %arg29[%c1_149, %c136_150] : memref<2x161xf32, #tpu.memory_space<vmem>>, vector<1x8xf32>
    tpu.vector_store %arg29[%c1_149, %c136_150], %237 {strides = array<i32>} : memref<2x161xf32, #tpu.memory_space<vmem>>, vector<1x8xf32>,
    %239 = vector.extract_strided_slice %162 {offsets = [38, 0], sizes = [1, 8], strides = [1, 1]} : vector<40x8xf32> to vector<1x8xf32>
    %c1_151 = arith.constant 1 : index
    %c144_152 = arith.constant 144 : index
    %240 = vector.load %arg29[%c1_151, %c144_152] : memref<2x161xf32, #tpu.memory_space<vmem>>, vector<1x8xf32>
    tpu.vector_store %arg29[%c1_151, %c144_152], %239 {strides = array<i32>} : memref<2x161xf32, #tpu.memory_space<vmem>>, vector<1x8xf32>,
    %241 = vector.extract_strided_slice %162 {offsets = [39, 0], sizes = [1, 8], strides = [1, 1]} : vector<40x8xf32> to vector<1x8xf32>
    %c1_153 = arith.constant 1 : index
    %c152_154 = arith.constant 152 : index
    %242 = vector.load %arg29[%c1_153, %c152_154] : memref<2x161xf32, #tpu.memory_space<vmem>>, vector<1x8xf32>
    tpu.vector_store %arg29[%c1_153, %c152_154], %241 {strides = array<i32>} : memref<2x161xf32, #tpu.memory_space<vmem>>, vector<1x8xf32>,
    %c0_155 = arith.constant 0 : index
    %c0_156 = arith.constant 0 : index
    %243 = vector.load %arg2[%c0_155, %c0_156] : memref<2x1xf32, #tpu.memory_space<vmem>>, vector<2x1xf32>
    %c0_157 = arith.constant 0 : index
    %c160 = arith.constant 160 : index
    %244 = vector.load %arg29[%c0_157, %c160] : memref<2x161xf32, #tpu.memory_space<vmem>>, vector<2x1xf32>
    tpu.vector_store %arg29[%c0_157, %c160], %243 {strides = array<i32>} : memref<2x161xf32, #tpu.memory_space<vmem>>, vector<2x1xf32>,
    %c0_158 = arith.constant 0 : index
    %c0_159 = arith.constant 0 : index
    %245 = vector.load %arg29[%c0_158, %c0_159] : memref<2x161xf32, #tpu.memory_space<vmem>>, vector<2x161xf32>
    %246 = arith.truncf %245 : vector<2x161xf32> to vector<2x161xbf16>
    %c0_160 = arith.constant 0 : index
    %c0_161 = arith.constant 0 : index
    %247 = vector.load %arg10[%c0_160, %c0_161] : memref<161x32xbf16, #tpu.memory_space<vmem>>, vector<161x32xbf16>
    %cst_162 = arith.constant dense<0.000000e+00> : vector<2x32xf32>
    %248 = tpu.matmul %246, %247, %cst_162 {dimension_numbers = #tpu.dot_dimension_numbers<[1], [0], [0], [1], [0, 0, 1, 1], [], []>} : vector<2x161xbf16>, vector<161x32xbf16>, vector<2x32xf32> -> vector<2x32xf32>
    %c0_163 = arith.constant 0 : index
    %c0_164 = arith.constant 0 : index
    %249 = vector.load %arg11[%c0_163, %c0_164] : memref<3x32xf32, #tpu.memory_space<vmem>>, vector<3x32xf32>
    %250 = vector.extract_strided_slice %249 {offsets = [0, 0], sizes = [1, 32], strides = [1, 1]} : vector<3x32xf32> to vector<1x32xf32>
    %251 = vector.extract_strided_slice %249 {offsets = [1, 0], sizes = [1, 32], strides = [1, 1]} : vector<3x32xf32> to vector<1x32xf32>
    %252 = vector.extract_strided_slice %249 {offsets = [2, 0], sizes = [1, 32], strides = [1, 1]} : vector<3x32xf32> to vector<1x32xf32>
    %253 = vector.broadcast %250 : vector<1x32xf32> to vector<2x32xf32>
    %254 = arith.addf %248, %253 : vector<2x32xf32>
    %cst_165 = arith.constant dense<0.000000e+00> : vector<32xf32>
    %255 = vector.multi_reduction <add>, %254, %cst_165 [0] : vector<2x32xf32> to vector<32xf32>
    %256 = vector.shape_cast %255 : vector<32xf32> to vector<1x32xf32>
    %257 = arith.mulf %254, %254 : vector<2x32xf32>
    %cst_166 = arith.constant dense<0.000000e+00> : vector<32xf32>
    %258 = vector.multi_reduction <add>, %257, %cst_166 [0] : vector<2x32xf32> to vector<32xf32>
    %259 = vector.shape_cast %258 : vector<32xf32> to vector<1x32xf32>
    %cst_167 = arith.constant 5.000000e-01 : f32
    %260 = vector.broadcast %cst_167 : f32 to vector<1x32xf32>
    %261 = arith.mulf %256, %260 : vector<1x32xf32>
    %cst_168 = arith.constant 5.000000e-01 : f32
    %262 = vector.broadcast %cst_168 : f32 to vector<1x32xf32>
    %263 = arith.mulf %259, %262 : vector<1x32xf32>
    %264 = arith.mulf %261, %261 : vector<1x32xf32>
    %265 = arith.subf %263, %264 : vector<1x32xf32>
    %266 = vector.broadcast %261 : vector<1x32xf32> to vector<2x32xf32>
    %267 = arith.subf %254, %266 : vector<2x32xf32>
    %cst_169 = arith.constant 9.99999974E-6 : f32
    %268 = vector.broadcast %cst_169 : f32 to vector<1x32xf32>
    %269 = arith.addf %265, %268 : vector<1x32xf32>
    %270 = math.rsqrt %269 : vector<1x32xf32>
    %271 = vector.broadcast %270 : vector<1x32xf32> to vector<2x32xf32>
    %272 = arith.mulf %267, %271 : vector<2x32xf32>
    %273 = vector.broadcast %251 : vector<1x32xf32> to vector<2x32xf32>
    %274 = arith.mulf %272, %273 : vector<2x32xf32>
    %275 = vector.broadcast %252 : vector<1x32xf32> to vector<2x32xf32>
    %276 = arith.addf %274, %275 : vector<2x32xf32>
    %cst_170 = arith.constant 0.000000e+00 : f32
    %277 = vector.broadcast %cst_170 : f32 to vector<2x32xf32>
    %278 = arith.maximumf %276, %277 : vector<2x32xf32>
    %279 = arith.truncf %278 : vector<2x32xf32> to vector<2x32xbf16>
    %c0_171 = arith.constant 0 : index
    %c0_172 = arith.constant 0 : index
    %280 = vector.load %arg12[%c0_171, %c0_172] : memref<32x118xbf16, #tpu.memory_space<vmem>>, vector<32x118xbf16>
    %cst_173 = arith.constant dense<0.000000e+00> : vector<2x118xf32>
    %281 = tpu.matmul %279, %280, %cst_173 {dimension_numbers = #tpu.dot_dimension_numbers<[1], [0], [0], [1], [0, 0, 1, 1], [], []>} : vector<2x32xbf16>, vector<32x118xbf16>, vector<2x118xf32> -> vector<2x118xf32>
    %c0_174 = arith.constant 0 : index
    %c0_175 = arith.constant 0 : index
    %282 = vector.load %arg13[%c0_174, %c0_175] : memref<1x118xf32, #tpu.memory_space<vmem>>, vector<1x118xf32>
    %283 = vector.broadcast %282 : vector<1x118xf32> to vector<2x118xf32>
    %284 = arith.addf %281, %283 : vector<2x118xf32>
    %285 = vector.extract_strided_slice %284 {offsets = [0, 0], sizes = [2, 8], strides = [1, 1]} : vector<2x118xf32> to vector<2x8xf32>
    %286 = vector.extract_strided_slice %284 {offsets = [0, 8], sizes = [2, 8], strides = [1, 1]} : vector<2x118xf32> to vector<2x8xf32>
    %287 = vector.extract_strided_slice %284 {offsets = [0, 16], sizes = [2, 48], strides = [1, 1]} : vector<2x118xf32> to vector<2x48xf32>
    %288 = vector.extract_strided_slice %284 {offsets = [0, 64], sizes = [2, 48], strides = [1, 1]} : vector<2x118xf32> to vector<2x48xf32>
    %289 = vector.extract_strided_slice %284 {offsets = [0, 112], sizes = [2, 6], strides = [1, 1]} : vector<2x118xf32> to vector<2x6xf32>
    %c0_176 = arith.constant 0 : index
    %c0_177 = arith.constant 0 : index
    %290 = vector.load %arg3[%c0_176, %c0_177] : memref<2x8xf32, #tpu.memory_space<vmem>>, vector<2x8xf32>
    %cst_178 = arith.constant 5.000000e-01 : f32
    %291 = vector.broadcast %cst_178 : f32 to vector<2x8xf32>
    %292 = arith.mulf %291, %286 : vector<2x8xf32>
    %293 = math.exp %292 : vector<2x8xf32>
    %294 = arith.mulf %290, %293 : vector<2x8xf32>
    %295 = arith.addf %285, %294 : vector<2x8xf32>
    %cst_179 = arith.constant 0.000000e+00 : f32
    %296 = vector.broadcast %cst_179 : f32 to vector<2x1xf32>
    %297 = vector.extract_strided_slice %287 {offsets = [0, 0], sizes = [2, 8], strides = [1, 1]} : vector<2x48xf32> to vector<2x8xf32>
    %298 = vector.extract_strided_slice %288 {offsets = [0, 0], sizes = [2, 8], strides = [1, 1]} : vector<2x48xf32> to vector<2x8xf32>
    %299 = vector.extract_strided_slice %289 {offsets = [0, 0], sizes = [2, 1], strides = [1, 1]} : vector<2x6xf32> to vector<2x1xf32>
    %300 = arith.mulf %298, %297 : vector<2x8xf32>
    %cst_180 = arith.constant dense<0.000000e+00> : vector<2xf32>
    %301 = vector.multi_reduction <add>, %300, %cst_180 [1] : vector<2x8xf32> to vector<2xf32>
    %302 = vector.shape_cast %301 : vector<2xf32> to vector<2x1xf32>
    %cst_181 = arith.constant 0.000000e+00 : f32
    %303 = vector.broadcast %cst_181 : f32 to vector<2x1xf32>
    %304 = arith.maximumf %302, %303 : vector<2x1xf32>
    %305 = vector.broadcast %cst_181 : f32 to vector<2x1xf32>
    %306 = arith.subf %302, %305 : vector<2x1xf32>
    %307 = arith.cmpf one, %306, %306 : vector<2x1xf32>
    %308 = vector.broadcast %cst_181 : f32 to vector<2x1xf32>
    %309 = arith.addf %302, %308 : vector<2x1xf32>
    %310 = math.absf %306 : vector<2x1xf32>
    %cst_182 = arith.constant 0.000000e+00 : f32
    %311 = vector.broadcast %cst_182 : f32 to vector<2x1xf32>
    %312 = arith.subf %311, %310 : vector<2x1xf32>
    %313 = math.exp %312 : vector<2x1xf32>
    %314 = math.log1p %313 : vector<2x1xf32>
    %315 = arith.addf %304, %314 : vector<2x1xf32>
    %316 = arith.select %307, %309, %315 : vector<2x1xi1>, vector<2x1xf32>
    %cst_183 = arith.constant -1.000000e+00 : f32
    %317 = vector.broadcast %cst_183 : f32 to vector<2x1xf32>
    %318 = arith.addf %317, %316 : vector<2x1xf32>
    %319 = arith.mulf %298, %298 : vector<2x8xf32>
    %cst_184 = arith.constant dense<0.000000e+00> : vector<2xf32>
    %320 = vector.multi_reduction <add>, %319, %cst_184 [1] : vector<2x8xf32> to vector<2xf32>
    %321 = vector.shape_cast %320 : vector<2xf32> to vector<2x1xf32>
    %322 = arith.subf %318, %302 : vector<2x1xf32>
    %323 = vector.broadcast %322 : vector<2x1xf32> to vector<2x8xf32>
    %324 = arith.mulf %323, %298 : vector<2x8xf32>
    %325 = vector.broadcast %321 : vector<2x1xf32> to vector<2x8xf32>
    %326 = arith.divf %324, %325 : vector<2x8xf32>
    %327 = arith.addf %297, %326 : vector<2x8xf32>
    %328 = arith.mulf %298, %295 : vector<2x8xf32>
    %cst_185 = arith.constant dense<0.000000e+00> : vector<2xf32>
    %329 = vector.multi_reduction <add>, %328, %cst_185 [1] : vector<2x8xf32> to vector<2xf32>
    %330 = vector.shape_cast %329 : vector<2xf32> to vector<2x1xf32>
    %331 = arith.addf %330, %299 : vector<2x1xf32>
    %332 = math.tanh %331 : vector<2x1xf32>
    %333 = vector.broadcast %332 : vector<2x1xf32> to vector<2x8xf32>
    %334 = arith.mulf %327, %333 : vector<2x8xf32>
    %335 = arith.addf %295, %334 : vector<2x8xf32>
    %336 = arith.mulf %332, %332 : vector<2x1xf32>
    %cst_186 = arith.constant 1.000000e+00 : f32
    %337 = vector.broadcast %cst_186 : f32 to vector<2x1xf32>
    %338 = arith.subf %337, %336 : vector<2x1xf32>
    %339 = arith.mulf %298, %327 : vector<2x8xf32>
    %cst_187 = arith.constant dense<0.000000e+00> : vector<2xf32>
    %340 = vector.multi_reduction <add>, %339, %cst_187 [1] : vector<2x8xf32> to vector<2xf32>
    %341 = vector.shape_cast %340 : vector<2xf32> to vector<2x1xf32>
    %342 = arith.mulf %338, %341 : vector<2x1xf32>
    %cst_188 = arith.constant 1.000000e+00 : f32
    %343 = vector.broadcast %cst_188 : f32 to vector<2x1xf32>
    %344 = arith.addf %343, %342 : vector<2x1xf32>
    %345 = math.absf %344 : vector<2x1xf32>
    %346 = math.log %345 : vector<2x1xf32>
    %347 = arith.addf %296, %346 : vector<2x1xf32>
    %348 = vector.extract_strided_slice %287 {offsets = [0, 8], sizes = [2, 8], strides = [1, 1]} : vector<2x48xf32> to vector<2x8xf32>
    %349 = vector.extract_strided_slice %288 {offsets = [0, 8], sizes = [2, 8], strides = [1, 1]} : vector<2x48xf32> to vector<2x8xf32>
    %350 = vector.extract_strided_slice %289 {offsets = [0, 1], sizes = [2, 1], strides = [1, 1]} : vector<2x6xf32> to vector<2x1xf32>
    %351 = arith.mulf %349, %348 : vector<2x8xf32>
    %cst_189 = arith.constant dense<0.000000e+00> : vector<2xf32>
    %352 = vector.multi_reduction <add>, %351, %cst_189 [1] : vector<2x8xf32> to vector<2xf32>
    %353 = vector.shape_cast %352 : vector<2xf32> to vector<2x1xf32>
    %cst_190 = arith.constant 0.000000e+00 : f32
    %354 = vector.broadcast %cst_190 : f32 to vector<2x1xf32>
    %355 = arith.maximumf %353, %354 : vector<2x1xf32>
    %356 = vector.broadcast %cst_190 : f32 to vector<2x1xf32>
    %357 = arith.subf %353, %356 : vector<2x1xf32>
    %358 = arith.cmpf one, %357, %357 : vector<2x1xf32>
    %359 = vector.broadcast %cst_190 : f32 to vector<2x1xf32>
    %360 = arith.addf %353, %359 : vector<2x1xf32>
    %361 = math.absf %357 : vector<2x1xf32>
    %cst_191 = arith.constant 0.000000e+00 : f32
    %362 = vector.broadcast %cst_191 : f32 to vector<2x1xf32>
    %363 = arith.subf %362, %361 : vector<2x1xf32>
    %364 = math.exp %363 : vector<2x1xf32>
    %365 = math.log1p %364 : vector<2x1xf32>
    %366 = arith.addf %355, %365 : vector<2x1xf32>
    %367 = arith.select %358, %360, %366 : vector<2x1xi1>, vector<2x1xf32>
    %cst_192 = arith.constant -1.000000e+00 : f32
    %368 = vector.broadcast %cst_192 : f32 to vector<2x1xf32>
    %369 = arith.addf %368, %367 : vector<2x1xf32>
    %370 = arith.mulf %349, %349 : vector<2x8xf32>
    %cst_193 = arith.constant dense<0.000000e+00> : vector<2xf32>
    %371 = vector.multi_reduction <add>, %370, %cst_193 [1] : vector<2x8xf32> to vector<2xf32>
    %372 = vector.shape_cast %371 : vector<2xf32> to vector<2x1xf32>
    %373 = arith.subf %369, %353 : vector<2x1xf32>
    %374 = vector.broadcast %373 : vector<2x1xf32> to vector<2x8xf32>
    %375 = arith.mulf %374, %349 : vector<2x8xf32>
    %376 = vector.broadcast %372 : vector<2x1xf32> to vector<2x8xf32>
    %377 = arith.divf %375, %376 : vector<2x8xf32>
    %378 = arith.addf %348, %377 : vector<2x8xf32>
    %379 = arith.mulf %349, %335 : vector<2x8xf32>
    %cst_194 = arith.constant dense<0.000000e+00> : vector<2xf32>
    %380 = vector.multi_reduction <add>, %379, %cst_194 [1] : vector<2x8xf32> to vector<2xf32>
    %381 = vector.shape_cast %380 : vector<2xf32> to vector<2x1xf32>
    %382 = arith.addf %381, %350 : vector<2x1xf32>
    %383 = math.tanh %382 : vector<2x1xf32>
    %384 = vector.broadcast %383 : vector<2x1xf32> to vector<2x8xf32>
    %385 = arith.mulf %378, %384 : vector<2x8xf32>
    %386 = arith.addf %335, %385 : vector<2x8xf32>
    %387 = arith.mulf %383, %383 : vector<2x1xf32>
    %cst_195 = arith.constant 1.000000e+00 : f32
    %388 = vector.broadcast %cst_195 : f32 to vector<2x1xf32>
    %389 = arith.subf %388, %387 : vector<2x1xf32>
    %390 = arith.mulf %349, %378 : vector<2x8xf32>
    %cst_196 = arith.constant dense<0.000000e+00> : vector<2xf32>
    %391 = vector.multi_reduction <add>, %390, %cst_196 [1] : vector<2x8xf32> to vector<2xf32>
    %392 = vector.shape_cast %391 : vector<2xf32> to vector<2x1xf32>
    %393 = arith.mulf %389, %392 : vector<2x1xf32>
    %cst_197 = arith.constant 1.000000e+00 : f32
    %394 = vector.broadcast %cst_197 : f32 to vector<2x1xf32>
    %395 = arith.addf %394, %393 : vector<2x1xf32>
    %396 = math.absf %395 : vector<2x1xf32>
    %397 = math.log %396 : vector<2x1xf32>
    %398 = arith.addf %347, %397 : vector<2x1xf32>
    %399 = vector.extract_strided_slice %287 {offsets = [0, 16], sizes = [2, 8], strides = [1, 1]} : vector<2x48xf32> to vector<2x8xf32>
    %400 = vector.extract_strided_slice %288 {offsets = [0, 16], sizes = [2, 8], strides = [1, 1]} : vector<2x48xf32> to vector<2x8xf32>
    %401 = vector.extract_strided_slice %289 {offsets = [0, 2], sizes = [2, 1], strides = [1, 1]} : vector<2x6xf32> to vector<2x1xf32>
    %402 = arith.mulf %400, %399 : vector<2x8xf32>
    %cst_198 = arith.constant dense<0.000000e+00> : vector<2xf32>
    %403 = vector.multi_reduction <add>, %402, %cst_198 [1] : vector<2x8xf32> to vector<2xf32>
    %404 = vector.shape_cast %403 : vector<2xf32> to vector<2x1xf32>
    %cst_199 = arith.constant 0.000000e+00 : f32
    %405 = vector.broadcast %cst_199 : f32 to vector<2x1xf32>
    %406 = arith.maximumf %404, %405 : vector<2x1xf32>
    %407 = vector.broadcast %cst_199 : f32 to vector<2x1xf32>
    %408 = arith.subf %404, %407 : vector<2x1xf32>
    %409 = arith.cmpf one, %408, %408 : vector<2x1xf32>
    %410 = vector.broadcast %cst_199 : f32 to vector<2x1xf32>
    %411 = arith.addf %404, %410 : vector<2x1xf32>
    %412 = math.absf %408 : vector<2x1xf32>
    %cst_200 = arith.constant 0.000000e+00 : f32
    %413 = vector.broadcast %cst_200 : f32 to vector<2x1xf32>
    %414 = arith.subf %413, %412 : vector<2x1xf32>
    %415 = math.exp %414 : vector<2x1xf32>
    %416 = math.log1p %415 : vector<2x1xf32>
    %417 = arith.addf %406, %416 : vector<2x1xf32>
    %418 = arith.select %409, %411, %417 : vector<2x1xi1>, vector<2x1xf32>
    %cst_201 = arith.constant -1.000000e+00 : f32
    %419 = vector.broadcast %cst_201 : f32 to vector<2x1xf32>
    %420 = arith.addf %419, %418 : vector<2x1xf32>
    %421 = arith.mulf %400, %400 : vector<2x8xf32>
    %cst_202 = arith.constant dense<0.000000e+00> : vector<2xf32>
    %422 = vector.multi_reduction <add>, %421, %cst_202 [1] : vector<2x8xf32> to vector<2xf32>
    %423 = vector.shape_cast %422 : vector<2xf32> to vector<2x1xf32>
    %424 = arith.subf %420, %404 : vector<2x1xf32>
    %425 = vector.broadcast %424 : vector<2x1xf32> to vector<2x8xf32>
    %426 = arith.mulf %425, %400 : vector<2x8xf32>
    %427 = vector.broadcast %423 : vector<2x1xf32> to vector<2x8xf32>
    %428 = arith.divf %426, %427 : vector<2x8xf32>
    %429 = arith.addf %399, %428 : vector<2x8xf32>
    %430 = arith.mulf %400, %386 : vector<2x8xf32>
    %cst_203 = arith.constant dense<0.000000e+00> : vector<2xf32>
    %431 = vector.multi_reduction <add>, %430, %cst_203 [1] : vector<2x8xf32> to vector<2xf32>
    %432 = vector.shape_cast %431 : vector<2xf32> to vector<2x1xf32>
    %433 = arith.addf %432, %401 : vector<2x1xf32>
    %434 = math.tanh %433 : vector<2x1xf32>
    %435 = vector.broadcast %434 : vector<2x1xf32> to vector<2x8xf32>
    %436 = arith.mulf %429, %435 : vector<2x8xf32>
    %437 = arith.addf %386, %436 : vector<2x8xf32>
    %438 = arith.mulf %434, %434 : vector<2x1xf32>
    %cst_204 = arith.constant 1.000000e+00 : f32
    %439 = vector.broadcast %cst_204 : f32 to vector<2x1xf32>
    %440 = arith.subf %439, %438 : vector<2x1xf32>
    %441 = arith.mulf %400, %429 : vector<2x8xf32>
    %cst_205 = arith.constant dense<0.000000e+00> : vector<2xf32>
    %442 = vector.multi_reduction <add>, %441, %cst_205 [1] : vector<2x8xf32> to vector<2xf32>
    %443 = vector.shape_cast %442 : vector<2xf32> to vector<2x1xf32>
    %444 = arith.mulf %440, %443 : vector<2x1xf32>
    %cst_206 = arith.constant 1.000000e+00 : f32
    %445 = vector.broadcast %cst_206 : f32 to vector<2x1xf32>
    %446 = arith.addf %445, %444 : vector<2x1xf32>
    %447 = math.absf %446 : vector<2x1xf32>
    %448 = math.log %447 : vector<2x1xf32>
    %449 = arith.addf %398, %448 : vector<2x1xf32>
    %450 = vector.extract_strided_slice %287 {offsets = [0, 24], sizes = [2, 8], strides = [1, 1]} : vector<2x48xf32> to vector<2x8xf32>
    %451 = vector.extract_strided_slice %288 {offsets = [0, 24], sizes = [2, 8], strides = [1, 1]} : vector<2x48xf32> to vector<2x8xf32>
    %452 = vector.extract_strided_slice %289 {offsets = [0, 3], sizes = [2, 1], strides = [1, 1]} : vector<2x6xf32> to vector<2x1xf32>
    %453 = arith.mulf %451, %450 : vector<2x8xf32>
    %cst_207 = arith.constant dense<0.000000e+00> : vector<2xf32>
    %454 = vector.multi_reduction <add>, %453, %cst_207 [1] : vector<2x8xf32> to vector<2xf32>
    %455 = vector.shape_cast %454 : vector<2xf32> to vector<2x1xf32>
    %cst_208 = arith.constant 0.000000e+00 : f32
    %456 = vector.broadcast %cst_208 : f32 to vector<2x1xf32>
    %457 = arith.maximumf %455, %456 : vector<2x1xf32>
    %458 = vector.broadcast %cst_208 : f32 to vector<2x1xf32>
    %459 = arith.subf %455, %458 : vector<2x1xf32>
    %460 = arith.cmpf one, %459, %459 : vector<2x1xf32>
    %461 = vector.broadcast %cst_208 : f32 to vector<2x1xf32>
    %462 = arith.addf %455, %461 : vector<2x1xf32>
    %463 = math.absf %459 : vector<2x1xf32>
    %cst_209 = arith.constant 0.000000e+00 : f32
    %464 = vector.broadcast %cst_209 : f32 to vector<2x1xf32>
    %465 = arith.subf %464, %463 : vector<2x1xf32>
    %466 = math.exp %465 : vector<2x1xf32>
    %467 = math.log1p %466 : vector<2x1xf32>
    %468 = arith.addf %457, %467 : vector<2x1xf32>
    %469 = arith.select %460, %462, %468 : vector<2x1xi1>, vector<2x1xf32>
    %cst_210 = arith.constant -1.000000e+00 : f32
    %470 = vector.broadcast %cst_210 : f32 to vector<2x1xf32>
    %471 = arith.addf %470, %469 : vector<2x1xf32>
    %472 = arith.mulf %451, %451 : vector<2x8xf32>
    %cst_211 = arith.constant dense<0.000000e+00> : vector<2xf32>
    %473 = vector.multi_reduction <add>, %472, %cst_211 [1] : vector<2x8xf32> to vector<2xf32>
    %474 = vector.shape_cast %473 : vector<2xf32> to vector<2x1xf32>
    %475 = arith.subf %471, %455 : vector<2x1xf32>
    %476 = vector.broadcast %475 : vector<2x1xf32> to vector<2x8xf32>
    %477 = arith.mulf %476, %451 : vector<2x8xf32>
    %478 = vector.broadcast %474 : vector<2x1xf32> to vector<2x8xf32>
    %479 = arith.divf %477, %478 : vector<2x8xf32>
    %480 = arith.addf %450, %479 : vector<2x8xf32>
    %481 = arith.mulf %451, %437 : vector<2x8xf32>
    %cst_212 = arith.constant dense<0.000000e+00> : vector<2xf32>
    %482 = vector.multi_reduction <add>, %481, %cst_212 [1] : vector<2x8xf32> to vector<2xf32>
    %483 = vector.shape_cast %482 : vector<2xf32> to vector<2x1xf32>
    %484 = arith.addf %483, %452 : vector<2x1xf32>
    %485 = math.tanh %484 : vector<2x1xf32>
    %486 = vector.broadcast %485 : vector<2x1xf32> to vector<2x8xf32>
    %487 = arith.mulf %480, %486 : vector<2x8xf32>
    %488 = arith.addf %437, %487 : vector<2x8xf32>
    %489 = arith.mulf %485, %485 : vector<2x1xf32>
    %cst_213 = arith.constant 1.000000e+00 : f32
    %490 = vector.broadcast %cst_213 : f32 to vector<2x1xf32>
    %491 = arith.subf %490, %489 : vector<2x1xf32>
    %492 = arith.mulf %451, %480 : vector<2x8xf32>
    %cst_214 = arith.constant dense<0.000000e+00> : vector<2xf32>
    %493 = vector.multi_reduction <add>, %492, %cst_214 [1] : vector<2x8xf32> to vector<2xf32>
    %494 = vector.shape_cast %493 : vector<2xf32> to vector<2x1xf32>
    %495 = arith.mulf %491, %494 : vector<2x1xf32>
    %cst_215 = arith.constant 1.000000e+00 : f32
    %496 = vector.broadcast %cst_215 : f32 to vector<2x1xf32>
    %497 = arith.addf %496, %495 : vector<2x1xf32>
    %498 = math.absf %497 : vector<2x1xf32>
    %499 = math.log %498 : vector<2x1xf32>
    %500 = arith.addf %449, %499 : vector<2x1xf32>
    %501 = vector.extract_strided_slice %287 {offsets = [0, 32], sizes = [2, 8], strides = [1, 1]} : vector<2x48xf32> to vector<2x8xf32>
    %502 = vector.extract_strided_slice %288 {offsets = [0, 32], sizes = [2, 8], strides = [1, 1]} : vector<2x48xf32> to vector<2x8xf32>
    %503 = vector.extract_strided_slice %289 {offsets = [0, 4], sizes = [2, 1], strides = [1, 1]} : vector<2x6xf32> to vector<2x1xf32>
    %504 = arith.mulf %502, %501 : vector<2x8xf32>
    %cst_216 = arith.constant dense<0.000000e+00> : vector<2xf32>
    %505 = vector.multi_reduction <add>, %504, %cst_216 [1] : vector<2x8xf32> to vector<2xf32>
    %506 = vector.shape_cast %505 : vector<2xf32> to vector<2x1xf32>
    %cst_217 = arith.constant 0.000000e+00 : f32
    %507 = vector.broadcast %cst_217 : f32 to vector<2x1xf32>
    %508 = arith.maximumf %506, %507 : vector<2x1xf32>
    %509 = vector.broadcast %cst_217 : f32 to vector<2x1xf32>
    %510 = arith.subf %506, %509 : vector<2x1xf32>
    %511 = arith.cmpf one, %510, %510 : vector<2x1xf32>
    %512 = vector.broadcast %cst_217 : f32 to vector<2x1xf32>
    %513 = arith.addf %506, %512 : vector<2x1xf32>
    %514 = math.absf %510 : vector<2x1xf32>
    %cst_218 = arith.constant 0.000000e+00 : f32
    %515 = vector.broadcast %cst_218 : f32 to vector<2x1xf32>
    %516 = arith.subf %515, %514 : vector<2x1xf32>
    %517 = math.exp %516 : vector<2x1xf32>
    %518 = math.log1p %517 : vector<2x1xf32>
    %519 = arith.addf %508, %518 : vector<2x1xf32>
    %520 = arith.select %511, %513, %519 : vector<2x1xi1>, vector<2x1xf32>
    %cst_219 = arith.constant -1.000000e+00 : f32
    %521 = vector.broadcast %cst_219 : f32 to vector<2x1xf32>
    %522 = arith.addf %521, %520 : vector<2x1xf32>
    %523 = arith.mulf %502, %502 : vector<2x8xf32>
    %cst_220 = arith.constant dense<0.000000e+00> : vector<2xf32>
    %524 = vector.multi_reduction <add>, %523, %cst_220 [1] : vector<2x8xf32> to vector<2xf32>
    %525 = vector.shape_cast %524 : vector<2xf32> to vector<2x1xf32>
    %526 = arith.subf %522, %506 : vector<2x1xf32>
    %527 = vector.broadcast %526 : vector<2x1xf32> to vector<2x8xf32>
    %528 = arith.mulf %527, %502 : vector<2x8xf32>
    %529 = vector.broadcast %525 : vector<2x1xf32> to vector<2x8xf32>
    %530 = arith.divf %528, %529 : vector<2x8xf32>
    %531 = arith.addf %501, %530 : vector<2x8xf32>
    %532 = arith.mulf %502, %488 : vector<2x8xf32>
    %cst_221 = arith.constant dense<0.000000e+00> : vector<2xf32>
    %533 = vector.multi_reduction <add>, %532, %cst_221 [1] : vector<2x8xf32> to vector<2xf32>
    %534 = vector.shape_cast %533 : vector<2xf32> to vector<2x1xf32>
    %535 = arith.addf %534, %503 : vector<2x1xf32>
    %536 = math.tanh %535 : vector<2x1xf32>
    %537 = vector.broadcast %536 : vector<2x1xf32> to vector<2x8xf32>
    %538 = arith.mulf %531, %537 : vector<2x8xf32>
    %539 = arith.addf %488, %538 : vector<2x8xf32>
    %540 = arith.mulf %536, %536 : vector<2x1xf32>
    %cst_222 = arith.constant 1.000000e+00 : f32
    %541 = vector.broadcast %cst_222 : f32 to vector<2x1xf32>
    %542 = arith.subf %541, %540 : vector<2x1xf32>
    %543 = arith.mulf %502, %531 : vector<2x8xf32>
    %cst_223 = arith.constant dense<0.000000e+00> : vector<2xf32>
    %544 = vector.multi_reduction <add>, %543, %cst_223 [1] : vector<2x8xf32> to vector<2xf32>
    %545 = vector.shape_cast %544 : vector<2xf32> to vector<2x1xf32>
    %546 = arith.mulf %542, %545 : vector<2x1xf32>
    %cst_224 = arith.constant 1.000000e+00 : f32
    %547 = vector.broadcast %cst_224 : f32 to vector<2x1xf32>
    %548 = arith.addf %547, %546 : vector<2x1xf32>
    %549 = math.absf %548 : vector<2x1xf32>
    %550 = math.log %549 : vector<2x1xf32>
    %551 = arith.addf %500, %550 : vector<2x1xf32>
    %552 = vector.extract_strided_slice %287 {offsets = [0, 40], sizes = [2, 8], strides = [1, 1]} : vector<2x48xf32> to vector<2x8xf32>
    %553 = vector.extract_strided_slice %288 {offsets = [0, 40], sizes = [2, 8], strides = [1, 1]} : vector<2x48xf32> to vector<2x8xf32>
    %554 = vector.extract_strided_slice %289 {offsets = [0, 5], sizes = [2, 1], strides = [1, 1]} : vector<2x6xf32> to vector<2x1xf32>
    %555 = arith.mulf %553, %552 : vector<2x8xf32>
    %cst_225 = arith.constant dense<0.000000e+00> : vector<2xf32>
    %556 = vector.multi_reduction <add>, %555, %cst_225 [1] : vector<2x8xf32> to vector<2xf32>
    %557 = vector.shape_cast %556 : vector<2xf32> to vector<2x1xf32>
    %cst_226 = arith.constant 0.000000e+00 : f32
    %558 = vector.broadcast %cst_226 : f32 to vector<2x1xf32>
    %559 = arith.maximumf %557, %558 : vector<2x1xf32>
    %560 = vector.broadcast %cst_226 : f32 to vector<2x1xf32>
    %561 = arith.subf %557, %560 : vector<2x1xf32>
    %562 = arith.cmpf one, %561, %561 : vector<2x1xf32>
    %563 = vector.broadcast %cst_226 : f32 to vector<2x1xf32>
    %564 = arith.addf %557, %563 : vector<2x1xf32>
    %565 = math.absf %561 : vector<2x1xf32>
    %cst_227 = arith.constant 0.000000e+00 : f32
    %566 = vector.broadcast %cst_227 : f32 to vector<2x1xf32>
    %567 = arith.subf %566, %565 : vector<2x1xf32>
    %568 = math.exp %567 : vector<2x1xf32>
    %569 = math.log1p %568 : vector<2x1xf32>
    %570 = arith.addf %559, %569 : vector<2x1xf32>
    %571 = arith.select %562, %564, %570 : vector<2x1xi1>, vector<2x1xf32>
    %cst_228 = arith.constant -1.000000e+00 : f32
    %572 = vector.broadcast %cst_228 : f32 to vector<2x1xf32>
    %573 = arith.addf %572, %571 : vector<2x1xf32>
    %574 = arith.mulf %553, %553 : vector<2x8xf32>
    %cst_229 = arith.constant dense<0.000000e+00> : vector<2xf32>
    %575 = vector.multi_reduction <add>, %574, %cst_229 [1] : vector<2x8xf32> to vector<2xf32>
    %576 = vector.shape_cast %575 : vector<2xf32> to vector<2x1xf32>
    %577 = arith.subf %573, %557 : vector<2x1xf32>
    %578 = vector.broadcast %577 : vector<2x1xf32> to vector<2x8xf32>
    %579 = arith.mulf %578, %553 : vector<2x8xf32>
    %580 = vector.broadcast %576 : vector<2x1xf32> to vector<2x8xf32>
    %581 = arith.divf %579, %580 : vector<2x8xf32>
    %582 = arith.addf %552, %581 : vector<2x8xf32>
    %583 = arith.mulf %553, %539 : vector<2x8xf32>
    %cst_230 = arith.constant dense<0.000000e+00> : vector<2xf32>
    %584 = vector.multi_reduction <add>, %583, %cst_230 [1] : vector<2x8xf32> to vector<2xf32>
    %585 = vector.shape_cast %584 : vector<2xf32> to vector<2x1xf32>
    %586 = arith.addf %585, %554 : vector<2x1xf32>
    %587 = math.tanh %586 : vector<2x1xf32>
    %588 = vector.broadcast %587 : vector<2x1xf32> to vector<2x8xf32>
    %589 = arith.mulf %582, %588 : vector<2x8xf32>
    %590 = arith.addf %539, %589 : vector<2x8xf32>
    %591 = arith.mulf %587, %587 : vector<2x1xf32>
    %cst_231 = arith.constant 1.000000e+00 : f32
    %592 = vector.broadcast %cst_231 : f32 to vector<2x1xf32>
    %593 = arith.subf %592, %591 : vector<2x1xf32>
    %594 = arith.mulf %553, %582 : vector<2x8xf32>
    %cst_232 = arith.constant dense<0.000000e+00> : vector<2xf32>
    %595 = vector.multi_reduction <add>, %594, %cst_232 [1] : vector<2x8xf32> to vector<2xf32>
    %596 = vector.shape_cast %595 : vector<2xf32> to vector<2x1xf32>
    %597 = arith.mulf %593, %596 : vector<2x1xf32>
    %cst_233 = arith.constant 1.000000e+00 : f32
    %598 = vector.broadcast %cst_233 : f32 to vector<2x1xf32>
    %599 = arith.addf %598, %597 : vector<2x1xf32>
    %600 = math.absf %599 : vector<2x1xf32>
    %601 = math.log %600 : vector<2x1xf32>
    %602 = arith.addf %551, %601 : vector<2x1xf32>
    %c0_234 = arith.constant 0 : index
    %c0_235 = arith.constant 0 : index
    %603 = vector.load %arg24[%c0_234, %c0_235] : memref<2x33xf32, #tpu.memory_space<vmem>>, vector<2x8xf32>
    tpu.vector_store %arg24[%c0_234, %c0_235], %285 {strides = array<i32>} : memref<2x33xf32, #tpu.memory_space<vmem>>, vector<2x8xf32>,
    %c0_236 = arith.constant 0 : index
    %c8_237 = arith.constant 8 : index
    %604 = vector.load %arg24[%c0_236, %c8_237] : memref<2x33xf32, #tpu.memory_space<vmem>>, vector<2x8xf32>
    tpu.vector_store %arg24[%c0_236, %c8_237], %286 {strides = array<i32>} : memref<2x33xf32, #tpu.memory_space<vmem>>, vector<2x8xf32>,
    %c0_238 = arith.constant 0 : index
    %c16_239 = arith.constant 16 : index
    %605 = vector.load %arg24[%c0_238, %c16_239] : memref<2x33xf32, #tpu.memory_space<vmem>>, vector<2x8xf32>
    tpu.vector_store %arg24[%c0_238, %c16_239], %295 {strides = array<i32>} : memref<2x33xf32, #tpu.memory_space<vmem>>, vector<2x8xf32>,
    %c0_240 = arith.constant 0 : index
    %c24_241 = arith.constant 24 : index
    %606 = vector.load %arg24[%c0_240, %c24_241] : memref<2x33xf32, #tpu.memory_space<vmem>>, vector<2x8xf32>
    tpu.vector_store %arg24[%c0_240, %c24_241], %590 {strides = array<i32>} : memref<2x33xf32, #tpu.memory_space<vmem>>, vector<2x8xf32>,
    %c0_242 = arith.constant 0 : index
    %c32_243 = arith.constant 32 : index
    %607 = vector.load %arg24[%c0_242, %c32_243] : memref<2x33xf32, #tpu.memory_space<vmem>>, vector<2x1xf32>
    tpu.vector_store %arg24[%c0_242, %c32_243], %602 {strides = array<i32>} : memref<2x33xf32, #tpu.memory_space<vmem>>, vector<2x1xf32>,
    %608 = arith.truncf %590 : vector<2x8xf32> to vector<2x8xbf16>
    %c0_244 = arith.constant 0 : index
    %c0_245 = arith.constant 0 : index
    %609 = vector.load %arg14[%c0_244, %c0_245] : memref<8x32xbf16, #tpu.memory_space<vmem>>, vector<8x32xbf16>
    %cst_246 = arith.constant dense<0.000000e+00> : vector<2x32xf32>
    %610 = tpu.matmul %608, %609, %cst_246 {dimension_numbers = #tpu.dot_dimension_numbers<[1], [0], [0], [1], [0, 0, 1, 1], [], []>} : vector<2x8xbf16>, vector<8x32xbf16>, vector<2x32xf32> -> vector<2x32xf32>
    %c0_247 = arith.constant 0 : index
    %c0_248 = arith.constant 0 : index
    %611 = vector.load %arg15[%c0_247, %c0_248] : memref<3x32xf32, #tpu.memory_space<vmem>>, vector<3x32xf32>
    %612 = vector.extract_strided_slice %611 {offsets = [0, 0], sizes = [1, 32], strides = [1, 1]} : vector<3x32xf32> to vector<1x32xf32>
    %613 = vector.extract_strided_slice %611 {offsets = [1, 0], sizes = [1, 32], strides = [1, 1]} : vector<3x32xf32> to vector<1x32xf32>
    %614 = vector.extract_strided_slice %611 {offsets = [2, 0], sizes = [1, 32], strides = [1, 1]} : vector<3x32xf32> to vector<1x32xf32>
    %615 = vector.broadcast %612 : vector<1x32xf32> to vector<2x32xf32>
    %616 = arith.addf %610, %615 : vector<2x32xf32>
    %cst_249 = arith.constant dense<0.000000e+00> : vector<32xf32>
    %617 = vector.multi_reduction <add>, %616, %cst_249 [0] : vector<2x32xf32> to vector<32xf32>
    %618 = vector.shape_cast %617 : vector<32xf32> to vector<1x32xf32>
    %619 = arith.mulf %616, %616 : vector<2x32xf32>
    %cst_250 = arith.constant dense<0.000000e+00> : vector<32xf32>
    %620 = vector.multi_reduction <add>, %619, %cst_250 [0] : vector<2x32xf32> to vector<32xf32>
    %621 = vector.shape_cast %620 : vector<32xf32> to vector<1x32xf32>
    %cst_251 = arith.constant 5.000000e-01 : f32
    %622 = vector.broadcast %cst_251 : f32 to vector<1x32xf32>
    %623 = arith.mulf %618, %622 : vector<1x32xf32>
    %cst_252 = arith.constant 5.000000e-01 : f32
    %624 = vector.broadcast %cst_252 : f32 to vector<1x32xf32>
    %625 = arith.mulf %621, %624 : vector<1x32xf32>
    %626 = arith.mulf %623, %623 : vector<1x32xf32>
    %627 = arith.subf %625, %626 : vector<1x32xf32>
    %628 = vector.broadcast %623 : vector<1x32xf32> to vector<2x32xf32>
    %629 = arith.subf %616, %628 : vector<2x32xf32>
    %cst_253 = arith.constant 9.99999974E-6 : f32
    %630 = vector.broadcast %cst_253 : f32 to vector<1x32xf32>
    %631 = arith.addf %627, %630 : vector<1x32xf32>
    %632 = math.rsqrt %631 : vector<1x32xf32>
    %633 = vector.broadcast %632 : vector<1x32xf32> to vector<2x32xf32>
    %634 = arith.mulf %629, %633 : vector<2x32xf32>
    %635 = vector.broadcast %613 : vector<1x32xf32> to vector<2x32xf32>
    %636 = arith.mulf %634, %635 : vector<2x32xf32>
    %637 = vector.broadcast %614 : vector<1x32xf32> to vector<2x32xf32>
    %638 = arith.addf %636, %637 : vector<2x32xf32>
    %cst_254 = arith.constant 0.000000e+00 : f32
    %639 = vector.broadcast %cst_254 : f32 to vector<2x32xf32>
    %640 = arith.maximumf %638, %639 : vector<2x32xf32>
    %641 = arith.truncf %640 : vector<2x32xf32> to vector<2x32xbf16>
    %c0_255 = arith.constant 0 : index
    %c0_256 = arith.constant 0 : index
    %642 = vector.load %arg16[%c0_255, %c0_256] : memref<32x160xbf16, #tpu.memory_space<vmem>>, vector<32x160xbf16>
    %cst_257 = arith.constant dense<0.000000e+00> : vector<2x160xf32>
    %643 = tpu.matmul %641, %642, %cst_257 {dimension_numbers = #tpu.dot_dimension_numbers<[1], [0], [0], [1], [0, 0, 1, 1], [], []>} : vector<2x32xbf16>, vector<32x160xbf16>, vector<2x160xf32> -> vector<2x160xf32>
    %c0_258 = arith.constant 0 : index
    %c0_259 = arith.constant 0 : index
    %644 = vector.load %arg17[%c0_258, %c0_259] : memref<3x160xf32, #tpu.memory_space<vmem>>, vector<3x160xf32>
    %645 = vector.extract_strided_slice %644 {offsets = [0, 0], sizes = [1, 160], strides = [1, 1]} : vector<3x160xf32> to vector<1x160xf32>
    %646 = vector.extract_strided_slice %644 {offsets = [1, 0], sizes = [1, 160], strides = [1, 1]} : vector<3x160xf32> to vector<1x160xf32>
    %647 = vector.extract_strided_slice %644 {offsets = [2, 0], sizes = [1, 160], strides = [1, 1]} : vector<3x160xf32> to vector<1x160xf32>
    %648 = vector.broadcast %645 : vector<1x160xf32> to vector<2x160xf32>
    %649 = arith.addf %643, %648 : vector<2x160xf32>
    %cst_260 = arith.constant dense<0.000000e+00> : vector<160xf32>
    %650 = vector.multi_reduction <add>, %649, %cst_260 [0] : vector<2x160xf32> to vector<160xf32>
    %651 = vector.shape_cast %650 : vector<160xf32> to vector<1x160xf32>
    %652 = arith.mulf %649, %649 : vector<2x160xf32>
    %cst_261 = arith.constant dense<0.000000e+00> : vector<160xf32>
    %653 = vector.multi_reduction <add>, %652, %cst_261 [0] : vector<2x160xf32> to vector<160xf32>
    %654 = vector.shape_cast %653 : vector<160xf32> to vector<1x160xf32>
    %cst_262 = arith.constant 5.000000e-01 : f32
    %655 = vector.broadcast %cst_262 : f32 to vector<1x160xf32>
    %656 = arith.mulf %651, %655 : vector<1x160xf32>
    %cst_263 = arith.constant 5.000000e-01 : f32
    %657 = vector.broadcast %cst_263 : f32 to vector<1x160xf32>
    %658 = arith.mulf %654, %657 : vector<1x160xf32>
    %659 = arith.mulf %656, %656 : vector<1x160xf32>
    %660 = arith.subf %658, %659 : vector<1x160xf32>
    %661 = vector.broadcast %656 : vector<1x160xf32> to vector<2x160xf32>
    %662 = arith.subf %649, %661 : vector<2x160xf32>
    %cst_264 = arith.constant 9.99999974E-6 : f32
    %663 = vector.broadcast %cst_264 : f32 to vector<1x160xf32>
    %664 = arith.addf %660, %663 : vector<1x160xf32>
    %665 = math.rsqrt %664 : vector<1x160xf32>
    %666 = vector.broadcast %665 : vector<1x160xf32> to vector<2x160xf32>
    %667 = arith.mulf %662, %666 : vector<2x160xf32>
    %668 = vector.broadcast %646 : vector<1x160xf32> to vector<2x160xf32>
    %669 = arith.mulf %667, %668 : vector<2x160xf32>
    %670 = vector.broadcast %647 : vector<1x160xf32> to vector<2x160xf32>
    %671 = arith.addf %669, %670 : vector<2x160xf32>
    %cst_265 = arith.constant 0.000000e+00 : f32
    %672 = vector.broadcast %cst_265 : f32 to vector<2x160xf32>
    %673 = arith.maximumf %671, %672 : vector<2x160xf32>
    %cst_266 = arith.constant 0.000000e+00 : f32
    %674 = vector.broadcast %cst_266 : f32 to vector<64x8xf32>
    %c0_267 = arith.constant 0 : index
    %c0_268 = arith.constant 0 : index
    %675 = vector.load %arg30[%c0_267, %c0_268] : memref<64x8xf32, #tpu.memory_space<vmem>>, vector<64x8xf32>
    tpu.vector_store %arg30[%c0_267, %c0_268], %674 {strides = array<i32>} : memref<64x8xf32, #tpu.memory_space<vmem>>, vector<64x8xf32>,
    %676 = vector.extract_strided_slice %673 {offsets = [0, 0], sizes = [1, 8], strides = [1, 1]} : vector<2x160xf32> to vector<1x8xf32>
    %c6 = arith.constant 6 : index
    %c0_269 = arith.constant 0 : index
    %677 = vector.load %arg30[%c6, %c0_269] : memref<64x8xf32, #tpu.memory_space<vmem>>, vector<1x8xf32>
    tpu.vector_store %arg30[%c6, %c0_269], %676 {strides = array<i32>} : memref<64x8xf32, #tpu.memory_space<vmem>>, vector<1x8xf32>,
    %678 = vector.extract_strided_slice %673 {offsets = [0, 8], sizes = [1, 8], strides = [1, 1]} : vector<2x160xf32> to vector<1x8xf32>
    %c7 = arith.constant 7 : index
    %c0_270 = arith.constant 0 : index
    %679 = vector.load %arg30[%c7, %c0_270] : memref<64x8xf32, #tpu.memory_space<vmem>>, vector<1x8xf32>
    tpu.vector_store %arg30[%c7, %c0_270], %678 {strides = array<i32>} : memref<64x8xf32, #tpu.memory_space<vmem>>, vector<1x8xf32>,
    %680 = vector.extract_strided_slice %673 {offsets = [0, 16], sizes = [1, 8], strides = [1, 1]} : vector<2x160xf32> to vector<1x8xf32>
    %c8_271 = arith.constant 8 : index
    %c0_272 = arith.constant 0 : index
    %681 = vector.load %arg30[%c8_271, %c0_272] : memref<64x8xf32, #tpu.memory_space<vmem>>, vector<1x8xf32>
    tpu.vector_store %arg30[%c8_271, %c0_272], %680 {strides = array<i32>} : memref<64x8xf32, #tpu.memory_space<vmem>>, vector<1x8xf32>,
    %682 = vector.extract_strided_slice %673 {offsets = [0, 24], sizes = [1, 8], strides = [1, 1]} : vector<2x160xf32> to vector<1x8xf32>
    %c9 = arith.constant 9 : index
    %c0_273 = arith.constant 0 : index
    %683 = vector.load %arg30[%c9, %c0_273] : memref<64x8xf32, #tpu.memory_space<vmem>>, vector<1x8xf32>
    tpu.vector_store %arg30[%c9, %c0_273], %682 {strides = array<i32>} : memref<64x8xf32, #tpu.memory_space<vmem>>, vector<1x8xf32>,
    %684 = vector.extract_strided_slice %673 {offsets = [0, 32], sizes = [1, 8], strides = [1, 1]} : vector<2x160xf32> to vector<1x8xf32>
    %c10 = arith.constant 10 : index
    %c0_274 = arith.constant 0 : index
    %685 = vector.load %arg30[%c10, %c0_274] : memref<64x8xf32, #tpu.memory_space<vmem>>, vector<1x8xf32>
    tpu.vector_store %arg30[%c10, %c0_274], %684 {strides = array<i32>} : memref<64x8xf32, #tpu.memory_space<vmem>>, vector<1x8xf32>,
    %686 = vector.extract_strided_slice %673 {offsets = [0, 40], sizes = [1, 8], strides = [1, 1]} : vector<2x160xf32> to vector<1x8xf32>
    %c11 = arith.constant 11 : index
    %c0_275 = arith.constant 0 : index
    %687 = vector.load %arg30[%c11, %c0_275] : memref<64x8xf32, #tpu.memory_space<vmem>>, vector<1x8xf32>
    tpu.vector_store %arg30[%c11, %c0_275], %686 {strides = array<i32>} : memref<64x8xf32, #tpu.memory_space<vmem>>, vector<1x8xf32>,
    %688 = vector.extract_strided_slice %673 {offsets = [0, 48], sizes = [1, 8], strides = [1, 1]} : vector<2x160xf32> to vector<1x8xf32>
    %c12 = arith.constant 12 : index
    %c0_276 = arith.constant 0 : index
    %689 = vector.load %arg30[%c12, %c0_276] : memref<64x8xf32, #tpu.memory_space<vmem>>, vector<1x8xf32>
    tpu.vector_store %arg30[%c12, %c0_276], %688 {strides = array<i32>} : memref<64x8xf32, #tpu.memory_space<vmem>>, vector<1x8xf32>,
    %690 = vector.extract_strided_slice %673 {offsets = [0, 56], sizes = [1, 8], strides = [1, 1]} : vector<2x160xf32> to vector<1x8xf32>
    %c13 = arith.constant 13 : index
    %c0_277 = arith.constant 0 : index
    %691 = vector.load %arg30[%c13, %c0_277] : memref<64x8xf32, #tpu.memory_space<vmem>>, vector<1x8xf32>
    tpu.vector_store %arg30[%c13, %c0_277], %690 {strides = array<i32>} : memref<64x8xf32, #tpu.memory_space<vmem>>, vector<1x8xf32>,
    %692 = vector.extract_strided_slice %673 {offsets = [0, 64], sizes = [1, 8], strides = [1, 1]} : vector<2x160xf32> to vector<1x8xf32>
    %c14 = arith.constant 14 : index
    %c0_278 = arith.constant 0 : index
    %693 = vector.load %arg30[%c14, %c0_278] : memref<64x8xf32, #tpu.memory_space<vmem>>, vector<1x8xf32>
    tpu.vector_store %arg30[%c14, %c0_278], %692 {strides = array<i32>} : memref<64x8xf32, #tpu.memory_space<vmem>>, vector<1x8xf32>,
    %694 = vector.extract_strided_slice %673 {offsets = [0, 72], sizes = [1, 8], strides = [1, 1]} : vector<2x160xf32> to vector<1x8xf32>
    %c15 = arith.constant 15 : index
    %c0_279 = arith.constant 0 : index
    %695 = vector.load %arg30[%c15, %c0_279] : memref<64x8xf32, #tpu.memory_space<vmem>>, vector<1x8xf32>
    tpu.vector_store %arg30[%c15, %c0_279], %694 {strides = array<i32>} : memref<64x8xf32, #tpu.memory_space<vmem>>, vector<1x8xf32>,
    %696 = vector.extract_strided_slice %673 {offsets = [0, 80], sizes = [1, 8], strides = [1, 1]} : vector<2x160xf32> to vector<1x8xf32>
    %c16_280 = arith.constant 16 : index
    %c0_281 = arith.constant 0 : index
    %697 = vector.load %arg30[%c16_280, %c0_281] : memref<64x8xf32, #tpu.memory_space<vmem>>, vector<1x8xf32>
    tpu.vector_store %arg30[%c16_280, %c0_281], %696 {strides = array<i32>} : memref<64x8xf32, #tpu.memory_space<vmem>>, vector<1x8xf32>,
    %698 = vector.extract_strided_slice %673 {offsets = [0, 88], sizes = [1, 8], strides = [1, 1]} : vector<2x160xf32> to vector<1x8xf32>
    %c17 = arith.constant 17 : index
    %c0_282 = arith.constant 0 : index
    %699 = vector.load %arg30[%c17, %c0_282] : memref<64x8xf32, #tpu.memory_space<vmem>>, vector<1x8xf32>
    tpu.vector_store %arg30[%c17, %c0_282], %698 {strides = array<i32>} : memref<64x8xf32, #tpu.memory_space<vmem>>, vector<1x8xf32>,
    %700 = vector.extract_strided_slice %673 {offsets = [0, 96], sizes = [1, 8], strides = [1, 1]} : vector<2x160xf32> to vector<1x8xf32>
    %c18 = arith.constant 18 : index
    %c0_283 = arith.constant 0 : index
    %701 = vector.load %arg30[%c18, %c0_283] : memref<64x8xf32, #tpu.memory_space<vmem>>, vector<1x8xf32>
    tpu.vector_store %arg30[%c18, %c0_283], %700 {strides = array<i32>} : memref<64x8xf32, #tpu.memory_space<vmem>>, vector<1x8xf32>,
    %702 = vector.extract_strided_slice %673 {offsets = [0, 104], sizes = [1, 8], strides = [1, 1]} : vector<2x160xf32> to vector<1x8xf32>
    %c19 = arith.constant 19 : index
    %c0_284 = arith.constant 0 : index
    %703 = vector.load %arg30[%c19, %c0_284] : memref<64x8xf32, #tpu.memory_space<vmem>>, vector<1x8xf32>
    tpu.vector_store %arg30[%c19, %c0_284], %702 {strides = array<i32>} : memref<64x8xf32, #tpu.memory_space<vmem>>, vector<1x8xf32>,
    %704 = vector.extract_strided_slice %673 {offsets = [0, 112], sizes = [1, 8], strides = [1, 1]} : vector<2x160xf32> to vector<1x8xf32>
    %c20_285 = arith.constant 20 : index
    %c0_286 = arith.constant 0 : index
    %705 = vector.load %arg30[%c20_285, %c0_286] : memref<64x8xf32, #tpu.memory_space<vmem>>, vector<1x8xf32>
    tpu.vector_store %arg30[%c20_285, %c0_286], %704 {strides = array<i32>} : memref<64x8xf32, #tpu.memory_space<vmem>>, vector<1x8xf32>,
    %706 = vector.extract_strided_slice %673 {offsets = [0, 120], sizes = [1, 8], strides = [1, 1]} : vector<2x160xf32> to vector<1x8xf32>
    %c21 = arith.constant 21 : index
    %c0_287 = arith.constant 0 : index
    %707 = vector.load %arg30[%c21, %c0_287] : memref<64x8xf32, #tpu.memory_space<vmem>>, vector<1x8xf32>
    tpu.vector_store %arg30[%c21, %c0_287], %706 {strides = array<i32>} : memref<64x8xf32, #tpu.memory_space<vmem>>, vector<1x8xf32>,
    %708 = vector.extract_strided_slice %673 {offsets = [0, 128], sizes = [1, 8], strides = [1, 1]} : vector<2x160xf32> to vector<1x8xf32>
    %c22 = arith.constant 22 : index
    %c0_288 = arith.constant 0 : index
    %709 = vector.load %arg30[%c22, %c0_288] : memref<64x8xf32, #tpu.memory_space<vmem>>, vector<1x8xf32>
    tpu.vector_store %arg30[%c22, %c0_288], %708 {strides = array<i32>} : memref<64x8xf32, #tpu.memory_space<vmem>>, vector<1x8xf32>,
    %710 = vector.extract_strided_slice %673 {offsets = [0, 136], sizes = [1, 8], strides = [1, 1]} : vector<2x160xf32> to vector<1x8xf32>
    %c23 = arith.constant 23 : index
    %c0_289 = arith.constant 0 : index
    %711 = vector.load %arg30[%c23, %c0_289] : memref<64x8xf32, #tpu.memory_space<vmem>>, vector<1x8xf32>
    tpu.vector_store %arg30[%c23, %c0_289], %710 {strides = array<i32>} : memref<64x8xf32, #tpu.memory_space<vmem>>, vector<1x8xf32>,
    %712 = vector.extract_strided_slice %673 {offsets = [0, 144], sizes = [1, 8], strides = [1, 1]} : vector<2x160xf32> to vector<1x8xf32>
    %c24_290 = arith.constant 24 : index
    %c0_291 = arith.constant 0 : index
    %713 = vector.load %arg30[%c24_290, %c0_291] : memref<64x8xf32, #tpu.memory_space<vmem>>, vector<1x8xf32>
    tpu.vector_store %arg30[%c24_290, %c0_291], %712 {strides = array<i32>} : memref<64x8xf32, #tpu.memory_space<vmem>>, vector<1x8xf32>,
    %714 = vector.extract_strided_slice %673 {offsets = [0, 152], sizes = [1, 8], strides = [1, 1]} : vector<2x160xf32> to vector<1x8xf32>
    %c25 = arith.constant 25 : index
    %c0_292 = arith.constant 0 : index
    %715 = vector.load %arg30[%c25, %c0_292] : memref<64x8xf32, #tpu.memory_space<vmem>>, vector<1x8xf32>
    tpu.vector_store %arg30[%c25, %c0_292], %714 {strides = array<i32>} : memref<64x8xf32, #tpu.memory_space<vmem>>, vector<1x8xf32>,
    %716 = vector.extract_strided_slice %673 {offsets = [1, 0], sizes = [1, 8], strides = [1, 1]} : vector<2x160xf32> to vector<1x8xf32>
    %c38 = arith.constant 38 : index
    %c0_293 = arith.constant 0 : index
    %717 = vector.load %arg30[%c38, %c0_293] : memref<64x8xf32, #tpu.memory_space<vmem>>, vector<1x8xf32>
    tpu.vector_store %arg30[%c38, %c0_293], %716 {strides = array<i32>} : memref<64x8xf32, #tpu.memory_space<vmem>>, vector<1x8xf32>,
    %718 = vector.extract_strided_slice %673 {offsets = [1, 8], sizes = [1, 8], strides = [1, 1]} : vector<2x160xf32> to vector<1x8xf32>
    %c39 = arith.constant 39 : index
    %c0_294 = arith.constant 0 : index
    %719 = vector.load %arg30[%c39, %c0_294] : memref<64x8xf32, #tpu.memory_space<vmem>>, vector<1x8xf32>
    tpu.vector_store %arg30[%c39, %c0_294], %718 {strides = array<i32>} : memref<64x8xf32, #tpu.memory_space<vmem>>, vector<1x8xf32>,
    %720 = vector.extract_strided_slice %673 {offsets = [1, 16], sizes = [1, 8], strides = [1, 1]} : vector<2x160xf32> to vector<1x8xf32>
    %c40_295 = arith.constant 40 : index
    %c0_296 = arith.constant 0 : index
    %721 = vector.load %arg30[%c40_295, %c0_296] : memref<64x8xf32, #tpu.memory_space<vmem>>, vector<1x8xf32>
    tpu.vector_store %arg30[%c40_295, %c0_296], %720 {strides = array<i32>} : memref<64x8xf32, #tpu.memory_space<vmem>>, vector<1x8xf32>,
    %722 = vector.extract_strided_slice %673 {offsets = [1, 24], sizes = [1, 8], strides = [1, 1]} : vector<2x160xf32> to vector<1x8xf32>
    %c41 = arith.constant 41 : index
    %c0_297 = arith.constant 0 : index
    %723 = vector.load %arg30[%c41, %c0_297] : memref<64x8xf32, #tpu.memory_space<vmem>>, vector<1x8xf32>
    tpu.vector_store %arg30[%c41, %c0_297], %722 {strides = array<i32>} : memref<64x8xf32, #tpu.memory_space<vmem>>, vector<1x8xf32>,
    %724 = vector.extract_strided_slice %673 {offsets = [1, 32], sizes = [1, 8], strides = [1, 1]} : vector<2x160xf32> to vector<1x8xf32>
    %c42 = arith.constant 42 : index
    %c0_298 = arith.constant 0 : index
    %725 = vector.load %arg30[%c42, %c0_298] : memref<64x8xf32, #tpu.memory_space<vmem>>, vector<1x8xf32>
    tpu.vector_store %arg30[%c42, %c0_298], %724 {strides = array<i32>} : memref<64x8xf32, #tpu.memory_space<vmem>>, vector<1x8xf32>,
    %726 = vector.extract_strided_slice %673 {offsets = [1, 40], sizes = [1, 8], strides = [1, 1]} : vector<2x160xf32> to vector<1x8xf32>
    %c43 = arith.constant 43 : index
    %c0_299 = arith.constant 0 : index
    %727 = vector.load %arg30[%c43, %c0_299] : memref<64x8xf32, #tpu.memory_space<vmem>>, vector<1x8xf32>
    tpu.vector_store %arg30[%c43, %c0_299], %726 {strides = array<i32>} : memref<64x8xf32, #tpu.memory_space<vmem>>, vector<1x8xf32>,
    %728 = vector.extract_strided_slice %673 {offsets = [1, 48], sizes = [1, 8], strides = [1, 1]} : vector<2x160xf32> to vector<1x8xf32>
    %c44 = arith.constant 44 : index
    %c0_300 = arith.constant 0 : index
    %729 = vector.load %arg30[%c44, %c0_300] : memref<64x8xf32, #tpu.memory_space<vmem>>, vector<1x8xf32>
    tpu.vector_store %arg30[%c44, %c0_300], %728 {strides = array<i32>} : memref<64x8xf32, #tpu.memory_space<vmem>>, vector<1x8xf32>,
    %730 = vector.extract_strided_slice %673 {offsets = [1, 56], sizes = [1, 8], strides = [1, 1]} : vector<2x160xf32> to vector<1x8xf32>
    %c45 = arith.constant 45 : index
    %c0_301 = arith.constant 0 : index
    %731 = vector.load %arg30[%c45, %c0_301] : memref<64x8xf32, #tpu.memory_space<vmem>>, vector<1x8xf32>
    tpu.vector_store %arg30[%c45, %c0_301], %730 {strides = array<i32>} : memref<64x8xf32, #tpu.memory_space<vmem>>, vector<1x8xf32>,
    %732 = vector.extract_strided_slice %673 {offsets = [1, 64], sizes = [1, 8], strides = [1, 1]} : vector<2x160xf32> to vector<1x8xf32>
    %c46 = arith.constant 46 : index
    %c0_302 = arith.constant 0 : index
    %733 = vector.load %arg30[%c46, %c0_302] : memref<64x8xf32, #tpu.memory_space<vmem>>, vector<1x8xf32>
    tpu.vector_store %arg30[%c46, %c0_302], %732 {strides = array<i32>} : memref<64x8xf32, #tpu.memory_space<vmem>>, vector<1x8xf32>,
    %734 = vector.extract_strided_slice %673 {offsets = [1, 72], sizes = [1, 8], strides = [1, 1]} : vector<2x160xf32> to vector<1x8xf32>
    %c47 = arith.constant 47 : index
    %c0_303 = arith.constant 0 : index
    %735 = vector.load %arg30[%c47, %c0_303] : memref<64x8xf32, #tpu.memory_space<vmem>>, vector<1x8xf32>
    tpu.vector_store %arg30[%c47, %c0_303], %734 {strides = array<i32>} : memref<64x8xf32, #tpu.memory_space<vmem>>, vector<1x8xf32>,
    %736 = vector.extract_strided_slice %673 {offsets = [1, 80], sizes = [1, 8], strides = [1, 1]} : vector<2x160xf32> to vector<1x8xf32>
    %c48_304 = arith.constant 48 : index
    %c0_305 = arith.constant 0 : index
    %737 = vector.load %arg30[%c48_304, %c0_305] : memref<64x8xf32, #tpu.memory_space<vmem>>, vector<1x8xf32>
    tpu.vector_store %arg30[%c48_304, %c0_305], %736 {strides = array<i32>} : memref<64x8xf32, #tpu.memory_space<vmem>>, vector<1x8xf32>,
    %738 = vector.extract_strided_slice %673 {offsets = [1, 88], sizes = [1, 8], strides = [1, 1]} : vector<2x160xf32> to vector<1x8xf32>
    %c49 = arith.constant 49 : index
    %c0_306 = arith.constant 0 : index
    %739 = vector.load %arg30[%c49, %c0_306] : memref<64x8xf32, #tpu.memory_space<vmem>>, vector<1x8xf32>
    tpu.vector_store %arg30[%c49, %c0_306], %738 {strides = array<i32>} : memref<64x8xf32, #tpu.memory_space<vmem>>, vector<1x8xf32>,
    %740 = vector.extract_strided_slice %673 {offsets = [1, 96], sizes = [1, 8], strides = [1, 1]} : vector<2x160xf32> to vector<1x8xf32>
    %c50 = arith.constant 50 : index
    %c0_307 = arith.constant 0 : index
    %741 = vector.load %arg30[%c50, %c0_307] : memref<64x8xf32, #tpu.memory_space<vmem>>, vector<1x8xf32>
    tpu.vector_store %arg30[%c50, %c0_307], %740 {strides = array<i32>} : memref<64x8xf32, #tpu.memory_space<vmem>>, vector<1x8xf32>,
    %742 = vector.extract_strided_slice %673 {offsets = [1, 104], sizes = [1, 8], strides = [1, 1]} : vector<2x160xf32> to vector<1x8xf32>
    %c51 = arith.constant 51 : index
    %c0_308 = arith.constant 0 : index
    %743 = vector.load %arg30[%c51, %c0_308] : memref<64x8xf32, #tpu.memory_space<vmem>>, vector<1x8xf32>
    tpu.vector_store %arg30[%c51, %c0_308], %742 {strides = array<i32>} : memref<64x8xf32, #tpu.memory_space<vmem>>, vector<1x8xf32>,
    %744 = vector.extract_strided_slice %673 {offsets = [1, 112], sizes = [1, 8], strides = [1, 1]} : vector<2x160xf32> to vector<1x8xf32>
    %c52 = arith.constant 52 : index
    %c0_309 = arith.constant 0 : index
    %745 = vector.load %arg30[%c52, %c0_309] : memref<64x8xf32, #tpu.memory_space<vmem>>, vector<1x8xf32>
    tpu.vector_store %arg30[%c52, %c0_309], %744 {strides = array<i32>} : memref<64x8xf32, #tpu.memory_space<vmem>>, vector<1x8xf32>,
    %746 = vector.extract_strided_slice %673 {offsets = [1, 120], sizes = [1, 8], strides = [1, 1]} : vector<2x160xf32> to vector<1x8xf32>
    %c53 = arith.constant 53 : index
    %c0_310 = arith.constant 0 : index
    %747 = vector.load %arg30[%c53, %c0_310] : memref<64x8xf32, #tpu.memory_space<vmem>>, vector<1x8xf32>
    tpu.vector_store %arg30[%c53, %c0_310], %746 {strides = array<i32>} : memref<64x8xf32, #tpu.memory_space<vmem>>, vector<1x8xf32>,
    %748 = vector.extract_strided_slice %673 {offsets = [1, 128], sizes = [1, 8], strides = [1, 1]} : vector<2x160xf32> to vector<1x8xf32>
    %c54 = arith.constant 54 : index
    %c0_311 = arith.constant 0 : index
    %749 = vector.load %arg30[%c54, %c0_311] : memref<64x8xf32, #tpu.memory_space<vmem>>, vector<1x8xf32>
    tpu.vector_store %arg30[%c54, %c0_311], %748 {strides = array<i32>} : memref<64x8xf32, #tpu.memory_space<vmem>>, vector<1x8xf32>,
    %750 = vector.extract_strided_slice %673 {offsets = [1, 136], sizes = [1, 8], strides = [1, 1]} : vector<2x160xf32> to vector<1x8xf32>
    %c55 = arith.constant 55 : index
    %c0_312 = arith.constant 0 : index
    %751 = vector.load %arg30[%c55, %c0_312] : memref<64x8xf32, #tpu.memory_space<vmem>>, vector<1x8xf32>
    tpu.vector_store %arg30[%c55, %c0_312], %750 {strides = array<i32>} : memref<64x8xf32, #tpu.memory_space<vmem>>, vector<1x8xf32>,
    %752 = vector.extract_strided_slice %673 {offsets = [1, 144], sizes = [1, 8], strides = [1, 1]} : vector<2x160xf32> to vector<1x8xf32>
    %c56_313 = arith.constant 56 : index
    %c0_314 = arith.constant 0 : index
    %753 = vector.load %arg30[%c56_313, %c0_314] : memref<64x8xf32, #tpu.memory_space<vmem>>, vector<1x8xf32>
    tpu.vector_store %arg30[%c56_313, %c0_314], %752 {strides = array<i32>} : memref<64x8xf32, #tpu.memory_space<vmem>>, vector<1x8xf32>,
    %754 = vector.extract_strided_slice %673 {offsets = [1, 152], sizes = [1, 8], strides = [1, 1]} : vector<2x160xf32> to vector<1x8xf32>
    %c57 = arith.constant 57 : index
    %c0_315 = arith.constant 0 : index
    %755 = vector.load %arg30[%c57, %c0_315] : memref<64x8xf32, #tpu.memory_space<vmem>>, vector<1x8xf32>
    tpu.vector_store %arg30[%c57, %c0_315], %754 {strides = array<i32>} : memref<64x8xf32, #tpu.memory_space<vmem>>, vector<1x8xf32>,
    %c0_316 = arith.constant 0 : index
    %c0_317 = arith.constant 0 : index
    %756 = vector.load %arg30[%c0_316, %c0_317] : memref<64x8xf32, #tpu.memory_space<vmem>>, vector<64x8xf32>
    %757 = vector.extract_strided_slice %756 {offsets = [0, 0], sizes = [26, 8], strides = [1, 1]} : vector<64x8xf32> to vector<26x8xf32>
    %c0_318 = arith.constant 0 : index
    %c0_319 = arith.constant 0 : index
    %758 = vector.load %arg31[%c0_318, %c0_319] : memref<52x56xf32, #tpu.memory_space<vmem>>, vector<26x8xf32>
    tpu.vector_store %arg31[%c0_318, %c0_319], %757 {strides = array<i32>} : memref<52x56xf32, #tpu.memory_space<vmem>>, vector<26x8xf32>,
    %759 = vector.extract_strided_slice %756 {offsets = [1, 0], sizes = [26, 8], strides = [1, 1]} : vector<64x8xf32> to vector<26x8xf32>
    %c0_320 = arith.constant 0 : index
    %c8_321 = arith.constant 8 : index
    %760 = vector.load %arg31[%c0_320, %c8_321] : memref<52x56xf32, #tpu.memory_space<vmem>>, vector<26x8xf32>
    tpu.vector_store %arg31[%c0_320, %c8_321], %759 {strides = array<i32>} : memref<52x56xf32, #tpu.memory_space<vmem>>, vector<26x8xf32>,
    %761 = vector.extract_strided_slice %756 {offsets = [2, 0], sizes = [26, 8], strides = [1, 1]} : vector<64x8xf32> to vector<26x8xf32>
    %c0_322 = arith.constant 0 : index
    %c16_323 = arith.constant 16 : index
    %762 = vector.load %arg31[%c0_322, %c16_323] : memref<52x56xf32, #tpu.memory_space<vmem>>, vector<26x8xf32>
    tpu.vector_store %arg31[%c0_322, %c16_323], %761 {strides = array<i32>} : memref<52x56xf32, #tpu.memory_space<vmem>>, vector<26x8xf32>,
    %763 = vector.extract_strided_slice %756 {offsets = [3, 0], sizes = [26, 8], strides = [1, 1]} : vector<64x8xf32> to vector<26x8xf32>
    %c0_324 = arith.constant 0 : index
    %c24_325 = arith.constant 24 : index
    %764 = vector.load %arg31[%c0_324, %c24_325] : memref<52x56xf32, #tpu.memory_space<vmem>>, vector<26x8xf32>
    tpu.vector_store %arg31[%c0_324, %c24_325], %763 {strides = array<i32>} : memref<52x56xf32, #tpu.memory_space<vmem>>, vector<26x8xf32>,
    %765 = vector.extract_strided_slice %756 {offsets = [4, 0], sizes = [26, 8], strides = [1, 1]} : vector<64x8xf32> to vector<26x8xf32>
    %c0_326 = arith.constant 0 : index
    %c32_327 = arith.constant 32 : index
    %766 = vector.load %arg31[%c0_326, %c32_327] : memref<52x56xf32, #tpu.memory_space<vmem>>, vector<26x8xf32>
    tpu.vector_store %arg31[%c0_326, %c32_327], %765 {strides = array<i32>} : memref<52x56xf32, #tpu.memory_space<vmem>>, vector<26x8xf32>,
    %767 = vector.extract_strided_slice %756 {offsets = [5, 0], sizes = [26, 8], strides = [1, 1]} : vector<64x8xf32> to vector<26x8xf32>
    %c0_328 = arith.constant 0 : index
    %c40_329 = arith.constant 40 : index
    %768 = vector.load %arg31[%c0_328, %c40_329] : memref<52x56xf32, #tpu.memory_space<vmem>>, vector<26x8xf32>
    tpu.vector_store %arg31[%c0_328, %c40_329], %767 {strides = array<i32>} : memref<52x56xf32, #tpu.memory_space<vmem>>, vector<26x8xf32>,
    %769 = vector.extract_strided_slice %756 {offsets = [6, 0], sizes = [26, 8], strides = [1, 1]} : vector<64x8xf32> to vector<26x8xf32>
    %c0_330 = arith.constant 0 : index
    %c48_331 = arith.constant 48 : index
    %770 = vector.load %arg31[%c0_330, %c48_331] : memref<52x56xf32, #tpu.memory_space<vmem>>, vector<26x8xf32>
    tpu.vector_store %arg31[%c0_330, %c48_331], %769 {strides = array<i32>} : memref<52x56xf32, #tpu.memory_space<vmem>>, vector<26x8xf32>,
    %771 = vector.extract_strided_slice %756 {offsets = [32, 0], sizes = [26, 8], strides = [1, 1]} : vector<64x8xf32> to vector<26x8xf32>
    %c26_332 = arith.constant 26 : index
    %c0_333 = arith.constant 0 : index
    %772 = vector.load %arg31[%c26_332, %c0_333] : memref<52x56xf32, #tpu.memory_space<vmem>>, vector<26x8xf32>
    tpu.vector_store %arg31[%c26_332, %c0_333], %771 {strides = array<i32>} : memref<52x56xf32, #tpu.memory_space<vmem>>, vector<26x8xf32>,
    %773 = vector.extract_strided_slice %756 {offsets = [33, 0], sizes = [26, 8], strides = [1, 1]} : vector<64x8xf32> to vector<26x8xf32>
    %c26_334 = arith.constant 26 : index
    %c8_335 = arith.constant 8 : index
    %774 = vector.load %arg31[%c26_334, %c8_335] : memref<52x56xf32, #tpu.memory_space<vmem>>, vector<26x8xf32>
    tpu.vector_store %arg31[%c26_334, %c8_335], %773 {strides = array<i32>} : memref<52x56xf32, #tpu.memory_space<vmem>>, vector<26x8xf32>,
    %775 = vector.extract_strided_slice %756 {offsets = [34, 0], sizes = [26, 8], strides = [1, 1]} : vector<64x8xf32> to vector<26x8xf32>
    %c26_336 = arith.constant 26 : index
    %c16_337 = arith.constant 16 : index
    %776 = vector.load %arg31[%c26_336, %c16_337] : memref<52x56xf32, #tpu.memory_space<vmem>>, vector<26x8xf32>
    tpu.vector_store %arg31[%c26_336, %c16_337], %775 {strides = array<i32>} : memref<52x56xf32, #tpu.memory_space<vmem>>, vector<26x8xf32>,
    %777 = vector.extract_strided_slice %756 {offsets = [35, 0], sizes = [26, 8], strides = [1, 1]} : vector<64x8xf32> to vector<26x8xf32>
    %c26_338 = arith.constant 26 : index
    %c24_339 = arith.constant 24 : index
    %778 = vector.load %arg31[%c26_338, %c24_339] : memref<52x56xf32, #tpu.memory_space<vmem>>, vector<26x8xf32>
    tpu.vector_store %arg31[%c26_338, %c24_339], %777 {strides = array<i32>} : memref<52x56xf32, #tpu.memory_space<vmem>>, vector<26x8xf32>,
    %779 = vector.extract_strided_slice %756 {offsets = [36, 0], sizes = [26, 8], strides = [1, 1]} : vector<64x8xf32> to vector<26x8xf32>
    %c26_340 = arith.constant 26 : index
    %c32_341 = arith.constant 32 : index
    %780 = vector.load %arg31[%c26_340, %c32_341] : memref<52x56xf32, #tpu.memory_space<vmem>>, vector<26x8xf32>
    tpu.vector_store %arg31[%c26_340, %c32_341], %779 {strides = array<i32>} : memref<52x56xf32, #tpu.memory_space<vmem>>, vector<26x8xf32>,
    %781 = vector.extract_strided_slice %756 {offsets = [37, 0], sizes = [26, 8], strides = [1, 1]} : vector<64x8xf32> to vector<26x8xf32>
    %c26_342 = arith.constant 26 : index
    %c40_343 = arith.constant 40 : index
    %782 = vector.load %arg31[%c26_342, %c40_343] : memref<52x56xf32, #tpu.memory_space<vmem>>, vector<26x8xf32>
    tpu.vector_store %arg31[%c26_342, %c40_343], %781 {strides = array<i32>} : memref<52x56xf32, #tpu.memory_space<vmem>>, vector<26x8xf32>,
    %783 = vector.extract_strided_slice %756 {offsets = [38, 0], sizes = [26, 8], strides = [1, 1]} : vector<64x8xf32> to vector<26x8xf32>
    %c26_344 = arith.constant 26 : index
    %c48_345 = arith.constant 48 : index
    %784 = vector.load %arg31[%c26_344, %c48_345] : memref<52x56xf32, #tpu.memory_space<vmem>>, vector<26x8xf32>
    tpu.vector_store %arg31[%c26_344, %c48_345], %783 {strides = array<i32>} : memref<52x56xf32, #tpu.memory_space<vmem>>, vector<26x8xf32>,
    %c0_346 = arith.constant 0 : index
    %c0_347 = arith.constant 0 : index
    %785 = vector.load %arg31[%c0_346, %c0_347] : memref<52x56xf32, #tpu.memory_space<vmem>>, vector<52x56xf32>
    %786 = arith.truncf %785 : vector<52x56xf32> to vector<52x56xbf16>
    %c0_348 = arith.constant 0 : index
    %c0_349 = arith.constant 0 : index
    %787 = vector.load %arg18[%c0_348, %c0_349] : memref<56x16xbf16, #tpu.memory_space<vmem>>, vector<56x16xbf16>
    %cst_350 = arith.constant dense<0.000000e+00> : vector<52x16xf32>
    %788 = tpu.matmul %786, %787, %cst_350 {dimension_numbers = #tpu.dot_dimension_numbers<[1], [0], [0], [1], [0, 0, 1, 1], [], []>} : vector<52x56xbf16>, vector<56x16xbf16>, vector<52x16xf32> -> vector<52x16xf32>
    %c0_351 = arith.constant 0 : index
    %c0_352 = arith.constant 0 : index
    %789 = vector.load %arg19[%c0_351, %c0_352] : memref<3x16xf32, #tpu.memory_space<vmem>>, vector<3x16xf32>
    %790 = vector.extract_strided_slice %789 {offsets = [0, 0], sizes = [1, 16], strides = [1, 1]} : vector<3x16xf32> to vector<1x16xf32>
    %791 = vector.extract_strided_slice %789 {offsets = [1, 0], sizes = [1, 16], strides = [1, 1]} : vector<3x16xf32> to vector<1x16xf32>
    %792 = vector.extract_strided_slice %789 {offsets = [2, 0], sizes = [1, 16], strides = [1, 1]} : vector<3x16xf32> to vector<1x16xf32>
    %793 = vector.broadcast %790 : vector<1x16xf32> to vector<52x16xf32>
    %794 = arith.addf %788, %793 : vector<52x16xf32>
    %cst_353 = arith.constant dense<0.000000e+00> : vector<16xf32>
    %795 = vector.multi_reduction <add>, %794, %cst_353 [0] : vector<52x16xf32> to vector<16xf32>
    %796 = vector.shape_cast %795 : vector<16xf32> to vector<1x16xf32>
    %797 = arith.mulf %794, %794 : vector<52x16xf32>
    %cst_354 = arith.constant dense<0.000000e+00> : vector<16xf32>
    %798 = vector.multi_reduction <add>, %797, %cst_354 [0] : vector<52x16xf32> to vector<16xf32>
    %799 = vector.shape_cast %798 : vector<16xf32> to vector<1x16xf32>
    %cst_355 = arith.constant 0.0192307699 : f32
    %800 = vector.broadcast %cst_355 : f32 to vector<1x16xf32>
    %801 = arith.mulf %796, %800 : vector<1x16xf32>
    %cst_356 = arith.constant 0.0192307699 : f32
    %802 = vector.broadcast %cst_356 : f32 to vector<1x16xf32>
    %803 = arith.mulf %799, %802 : vector<1x16xf32>
    %804 = arith.mulf %801, %801 : vector<1x16xf32>
    %805 = arith.subf %803, %804 : vector<1x16xf32>
    %806 = vector.broadcast %801 : vector<1x16xf32> to vector<52x16xf32>
    %807 = arith.subf %794, %806 : vector<52x16xf32>
    %cst_357 = arith.constant 9.99999974E-6 : f32
    %808 = vector.broadcast %cst_357 : f32 to vector<1x16xf32>
    %809 = arith.addf %805, %808 : vector<1x16xf32>
    %810 = math.rsqrt %809 : vector<1x16xf32>
    %811 = vector.broadcast %810 : vector<1x16xf32> to vector<52x16xf32>
    %812 = arith.mulf %807, %811 : vector<52x16xf32>
    %813 = vector.broadcast %791 : vector<1x16xf32> to vector<52x16xf32>
    %814 = arith.mulf %812, %813 : vector<52x16xf32>
    %815 = vector.broadcast %792 : vector<1x16xf32> to vector<52x16xf32>
    %816 = arith.addf %814, %815 : vector<52x16xf32>
    %cst_358 = arith.constant 0.000000e+00 : f32
    %817 = vector.broadcast %cst_358 : f32 to vector<52x16xf32>
    %818 = arith.maximumf %816, %817 : vector<52x16xf32>
    %cst_359 = arith.constant 0.000000e+00 : f32
    %819 = vector.broadcast %cst_359 : f32 to vector<68x16xf32>
    %c0_360 = arith.constant 0 : index
    %c0_361 = arith.constant 0 : index
    %820 = vector.load %arg32[%c0_360, %c0_361] : memref<68x16xf32, #tpu.memory_space<vmem>>, vector<68x16xf32>
    tpu.vector_store %arg32[%c0_360, %c0_361], %819 {strides = array<i32>} : memref<68x16xf32, #tpu.memory_space<vmem>>, vector<68x16xf32>,
    %821 = vector.extract_strided_slice %818 {offsets = [0, 0], sizes = [26, 16], strides = [1, 1]} : vector<52x16xf32> to vector<26x16xf32>
    %c4_362 = arith.constant 4 : index
    %c0_363 = arith.constant 0 : index
    %822 = vector.load %arg32[%c4_362, %c0_363] : memref<68x16xf32, #tpu.memory_space<vmem>>, vector<26x16xf32>
    tpu.vector_store %arg32[%c4_362, %c0_363], %821 {strides = array<i32>} : memref<68x16xf32, #tpu.memory_space<vmem>>, vector<26x16xf32>,
    %823 = vector.extract_strided_slice %818 {offsets = [26, 0], sizes = [26, 16], strides = [1, 1]} : vector<52x16xf32> to vector<26x16xf32>
    %c38_364 = arith.constant 38 : index
    %c0_365 = arith.constant 0 : index
    %824 = vector.load %arg32[%c38_364, %c0_365] : memref<68x16xf32, #tpu.memory_space<vmem>>, vector<26x16xf32>
    tpu.vector_store %arg32[%c38_364, %c0_365], %823 {strides = array<i32>} : memref<68x16xf32, #tpu.memory_space<vmem>>, vector<26x16xf32>,
    %c0_366 = arith.constant 0 : index
    %c0_367 = arith.constant 0 : index
    %825 = vector.load %arg32[%c0_366, %c0_367] : memref<68x16xf32, #tpu.memory_space<vmem>>, vector<68x16xf32>
    %826 = vector.extract_strided_slice %825 {offsets = [0, 0], sizes = [30, 16], strides = [1, 1]} : vector<68x16xf32> to vector<30x16xf32>
    %c0_368 = arith.constant 0 : index
    %c0_369 = arith.constant 0 : index
    %827 = vector.load %arg33[%c0_368, %c0_369] : memref<60x80xf32, #tpu.memory_space<vmem>>, vector<30x16xf32>
    tpu.vector_store %arg33[%c0_368, %c0_369], %826 {strides = array<i32>} : memref<60x80xf32, #tpu.memory_space<vmem>>, vector<30x16xf32>,
    %828 = vector.extract_strided_slice %825 {offsets = [1, 0], sizes = [30, 16], strides = [1, 1]} : vector<68x16xf32> to vector<30x16xf32>
    %c0_370 = arith.constant 0 : index
    %c16_371 = arith.constant 16 : index
    %829 = vector.load %arg33[%c0_370, %c16_371] : memref<60x80xf32, #tpu.memory_space<vmem>>, vector<30x16xf32>
    tpu.vector_store %arg33[%c0_370, %c16_371], %828 {strides = array<i32>} : memref<60x80xf32, #tpu.memory_space<vmem>>, vector<30x16xf32>,
    %830 = vector.extract_strided_slice %825 {offsets = [2, 0], sizes = [30, 16], strides = [1, 1]} : vector<68x16xf32> to vector<30x16xf32>
    %c0_372 = arith.constant 0 : index
    %c32_373 = arith.constant 32 : index
    %831 = vector.load %arg33[%c0_372, %c32_373] : memref<60x80xf32, #tpu.memory_space<vmem>>, vector<30x16xf32>
    tpu.vector_store %arg33[%c0_372, %c32_373], %830 {strides = array<i32>} : memref<60x80xf32, #tpu.memory_space<vmem>>, vector<30x16xf32>,
    %832 = vector.extract_strided_slice %825 {offsets = [3, 0], sizes = [30, 16], strides = [1, 1]} : vector<68x16xf32> to vector<30x16xf32>
    %c0_374 = arith.constant 0 : index
    %c48_375 = arith.constant 48 : index
    %833 = vector.load %arg33[%c0_374, %c48_375] : memref<60x80xf32, #tpu.memory_space<vmem>>, vector<30x16xf32>
    tpu.vector_store %arg33[%c0_374, %c48_375], %832 {strides = array<i32>} : memref<60x80xf32, #tpu.memory_space<vmem>>, vector<30x16xf32>,
    %834 = vector.extract_strided_slice %825 {offsets = [4, 0], sizes = [30, 16], strides = [1, 1]} : vector<68x16xf32> to vector<30x16xf32>
    %c0_376 = arith.constant 0 : index
    %c64_377 = arith.constant 64 : index
    %835 = vector.load %arg33[%c0_376, %c64_377] : memref<60x80xf32, #tpu.memory_space<vmem>>, vector<30x16xf32>
    tpu.vector_store %arg33[%c0_376, %c64_377], %834 {strides = array<i32>} : memref<60x80xf32, #tpu.memory_space<vmem>>, vector<30x16xf32>,
    %836 = vector.extract_strided_slice %825 {offsets = [34, 0], sizes = [30, 16], strides = [1, 1]} : vector<68x16xf32> to vector<30x16xf32>
    %c30_378 = arith.constant 30 : index
    %c0_379 = arith.constant 0 : index
    %837 = vector.load %arg33[%c30_378, %c0_379] : memref<60x80xf32, #tpu.memory_space<vmem>>, vector<30x16xf32>
    tpu.vector_store %arg33[%c30_378, %c0_379], %836 {strides = array<i32>} : memref<60x80xf32, #tpu.memory_space<vmem>>, vector<30x16xf32>,
    %838 = vector.extract_strided_slice %825 {offsets = [35, 0], sizes = [30, 16], strides = [1, 1]} : vector<68x16xf32> to vector<30x16xf32>
    %c30_380 = arith.constant 30 : index
    %c16_381 = arith.constant 16 : index
    %839 = vector.load %arg33[%c30_380, %c16_381] : memref<60x80xf32, #tpu.memory_space<vmem>>, vector<30x16xf32>
    tpu.vector_store %arg33[%c30_380, %c16_381], %838 {strides = array<i32>} : memref<60x80xf32, #tpu.memory_space<vmem>>, vector<30x16xf32>,
    %840 = vector.extract_strided_slice %825 {offsets = [36, 0], sizes = [30, 16], strides = [1, 1]} : vector<68x16xf32> to vector<30x16xf32>
    %c30_382 = arith.constant 30 : index
    %c32_383 = arith.constant 32 : index
    %841 = vector.load %arg33[%c30_382, %c32_383] : memref<60x80xf32, #tpu.memory_space<vmem>>, vector<30x16xf32>
    tpu.vector_store %arg33[%c30_382, %c32_383], %840 {strides = array<i32>} : memref<60x80xf32, #tpu.memory_space<vmem>>, vector<30x16xf32>,
    %842 = vector.extract_strided_slice %825 {offsets = [37, 0], sizes = [30, 16], strides = [1, 1]} : vector<68x16xf32> to vector<30x16xf32>
    %c30_384 = arith.constant 30 : index
    %c48_385 = arith.constant 48 : index
    %843 = vector.load %arg33[%c30_384, %c48_385] : memref<60x80xf32, #tpu.memory_space<vmem>>, vector<30x16xf32>
    tpu.vector_store %arg33[%c30_384, %c48_385], %842 {strides = array<i32>} : memref<60x80xf32, #tpu.memory_space<vmem>>, vector<30x16xf32>,
    %844 = vector.extract_strided_slice %825 {offsets = [38, 0], sizes = [30, 16], strides = [1, 1]} : vector<68x16xf32> to vector<30x16xf32>
    %c30_386 = arith.constant 30 : index
    %c64_387 = arith.constant 64 : index
    %845 = vector.load %arg33[%c30_386, %c64_387] : memref<60x80xf32, #tpu.memory_space<vmem>>, vector<30x16xf32>
    tpu.vector_store %arg33[%c30_386, %c64_387], %844 {strides = array<i32>} : memref<60x80xf32, #tpu.memory_space<vmem>>, vector<30x16xf32>,
    %c0_388 = arith.constant 0 : index
    %c0_389 = arith.constant 0 : index
    %846 = vector.load %arg33[%c0_388, %c0_389] : memref<60x80xf32, #tpu.memory_space<vmem>>, vector<60x80xf32>
    %847 = arith.truncf %846 : vector<60x80xf32> to vector<60x80xbf16>
    %c0_390 = arith.constant 0 : index
    %c0_391 = arith.constant 0 : index
    %848 = vector.load %arg20[%c0_390, %c0_391] : memref<80x32xbf16, #tpu.memory_space<vmem>>, vector<80x32xbf16>
    %cst_392 = arith.constant dense<0.000000e+00> : vector<60x32xf32>
    %849 = tpu.matmul %847, %848, %cst_392 {dimension_numbers = #tpu.dot_dimension_numbers<[1], [0], [0], [1], [0, 0, 1, 1], [], []>} : vector<60x80xbf16>, vector<80x32xbf16>, vector<60x32xf32> -> vector<60x32xf32>
    %c0_393 = arith.constant 0 : index
    %c0_394 = arith.constant 0 : index
    %850 = vector.load %arg21[%c0_393, %c0_394] : memref<3x32xf32, #tpu.memory_space<vmem>>, vector<3x32xf32>
    %851 = vector.extract_strided_slice %850 {offsets = [0, 0], sizes = [1, 32], strides = [1, 1]} : vector<3x32xf32> to vector<1x32xf32>
    %852 = vector.extract_strided_slice %850 {offsets = [1, 0], sizes = [1, 32], strides = [1, 1]} : vector<3x32xf32> to vector<1x32xf32>
    %853 = vector.extract_strided_slice %850 {offsets = [2, 0], sizes = [1, 32], strides = [1, 1]} : vector<3x32xf32> to vector<1x32xf32>
    %854 = vector.broadcast %851 : vector<1x32xf32> to vector<60x32xf32>
    %855 = arith.addf %849, %854 : vector<60x32xf32>
    %cst_395 = arith.constant dense<0.000000e+00> : vector<32xf32>
    %856 = vector.multi_reduction <add>, %855, %cst_395 [0] : vector<60x32xf32> to vector<32xf32>
    %857 = vector.shape_cast %856 : vector<32xf32> to vector<1x32xf32>
    %858 = arith.mulf %855, %855 : vector<60x32xf32>
    %cst_396 = arith.constant dense<0.000000e+00> : vector<32xf32>
    %859 = vector.multi_reduction <add>, %858, %cst_396 [0] : vector<60x32xf32> to vector<32xf32>
    %860 = vector.shape_cast %859 : vector<32xf32> to vector<1x32xf32>
    %cst_397 = arith.constant 0.0166666675 : f32
    %861 = vector.broadcast %cst_397 : f32 to vector<1x32xf32>
    %862 = arith.mulf %857, %861 : vector<1x32xf32>
    %cst_398 = arith.constant 0.0166666675 : f32
    %863 = vector.broadcast %cst_398 : f32 to vector<1x32xf32>
    %864 = arith.mulf %860, %863 : vector<1x32xf32>
    %865 = arith.mulf %862, %862 : vector<1x32xf32>
    %866 = arith.subf %864, %865 : vector<1x32xf32>
    %867 = vector.broadcast %862 : vector<1x32xf32> to vector<60x32xf32>
    %868 = arith.subf %855, %867 : vector<60x32xf32>
    %cst_399 = arith.constant 9.99999974E-6 : f32
    %869 = vector.broadcast %cst_399 : f32 to vector<1x32xf32>
    %870 = arith.addf %866, %869 : vector<1x32xf32>
    %871 = math.rsqrt %870 : vector<1x32xf32>
    %872 = vector.broadcast %871 : vector<1x32xf32> to vector<60x32xf32>
    %873 = arith.mulf %868, %872 : vector<60x32xf32>
    %874 = vector.broadcast %852 : vector<1x32xf32> to vector<60x32xf32>
    %875 = arith.mulf %873, %874 : vector<60x32xf32>
    %876 = vector.broadcast %853 : vector<1x32xf32> to vector<60x32xf32>
    %877 = arith.addf %875, %876 : vector<60x32xf32>
    %cst_400 = arith.constant 0.000000e+00 : f32
    %878 = vector.broadcast %cst_400 : f32 to vector<60x32xf32>
    %879 = arith.maximumf %877, %878 : vector<60x32xf32>
    %cst_401 = arith.constant 0.000000e+00 : f32
    %880 = vector.broadcast %cst_401 : f32 to vector<68x32xf32>
    %c0_402 = arith.constant 0 : index
    %c0_403 = arith.constant 0 : index
    %881 = vector.load %arg34[%c0_402, %c0_403] : memref<68x32xf32, #tpu.memory_space<vmem>>, vector<68x32xf32>
    tpu.vector_store %arg34[%c0_402, %c0_403], %880 {strides = array<i32>} : memref<68x32xf32, #tpu.memory_space<vmem>>, vector<68x32xf32>,
    %882 = vector.extract_strided_slice %879 {offsets = [0, 0], sizes = [30, 32], strides = [1, 1]} : vector<60x32xf32> to vector<30x32xf32>
    %c2 = arith.constant 2 : index
    %c0_404 = arith.constant 0 : index
    %883 = vector.load %arg34[%c2, %c0_404] : memref<68x32xf32, #tpu.memory_space<vmem>>, vector<30x32xf32>
    tpu.vector_store %arg34[%c2, %c0_404], %882 {strides = array<i32>} : memref<68x32xf32, #tpu.memory_space<vmem>>, vector<30x32xf32>,
    %884 = vector.extract_strided_slice %879 {offsets = [30, 0], sizes = [30, 32], strides = [1, 1]} : vector<60x32xf32> to vector<30x32xf32>
    %c36 = arith.constant 36 : index
    %c0_405 = arith.constant 0 : index
    %885 = vector.load %arg34[%c36, %c0_405] : memref<68x32xf32, #tpu.memory_space<vmem>>, vector<30x32xf32>
    tpu.vector_store %arg34[%c36, %c0_405], %884 {strides = array<i32>} : memref<68x32xf32, #tpu.memory_space<vmem>>, vector<30x32xf32>,
    %c0_406 = arith.constant 0 : index
    %c0_407 = arith.constant 0 : index
    %886 = vector.load %arg34[%c0_406, %c0_407] : memref<68x32xf32, #tpu.memory_space<vmem>>, vector<68x32xf32>
    %887 = vector.extract_strided_slice %886 {offsets = [0, 0], sizes = [32, 32], strides = [1, 1]} : vector<68x32xf32> to vector<32x32xf32>
    %c0_408 = arith.constant 0 : index
    %c0_409 = arith.constant 0 : index
    %888 = vector.load %arg35[%c0_408, %c0_409] : memref<64x96xf32, #tpu.memory_space<vmem>>, vector<32x32xf32>
    tpu.vector_store %arg35[%c0_408, %c0_409], %887 {strides = array<i32>} : memref<64x96xf32, #tpu.memory_space<vmem>>, vector<32x32xf32>,
    %889 = vector.extract_strided_slice %886 {offsets = [1, 0], sizes = [32, 32], strides = [1, 1]} : vector<68x32xf32> to vector<32x32xf32>
    %c0_410 = arith.constant 0 : index
    %c32_411 = arith.constant 32 : index
    %890 = vector.load %arg35[%c0_410, %c32_411] : memref<64x96xf32, #tpu.memory_space<vmem>>, vector<32x32xf32>
    tpu.vector_store %arg35[%c0_410, %c32_411], %889 {strides = array<i32>} : memref<64x96xf32, #tpu.memory_space<vmem>>, vector<32x32xf32>,
    %891 = vector.extract_strided_slice %886 {offsets = [2, 0], sizes = [32, 32], strides = [1, 1]} : vector<68x32xf32> to vector<32x32xf32>
    %c0_412 = arith.constant 0 : index
    %c64_413 = arith.constant 64 : index
    %892 = vector.load %arg35[%c0_412, %c64_413] : memref<64x96xf32, #tpu.memory_space<vmem>>, vector<32x32xf32>
    tpu.vector_store %arg35[%c0_412, %c64_413], %891 {strides = array<i32>} : memref<64x96xf32, #tpu.memory_space<vmem>>, vector<32x32xf32>,
    %893 = vector.extract_strided_slice %886 {offsets = [34, 0], sizes = [32, 32], strides = [1, 1]} : vector<68x32xf32> to vector<32x32xf32>
    %c32_414 = arith.constant 32 : index
    %c0_415 = arith.constant 0 : index
    %894 = vector.load %arg35[%c32_414, %c0_415] : memref<64x96xf32, #tpu.memory_space<vmem>>, vector<32x32xf32>
    tpu.vector_store %arg35[%c32_414, %c0_415], %893 {strides = array<i32>} : memref<64x96xf32, #tpu.memory_space<vmem>>, vector<32x32xf32>,
    %895 = vector.extract_strided_slice %886 {offsets = [35, 0], sizes = [32, 32], strides = [1, 1]} : vector<68x32xf32> to vector<32x32xf32>
    %c32_416 = arith.constant 32 : index
    %c32_417 = arith.constant 32 : index
    %896 = vector.load %arg35[%c32_416, %c32_417] : memref<64x96xf32, #tpu.memory_space<vmem>>, vector<32x32xf32>
    tpu.vector_store %arg35[%c32_416, %c32_417], %895 {strides = array<i32>} : memref<64x96xf32, #tpu.memory_space<vmem>>, vector<32x32xf32>,
    %897 = vector.extract_strided_slice %886 {offsets = [36, 0], sizes = [32, 32], strides = [1, 1]} : vector<68x32xf32> to vector<32x32xf32>
    %c32_418 = arith.constant 32 : index
    %c64_419 = arith.constant 64 : index
    %898 = vector.load %arg35[%c32_418, %c64_419] : memref<64x96xf32, #tpu.memory_space<vmem>>, vector<32x32xf32>
    tpu.vector_store %arg35[%c32_418, %c64_419], %897 {strides = array<i32>} : memref<64x96xf32, #tpu.memory_space<vmem>>, vector<32x32xf32>,
    %c0_420 = arith.constant 0 : index
    %c0_421 = arith.constant 0 : index
    %899 = vector.load %arg35[%c0_420, %c0_421] : memref<64x96xf32, #tpu.memory_space<vmem>>, vector<64x96xf32>
    %900 = arith.truncf %899 : vector<64x96xf32> to vector<64x96xbf16>
    %c0_422 = arith.constant 0 : index
    %c0_423 = arith.constant 0 : index
    %901 = vector.load %arg22[%c0_422, %c0_423] : memref<96x4xbf16, #tpu.memory_space<vmem>>, vector<96x4xbf16>
    %cst_424 = arith.constant dense<0.000000e+00> : vector<64x4xf32>
    %902 = tpu.matmul %900, %901, %cst_424 {dimension_numbers = #tpu.dot_dimension_numbers<[1], [0], [0], [1], [0, 0, 1, 1], [], []>} : vector<64x96xbf16>, vector<96x4xbf16>, vector<64x4xf32> -> vector<64x4xf32>
    %c0_425 = arith.constant 0 : index
    %c0_426 = arith.constant 0 : index
    %903 = vector.load %arg23[%c0_425, %c0_426] : memref<1x1xf32, #tpu.memory_space<vmem>>, vector<1x1xf32>
    %904 = vector.broadcast %903 : vector<1x1xf32> to vector<64x4xf32>
    %905 = arith.addf %902, %904 : vector<64x4xf32>
    %c0_427 = arith.constant 0 : index
    %c0_428 = arith.constant 0 : index
    %906 = vector.load %arg25[%c0_427, %c0_428] : memref<64x4xf32, #tpu.memory_space<vmem>>, vector<64x4xf32>
    tpu.vector_store %arg25[%c0_427, %c0_428], %905 {strides = array<i32>} : memref<64x4xf32, #tpu.memory_space<vmem>>, vector<64x4xf32>,
    return
  }
  func.func @transform_0(%arg0: i32) -> (i32, i32) {
    %c0_i32 = arith.constant 0 : i32
    %c0_i32_0 = arith.constant 0 : i32
    %c0_i32_1 = arith.constant 0 : i32
    return %c0_i32, %c0_i32_0 : i32, i32
  }
  func.func @transform_1(%arg0: i32) -> (i32, i32) {
    %c0_i32 = arith.constant 0 : i32
    %c0_i32_0 = arith.constant 0 : i32
    %c0_i32_1 = arith.constant 0 : i32
    return %c0_i32, %c0_i32_0 : i32, i32
  }
  func.func @transform_2(%arg0: i32) -> (i32, i32) {
    %c0_i32 = arith.constant 0 : i32
    %c0_i32_0 = arith.constant 0 : i32
    %c0_i32_1 = arith.constant 0 : i32
    return %c0_i32, %c0_i32_0 : i32, i32
  }
  func.func @transform_3(%arg0: i32) -> (i32, i32) {
    %c0_i32 = arith.constant 0 : i32
    %c0_i32_0 = arith.constant 0 : i32
    %c0_i32_1 = arith.constant 0 : i32
    return %c0_i32, %c0_i32_0 : i32, i32
  }
  func.func @transform_4(%arg0: i32) -> (i32, i32) {
    %c0_i32 = arith.constant 0 : i32
    %c0_i32_0 = arith.constant 0 : i32
    %c0_i32_1 = arith.constant 0 : i32
    return %c0_i32, %c0_i32_0 : i32, i32
  }
  func.func @transform_5(%arg0: i32) -> (i32, i32) {
    %c0_i32 = arith.constant 0 : i32
    %c0_i32_0 = arith.constant 0 : i32
    %c0_i32_1 = arith.constant 0 : i32
    return %c0_i32, %c0_i32_0 : i32, i32
  }
  func.func @transform_6(%arg0: i32) -> (i32, i32) {
    %c0_i32 = arith.constant 0 : i32
    %c0_i32_0 = arith.constant 0 : i32
    %c0_i32_1 = arith.constant 0 : i32
    return %c0_i32, %c0_i32_0 : i32, i32
  }
  func.func @transform_7(%arg0: i32) -> (i32, i32) {
    %c0_i32 = arith.constant 0 : i32
    %c0_i32_0 = arith.constant 0 : i32
    %c0_i32_1 = arith.constant 0 : i32
    return %c0_i32, %c0_i32_0 : i32, i32
  }
  func.func @transform_8(%arg0: i32) -> (i32, i32) {
    %c0_i32 = arith.constant 0 : i32
    %c0_i32_0 = arith.constant 0 : i32
    %c0_i32_1 = arith.constant 0 : i32
    return %c0_i32, %c0_i32_0 : i32, i32
  }
  func.func @transform_9(%arg0: i32) -> (i32, i32) {
    %c0_i32 = arith.constant 0 : i32
    %c0_i32_0 = arith.constant 0 : i32
    %c0_i32_1 = arith.constant 0 : i32
    return %c0_i32, %c0_i32_0 : i32, i32
  }
  func.func @transform_10(%arg0: i32) -> (i32, i32) {
    %c0_i32 = arith.constant 0 : i32
    %c0_i32_0 = arith.constant 0 : i32
    %c0_i32_1 = arith.constant 0 : i32
    return %c0_i32, %c0_i32_0 : i32, i32
  }
  func.func @transform_11(%arg0: i32) -> (i32, i32) {
    %c0_i32 = arith.constant 0 : i32
    %c0_i32_0 = arith.constant 0 : i32
    %c0_i32_1 = arith.constant 0 : i32
    return %c0_i32, %c0_i32_0 : i32, i32
  }
  func.func @transform_12(%arg0: i32) -> (i32, i32) {
    %c0_i32 = arith.constant 0 : i32
    %c0_i32_0 = arith.constant 0 : i32
    %c0_i32_1 = arith.constant 0 : i32
    return %c0_i32, %c0_i32_0 : i32, i32
  }
  func.func @transform_13(%arg0: i32) -> (i32, i32) {
    %c0_i32 = arith.constant 0 : i32
    %c0_i32_0 = arith.constant 0 : i32
    %c0_i32_1 = arith.constant 0 : i32
    return %c0_i32, %c0_i32_0 : i32, i32
  }
  func.func @transform_14(%arg0: i32) -> (i32, i32) {
    %c0_i32 = arith.constant 0 : i32
    %c0_i32_0 = arith.constant 0 : i32
    %c0_i32_1 = arith.constant 0 : i32
    return %c0_i32, %c0_i32_0 : i32, i32
  }
  func.func @transform_15(%arg0: i32) -> (i32, i32) {
    %c0_i32 = arith.constant 0 : i32
    %c0_i32_0 = arith.constant 0 : i32
    %c0_i32_1 = arith.constant 0 : i32
    return %c0_i32, %c0_i32_0 : i32, i32
  }
  func.func @transform_16(%arg0: i32) -> (i32, i32) {
    %c0_i32 = arith.constant 0 : i32
    %c0_i32_0 = arith.constant 0 : i32
    %c0_i32_1 = arith.constant 0 : i32
    return %c0_i32, %c0_i32_0 : i32, i32
  }
  func.func @transform_17(%arg0: i32) -> (i32, i32) {
    %c0_i32 = arith.constant 0 : i32
    %c0_i32_0 = arith.constant 0 : i32
    %c0_i32_1 = arith.constant 0 : i32
    return %c0_i32, %c0_i32_0 : i32, i32
  }
  func.func @transform_18(%arg0: i32) -> (i32, i32) {
    %c0_i32 = arith.constant 0 : i32
    %c0_i32_0 = arith.constant 0 : i32
    %c0_i32_1 = arith.constant 0 : i32
    return %c0_i32, %c0_i32_0 : i32, i32
  }
  func.func @transform_19(%arg0: i32) -> (i32, i32) {
    %c0_i32 = arith.constant 0 : i32
    %c0_i32_0 = arith.constant 0 : i32
    %c0_i32_1 = arith.constant 0 : i32
    return %c0_i32, %c0_i32_0 : i32, i32
  }
  func.func @transform_20(%arg0: i32) -> (i32, i32) {
    %c0_i32 = arith.constant 0 : i32
    %c0_i32_0 = arith.constant 0 : i32
    %c0_i32_1 = arith.constant 0 : i32
    return %c0_i32, %c0_i32_0 : i32, i32
  }
  func.func @transform_21(%arg0: i32) -> (i32, i32) {
    %c0_i32 = arith.constant 0 : i32
    %c0_i32_0 = arith.constant 0 : i32
    %c0_i32_1 = arith.constant 0 : i32
    return %c0_i32, %c0_i32_0 : i32, i32
  }
  func.func @transform_22(%arg0: i32) -> (i32, i32) {
    %c0_i32 = arith.constant 0 : i32
    %c0_i32_0 = arith.constant 0 : i32
    %c0_i32_1 = arith.constant 0 : i32
    return %c0_i32, %c0_i32_0 : i32, i32
  }
  func.func @transform_23(%arg0: i32) -> (i32, i32) {
    %c0_i32 = arith.constant 0 : i32
    %c0_i32_0 = arith.constant 0 : i32
    %c0_i32_1 = arith.constant 0 : i32
    return %c0_i32, %c0_i32_0 : i32, i32
  }
  func.func @transform_24(%arg0: i32) -> (i32, i32) {
    %c0_i32 = arith.constant 0 : i32
    %c0_i32_0 = arith.constant 0 : i32
    %c0_i32_1 = arith.constant 0 : i32
    return %c0_i32, %c0_i32_0 : i32, i32
  }
}

</mosaic_0001>

<bundles_post_ra>
// kernel: planar_vae_forward.1
= control target key start
LH: loop header
LB: loop body
LE: loop exit
PB: predicated region body
PF: predicated region fallthrough
CT: control target
= control target key end

     0   :  { %vm6178_vm0 = vcmask 31744   ;;  %vm91_vm1 = vcmask 29696   ;;  %vm211_vm2 = vcmask 1045504   ;;  %vm111_vm3 = vcmask 64544   ;;  %s6201_s25 = smov 64   ;;  %s6226_s28 = smov 72   ;;  %s6149_s0 = inlined_call_operand.vmem [shape: f32[64,4], index: 0, kind: input, shape index: {}]   ;;  %s6150_s3 = inlined_call_operand.vmem [shape: bf16[12,32], index: 3, kind: input, shape index: {}]   ;;  %s6151_s5 = inlined_call_operand.vmem [shape: bf16[160,16], index: 5, kind: input, shape index: {}]   ;;  %s6152_s4 = inlined_call_operand.vmem [shape: f32[3,32], index: 4, kind: input, shape index: {}]   ;;  %s6153_s6 = inlined_call_operand.vmem [shape: f32[3,16], index: 6, kind: input, shape index: {}]   ;;  %s6154_s7 = inlined_call_operand.vmem [shape: bf16[112,8], index: 7, kind: input, shape index: {}]   ;;  %s6155_s8 = inlined_call_operand.vmem [shape: f32[3,8], index: 8, kind: input, shape index: {}]   ;;  %s6156_s9 = inlined_call_operand.vmem [shape: bf16[161,32], index: 9, kind: input, shape index: {}]   ;;  %s6157_s1 = inlined_call_operand.vmem [shape: f32[2,1], index: 1, kind: input, shape index: {}]   ;;  %s6158_s11 = inlined_call_operand.vmem [shape: bf16[32,118], index: 11, kind: input, shape index: {}]   ;;  %s6159_s10 = inlined_call_operand.vmem [shape: f32[3,32], index: 10, kind: input, shape index: {}]   ;;  %s6160_s12 = inlined_call_operand.vmem [shape: f32[1,118], index: 12, kind: input, shape index: {}]   ;;  %s6161_s23 = inlined_call_operand.vmem [shape: f32[2,33], index: 23, kind: output, shape index: {0}]   ;;  %s6162_s2 = inlined_call_operand.vmem [shape: f32[2,8], index: 2, kind: input, shape index: {}]   ;;  %s6163_s13 = inlined_call_operand.vmem [shape: bf16[8,32], index: 13, kind: input, shape index: {}]   ;;  %s6164_s15 = inlined_call_operand.vmem [shape: bf16[32,160], index: 15, kind: input, shape index: {}]   ;;  %s6165_s14 = inlined_call_operand.vmem [shape: f32[3,32], index: 14, kind: input, shape index: {}]   ;;  %s6166_s16 = inlined_call_operand.vmem [shape: f32[3,160], index: 16, kind: input, shape index: {}]   ;;  %s6167_s17 = inlined_call_operand.vmem [shape: bf16[56,16], index: 17, kind: input, shape index: {}]   ;;  %s6168_s18 = inlined_call_operand.vmem [shape: f32[3,16], index: 18, kind: input, shape index: {}]   ;;  %s6169_s19 = inlined_call_operand.vmem [shape: bf16[80,32], index: 19, kind: input, shape index: {}]   ;;  %s6170_s20 = inlined_call_operand.vmem [shape: f32[3,32], index: 20, kind: input, shape index: {}]   ;;  %s6171_s21 = inlined_call_operand.vmem [shape: bf16[96,4], index: 21, kind: input, shape index: {}]   ;;  %s6172_s22 = inlined_call_operand.<no memory space> [shape: f32[1,1], index: 22, kind: input, shape index: {}]   ;;  %s6173_s24 = inlined_call_operand.vmem [shape: f32[64,4], index: 24, kind: output, shape index: {1}]  }
   0x1   :  { %6227 = sst [smem:[#allocation13_spill]] %s6149_s0  ;;  %s4382_s0 = smov 4   ;;  %vm109_vm4 = vcmask 64545   ;;  %vm114_vm5 = vcmask 63520   ;;  %vm130_vm6 = vcmask 97344   ;;  %vm128_vm7 = vcmask 97346  }
   0x2   :  { %6228 = sst [smem:[#allocation14_spill]] %s6150_s3  ;;  %s6236_s27 = sld [smem:[#allocation13_spill]]  ;;  %vm198_vm8 = vcmask 97280   ;;  %vm280_vm9 = vcmask 261120   ;;  %vm6185_vm10 = vcmask 257024   ;;  %v4384_v38 = vmov 0.0  }
   0x3   :  { %6229 = sst [smem:[#allocation15_spill]] %s6151_s5  ;;  %s6237_s29 = sld [smem:[#allocation14_spill]]  ;;  %3675 = vst.msk [vmem:[#allocation10 + $0x40] sm:$0xf] %vm6185_vm10, %v4384_v38  ;;  %v189_v39 = vlaneseq  ;;  %v4385_v40 = vmov 0   ;;  %vm389_vm11 = vcmask 254976  }
   0x4   :  { %6230 = sst [smem:[#allocation16_spill]] %s6152_s4  ;;  %3667 = vst.msk [vmem:[#allocation10] sm:$0xff] %vm280_vm9, %v4384_v38  ;;  %3668 = vst.msk [vmem:[#allocation10 + $0x8] sm:$0xff] %vm280_vm9, %v4384_v38  ;;  %710 = vmatprep.subr.bf16.mxu1 %v4385_v40  ;;  %s6238_s30 = sld [smem:[#allocation15_spill]]  ;;  %4249 = vset.pattern.permute.xlu0 %v4385_v40  ;;  %vm6184_vm12 = vcmask 261122   ;;  %vm395_vm13 = vcmask 1046528  }
   0x5   :  { %6231 = sst [smem:[#allocation17_spill]] %s6153_s6  ;;  %3669 = vst.msk [vmem:[#allocation10 + $0x10] sm:$0xff] %vm280_vm9, %v4384_v38  ;;  %3670 = vst.msk [vmem:[#allocation10 + $0x18] sm:$0xff] %vm280_vm9, %v4384_v38  ;;  %v4633_v42 = vshrl.u32 %v189_v39, 7  ;;  %s6239_s26 = sld [smem:[#allocation16_spill]]  ;;  %vm472_vm14 = vcmask 1043456  }
   0x6   :  { %6232 = sst [smem:[#allocation18_spill]] %s6154_s7  ;;  %3671 = vst.msk [vmem:[#allocation10 + $0x20] sm:$0xff] %vm280_vm9, %v4384_v38  ;;  %3672 = vst.msk [vmem:[#allocation10 + $0x28] sm:$0xff] %vm280_vm9, %v4384_v38  ;;  %vm446_vm15 = vcmask 1044480   ;;  %s6205_s6 = smov 32  }
   0x7   :  { %6233 = sst [smem:[#allocation19_spill]] %s6155_s8  ;;  %3673 = vst.msk [vmem:[#allocation10 + $0x30] sm:$0xff] %vm280_vm9, %v4384_v38  ;;  %3674 = vst.msk [vmem:[#allocation10 + $0x38] sm:$0xff] %vm280_vm9, %v4384_v38  ;;  %v4644_v45 = vsub.s32 0, %v4633_v42  ;;  %s6241_s7 = sld [smem:[#allocation18_spill]] }
   0x8   :  { %6234 = sst [smem:[#allocation20_spill]] %s6156_s9  ;;  %v81_v0 = vld [vmem:[%s6236_s27 + $0x10] sm:$0xff]  ;;  %v79_v1 = vld [vmem:[%s6236_s27] sm:$0xff]  ;;  %v82_v2 = vld [vmem:[%s6236_s27 + $0x18] sm:$0xff]  ;;  %s6207_s9 = smov 8  }
   0x9   :  { %6235 = sst [smem:[#allocation21_spill]] %s6157_s1  ;;  %101 = vrot.lane.b32.xlu1 %v81_v0, %s4382_s0  ;;  %90 = vst.msk [vmem:[#allocation2 + $0x10] sm:$0xff] %vm6178_vm0, %v81_v0  ;;  %97 = vrot.lane.b32.xlu0 %v79_v1, %s4382_s0  ;;  %88 = vst.msk [vmem:[#allocation2] sm:$0xff] %vm6178_vm0, %v79_v1  ;;  %v80_v3 = vld [vmem:[%s6236_s27 + $0x8] sm:$0xff]  ;;  %v83_v4 = vld [vmem:[%s6236_s27 + $0x20] sm:$0xff]  ;;  %s6209_s1 = smov 16  }
   0xa   :  { %92 = vst.msk [vmem:[#allocation2 + $0x18] sm:$0x3f] %vm91_vm1, %v82_v2  ;;  %v85_v5 = vld [vmem:[%s6236_s27 + $0x30] sm:$0xff]  ;;  %v84_v6 = vld [vmem:[%s6236_s27 + $0x28] sm:$0xff]  ;;  %v86_v7 = vld [vmem:[%s6236_s27 + $0x38] sm:$0xff]  ;;  %s6242_s4 = sld [smem:[#allocation19_spill]] }
   0xb   :  { %89 = vst.msk [vmem:[#allocation2 + $0x8] sm:$0xff] %vm6178_vm0, %v80_v3  ;;  %134 = vst.msk [vmem:[#allocation2 + $0x1e] sm:$0xff] %vm6178_vm0, %v83_v4  ;;  %v4250_v8 = vld [vmem:[%s6237_s29] sm:$0x3f]   ;;  %v4252_v43 = vld [vmem:[%s6238_s30 + $0x8] sm:$0xff]   ;;  %s6211_s3 = smov 40  }
   0xc   :  { %136 = vst.msk [vmem:[#allocation2 + $0x2e] sm:$0xff] %vm6178_vm0, %v85_v5  ;;  %135 = vst.msk [vmem:[#allocation2 + $0x26] sm:$0xff] %vm6178_vm0, %v84_v6  ;;  %4209 = vmatprep.subr.msk.bf16.mxu0 %vm211_vm2, %v4250_v8  ;;  %v213_v9 = vsel %vm211_vm2, %v4250_v8, 0  ;;  %v4251_v41 = vld [vmem:[%s6238_s30] sm:$0xff]   ;;  %v4253_v44 = vld [vmem:[%s6238_s30 + $0x10] sm:$0xff]   ;;  %vm6186_vm0 = vcmask 128000  }
   0xd   :  { %137 = vst.msk [vmem:[#allocation2 + $0x36] sm:$0x3f] %vm91_vm1, %v86_v7  ;;  %103 = vrot.lane.b32.xlu1 %v82_v2, %s4382_s0  ;;  %99 = vrot.lane.b32.xlu0 %v80_v3, %s4382_s0  ;;  %v4649_v46 = vld [vmem:[%s6239_s26] sm:$0x7]  ;;  %vm507_vm1 = vcmask 1042432   ;;  %s6203_s26 = smov 96  }
   0xe   :  { %4106 = vmatpush3.bf16.msra.mxu0 %v213_v9  ;;  %711 = vmatpush1.bf16.msra.mxu1 %v4251_v41  ;;  %v192_v47 = vrot.slane %v4649_v46, %v4644_v45  ;;  %s6243_s29 = sld [smem:[#allocation20_spill]]  ;;  %s4398_s5 = smov 112  }
   0xf   :  { %4115 = vmatprep.subr.bf16.mxu0 %v4384_v38  ;;  %712 = vmatprep.subr.bf16.mxu1 %v4385_v40  ;;  %s6248_s27 = smov 96  }
  0x11   :  { %118 = vrot.lane.b32.xlu1 %v80_v3, %s6207_s9  ;;  %116 = vrot.lane.b32.xlu0 %v79_v1, %s6207_s9 }
  0x12   :  { %713 = vmatpush1.bf16.msra.mxu1 %v4252_v43 }
  0x13   :  { %714 = vmatprep.subr.bf16.mxu1 %v4385_v40 }
  0x15   :  { %142 = vrot.lane.b32.xlu1 %v83_v4, %s4382_s0  ;;  %120 = vrot.lane.b32.xlu0 %v81_v0, %s6207_s9 }
  0x16   :  { %715 = vmatpush1.bf16.msra.mxu1 %v4253_v44 }
  0x17   :  { %716 = vmatprep.subr.bf16.mxu1 %v4385_v40 }
  0x19   :  { %158 = vrot.lane.b32.xlu1 %v83_v4, %s6207_s9  ;;  %122 = vrot.lane.b32.xlu0 %v82_v2, %s6207_s9 }
  0x1d   :  { %146 = vrot.lane.b32.xlu1 %v85_v5, %s4382_s0  ;;  %144 = vrot.lane.b32.xlu0 %v84_v6, %s4382_s0 }
  0x21   :  { %160 = vrot.lane.b32.xlu1 %v84_v6, %s6207_s9  ;;  %148 = vrot.lane.b32.xlu0 %v86_v7, %s4382_s0  ;;  %s6240_s0 = sld [smem:[#allocation17_spill]] }
  0x25   :  { %164 = vrot.lane.b32.xlu1 %v86_v7, %s6207_s9  ;;  %162 = vrot.lane.b32.xlu0 %v85_v5, %s6207_s9 }
  0x7b   :  { %v102_v10 = vpop.permute.xlu1 %101  ;;  %v98_v11 = vpop.permute.xlu0 %97 }
  0x7c   :  { %113 = vst.msk [vmem:[#allocation2 + $0xf] sm:$0xff] %vm111_vm3, %v102_v10 }
  0x7d   :  { %110 = vst.msk [vmem:[#allocation2 - $0x1] sm:$0xfe] %vm109_vm4, %v98_v11 }
  0x7f   :  { %v104_v12 = vpop.permute.xlu1 %103  ;;  %v100_v13 = vpop.permute.xlu0 %99 }
  0x80   :  { %115 = vst.msk [vmem:[#allocation2 + $0x17] sm:$0x7f] %vm114_vm5, %v104_v12 }
  0x81   :  { %112 = vst.msk [vmem:[#allocation2 + $0x7] sm:$0xff] %vm111_vm3, %v100_v13 }
  0x83   :  { %v119_v14 = vpop.permute.xlu1 %118  ;;  %v117_v15 = vpop.permute.xlu0 %116 }
  0x84   :  { %131 = vst.msk [vmem:[#allocation2 + $0x6] sm:$0xff] %vm130_vm6, %v119_v14 }
  0x85   :  { %129 = vst.msk [vmem:[#allocation2 - $0x2] sm:$0xfc] %vm128_vm7, %v117_v15 }
  0x87   :  { %v143_v16 = vpop.permute.xlu1 %142  ;;  %v121_v17 = vpop.permute.xlu0 %120 }
  0x88   :  { %154 = vst.msk [vmem:[#allocation2 + $0x1d] sm:$0xfe] %vm109_vm4, %v143_v16  ;;  %vm561_vm4 = vcmask 1040384  }
  0x89   :  { %132 = vst.msk [vmem:[#allocation2 + $0xe] sm:$0xff] %vm130_vm6, %v121_v17 }
  0x8b   :  { %v159_v18 = vpop.permute.xlu1 %158  ;;  %v123_v19 = vpop.permute.xlu0 %122 }
  0x8c   :  { %170 = vst.msk [vmem:[#allocation2 + $0x1c] sm:$0xfc] %vm128_vm7, %v159_v18  ;;  %v174_v22 = vld [vmem:[#allocation2] sm:$0xff]  ;;  %vm6183_vm7 = vcmask 523520  }
  0x8d   :  { %133 = vst.msk [vmem:[#allocation2 + $0x16] sm:$0xff] %vm130_vm6, %v123_v19 }
  0x8f   :  { %v147_v20 = vpop.permute.xlu1 %146  ;;  %v145_v21 = vpop.permute.xlu0 %144 }
  0x90   :  { %v175_v23 = vld [vmem:[#allocation2 + $0x8] sm:$0xff]  ;;  %156 = vst.msk [vmem:[#allocation2 + $0x2d] sm:$0xff] %vm111_vm3, %v147_v20  ;;  %155 = vst.msk [vmem:[#allocation2 + $0x25] sm:$0xff] %vm111_vm3, %v145_v21  ;;  %vm535_vm3 = vcmask 1041408  }
  0x91   :  { %v182_v24 = vpack.c.bf16 %v175_v23, %v174_v22 }
  0x93   :  { %4107 = vmatprep.mubr.msk.bf16.mxu0 %vm198_vm8, %v182_v24  ;;  %v161_v25 = vpop.permute.xlu1 %160  ;;  %v149_v26 = vpop.permute.xlu0 %148 }
  0x94   :  { %v176_v27 = vld [vmem:[#allocation2 + $0x10] sm:$0xff]  ;;  %v177_v28 = vld [vmem:[#allocation2 + $0x18] sm:$0xff]  ;;  %171 = vst.msk [vmem:[#allocation2 + $0x24] sm:$0xff] %vm130_vm6, %v161_v25 }
  0x95   :  { %157 = vst.msk [vmem:[#allocation2 + $0x35] sm:$0x7f] %vm114_vm5, %v149_v26  ;;  %v183_v29 = vpack.c.bf16 %v177_v28, %v176_v27  ;;  %vm6180_vm5 = vcmask 779776  }
  0x97   :  { %4108 = vmatmul.mubr.msk.bf16.vlgmr.msra.gmra.mrb[0].mxu0 %vm198_vm8, %v183_v29  ;;  %v165_v30 = vpop.permute.xlu1 %164  ;;  %v163_v31 = vpop.permute.xlu0 %162 }
  0x98   :  { %173 = vst.msk [vmem:[#allocation2 + $0x34] sm:$0xff] %vm130_vm6, %v165_v30  ;;  %172 = vst.msk [vmem:[#allocation2 + $0x2c] sm:$0xff] %vm130_vm6, %v163_v31  ;;  %vm470_vm6 = vcmask 1042176  }
  0x9b   :  { %v178_v32 = vld [vmem:[#allocation2 + $0x20] sm:$0xff] }
  0x9f   :  { %v179_v33 = vld [vmem:[#allocation2 + $0x28] sm:$0xff]  ;;  %v180_v34 = vld [vmem:[#allocation2 + $0x30] sm:$0xff]  ;;  %v181_v35 = vld [vmem:[#allocation2 + $0x38] sm:$0xf] }
  0xa0   :  { %v184_v36 = vpack.c.bf16 %v179_v33, %v178_v32  ;;  %v185_v37 = vpack.c.bf16 %v181_v35, %v180_v34 }
  0xa2   :  { %4111 = vmatprep.mubr.msk.bf16.mxu0 %vm198_vm8, %v184_v36 }
  0xa3   :  { %4112 = vmatmul.mubr.msk.bf16.gmra.mrb[4].mxu0 %vm198_vm8, %v185_v37  ;;  %vm6182_vm8 = vcmask 785920  }
 0x16a   :  { %v4109_v48 = vpop.f32.mrb[0].mxu0 }
 0x16b   :  { %v249_v49 = vpop.f32.mrb[1].mxu0  ;;  %v4654_v50 = vadd.f32 %v4109_v48, %v192_v47 }
 0x16c   :  { %v4656_v51 = vadd.f32 %v249_v49, %v192_v47  ;;  %v4110_v52 = vpop.f32.mrb[2].mxu0 }
 0x16d   :  { %v252_v53 = vpop.f32.mrb[3].mxu0  ;;  %v4660_v55 = vadd.f32 %v4110_v52, %v192_v47  ;;  %v305_v57 = vmul.f32 %v4654_v50, %v4654_v50  ;;  %v284_v62 = vsel %vm280_vm9, %v4654_v50, 0.0 }
 0x16e   :  { %v303_v54 = vmul.f32 %v4656_v51, %v4656_v51  ;;  %v4662_v56 = vadd.f32 %v252_v53, %v192_v47  ;;  %v281_v58 = vsel %vm280_vm9, %v4656_v51, 0.0 }
 0x16f   :  { %v306_v0 = vmul.f32 %v4660_v55, %v4660_v55  ;;  %v314_v4 = vsel %vm280_vm9, %v305_v57, 0.0  ;;  %v286_v5 = vsel %vm280_vm9, %v4660_v55, 0.0 }
 0x170   :  { %v282_v59 = vsel %vm280_vm9, %v4662_v56, 0.0  ;;  %v304_v60 = vmul.f32 %v4662_v56, %v4662_v56  ;;  %v311_v63 = vsel %vm280_vm9, %v303_v54, 0.0 }
 0x171   :  { %v283_v61 = vadd.f32 %v282_v59, %v281_v58  ;;  %v316_v8 = vsel %vm280_vm9, %v306_v0, 0.0 }
 0x172   :  { %v312_v1 = vsel %vm280_vm9, %v304_v60, 0.0 }
 0x173   :  { %v285_v2 = vadd.f32 %v284_v62, %v283_v61  ;;  %v313_v3 = vadd.f32 %v312_v1, %v311_v63 }
 0x175   :  { %v315_v6 = vadd.f32 %v314_v4, %v313_v3  ;;  %v287_v7 = vadd.f32 %v286_v5, %v285_v2 }
 0x176   :  { %v4113_v9 = vpop.f32.mrb[4].mxu0 }
 0x177   :  { %v317_v10 = vadd.f32 %v316_v8, %v315_v6  ;;  %v265_v11 = vpop.f32.mrb[5].mxu0  ;;  %v4682_v12 = vadd.f32 %v4113_v9, %v192_v47  ;;  %v4713_v8 = vsub.s32 1, %v4633_v42 }
 0x178   :  { %v4684_v13 = vadd.f32 %v265_v11, %v192_v47  ;;  %v4114_v14 = vpop.f32.mrb[6].mxu0 }
 0x179   :  { %v268_v15 = vpop.f32.mrb[7].mxu0  ;;  %v4690_v18 = vadd.f32 %v4114_v14, %v192_v47  ;;  %v309_v21 = vmul.f32 %v4682_v12, %v4682_v12  ;;  %v292_v27 = vsel %vm280_vm9, %v4682_v12, 0.0  ;;  %v4255_v14 = vld [vmem:[%s6238_s30 + $0x20] sm:$0xff]  }
 0x17a   :  { %v288_v16 = vsel %vm280_vm9, %v4684_v13, 0.0  ;;  %v307_v17 = vmul.f32 %v4684_v13, %v4684_v13  ;;  %v269_v19 = vadd.f32 %v268_v15, %v192_v47 }
 0x17b   :  { %v289_v20 = vadd.f32 %v288_v16, %v287_v7  ;;  %v310_v28 = vmul.f32 %v4690_v18, %v4690_v18  ;;  %v322_v32 = vsel %vm280_vm9, %v309_v21, 0.0  ;;  %v295_v33 = vsel %vm6185_vm10, %v4690_v18, 0.0 }
 0x17c   :  { %v318_v22 = vsel %vm280_vm9, %v307_v17, 0.0  ;;  %v290_v23 = vsel %vm280_vm9, %v269_v19, 0.0  ;;  %v308_v24 = vmul.f32 %v269_v19, %v269_v19 }
 0x17d   :  { %v319_v25 = vadd.f32 %v318_v22, %v317_v10  ;;  %v291_v26 = vadd.f32 %v290_v23, %v289_v20  ;;  %v324_v36 = vsel %vm6185_vm10, %v310_v28, 0.0 }
 0x17e   :  { %v320_v29 = vsel %vm280_vm9, %v308_v24, 0.0 }
 0x17f   :  { %v293_v30 = vadd.f32 %v292_v27, %v291_v26  ;;  %v321_v31 = vadd.f32 %v320_v29, %v319_v25 }
 0x181   :  { %v296_v34 = vadd.f32 %v295_v33, %v293_v30  ;;  %v323_v35 = vadd.f32 %v322_v32, %v321_v31 }
 0x183   :  { %v297_v37 = vrot.slane %v296_v34, 4  ;;  %v325_v39 = vadd.f32 %v324_v36, %v323_v35 }
 0x185   :  { %v298_v41 = vadd.f32 %v297_v37, %v296_v34  ;;  %v326_v43 = vrot.slane %v325_v39, 4  ;;  %v4256_v34 = vld [vmem:[%s6238_s30 + $0x28] sm:$0xff]  }
 0x187   :  { %v299_v44 = vrot.slane %v298_v41, 2  ;;  %v327_v47 = vadd.f32 %v326_v43, %v325_v39 }
 0x189   :  { %v300_v48 = vadd.f32 %v299_v44, %v298_v41  ;;  %v328_v49 = vrot.slane %v327_v47, 2 }
 0x18b   :  { %v301_v52 = vrot.slane %v300_v48, 1  ;;  %v329_v53 = vadd.f32 %v328_v49, %v327_v47 }
 0x18d   :  { %v302_v54 = vadd.f32 %v301_v52, %v300_v48  ;;  %v330_v57 = vrot.slane %v329_v53, 1 }
 0x18f   :  { %v331_v58 = vadd.f32 %v330_v57, %v329_v53  ;;  %v332_v59 = vmul.f32 0.016666668, %v302_v54 }
 0x191   :  { %v333_v60 = vmul.f32 0.016666668, %v331_v58  ;;  %v334_v61 = vmul.f32 %v332_v59, %v332_v59  ;;  %v338_v62 = vsub.f32 %v4654_v50, %v332_v59  ;;  %v341_v63 = vsub.f32 %v269_v19, %v332_v59 }
 0x192   :  { %v339_v0 = vsub.f32 %v4660_v55, %v332_v59  ;;  %v340_v1 = vsub.f32 %v4684_v13, %v332_v59  ;;  %v336_v2 = vsub.f32 %v4656_v51, %v332_v59  ;;  %v337_v3 = vsub.f32 %v4662_v56, %v332_v59  ;;  %v4254_v55 = vld [vmem:[%s6238_s30 + $0x18] sm:$0xff]  }
 0x193   :  { %v335_v4 = vsub.f32 %v333_v60, %v334_v61  ;;  %v342_v5 = vsub.f32 %v4682_v12, %v332_v59  ;;  %v343_v6 = vsub.f32 %v4690_v18, %v332_v59  ;;  %v4716_v50 = vsub.s32 2, %v4633_v42  ;;  %717 = vmatpush1.bf16.msra.mxu1 %v4254_v55  ;;  %v4257_v60 = vld [vmem:[%s6238_s30 + $0x30] sm:$0xff]  }
 0x194   :  { %v357_v51 = vrot.slane %v4649_v46, %v4713_v8  ;;  %718 = vmatprep.subr.bf16.mxu1 %v4385_v40 }
 0x195   :  { %v344_v7 = vadd.f32 1e-05, %v335_v4  ;;  %v369_v9 = vrot.slane %v4649_v46, %v4716_v50 }
 0x197   :  { %4302 = vrsqrt.f32 %v344_v7  ;;  %719 = vmatpush1.bf16.msra.mxu1 %v4255_v14 }
 0x198   :  { %720 = vmatprep.subr.bf16.mxu1 %v4385_v40 }
 0x19b   :  { %721 = vmatpush1.bf16.msra.mxu1 %v4256_v34 }
 0x19c   :  { %722 = vmatprep.subr.bf16.mxu1 %v4385_v40 }
 0x19f   :  { %723 = vmatpush1.bf16.msra.mxu1 %v4257_v60 }
 0x1a0   :  { %724 = vmatprep.subr.bf16.mxu1 %v4385_v40 }
 0x1a1   :  { %v4303_v56 = vpop.eup %4302 }
 0x1a2   :  { %v351_v10 = vmul.f32 %v4303_v56, %v341_v63  ;;  %v349_v11 = vmul.f32 %v4303_v56, %v339_v0  ;;  %v350_v12 = vmul.f32 %v4303_v56, %v340_v1  ;;  %v346_v13 = vmul.f32 %v4303_v56, %v336_v2 }
 0x1a3   :  { %v347_v15 = vmul.f32 %v4303_v56, %v337_v3  ;;  %v348_v16 = vmul.f32 %v4303_v56, %v338_v62  ;;  %v352_v17 = vmul.f32 %v4303_v56, %v342_v5  ;;  %v353_v18 = vmul.f32 %v4303_v56, %v343_v6 }
 0x1a4   :  { %v363_v46 = vmul.f32 %v357_v51, %v351_v10  ;;  %v361_v19 = vmul.f32 %v357_v51, %v349_v11  ;;  %v362_v20 = vmul.f32 %v357_v51, %v350_v12  ;;  %v358_v21 = vmul.f32 %v357_v51, %v346_v13  ;;  %v4258_v11 = vld [vmem:[%s6238_s30 + $0x38] sm:$0xff]  }
 0x1a5   :  { %v359_v22 = vmul.f32 %v357_v51, %v347_v15  ;;  %v360_v23 = vmul.f32 %v357_v51, %v348_v16  ;;  %v364_v24 = vmul.f32 %v357_v51, %v352_v17  ;;  %v365_v25 = vmul.f32 %v357_v51, %v353_v18  ;;  %725 = vmatpush1.bf16.msra.mxu1 %v4258_v11 }
 0x1a6   :  { %v375_v26 = vadd.f32 %v369_v9, %v363_v46  ;;  %v373_v27 = vadd.f32 %v369_v9, %v361_v19  ;;  %v374_v28 = vadd.f32 %v369_v9, %v362_v20  ;;  %v370_v29 = vadd.f32 %v369_v9, %v358_v21  ;;  %726 = vmatprep.subr.bf16.mxu1 %v4385_v40 }
 0x1a7   :  { %v371_v30 = vadd.f32 %v369_v9, %v359_v22  ;;  %v372_v31 = vadd.f32 %v369_v9, %v360_v23  ;;  %v376_v32 = vadd.f32 %v369_v9, %v364_v24  ;;  %v377_v33 = vadd.f32 %v369_v9, %v365_v25 }
 0x1a8   :  { %v4733_v35 = vmax.f32 %v375_v26, 0.0  ;;  %v4735_v36 = vmax.f32 %v373_v27, 0.0  ;;  %v4737_v37 = vmax.f32 %v374_v28, 0.0  ;;  %v378_v39 = vmax.f32 %v370_v29, 0.0  ;;  %v4259_v27 = vld [vmem:[%s6238_s30 + $0x40] sm:$0xff]  }
 0x1a9   :  { %v379_v41 = vmax.f32 %v371_v30, 0.0  ;;  %v4739_v43 = vmax.f32 %v372_v31, 0.0  ;;  %v4741_v44 = vmax.f32 %v376_v32, 0.0  ;;  %v4743_v47 = vmax.f32 %v377_v33, 0.0  ;;  %727 = vmatpush1.bf16.msra.mxu1 %v4259_v27 }
 0x1aa   :  { %588 = vst.msk [vmem:[#allocation3 + $0x48] sm:$0xff] %vm280_vm9, %v4733_v35  ;;  %v426_v48 = vrot.slane %v4735_v36, 2  ;;  %v401_v49 = vrot.slane %v4735_v36, 1  ;;  %v562_v52 = vrot.slane %v4737_v37, 7  ;;  %v536_v53 = vrot.slane %v4737_v37, 6  ;;  %386 = vst.msk [vmem:[#allocation3] sm:$0xff] %vm280_vm9, %v378_v39  ;;  %728 = vmatprep.subr.bf16.mxu1 %v4385_v40 }
 0x1ab   :  { %390 = vst.msk [vmem:[#allocation3 + $0x30] sm:$0x3] %vm389_vm11, %v4735_v36  ;;  %v452_v54 = vrot.slane %v4735_v36, 3  ;;  %v396_v57 = vrot.slane %v378_v39, 1  ;;  %v397_v58 = vrot.slane %v379_v41, 1  ;;  %v473_v59 = vrot.slane %v378_v39, 4 }
 0x1ac   :  { %587 = vst.msk [vmem:[#allocation3 + $0x38] sm:$0xfc] %vm6184_vm12, %v4737_v37  ;;  %434 = vrot.lane.b32.xlu0 %v426_v48, %s6201_s25  ;;  %409 = vrot.lane.b32.xlu1 %v401_v49, %s6205_s6  ;;  %v474_v61 = vrot.slane %v379_v41, 4  ;;  %v476_v62 = vrot.slane %v4739_v43, 4  ;;  %v399_v63 = vrot.slane %v4739_v43, 1  ;;  %v421_v0 = vrot.slane %v378_v39, 2 }
 0x1ad   :  { %387 = vst.msk [vmem:[#allocation3 + $0x10] sm:$0xff] %vm280_vm9, %v379_v41  ;;  %388 = vst.msk [vmem:[#allocation3 + $0x20] sm:$0xff] %vm280_vm9, %v4739_v43  ;;  %v398_v1 = vsel %vm395_vm13, %v396_v57, %v397_v58  ;;  %v422_v2 = vrot.slane %v379_v41, 2  ;;  %v424_v3 = vrot.slane %v4739_v43, 2  ;;  %v447_v4 = vrot.slane %v378_v39, 3  ;;  %v4260_v57 = vld [vmem:[%s6238_s30 + $0x48] sm:$0xff]  }
 0x1ae   :  { %589 = vst.msk [vmem:[#allocation3 + $0x58] sm:$0xff] %vm280_vm9, %v4741_v44  ;;  %v475_v5 = vsel %vm472_vm14, %v473_v59, %v474_v61  ;;  %v477_v6 = vsel %vm472_vm14, %v474_v61, %v476_v62  ;;  %v400_v7 = vsel %vm395_vm13, %v397_v58, %v399_v63  ;;  %v448_v55 = vrot.slane %v379_v41, 3  ;;  %729 = vmatpush1.bf16.msra.mxu1 %v4260_v57  ;;  %s4391_s30 = smov 80  }
 0x1af   :  { %590 = vst.msk [vmem:[#allocation3 + $0x68] sm:$0xf] %vm6185_vm10, %v4743_v47  ;;  %v423_v51 = vsel %vm211_vm2, %v421_v0, %v422_v2  ;;  %v425_v56 = vsel %vm211_vm2, %v422_v2, %v424_v3  ;;  %v450_v9 = vrot.slane %v4739_v43, 3  ;;  %v402_v10 = vsel %vm395_vm13, %v399_v63, %v401_v49  ;;  %4149 = vmatprep.subr.bf16.mxu1 %v4384_v38 }
 0x1b0   :  { %484 = vst.msk [vmem:[#allocation3 + $0x8] sm:$0xff] %vm280_vm9, %v475_v5  ;;  %485 = vst.msk [vmem:[#allocation3 + $0x18] sm:$0xff] %vm280_vm9, %v477_v6  ;;  %569 = vrot.lane.b32.xlu0 %v562_v52, %s6203_s26  ;;  %543 = vrot.lane.b32.xlu1 %v536_v53, %s6201_s25  ;;  %v449_v12 = vsel %vm446_vm15, %v447_v4, %v448_v55  ;;  %v427_v13 = vsel %vm211_vm2, %v424_v3, %v426_v48  ;;  %v508_v14 = vrot.slane %v4735_v36, 5  ;;  %vm419_vm2 = vcmask 517376  }
 0x1b1   :  { %v509_v15 = vrot.slane %v4737_v37, 5  ;;  %v451_v16 = vsel %vm446_vm15, %v448_v55, %v450_v9  ;;  %v511_v17 = vrot.slane %v4733_v35, 5  ;;  %v453_v18 = vsel %vm446_vm15, %v450_v9, %v452_v54 }
 0x1b2   :  { %v537_v46 = vrot.slane %v4733_v35, 6  ;;  %v513_v20 = vrot.slane %v4741_v44, 5  ;;  %v563_v21 = vrot.slane %v4733_v35, 7  ;;  %v539_v22 = vrot.slane %v4741_v44, 6 }
 0x1b3   :  { %v510_v19 = vsel %vm507_vm1, %v508_v14, %v509_v15  ;;  %v512_v23 = vsel %vm507_vm1, %v509_v15, %v511_v17  ;;  %v515_v25 = vrot.slane %v4743_v47, 5  ;;  %v565_v26 = vrot.slane %v4741_v44, 7 }
 0x1b4   :  { %v538_v24 = vsel %vm535_vm3, %v536_v53, %v537_v46  ;;  %460 = vrot.lane.b32.xlu1 %v452_v54, %s6203_s26  ;;  %403 = vrot.lane.b32.xlu0 %v398_v1, %s6205_s6  ;;  %v514_v28 = vsel %vm507_vm1, %v511_v17, %v513_v20  ;;  %v564_v29 = vsel %vm561_vm4, %v562_v52, %v563_v21  ;;  %v567_v31 = vrot.slane %v4743_v47, 7 }
 0x1b5   :  { %v540_v30 = vsel %vm535_vm3, %v537_v46, %v539_v22  ;;  %v516_v32 = vsel %vm507_vm1, %v513_v20, %v515_v25  ;;  %v566_v33 = vsel %vm561_vm4, %v563_v21, %v565_v26  ;;  %v541_v34 = vrot.slane %v4743_v47, 6  ;;  %v602_v17 = vld [vmem:[#allocation3 + $0x58] sm:$0xff] }
 0x1b6   :  { %v568_v48 = vsel %vm561_vm4, %v565_v26, %v567_v31  ;;  %v478_v53 = vrot.slane %v4735_v36, 4  ;;  %v491_v54 = vrot.slane %v4737_v37, 4  ;;  %v493_v36 = vrot.slane %v4733_v35, 4  ;;  %v604_v27 = vld [vmem:[#allocation3 + $0x68] sm:$0xf] }
 0x1b7   :  { %v592_v39 = vld [vmem:[#allocation3 + $0x8] sm:$0xff]  ;;  %v594_v41 = vld [vmem:[#allocation3 + $0x18] sm:$0xff]  ;;  %v542_v52 = vsel %vm535_vm3, %v539_v22, %v541_v34  ;;  %v495_v58 = vrot.slane %v4741_v44, 4  ;;  %vm466_vm13 = vcmask 1048320   ;;  %vm529_vm15 = vcmask 523522  }
 0x1b8   :  { %v606_v49 = vpack.c.bf16 %v594_v41, %v592_v39  ;;  %405 = vrot.lane.b32.xlu1 %v400_v7, %s6205_s6  ;;  %428 = vrot.lane.b32.xlu0 %v423_v51, %s6201_s25  ;;  %v479_v47 = vsel %vm472_vm14, %v476_v62, %v478_v53  ;;  %487 = vst.msk [vmem:[#allocation3 + $0x38] sm:$0x3] %vm389_vm11, %v478_v53  ;;  %vm6181_vm1 = vcmask 785922   ;;  %v4908_v34 = vld [vmem:[%s6240_s0] sm:$0x7]  ;;  %s6224_s0 = smov 48  }
 0x1b9   :  { %486 = vst.msk [vmem:[#allocation3 + $0x28] sm:$0xff] %vm280_vm9, %v479_v47  ;;  %v492_v37 = vsel %vm472_vm14, %v478_v53, %v491_v54  ;;  %v494_v43 = vsel %vm472_vm14, %v491_v54, %v493_v36  ;;  %v496_v59 = vsel %vm472_vm14, %v493_v36, %v495_v58  ;;  %v612_v31 = vpack.c.bf16 %v604_v27, %v604_v27 }
 0x1ba   :  { %3972 = vmatprep.mubr.msk.bf16.mxu1 %vm280_vm9, %v606_v49  ;;  %502 = vst.msk [vmem:[#allocation3 + $0x30] sm:$0xfc] %vm6184_vm12, %v492_v37  ;;  %v637_v39 = vrot.slane %v4908_v34, %v4644_v45  ;;  %vm904_vm12 = vcmask 390400  }
 0x1bb   :  { %505 = vst.msk [vmem:[#allocation3 + $0x60] sm:$0xf] %vm6185_vm10, %v495_v58  ;;  %vm6196_vm10 = vcmask 392448  }
 0x1bc   :  { %430 = vrot.lane.b32.xlu1 %v425_v56, %s6201_s25  ;;  %454 = vrot.lane.b32.xlu0 %v449_v12, %s6203_s26  ;;  %503 = vst.msk [vmem:[#allocation3 + $0x40] sm:$0xff] %vm280_vm9, %v494_v43  ;;  %504 = vst.msk [vmem:[#allocation3 + $0x50] sm:$0xff] %vm280_vm9, %v496_v59 }
 0x1bf   :  { %v598_v51 = vld [vmem:[#allocation3 + $0x38] sm:$0xff] }
 0x1c0   :  { %456 = vrot.lane.b32.xlu1 %v451_v16, %s6203_s26  ;;  %407 = vrot.lane.b32.xlu0 %v402_v10, %s6205_s6  ;;  %v596_v55 = vld [vmem:[#allocation3 + $0x28] sm:$0xff] }
 0x1c1   :  { %v600_v16 = vld [vmem:[#allocation3 + $0x48] sm:$0xff] }
 0x1c2   :  { %v610_v22 = vpack.c.bf16 %v602_v17, %v600_v16 }
 0x1c4   :  { %432 = vrot.lane.b32.xlu1 %v427_v13, %s6201_s25  ;;  %517 = vrot.lane.b32.xlu0 %v510_v19, %s6205_s6  ;;  %v608_v13 = vpack.c.bf16 %v598_v51, %v596_v55 }
 0x1c8   :  { %519 = vrot.lane.b32.xlu1 %v512_v23, %s6205_s6  ;;  %458 = vrot.lane.b32.xlu0 %v453_v18, %s6203_s26 }
 0x1cc   :  { %545 = vrot.lane.b32.xlu1 %v538_v24, %s6201_s25  ;;  %521 = vrot.lane.b32.xlu0 %v514_v28, %s6205_s6 }
 0x1d0   :  { %571 = vrot.lane.b32.xlu1 %v564_v29, %s6203_s26  ;;  %547 = vrot.lane.b32.xlu0 %v540_v30, %s6201_s25 }
 0x1d4   :  { %523 = vrot.lane.b32.xlu1 %v516_v32, %s6205_s6  ;;  %573 = vrot.lane.b32.xlu0 %v566_v33, %s6203_s26 }
 0x1d8   :  { %575 = vrot.lane.b32.xlu1 %v568_v48, %s6203_s26  ;;  %549 = vrot.lane.b32.xlu0 %v542_v52, %s6201_s25 }
 0x21e   :  { %v435_v35 = vpop.permute.xlu0 %434  ;;  %v410_v44 = vpop.permute.xlu1 %409 }
 0x21f   :  { %420 = vst.msk [vmem:[#allocation3 + $0x30] sm:$0x3] %vm419_vm2, %v410_v44  ;;  %vm581_vm2 = vcmask 1048322  }
 0x220   :  { %445 = vst.msk [vmem:[#allocation3 + $0x30] sm:$0x3] %vm6180_vm5, %v435_v35  ;;  %vm6220_vm5 = vcmask 261248  }
 0x222   :  { %v570_v60 = vpop.permute.xlu0 %569  ;;  %v544_v61 = vpop.permute.xlu1 %543 }
 0x226   :  { %v461_v62 = vpop.permute.xlu1 %460  ;;  %v404_v63 = vpop.permute.xlu0 %403 }
 0x227   :  { %471 = vst.msk [vmem:[#allocation3 + $0x30] sm:$0x3] %vm470_vm6, %v461_v62  ;;  %vm533_vm6 = vcmask 519424  }
 0x228   :  { %416 = vst.msk [vmem:[#allocation3] sm:$0xff] %vm6183_vm7, %v404_v63 }
 0x22a   :  { %v406_v0 = vpop.permute.xlu1 %405  ;;  %v429_v1 = vpop.permute.xlu0 %428 }
 0x22b   :  { %417 = vst.msk [vmem:[#allocation3 + $0x10] sm:$0xff] %vm6183_vm7, %v406_v0 }
 0x22c   :  { %441 = vst.msk [vmem:[#allocation3] sm:$0xff] %vm6182_vm8, %v429_v1 }
 0x22e   :  { %v431_v2 = vpop.permute.xlu1 %430  ;;  %v455_v3 = vpop.permute.xlu0 %454 }
 0x22f   :  { %442 = vst.msk [vmem:[#allocation3 + $0x10] sm:$0xff] %vm6182_vm8, %v431_v2 }
 0x230   :  { %467 = vst.msk [vmem:[#allocation3] sm:$0xff] %vm466_vm13, %v455_v3 }
 0x232   :  { %v457_v4 = vpop.permute.xlu1 %456  ;;  %v408_v5 = vpop.permute.xlu0 %407 }
 0x233   :  { %468 = vst.msk [vmem:[#allocation3 + $0x10] sm:$0xff] %vm466_vm13, %v457_v4 }
 0x234   :  { %418 = vst.msk [vmem:[#allocation3 + $0x20] sm:$0xff] %vm6183_vm7, %v408_v5 }
 0x236   :  { %v433_v6 = vpop.permute.xlu1 %432  ;;  %v518_v7 = vpop.permute.xlu0 %517 }
 0x237   :  { %443 = vst.msk [vmem:[#allocation3 + $0x20] sm:$0xff] %vm6182_vm8, %v433_v6  ;;  %v591_v10 = vld [vmem:[#allocation3] sm:$0xff] }
 0x238   :  { %530 = vst.msk [vmem:[#allocation3 + $0x30] sm:$0xfc] %vm529_vm15, %v518_v7  ;;  %vm6179_vm15 = vcmask 781824  }
 0x239   :  { %556 = vst.msk [vmem:[#allocation3 + $0x30] sm:$0xfc] %vm6181_vm1, %v544_v61  ;;  %vm6188_vm1 = vcmask 261249  }
 0x23a   :  { %582 = vst.msk [vmem:[#allocation3 + $0x30] sm:$0xfc] %vm581_vm2, %v570_v60  ;;  %v520_v56 = vpop.permute.xlu1 %519  ;;  %v459_v9 = vpop.permute.xlu0 %458  ;;  %v593_v11 = vld [vmem:[#allocation3 + $0x10] sm:$0xff]  ;;  %vm585_vm2 = vcmask 1044224  }
 0x23b   :  { %531 = vst.msk [vmem:[#allocation3 + $0x40] sm:$0xff] %vm6183_vm7, %v520_v56  ;;  %v605_v12 = vpack.c.bf16 %v593_v11, %v591_v10 }
 0x23c   :  { %469 = vst.msk [vmem:[#allocation3 + $0x20] sm:$0xff] %vm466_vm13, %v459_v9 }
 0x23d   :  { %743 = vmatmul.mubr.bf16.vlgmr.msra.gmra.mrb[0].mxu1 %v605_v12 }
 0x23e   :  { %v546_v14 = vpop.permute.xlu1 %545  ;;  %v522_v15 = vpop.permute.xlu0 %521  ;;  %3973 = vmatprep.mubr.msk.bf16.mxu1 %vm280_vm9, %v608_v13 }
 0x23f   :  { %557 = vst.msk [vmem:[#allocation3 + $0x40] sm:$0xff] %vm6182_vm8, %v546_v14 }
 0x240   :  { %532 = vst.msk [vmem:[#allocation3 + $0x50] sm:$0xff] %vm6183_vm7, %v522_v15  ;;  %vm889_vm7 = vcmask 258176  }
 0x241   :  { %v597_v20 = vld [vmem:[#allocation3 + $0x30] sm:$0xff] }
 0x242   :  { %v572_v18 = vpop.permute.xlu1 %571  ;;  %v548_v46 = vpop.permute.xlu0 %547 }
 0x243   :  { %v595_v19 = vld [vmem:[#allocation3 + $0x20] sm:$0xff]  ;;  %583 = vst.msk [vmem:[#allocation3 + $0x40] sm:$0xff] %vm466_vm13, %v572_v18 }
 0x244   :  { %558 = vst.msk [vmem:[#allocation3 + $0x50] sm:$0xff] %vm6182_vm8, %v548_v46  ;;  %v607_v21 = vpack.c.bf16 %v597_v20, %v595_v19  ;;  %vm6190_vm8 = vcmask 392450  }
 0x246   :  { %751 = vmatmul.mubr.bf16.gmra.mrb[4].mxu1 %v607_v21  ;;  %v524_v23 = vpop.permute.xlu1 %523  ;;  %v574_v24 = vpop.permute.xlu0 %573 }
 0x247   :  { %3974 = vmatprep.mubr.msk.bf16.mxu1 %vm280_vm9, %v610_v22  ;;  %534 = vst.msk [vmem:[#allocation3 + $0x60] sm:$0xf] %vm533_vm6, %v524_v23  ;;  %vm6193_vm6 = vcmask 130048  }
 0x248   :  { %584 = vst.msk [vmem:[#allocation3 + $0x50] sm:$0xff] %vm466_vm13, %v574_v24  ;;  %vm6189_vm13 = vcmask 125952  }
 0x249   :  { %3234 = vst.msk [vmem:[#allocation8] sm:$0xff] %vm6193_vm6, %v4384_v38  ;;  %3235 = vst.msk [vmem:[#allocation8 + $0x8] sm:$0xff] %vm6193_vm6, %v4384_v38 }
 0x24a   :  { %v576_v25 = vpop.permute.xlu1 %575  ;;  %v550_v26 = vpop.permute.xlu0 %549  ;;  %v599_v28 = vld [vmem:[#allocation3 + $0x40] sm:$0xff]  ;;  %3236 = vst.msk [vmem:[#allocation8 + $0x10] sm:$0xff] %vm6193_vm6, %v4384_v38  ;;  %3237 = vst.msk [vmem:[#allocation8 + $0x18] sm:$0xff] %vm6193_vm6, %v4384_v38 }
 0x24b   :  { %560 = vst.msk [vmem:[#allocation3 + $0x60] sm:$0xf] %vm6179_vm15, %v550_v26  ;;  %vm4392_vm15 = vmmov 0  }
 0x24c   :  { %586 = vst.msk [vmem:[#allocation3 + $0x60] sm:$0xf] %vm585_vm2, %v576_v25  ;;  %vm6187_vm2 = vcmask 130050   ;;  %4129 = vmatprep.mubr.msk.bf16.mxu0 %vm4392_vm15, %v4384_v38 }
 0x24d   :  { %3238 = vst.msk [vmem:[#allocation8 + $0x20] sm:$0xff] %vm6193_vm6, %v4384_v38  ;;  %3239 = vst.msk [vmem:[#allocation8 + $0x28] sm:$0xff] %vm6193_vm6, %v4384_v38 }
 0x24e   :  { %3240 = vst.msk [vmem:[#allocation8 + $0x30] sm:$0xff] %vm6193_vm6, %v4384_v38  ;;  %3241 = vst.msk [vmem:[#allocation8 + $0x38] sm:$0xff] %vm6193_vm6, %v4384_v38 }
 0x24f   :  { %v601_v29 = vld [vmem:[#allocation3 + $0x50] sm:$0xff]  ;;  %3242 = vst.msk [vmem:[#allocation8 + $0x40] sm:$0xf] %vm6189_vm13, %v4384_v38 }
 0x250   :  { %v609_v30 = vpack.c.bf16 %v601_v29, %v599_v28 }
 0x252   :  { %759 = vmatmul.mubr.bf16.gmra.mrb[8].mxu1 %v609_v30 }
 0x253   :  { %3975 = vmatprep.mubr.msk.bf16.mxu1 %vm280_vm9, %v612_v31  ;;  %v603_v32 = vld [vmem:[#allocation3 + $0x60] sm:$0xf] }
 0x254   :  { %v611_v33 = vpack.c.bf16 %v603_v32, %v603_v32 }
 0x25a   :  { %767 = vmatmul.mubr.bf16.gmra.mrb[12].mxu1 %v611_v33 }
 0x25b   :  { %4151 = vmatprep.mubr.msk.bf16.mxu1 %vm4392_vm15, %v4384_v38 }
 0x310   :  { %v744_v41 = vpop.f32.mrb[0].mxu1 }
 0x311   :  { %v4912_v48 = vadd.f32 %v744_v41, %v637_v39  ;;  %v746_v49 = vpop.f32.mrb[1].mxu1 }
 0x312   :  { %v747_v52 = vpop.f32.mrb[2].mxu1 }
 0x313   :  { %v795_v53 = vmul.f32 %v4912_v48, %v4912_v48  ;;  %v4916_v54 = vadd.f32 %v747_v52, %v637_v39  ;;  %v749_v47 = vpop.f32.mrb[3].mxu1  ;;  %v775_v57 = vsel %vm6193_vm6, %v4912_v48, 0.0 }
 0x315   :  { %v776_v36 = vsel %vm6193_vm6, %v4916_v54, 0.0  ;;  %v796_v58 = vmul.f32 %v4916_v54, %v4916_v54  ;;  %v802_v43 = vsel %vm6193_vm6, %v795_v53, 0.0 }
 0x316   :  { %v777_v37 = vadd.f32 %v776_v36, %v775_v57 }
 0x317   :  { %v803_v59 = vsel %vm6193_vm6, %v796_v58, 0.0 }
 0x318   :  { %v804_v35 = vadd.f32 %v803_v59, %v802_v43 }
 0x319   :  { %v752_v44 = vpop.f32.mrb[4].mxu1 }
 0x31a   :  { %v4926_v60 = vadd.f32 %v752_v44, %v637_v39  ;;  %v754_v61 = vpop.f32.mrb[5].mxu1 }
 0x31b   :  { %v755_v62 = vpop.f32.mrb[6].mxu1 }
 0x31c   :  { %v778_v63 = vsel %vm6193_vm6, %v4926_v60, 0.0  ;;  %v797_v0 = vmul.f32 %v4926_v60, %v4926_v60  ;;  %v4932_v1 = vadd.f32 %v755_v62, %v637_v39  ;;  %v757_v2 = vpop.f32.mrb[7].mxu1 }
 0x31d   :  { %v779_v3 = vadd.f32 %v778_v63, %v777_v37 }
 0x31e   :  { %v805_v4 = vsel %vm6193_vm6, %v797_v0, 0.0  ;;  %v780_v5 = vsel %vm6193_vm6, %v4932_v1, 0.0  ;;  %v798_v6 = vmul.f32 %v4932_v1, %v4932_v1 }
 0x31f   :  { %v806_v7 = vadd.f32 %v805_v4, %v804_v35  ;;  %v781_v55 = vadd.f32 %v780_v5, %v779_v3 }
 0x320   :  { %v807_v51 = vsel %vm6193_vm6, %v798_v6, 0.0 }
 0x321   :  { %v808_v56 = vadd.f32 %v807_v51, %v806_v7 }
 0x325   :  { %v760_v9 = vpop.f32.mrb[8].mxu1 }
 0x326   :  { %v761_v10 = vadd.f32 %v760_v9, %v637_v39  ;;  %v762_v11 = vpop.f32.mrb[9].mxu1 }
 0x327   :  { %v763_v12 = vpop.f32.mrb[10].mxu1 }
 0x328   :  { %v782_v13 = vsel %vm6193_vm6, %v761_v10, 0.0  ;;  %v799_v14 = vmul.f32 %v761_v10, %v761_v10  ;;  %v764_v15 = vadd.f32 %v763_v12, %v637_v39  ;;  %v765_v16 = vpop.f32.mrb[11].mxu1 }
 0x329   :  { %v783_v17 = vadd.f32 %v782_v13, %v781_v55  ;;  %v844_v55 = vrot.slane %v4908_v34, %v4713_v8 }
 0x32a   :  { %v809_v18 = vsel %vm6193_vm6, %v799_v14, 0.0  ;;  %v784_v46 = vsel %vm6193_vm6, %v764_v15, 0.0  ;;  %v800_v19 = vmul.f32 %v764_v15, %v764_v15 }
 0x32b   :  { %v810_v20 = vadd.f32 %v809_v18, %v808_v56  ;;  %v785_v21 = vadd.f32 %v784_v46, %v783_v17  ;;  %v855_v56 = vrot.slane %v4908_v34, %v4716_v50 }
 0x32c   :  { %v811_v22 = vsel %vm6193_vm6, %v800_v19, 0.0 }
 0x32d   :  { %v812_v23 = vadd.f32 %v811_v22, %v810_v20  ;;  %v768_v24 = vpop.f32.mrb[12].mxu1 }
 0x32e   :  { %v769_v25 = vadd.f32 %v768_v24, %v637_v39  ;;  %v770_v26 = vpop.f32.mrb[13].mxu1 }
 0x32f   :  { %v771_v27 = vpop.f32.mrb[14].mxu1 }
 0x330   :  { %v787_v28 = vsel %vm6189_vm13, %v769_v25, 0.0  ;;  %v801_v29 = vmul.f32 %v769_v25, %v769_v25  ;;  %v772_v30 = vpop.f32.mrb[15].mxu1 }
 0x331   :  { %v788_v31 = vadd.f32 %v787_v28, %v785_v21  ;;  %v4261_v30 = vld [vmem:[%s6241_s7] sm:$0xff]  }
 0x332   :  { %v813_v32 = vsel %vm6189_vm13, %v801_v29, 0.0  ;;  %4116 = vmatpush3.bf16.msra.mxu0 %v4261_v30 }
 0x333   :  { %v789_v33 = vrot.slane %v788_v31, 4  ;;  %v814_v41 = vadd.f32 %v813_v32, %v812_v23  ;;  %4117 = vmatprep.subr.bf16.mxu0 %v4384_v38  ;;  %v4263_v32 = vld [vmem:[%s6241_s7 + $0x10] sm:$0xff]  }
 0x335   :  { %v790_v49 = vadd.f32 %v789_v33, %v788_v31  ;;  %v815_v52 = vrot.slane %v814_v41, 4  ;;  %v4262_v31 = vld [vmem:[%s6241_s7 + $0x8] sm:$0xff]   ;;  %v4264_v33 = vld [vmem:[%s6241_s7 + $0x18] sm:$0xff]  }
 0x336   :  { %4118 = vmatpush3.bf16.msra.mxu0 %v4262_v31 }
 0x337   :  { %v791_v53 = vrot.slane %v790_v49, 2  ;;  %v816_v47 = vadd.f32 %v815_v52, %v814_v41  ;;  %4119 = vmatprep.subr.bf16.mxu0 %v4384_v38  ;;  %v4265_v41 = vld [vmem:[%s6241_s7 + $0x20] sm:$0xff]   ;;  %v4267_v52 = vld [vmem:[%s6241_s7 + $0x30] sm:$0xff]  }
 0x339   :  { %v792_v57 = vadd.f32 %v791_v53, %v790_v49  ;;  %v817_v36 = vrot.slane %v816_v47, 2  ;;  %v4266_v49 = vld [vmem:[%s6241_s7 + $0x28] sm:$0xff]   ;;  %s6215_s7 = smov 88  }
 0x33a   :  { %4120 = vmatpush3.bf16.msra.mxu0 %v4263_v32 }
 0x33b   :  { %v793_v58 = vrot.slane %v792_v57, 1  ;;  %v818_v37 = vadd.f32 %v817_v36, %v816_v47  ;;  %4121 = vmatprep.subr.bf16.mxu0 %v4384_v38 }
 0x33d   :  { %v794_v39 = vadd.f32 %v793_v58, %v792_v57  ;;  %v819_v43 = vrot.slane %v818_v37, 1 }
 0x33e   :  { %4122 = vmatpush3.bf16.msra.mxu0 %v4264_v33 }
 0x33f   :  { %v820_v59 = vadd.f32 %v819_v43, %v818_v37  ;;  %v821_v35 = vmul.f32 0.01923077, %v794_v39  ;;  %4123 = vmatprep.subr.bf16.mxu0 %v4384_v38 }
 0x341   :  { %v822_v44 = vmul.f32 0.01923077, %v820_v59  ;;  %v823_v61 = vmul.f32 %v821_v35, %v821_v35  ;;  %v831_v62 = vsub.f32 %v769_v25, %v821_v35  ;;  %v826_v63 = vsub.f32 %v4916_v54, %v821_v35 }
 0x342   :  { %v825_v0 = vsub.f32 %v4912_v48, %v821_v35  ;;  %v827_v2 = vsub.f32 %v4926_v60, %v821_v35  ;;  %v829_v3 = vsub.f32 %v761_v10, %v821_v35  ;;  %v828_v4 = vsub.f32 %v4932_v1, %v821_v35  ;;  %4124 = vmatpush3.bf16.msra.mxu0 %v4265_v41 }
 0x343   :  { %v824_v5 = vsub.f32 %v822_v44, %v823_v61  ;;  %v830_v6 = vsub.f32 %v764_v15, %v821_v35  ;;  %4125 = vmatprep.subr.bf16.mxu0 %v4384_v38 }
 0x345   :  { %v832_v7 = vadd.f32 1e-05, %v824_v5 }
 0x346   :  { %4126 = vmatpush3.bf16.msra.mxu0 %v4266_v49 }
 0x347   :  { %4304 = vrsqrt.f32 %v832_v7  ;;  %4127 = vmatprep.subr.bf16.mxu0 %v4384_v38 }
 0x34a   :  { %4128 = vmatpush3.bf16.msra.mxu0 %v4267_v52 }
 0x34b   :  { %1705 = vmatprep.subr.bf16.mxu0 %v4385_v40 }
 0x351   :  { %v4305_v51 = vpop.eup %4304 }
 0x352   :  { %v840_v9 = vmul.f32 %v4305_v51, %v831_v62  ;;  %v835_v54 = vmul.f32 %v4305_v51, %v826_v63  ;;  %v834_v11 = vmul.f32 %v4305_v51, %v825_v0  ;;  %v836_v48 = vmul.f32 %v4305_v51, %v827_v2 }
 0x353   :  { %v838_v12 = vmul.f32 %v4305_v51, %v829_v3  ;;  %v837_v60 = vmul.f32 %v4305_v51, %v828_v4  ;;  %v839_v10 = vmul.f32 %v4305_v51, %v830_v6 }
 0x354   :  { %v851_v13 = vmul.f32 %v844_v55, %v840_v9  ;;  %v846_v1 = vmul.f32 %v844_v55, %v835_v54  ;;  %v845_v14 = vmul.f32 %v844_v55, %v834_v11  ;;  %v847_v15 = vmul.f32 %v844_v55, %v836_v48 }
 0x355   :  { %v849_v16 = vmul.f32 %v844_v55, %v838_v12  ;;  %v848_v17 = vmul.f32 %v844_v55, %v837_v60  ;;  %v850_v18 = vmul.f32 %v844_v55, %v839_v10 }
 0x356   :  { %v857_v46 = vadd.f32 %v855_v56, %v846_v1  ;;  %v856_v19 = vadd.f32 %v855_v56, %v845_v14  ;;  %v858_v20 = vadd.f32 %v855_v56, %v847_v15  ;;  %v4954_v21 = vadd.f32 %v855_v56, %v851_v13 }
 0x357   :  { %v860_v34 = vadd.f32 %v855_v56, %v849_v16  ;;  %v859_v22 = vadd.f32 %v855_v56, %v848_v17  ;;  %v861_v23 = vadd.f32 %v855_v56, %v850_v18 }
 0x358   :  { %v864_v24 = vmax.f32 %v857_v46, 0.0  ;;  %v863_v25 = vmax.f32 %v856_v19, 0.0  ;;  %v865_v26 = vmax.f32 %v858_v20, 0.0  ;;  %v869_v53 = vmax.f32 %v4954_v21, 0.0 }
 0x359   :  { %v4956_v27 = vmax.f32 %v860_v34, 0.0  ;;  %v4958_v28 = vmax.f32 %v859_v22, 0.0  ;;  %v4960_v29 = vmax.f32 %v861_v23, 0.0 }
 0x35a   :  { %878 = vrot.lane.b32.xlu1 %v864_v24, %s6209_s1  ;;  %871 = vst.msk [vmem:[#allocation4 + $0x8] sm:$0xff] %vm6193_vm6, %v864_v24  ;;  %876 = vrot.lane.b32.xlu0 %v863_v25, %s6209_s1  ;;  %870 = vst.msk [vmem:[#allocation4] sm:$0xff] %vm6193_vm6, %v863_v25 }
 0x35b   :  { %872 = vst.msk [vmem:[#allocation4 + $0x10] sm:$0xf] %vm6189_vm13, %v865_v26  ;;  %vm919_vm13 = vcmask 522624  }
 0x35c   :  { %976 = vst.msk [vmem:[#allocation4 + $0x1a] sm:$0xff] %vm6193_vm6, %v4956_v27  ;;  %vm6197_vm6 = vcmask 260224  }
 0x35d   :  { %975 = vst.msk [vmem:[#allocation4 + $0x12] sm:$0xfc] %vm6187_vm2, %v4958_v28  ;;  %vm6191_vm2 = vcmask 523651  }
 0x35e   :  { %978 = vst.msk [vmem:[#allocation4 + $0x22] sm:$0x3f] %vm6186_vm0, %v4960_v29  ;;  %891 = vrot.lane.b32.xlu1 %v863_v25, %s6205_s6  ;;  %880 = vrot.lane.b32.xlu0 %v865_v26, %s6209_s1  ;;  %vm6219_vm0 = vcmask 523648  }
 0x362   :  { %895 = vrot.lane.b32.xlu1 %v865_v26, %s6205_s6  ;;  %893 = vrot.lane.b32.xlu0 %v864_v24, %s6205_s6 }
 0x366   :  { %908 = vrot.lane.b32.xlu1 %v864_v24, %s6224_s0  ;;  %906 = vrot.lane.b32.xlu0 %v863_v25, %s6224_s0 }
 0x36a   :  { %921 = vrot.lane.b32.xlu1 %v863_v25, %s6201_s25  ;;  %910 = vrot.lane.b32.xlu0 %v865_v26, %s6224_s0 }
 0x36e   :  { %925 = vrot.lane.b32.xlu1 %v865_v26, %s6201_s25  ;;  %923 = vrot.lane.b32.xlu0 %v864_v24, %s6201_s25 }
 0x372   :  { %938 = vrot.lane.b32.xlu1 %v864_v24, %s4391_s30  ;;  %936 = vrot.lane.b32.xlu0 %v863_v25, %s4391_s30 }
 0x376   :  { %955 = vrot.lane.b32.xlu1 %v863_v25, %s6203_s26  ;;  %940 = vrot.lane.b32.xlu0 %v865_v26, %s4391_s30 }
 0x37a   :  { %959 = vrot.lane.b32.xlu1 %v865_v26, %s6203_s26  ;;  %957 = vrot.lane.b32.xlu0 %v864_v24, %s6203_s26 }
 0x37e   :  { %983 = vrot.lane.b32.xlu1 %v4956_v27, %s6209_s1  ;;  %981 = vrot.lane.b32.xlu0 %v4958_v28, %s6209_s1 }
 0x382   :  { %995 = vrot.lane.b32.xlu1 %v4958_v28, %s6205_s6  ;;  %985 = vrot.lane.b32.xlu0 %v4960_v29, %s6209_s1 }
 0x386   :  { %999 = vrot.lane.b32.xlu1 %v4960_v29, %s6205_s6  ;;  %997 = vrot.lane.b32.xlu0 %v4956_v27, %s6205_s6 }
 0x38a   :  { %1011 = vrot.lane.b32.xlu1 %v4956_v27, %s6224_s0  ;;  %1009 = vrot.lane.b32.xlu0 %v4958_v28, %s6224_s0 }
 0x38e   :  { %1027 = vrot.lane.b32.xlu1 %v4958_v28, %s6201_s25  ;;  %1013 = vrot.lane.b32.xlu0 %v4960_v29, %s6224_s0 }
 0x392   :  { %1031 = vrot.lane.b32.xlu1 %v4960_v29, %s6201_s25  ;;  %1029 = vrot.lane.b32.xlu0 %v4956_v27, %s6201_s25 }
 0x396   :  { %1045 = vrot.lane.b32.xlu1 %v4956_v27, %s4391_s30  ;;  %942 = vrot.lane.b32.xlu0 %v4958_v28, %s4391_s30 }
 0x39a   :  { %961 = vrot.lane.b32.xlu1 %v4958_v28, %s6203_s26  ;;  %1047 = vrot.lane.b32.xlu0 %v4960_v29, %s4391_s30  ;;  %v5119_v28 = vld [vmem:[%s6242_s4] sm:$0x7]  ;;  %s6222_s4 = smov 56  }
 0x39e   :  { %1062 = vrot.lane.b32.xlu1 %v4960_v29, %s6203_s26  ;;  %1060 = vrot.lane.b32.xlu0 %v4956_v27, %s6203_s26  ;;  %v1099_v29 = vrot.slane %v5119_v28, %v4644_v45 }
 0x3a2   :  { %1033 = vrot.lane.b32.xlu1 %v869_v53, %s6201_s25  ;;  %1015 = vrot.lane.b32.xlu0 %v869_v53, %s6224_s0 }
 0x3a6   :  { %1064 = vrot.lane.b32.xlu1 %v869_v53, %s6203_s26  ;;  %1049 = vrot.lane.b32.xlu0 %v869_v53, %s4391_s30 }
 0x3cc   :  { %v879_v47 = vpop.permute.xlu1 %878  ;;  %v877_v57 = vpop.permute.xlu0 %876 }
 0x3cd   :  { %888 = vst.msk [vmem:[#allocation4 + $0x7] sm:$0xff] %vm6220_vm5, %v879_v47 }
 0x3ce   :  { %886 = vst.msk [vmem:[#allocation4 - $0x1] sm:$0xfe] %vm6188_vm1, %v877_v57  ;;  %vm6192_vm1 = vcmask 654852  }
 0x3d0   :  { %v892_v36 = vpop.permute.xlu1 %891  ;;  %v881_v58 = vpop.permute.xlu0 %880 }
 0x3d1   :  { %901 = vst.msk [vmem:[#allocation4 - $0x2] sm:$0xfc] %vm6190_vm8, %v892_v36  ;;  %vm948_vm8 = vcmask 786053  }
 0x3d2   :  { %890 = vst.msk [vmem:[#allocation4 + $0xf] sm:$0x1f] %vm889_vm7, %v881_v58  ;;  %vm6200_vm7 = vcmask 654848  }
 0x3d4   :  { %v896_v37 = vpop.permute.xlu1 %895  ;;  %v894_v39 = vpop.permute.xlu0 %893 }
 0x3d5   :  { %905 = vst.msk [vmem:[#allocation4 + $0xe] sm:$0x3f] %vm904_vm12, %v896_v37  ;;  %vm950_vm12 = vcmask 786048  }
 0x3d6   :  { %903 = vst.msk [vmem:[#allocation4 + $0x6] sm:$0xff] %vm6196_vm10, %v894_v39 }
 0x3d8   :  { %v909_v43 = vpop.permute.xlu1 %908  ;;  %v907_v59 = vpop.permute.xlu0 %906 }
 0x3d9   :  { %918 = vst.msk [vmem:[#allocation4 + $0x5] sm:$0xff] %vm6219_vm0, %v909_v43 }
 0x3da   :  { %916 = vst.msk [vmem:[#allocation4 - $0x3] sm:$0xf8] %vm6191_vm2, %v907_v59  ;;  %vm967_vm2 = vcmask 917254  }
 0x3dc   :  { %v922_v35 = vpop.permute.xlu1 %921  ;;  %v911_v44 = vpop.permute.xlu0 %910 }
 0x3dd   :  { %931 = vst.msk [vmem:[#allocation4 - $0x4] sm:$0xf0] %vm6192_vm1, %v922_v35  ;;  %vm6194_vm1 = vcmask 261251  }
 0x3de   :  { %920 = vst.msk [vmem:[#allocation4 + $0xd] sm:$0x7f] %vm919_vm13, %v911_v44  ;;  %vm969_vm13 = vcmask 917248  }
 0x3e0   :  { %v926_v61 = vpop.permute.xlu1 %925  ;;  %v924_v62 = vpop.permute.xlu0 %923 }
 0x3e1   :  { %934 = vst.msk [vmem:[#allocation4 + $0xc] sm:$0xff] %vm6200_vm7, %v926_v61  ;;  %933 = vst.msk [vmem:[#allocation4 + $0x4] sm:$0xff] %vm6200_vm7, %v924_v62 }
 0x3e4   :  { %v939_v63 = vpop.permute.xlu1 %938  ;;  %v937_v0 = vpop.permute.xlu0 %936 }
 0x3e5   :  { %951 = vst.msk [vmem:[#allocation4 + $0x3] sm:$0xff] %vm950_vm12, %v939_v63 }
 0x3e6   :  { %949 = vst.msk [vmem:[#allocation4 - $0x5] sm:$0xe0] %vm948_vm8, %v937_v0  ;;  %vm6195_vm8 = vcmask 392452  }
 0x3e8   :  { %v956_v2 = vpop.permute.xlu1 %955  ;;  %v941_v3 = vpop.permute.xlu0 %940 }
 0x3e9   :  { %968 = vst.msk [vmem:[#allocation4 - $0x6] sm:$0xc0] %vm967_vm2, %v956_v2  ;;  %vm1142_vm2 = vcmask 916480  }
 0x3ea   :  { %952 = vst.msk [vmem:[#allocation4 + $0xb] sm:$0xff] %vm950_vm12, %v941_v3 }
 0x3ec   :  { %v960_v4 = vpop.permute.xlu1 %959  ;;  %v958_v5 = vpop.permute.xlu0 %957 }
 0x3ed   :  { %971 = vst.msk [vmem:[#allocation4 + $0xa] sm:$0xff] %vm969_vm13, %v960_v4  ;;  %970 = vst.msk [vmem:[#allocation4 + $0x2] sm:$0xff] %vm969_vm13, %v958_v5 }
 0x3f0   :  { %v984_v6 = vpop.permute.xlu1 %983  ;;  %v982_v7 = vpop.permute.xlu0 %981 }
 0x3f1   :  { %992 = vst.msk [vmem:[#allocation4 + $0x19] sm:$0xff] %vm6220_vm5, %v984_v6  ;;  %vm1377_vm5 = vcmask 778944  }
 0x3f2   :  { %991 = vst.msk [vmem:[#allocation4 + $0x11] sm:$0xf8] %vm6194_vm1, %v982_v7  ;;  %vm6198_vm1 = vcmask 523653  }
 0x3f4   :  { %v996_v55 = vpop.permute.xlu1 %995  ;;  %v986_v51 = vpop.permute.xlu0 %985  ;;  %v1073_v56 = vld [vmem:[#allocation4] sm:$0xff]  ;;  %v1074_v9 = vld [vmem:[#allocation4 + $0x8] sm:$0xff] }
 0x3f5   :  { %1005 = vst.msk [vmem:[#allocation4 + $0x10] sm:$0xf0] %vm6195_vm8, %v996_v55  ;;  %v1078_v54 = vpack.c.bf16 %v1074_v9, %v1073_v56  ;;  %vm6199_vm8 = vcmask 654854  }
 0x3f6   :  { %994 = vst.msk [vmem:[#allocation4 + $0x21] sm:$0x7f] %vm6197_vm6, %v986_v51  ;;  %vm1054_vm6 = vcmask 786055  }
 0x3f7   :  { %4130 = vmatmul.mubr.msk.bf16.vlgmr.msra.gmra.mrb[8].mxu0 %vm1142_vm2, %v1078_v54 }
 0x3f8   :  { %v1000_v11 = vpop.permute.xlu1 %999  ;;  %v998_v48 = vpop.permute.xlu0 %997  ;;  %4133 = vmatprep.mubr.msk.bf16.mxu0 %vm4392_vm15, %v4384_v38 }
 0x3f9   :  { %1007 = vst.msk [vmem:[#allocation4 + $0x20] sm:$0xff] %vm6196_vm10, %v1000_v11  ;;  %1006 = vst.msk [vmem:[#allocation4 + $0x18] sm:$0xff] %vm6196_vm10, %v998_v48  ;;  %vm953_vm10 = vcmask 778880  }
 0x3fc   :  { %v1012_v12 = vpop.permute.xlu1 %1011  ;;  %v1010_v60 = vpop.permute.xlu0 %1009 }
 0x3fd   :  { %1023 = vst.msk [vmem:[#allocation4 + $0x17] sm:$0xff] %vm6219_vm0, %v1012_v12 }
 0x3fe   :  { %1022 = vst.msk [vmem:[#allocation4 + $0xf] sm:$0xe0] %vm6198_vm1, %v1010_v60  ;;  %vm972_vm1 = vcmask 911104  }
 0x400   :  { %v1028_v10 = vpop.permute.xlu1 %1027  ;;  %v1014_v13 = vpop.permute.xlu0 %1013 }
 0x401   :  { %1040 = vst.msk [vmem:[#allocation4 + $0xe] sm:$0xc0] %vm6199_vm8, %v1028_v10  ;;  %vm6218_vm8 = vcmask 516480  }
 0x402   :  { %1024 = vst.msk [vmem:[#allocation4 + $0x1f] sm:$0xff] %vm6219_vm0, %v1014_v13  ;;  %vm1364_vm0 = vcmask 647744  }
 0x404   :  { %v1032_v1 = vpop.permute.xlu1 %1031  ;;  %v1030_v14 = vpop.permute.xlu0 %1029 }
 0x405   :  { %1042 = vst.msk [vmem:[#allocation4 + $0x1e] sm:$0xff] %vm6200_vm7, %v1032_v1  ;;  %1041 = vst.msk [vmem:[#allocation4 + $0x16] sm:$0xff] %vm6200_vm7, %v1030_v14  ;;  %vm6217_vm7 = vcmask 648704  }
 0x408   :  { %v1046_v15 = vpop.permute.xlu1 %1045  ;;  %v943_v16 = vpop.permute.xlu0 %942 }
 0x409   :  { %1056 = vst.msk [vmem:[#allocation4 + $0x15] sm:$0xff] %vm950_vm12, %v1046_v15 }
 0x40a   :  { %954 = vst.msk [vmem:[#allocation4 + $0x13] sm:$0x1] %vm953_vm10, %v943_v16  ;;  %vm1058_vm10 = vcmask 780928  }
 0x40b   :  { %1055 = vst.msk [vmem:[#allocation4 + $0xd] sm:$0x80] %vm1054_vm6, %v943_v16  ;;  %vm1071_vm6 = vcmask 913152  }
 0x40c   :  { %v962_v17 = vpop.permute.xlu1 %961  ;;  %v1048_v18 = vpop.permute.xlu0 %1047 }
 0x40d   :  { %973 = vst.msk [vmem:[#allocation4 + $0x12] sm:$0x3] %vm972_vm1, %v962_v17  ;;  %vm1208_vm1 = vcmask 64512  }
 0x40e   :  { %1057 = vst.msk [vmem:[#allocation4 + $0x1d] sm:$0xff] %vm950_vm12, %v1048_v18  ;;  %vm6221_vm12 = vcmask 57344  }
 0x40f   :  { %2678 = vst.msk [vmem:[#allocation6] sm:$0xff] %vm1208_vm1, %v4384_v38  ;;  %2679 = vst.msk [vmem:[#allocation6 + $0x8] sm:$0xff] %vm1208_vm1, %v4384_v38 }
 0x410   :  { %v1063_v46 = vpop.permute.xlu1 %1062  ;;  %v1061_v19 = vpop.permute.xlu0 %1060  ;;  %2680 = vst.msk [vmem:[#allocation6 + $0x10] sm:$0xff] %vm1208_vm1, %v4384_v38  ;;  %2681 = vst.msk [vmem:[#allocation6 + $0x18] sm:$0xff] %vm1208_vm1, %v4384_v38 }
 0x411   :  { %1070 = vst.msk [vmem:[#allocation4 + $0x1c] sm:$0xff] %vm969_vm13, %v1063_v46  ;;  %1069 = vst.msk [vmem:[#allocation4 + $0x14] sm:$0xff] %vm969_vm13, %v1061_v19  ;;  %vm1304_vm13 = vcmask 188544  }
 0x412   :  { %2682 = vst.msk [vmem:[#allocation6 + $0x20] sm:$0xff] %vm1208_vm1, %v4384_v38  ;;  %2683 = vst.msk [vmem:[#allocation6 + $0x28] sm:$0xff] %vm1208_vm1, %v4384_v38 }
 0x413   :  { %2684 = vst.msk [vmem:[#allocation6 + $0x30] sm:$0xff] %vm1208_vm1, %v4384_v38  ;;  %2685 = vst.msk [vmem:[#allocation6 + $0x38] sm:$0xff] %vm1208_vm1, %v4384_v38 }
 0x414   :  { %v1034_v20 = vpop.permute.xlu1 %1033  ;;  %v1016_v21 = vpop.permute.xlu0 %1015 }
 0x415   :  { %1026 = vst.msk [vmem:[#allocation4 + $0x27] sm:$0x1] %vm6218_vm8, %v1016_v21  ;;  %vm1344_vm8 = vcmask 516544  }
 0x416   :  { %1044 = vst.msk [vmem:[#allocation4 + $0x26] sm:$0x3] %vm6217_vm7, %v1034_v20  ;;  %vm1337_vm7 = vcmask 450944  }
 0x418   :  { %v1065_v34 = vpop.permute.xlu1 %1064  ;;  %v1050_v22 = vpop.permute.xlu0 %1049  ;;  %v1075_v23 = vld [vmem:[#allocation4 + $0x10] sm:$0xff]  ;;  %v1076_v24 = vld [vmem:[#allocation4 + $0x18] sm:$0xff] }
 0x419   :  { %1059 = vst.msk [vmem:[#allocation4 + $0x25] sm:$0x7] %vm1058_vm10, %v1050_v22  ;;  %v1079_v25 = vpack.c.bf16 %v1076_v24, %v1075_v23  ;;  %vm1324_vm10 = vcmask 319744  }
 0x41a   :  { %1072 = vst.msk [vmem:[#allocation4 + $0x24] sm:$0xf] %vm1071_vm6, %v1065_v34  ;;  %vm1331_vm6 = vcmask 385344  }
 0x41b   :  { %4134 = vmatmul.mubr.msk.bf16.gmra.mrb[12].mxu0 %vm1142_vm2, %v1079_v25 }
 0x41c   :  { %4137 = vmatprep.mubr.msk.bf16.mxu0 %vm4392_vm15, %v4384_v38 }
 0x421   :  { %v1077_v26 = vld [vmem:[#allocation4 + $0x20] sm:$0xff] }
 0x422   :  { %v1080_v27 = vpack.c.bf16 %v1077_v26, %v1077_v26 }
 0x424   :  { %4138 = vmatmul.mubr.msk.bf16.gmra.mrb[16].mxu0 %vm1142_vm2, %v1080_v27  ;;  %vm1311_vm2 = vcmask 254144  }
 0x4ca   :  { %v1186_v30 = vpop.f32.mrb[8].mxu0 }
 0x4cb   :  { %v5123_v31 = vadd.f32 %v1186_v30, %v1099_v29  ;;  %v4131_v32 = vpop.f32.mrb[9].mxu0 }
 0x4cc   :  { %v1189_v33 = vpop.f32.mrb[10].mxu0 }
 0x4cd   :  { %v1224_v41 = vmul.f32 %v5123_v31, %v5123_v31  ;;  %v5127_v49 = vadd.f32 %v1189_v33, %v1099_v29  ;;  %v4132_v52 = vpop.f32.mrb[11].mxu0  ;;  %v1209_v53 = vsel %vm1208_vm1, %v5123_v31, 0.0 }
 0x4cf   :  { %v1210_v47 = vsel %vm1208_vm1, %v5127_v49, 0.0  ;;  %v1225_v57 = vmul.f32 %v5127_v49, %v5127_v49  ;;  %v1229_v58 = vsel %vm1208_vm1, %v1224_v41, 0.0 }
 0x4d0   :  { %v1211_v36 = vadd.f32 %v1210_v47, %v1209_v53  ;;  %v4393_v53 = vmov 1983009808  }
 0x4d1   :  { %v1230_v37 = vsel %vm1208_vm1, %v1225_v57, 0.0  ;;  %v1287_v47 = vunpack.c.l.s4 %v4393_v53  ;;  %v1263_v57 = vrot.slane %v5119_v28, %v4713_v8  ;;  %v4270_v53 = vld [vmem:[%s6243_s29 + $0x10] sm:$0xff]  }
 0x4d2   :  { %v1231_v39 = vadd.f32 %v1230_v37, %v1229_v58  ;;  %v1272_v58 = vrot.slane %v5119_v28, %v4716_v50 }
 0x4d3   :  { %v1288_v37 = vunpack.c.0.s8 %v1287_v47 }
 0x4ee   :  { %v1194_v43 = vpop.f32.mrb[12].mxu0 }
 0x4ef   :  { %v1195_v59 = vadd.f32 %v1194_v43, %v1099_v29  ;;  %v4135_v35 = vpop.f32.mrb[13].mxu0 }
 0x4f0   :  { %v1197_v44 = vpop.f32.mrb[14].mxu0 }
 0x4f1   :  { %v1212_v61 = vsel %vm1208_vm1, %v1195_v59, 0.0  ;;  %v1226_v62 = vmul.f32 %v1195_v59, %v1195_v59  ;;  %v1198_v63 = vadd.f32 %v1197_v44, %v1099_v29  ;;  %v4136_v0 = vpop.f32.mrb[15].mxu0 }
 0x4f2   :  { %v1213_v2 = vadd.f32 %v1212_v61, %v1211_v36 }
 0x4f3   :  { %v1232_v3 = vsel %vm1208_vm1, %v1226_v62, 0.0  ;;  %v1214_v4 = vsel %vm1208_vm1, %v1198_v63, 0.0  ;;  %v1227_v5 = vmul.f32 %v1198_v63, %v1198_v63 }
 0x4f4   :  { %v1233_v6 = vadd.f32 %v1232_v3, %v1231_v39  ;;  %v1215_v7 = vadd.f32 %v1214_v4, %v1213_v2 }
 0x4f5   :  { %v1234_v55 = vsel %vm1208_vm1, %v1227_v5, 0.0 }
 0x4f6   :  { %v1235_v51 = vadd.f32 %v1234_v55, %v1233_v6 }
 0x4f7   :  { %v1202_v56 = vpop.f32.mrb[16].mxu0 }
 0x4f8   :  { %v1203_v9 = vadd.f32 %v1202_v56, %v1099_v29  ;;  %v4139_v54 = vpop.f32.mrb[17].mxu0 }
 0x4f9   :  { %v1205_v11 = vpop.f32.mrb[18].mxu0 }
 0x4fa   :  { %v1216_v48 = vsel %vm1208_vm1, %v1203_v9, 0.0  ;;  %v1228_v12 = vmul.f32 %v1203_v9, %v1203_v9  ;;  %v4140_v60 = vpop.f32.mrb[19].mxu0 }
 0x4fb   :  { %v1217_v10 = vadd.f32 %v1216_v48, %v1215_v7 }
 0x4fc   :  { %v1236_v13 = vsel %vm1208_vm1, %v1228_v12, 0.0 }
 0x4fd   :  { %v1218_v1 = vrot.slane %v1217_v10, 4  ;;  %v1237_v14 = vadd.f32 %v1236_v13, %v1235_v51 }
 0x4ff   :  { %v1219_v15 = vadd.f32 %v1218_v1, %v1217_v10  ;;  %v1238_v16 = vrot.slane %v1237_v14, 4 }
 0x501   :  { %v1220_v17 = vrot.slane %v1219_v15, 2  ;;  %v1239_v18 = vadd.f32 %v1238_v16, %v1237_v14 }
 0x503   :  { %v1221_v46 = vadd.f32 %v1220_v17, %v1219_v15  ;;  %v1240_v19 = vrot.slane %v1239_v18, 2 }
 0x505   :  { %v1222_v20 = vrot.slane %v1221_v46, 1  ;;  %v1241_v21 = vadd.f32 %v1240_v19, %v1239_v18 }
 0x507   :  { %v1223_v34 = vadd.f32 %v1222_v20, %v1221_v46  ;;  %v1242_v22 = vrot.slane %v1241_v21, 1 }
 0x509   :  { %v1243_v23 = vadd.f32 %v1242_v22, %v1241_v21  ;;  %v1244_v24 = vmul.f32 0.025, %v1223_v34 }
 0x50b   :  { %v1245_v25 = vmul.f32 0.025, %v1243_v23  ;;  %v1246_v26 = vmul.f32 %v1244_v24, %v1244_v24  ;;  %v1252_v27 = vsub.f32 %v1203_v9, %v1244_v24  ;;  %v1251_v29 = vsub.f32 %v1198_v63, %v1244_v24 }
 0x50c   :  { %v1249_v30 = vsub.f32 %v5127_v49, %v1244_v24  ;;  %v1248_v32 = vsub.f32 %v5123_v31, %v1244_v24  ;;  %v1250_v33 = vsub.f32 %v1195_v59, %v1244_v24  ;;  %v1291_v63 = vsub.s32 %v1288_v37, %v4633_v42 }
 0x50d   :  { %v1247_v41 = vsub.f32 %v1245_v25, %v1246_v26 }
 0x50f   :  { %v1253_v52 = vadd.f32 1e-05, %v1247_v41 }
 0x511   :  { %4306 = vrsqrt.f32 %v1253_v52 }
 0x51b   :  { %v4307_v36 = vpop.eup %4306 }
 0x51c   :  { %v1259_v39 = vmul.f32 %v4307_v36, %v1252_v27  ;;  %v1258_v43 = vmul.f32 %v4307_v36, %v1251_v29  ;;  %v1256_v35 = vmul.f32 %v4307_v36, %v1249_v30  ;;  %v1255_v49 = vmul.f32 %v4307_v36, %v1248_v32  ;;  %v4268_v32 = vld [vmem:[%s6243_s29] sm:$0xff]  }
 0x51d   :  { %v1257_v44 = vmul.f32 %v4307_v36, %v1250_v33  ;;  %1706 = vmatpush1.bf16.msra.mxu0 %v4268_v32  ;;  %v4269_v33 = vld [vmem:[%s6243_s29 + $0x8] sm:$0xff]   ;;  %v4271_v36 = vld [vmem:[%s6243_s29 + $0x18] sm:$0xff]  }
 0x51e   :  { %v1267_v31 = vmul.f32 %v1263_v57, %v1258_v43  ;;  %v1265_v59 = vmul.f32 %v1263_v57, %v1256_v35  ;;  %v1268_v61 = vmul.f32 %v1263_v57, %v1259_v39  ;;  %v1264_v62 = vmul.f32 %v1263_v57, %v1255_v49  ;;  %1707 = vmatprep.subr.bf16.mxu0 %v4385_v40  ;;  %v4272_v35 = vld [vmem:[%s6243_s29 + $0x20] sm:$0xff]  }
 0x51f   :  { %v1266_v0 = vmul.f32 %v1263_v57, %v1257_v44 }
 0x520   :  { %v1276_v2 = vadd.f32 %v1272_v58, %v1267_v31  ;;  %v1274_v3 = vadd.f32 %v1272_v58, %v1265_v59  ;;  %v1277_v4 = vadd.f32 %v1272_v58, %v1268_v61  ;;  %v1273_v5 = vadd.f32 %v1272_v58, %v1264_v62  ;;  %v4273_v31 = vld [vmem:[%s6243_s29 + $0x28] sm:$0xff]   ;;  %v4274_v62 = vld [vmem:[%s6243_s29 + $0x30] sm:$0xff]  }
 0x521   :  { %v1275_v6 = vadd.f32 %v1272_v58, %v1266_v0  ;;  %1708 = vmatpush1.bf16.msra.mxu0 %v4269_v33 }
 0x522   :  { %v1281_v28 = vmax.f32 %v1276_v2, 0.0  ;;  %v1279_v7 = vmax.f32 %v1274_v3, 0.0  ;;  %v1282_v55 = vmax.f32 %v1277_v4, 0.0  ;;  %v1278_v51 = vmax.f32 %v1273_v5, 0.0  ;;  %1709 = vmatprep.subr.bf16.mxu0 %v4385_v40  ;;  %v4275_v2 = vld [vmem:[%s6243_s29 + $0x38] sm:$0xff]   ;;  %v4276_v5 = vld [vmem:[%s6243_s29 + $0x40] sm:$0xff]  }
 0x523   :  { %v1280_v56 = vmax.f32 %v1275_v6, 0.0 }
 0x524   :  { %v1472_v9 = vrot.slane %v1281_v28, %v1291_v63  ;;  %v1353_v54 = vrot.slane %v1279_v7, %v1291_v63  ;;  %v1552_v11 = vcombine.high %v1282_v55, %v1282_v55  ;;  %1284 = vst.msk [vmem:[#allocation5] sm:$0x1] %vm6221_vm12, %v1278_v51  ;;  %v1530_v60 = vrot.slane %v1282_v55, %v1291_v63  ;;  %v4278_v55 = vld [vmem:[%s6243_s29 + $0x50] ss:$0 sps:$4 sm:$0x11]  }
 0x525   :  { %1412 = vst.msk [vmem:[#allocation5 + $0x2] sm:$0x1] %vm6221_vm12, %v1280_v56  ;;  %v1292_v10 = vrot.slane %v1278_v51, %v1291_v63  ;;  %v1438_v13 = vcombine.high %v1280_v56, %v1280_v56  ;;  %v1494_v16 = vcombine.high %v1281_v28, %v1281_v28  ;;  %v1420_v46 = vrot.slane %v1280_v56, %v1291_v63 }
 0x526   :  { %1473 = vrot.lane.b32.xlu1 %v1472_v9, %s6205_s6  ;;  %1354 = vrot.lane.b32.xlu0 %v1353_v54, %s6201_s25  ;;  %v5154_v48 = vrot.slane %v1552_v11, %v1291_v63  ;;  %v3998_v12 = vrot.slane %v1472_v9, 9  ;;  %v1483_v14 = vcombine.high %v1472_v9, %v1472_v9  ;;  %v1313_v19 = vcombine.high %v1278_v51, %v1278_v51 }
 0x527   :  { %v1445_v1 = vrot.slane %v1438_v13, %v1291_v63  ;;  %v3986_v15 = vrot.slane %v1292_v10, 9  ;;  %v1501_v17 = vrot.slane %v1494_v16, %v1291_v63  ;;  %v1300_v18 = vcombine.high %v1292_v10, %v1292_v10  ;;  %1710 = vmatpush1.bf16.msra.mxu0 %v4270_v53 }
 0x528   :  { %1561 = vst.msk [vmem:[#allocation5 + $0x3] sm:$0x1] %vm6221_vm12, %v5154_v48  ;;  %v3994_v20 = vrot.slane %v1420_v46, 9  ;;  %v1320_v21 = vrot.slane %v1313_v19, %v1291_v63  ;;  %v1427_v34 = vcombine.high %v1420_v46, %v1420_v46  ;;  %v3990_v22 = vrot.slane %v1353_v54, 9  ;;  %1711 = vmatprep.subr.bf16.mxu0 %v4385_v40 }
 0x529   :  { %1447 = vst.msk [vmem:[#allocation5 + $0x1] sm:$0x1] %vm6221_vm12, %v1445_v1  ;;  %v3996_v23 = vrot.slane %v1445_v1, 9  ;;  %v1366_v24 = vcombine.high %v1353_v54, %v1353_v54  ;;  %v1379_v25 = vcombine.high %v1279_v7, %v1279_v7  ;;  %v1454_v26 = vcombine.high %v1445_v1, %v1445_v1  ;;  %v4277_v7 = vld [vmem:[%s6243_s29 + $0x48] sm:$0xff]  }
 0x52a   :  { %1479 = vrot.lane.b32.xlu1 %v3998_v12, %s6211_s3  ;;  %1531 = vrot.lane.b32.xlu0 %v1530_v60, %s6203_s26  ;;  %v3999_v29 = vrot.slane %v1483_v14, 9  ;;  %v4002_v30 = vrot.slane %v1530_v60, 9  ;;  %v4000_v41 = vrot.slane %v1501_v17, 9  ;;  %v5182_v52 = vcombine.high %v1530_v60, %v1530_v60 }
 0x52b   :  { %v1386_v27 = vrot.slane %v1379_v25, %v1291_v63  ;;  %v3987_v47 = vrot.slane %v1300_v18, 9  ;;  %v1512_v57 = vcombine.high %v1501_v17, %v1501_v17  ;;  %v4004_v58 = vrot.slane %v5154_v48, 9  ;;  %1712 = vmatpush1.bf16.msra.mxu0 %v4271_v36 }
 0x52c   :  { %v3988_v37 = vrot.slane %v1320_v21, 9  ;;  %1713 = vmatprep.subr.bf16.mxu0 %v4385_v40  ;;  %v1568_v39 = vcombine.high %v5154_v48, %v5154_v48  ;;  %v1333_v43 = vcombine.high %v1320_v21, %v1320_v21  ;;  %v3995_v49 = vrot.slane %v1427_v34, 9 }
 0x52d   :  { %v3991_v44 = vrot.slane %v1366_v24, 9  ;;  %v3997_v59 = vrot.slane %v1454_v26, 9  ;;  %v3992_v61 = vrot.slane %v1386_v27, 9  ;;  %v4001_v63 = vrot.slane %v1512_v57, 9 }
 0x52e   :  { %1484 = vrot.lane.b32.xlu1 %v1483_v14, %s6224_s0  ;;  %1295 = vrot.lane.b32.xlu0 %v3986_v15, %s6207_s9  ;;  %v1399_v0 = vcombine.high %v1386_v27, %v1386_v27  ;;  %v4005_v3 = vrot.slane %v1568_v39, 9  ;;  %v3989_v4 = vrot.slane %v1333_v43, 9  ;;  %v4003_v6 = vrot.slane %v5182_v52, 9 }
 0x52f   :  { %1714 = vmatpush1.bf16.msra.mxu0 %v4272_v35  ;;  %v1701_v51 = vsel %vm561_vm4, 65535, %v4385_v40  ;;  %vm1298_vm4 = vcmask 122944   ;;  %vm1390_vm12 = vcmask 844544  }
 0x530   :  { %1715 = vmatprep.subr.bf16.mxu0 %v4385_v40  ;;  %v3993_v28 = vrot.slane %v1399_v0, 9  ;;  %v1703_v9 = vand.u32 %v4278_v55, %v1701_v51 }
 0x532   :  { %1502 = vrot.lane.b32.xlu1 %v1501_v17, %s6201_s25  ;;  %1301 = vrot.lane.b32.xlu0 %v1300_v18, %s6209_s1  ;;  %s4397_s25 = smov 104  }
 0x533   :  { %1716 = vmatpush1.bf16.msra.mxu0 %v4273_v31  ;;  %v4279_v31 = vld [vmem:[%s6158_s11] sm:$0xff]  }
 0x534   :  { %1717 = vmatprep.subr.bf16.mxu0 %v4385_v40 }
 0x536   :  { %1423 = vrot.lane.b32.xlu1 %v3994_v20, %s6207_s9  ;;  %1321 = vrot.lane.b32.xlu0 %v1320_v21, %s6205_s6  ;;  %s6213_s6 = smov 24  }
 0x537   :  { %1718 = vmatpush1.bf16.msra.mxu0 %v4274_v62 }
 0x538   :  { %1719 = vmatprep.subr.bf16.mxu0 %v4385_v40 }
 0x53a   :  { %1428 = vrot.lane.b32.xlu1 %v1427_v34, %s6209_s1  ;;  %1361 = vrot.lane.b32.xlu0 %v3990_v22, %s6226_s28 }
 0x53b   :  { %1720 = vmatpush1.bf16.msra.mxu0 %v4275_v2 }
 0x53c   :  { %1721 = vmatprep.subr.bf16.mxu0 %v4385_v40 }
 0x53e   :  { %1450 = vrot.lane.b32.xlu1 %v3996_v23, %s6207_s9  ;;  %1367 = vrot.lane.b32.xlu0 %v1366_v24, %s4391_s30 }
 0x53f   :  { %1722 = vmatpush1.bf16.msra.mxu0 %v4276_v5 }
 0x540   :  { %1723 = vmatprep.subr.bf16.mxu0 %v4385_v40 }
 0x542   :  { %1455 = vrot.lane.b32.xlu1 %v1454_v26, %s6209_s1  ;;  %1387 = vrot.lane.b32.xlu0 %v1386_v27, %s6203_s26  ;;  %s6245_s26 = smov 32  }
 0x543   :  { %1724 = vmatpush1.bf16.msra.mxu0 %v4277_v7 }
 0x544   :  { %1725 = vmatprep.subr.bf16.mxu0 %v4385_v40 }
 0x546   :  { %1490 = vrot.lane.b32.xlu1 %v3999_v29, %s6222_s4  ;;  %1537 = vrot.lane.b32.xlu0 %v4002_v30, %s4397_s25 }
 0x547   :  { %1726 = vmatpush1.bf16.msra.mxu0 %v1703_v9 }
 0x548   :  { %4141 = vmatprep.subr.bf16.mxu0 %v4384_v38 }
 0x54a   :  { %1508 = vrot.lane.b32.xlu1 %v4000_v41, %s6226_s28  ;;  %1542 = vrot.lane.b32.xlu0 %v5182_v52, %s4398_s5 }
 0x54e   :  { %1513 = vrot.lane.b32.xlu1 %v1512_v57, %s4391_s30  ;;  %1308 = vrot.lane.b32.xlu0 %v3987_v47, %s6213_s6 }
 0x552   :  { %1564 = vrot.lane.b32.xlu1 %v4004_v58, %s6207_s9  ;;  %1328 = vrot.lane.b32.xlu0 %v3988_v37, %s6211_s3 }
 0x556   :  { %1569 = vrot.lane.b32.xlu1 %v1568_v39, %s6209_s1  ;;  %1334 = vrot.lane.b32.xlu0 %v1333_v43, %s6224_s0  ;;  %s4401_s1 = smov 120  }
 0x55a   :  { %1434 = vrot.lane.b32.xlu1 %v3995_v49, %s6213_s6  ;;  %1374 = vrot.lane.b32.xlu0 %v3991_v44, %s6215_s7 }
 0x55e   :  { %1461 = vrot.lane.b32.xlu1 %v3997_v59, %s6213_s6  ;;  %1394 = vrot.lane.b32.xlu0 %v3992_v61, %s4397_s25  ;;  %v4280_v59 = vld [vmem:[%s6158_s11 + $0x8] sm:$0xff]   ;;  %v1628_v61 = vld [vmem:[%s6159_s10] sm:$0x7]  ;;  %s6249_s10 = smov 88   ;;  %s6250_s11 = smov 24  }
 0x55f   :  { %v1632_v62 = vrot.slane %v1628_v61, %v4644_v45 }
 0x562   :  { %1519 = vrot.lane.b32.xlu1 %v4001_v63, %s6215_s7  ;;  %1400 = vrot.lane.b32.xlu0 %v1399_v0, %s4398_s5  ;;  %s6244_s7 = sld [smem:[#allocation21_spill]] }
 0x566   :  { %1575 = vrot.lane.b32.xlu1 %v4005_v3, %s6213_s6  ;;  %1341 = vrot.lane.b32.xlu0 %v3989_v4, %s6222_s4 }
 0x568   :  { %v4006_v56 = vld.sshfl [vmem:[%s6244_s7] sm:$0x3 pattern:$0x76325410]  ;;  %s6246_s7 = smov 64  }
 0x56a   :  { %1548 = vrot.lane.b32.xlu1 %v4003_v6, %s4401_s1  ;;  %1407 = vrot.lane.b32.xlu0 %v3993_v28, %s4401_s1 }
 0x56e   :  { %1588 = vrot.lane.b32.xlu0 %v4006_v56, %s6245_s26 }
 0x598   :  { %v1474_v54 = vpop.permute.xlu1 %1473  ;;  %v5250_v11 = vpop.permute.xlu0 %1354 }
 0x59c   :  { %v1480_v48 = vpop.permute.xlu1 %1479  ;;  %v5252_v12 = vpop.permute.xlu0 %1531 }
 0x5a0   :  { %v1485_v60 = vpop.permute.xlu1 %1484  ;;  %v1296_v10 = vpop.permute.xlu0 %1295 }
 0x5a1   :  { %1299 = vst.msk [vmem:[#allocation5] sm:$0x1] %vm1298_vm4, %v1296_v10 }
 0x5a4   :  { %v1503_v13 = vpop.permute.xlu1 %1502  ;;  %v1302_v1 = vpop.permute.xlu0 %1301 }
 0x5a5   :  { %1305 = vst.msk [vmem:[#allocation5] sm:$0x1] %vm1304_vm13, %v1302_v1 }
 0x5a8   :  { %v1424_v14 = vpop.permute.xlu1 %1423  ;;  %v1322_v15 = vpop.permute.xlu0 %1321 }
 0x5a9   :  { %1426 = vst.msk [vmem:[#allocation5 + $0x2] sm:$0x1] %vm1298_vm4, %v1424_v14 }
 0x5ac   :  { %v1429_v16 = vpop.permute.xlu1 %1428  ;;  %v1362_v17 = vpop.permute.xlu0 %1361 }
 0x5ad   :  { %1431 = vst.msk [vmem:[#allocation5 + $0x2] sm:$0x1] %vm1304_vm13, %v1429_v16 }
 0x5b0   :  { %v1451_v18 = vpop.permute.xlu1 %1450  ;;  %v1368_v46 = vpop.permute.xlu0 %1367 }
 0x5b1   :  { %1453 = vst.msk [vmem:[#allocation5 + $0x1] sm:$0x1] %vm1298_vm4, %v1451_v18  ;;  %v1771_v18 = vrot.slane %v1628_v61, %v4713_v8 }
 0x5b4   :  { %v1456_v19 = vpop.permute.xlu1 %1455  ;;  %v1388_v20 = vpop.permute.xlu0 %1387 }
 0x5b5   :  { %1458 = vst.msk [vmem:[#allocation5 + $0x1] sm:$0x1] %vm1304_vm13, %v1456_v19 }
 0x5b8   :  { %v1491_v21 = vpop.permute.xlu1 %1490  ;;  %v1538_v34 = vpop.permute.xlu0 %1537 }
 0x5bc   :  { %v1509_v22 = vpop.permute.xlu1 %1508  ;;  %v1543_v23 = vpop.permute.xlu0 %1542 }
 0x5c0   :  { %v1514_v24 = vpop.permute.xlu1 %1513  ;;  %v1309_v25 = vpop.permute.xlu0 %1308 }
 0x5c1   :  { %1312 = vst.msk [vmem:[#allocation5] sm:$0x1] %vm1311_vm2, %v1309_v25 }
 0x5c2   :  { %1325 = vst.msk [vmem:[#allocation5] sm:$0x1] %vm1324_vm10, %v1322_v15 }
 0x5c4   :  { %v1565_v26 = vpop.permute.xlu1 %1564  ;;  %v1329_v27 = vpop.permute.xlu0 %1328 }
 0x5c5   :  { %1567 = vst.msk [vmem:[#allocation5 + $0x3] sm:$0x1] %vm1298_vm4, %v1565_v26  ;;  %vm1357_vm4 = vcmask 582144  }
 0x5c6   :  { %1332 = vst.msk [vmem:[#allocation5] sm:$0x1] %vm1331_vm6, %v1329_v27 }
 0x5c8   :  { %v1570_v29 = vpop.permute.xlu1 %1569  ;;  %v1335_v30 = vpop.permute.xlu0 %1334 }
 0x5c9   :  { %1572 = vst.msk [vmem:[#allocation5 + $0x3] sm:$0x1] %vm1304_vm13, %v1570_v29  ;;  %vm1370_vm13 = vcmask 713344  }
 0x5ca   :  { %1338 = vst.msk [vmem:[#allocation5] sm:$0x1] %vm1337_vm7, %v1335_v30 }
 0x5cc   :  { %v1435_v32 = vpop.permute.xlu1 %1434  ;;  %v1375_v33 = vpop.permute.xlu0 %1374 }
 0x5cd   :  { %1437 = vst.msk [vmem:[#allocation5 + $0x2] sm:$0x1] %vm1311_vm2, %v1435_v32 }
 0x5d0   :  { %v1462_v41 = vpop.permute.xlu1 %1461  ;;  %v1395_v52 = vpop.permute.xlu0 %1394 }
 0x5d1   :  { %1464 = vst.msk [vmem:[#allocation5 + $0x1] sm:$0x1] %vm1311_vm2, %v1462_v41 }
 0x5d2   :  { %1476 = vst.msk [vmem:[#allocation5 + $0x1] sm:$0x1] %vm1324_vm10, %v1474_v54  ;;  %vm1397_vm10 = vcmask 910144  }
 0x5d3   :  { %1482 = vst.msk [vmem:[#allocation5 + $0x1] sm:$0x1] %vm1331_vm6, %v1480_v48  ;;  %vm1410_vm6 = vcmask 1041344  }
 0x5d4   :  { %1487 = vst.msk [vmem:[#allocation5 + $0x1] sm:$0x1] %vm1337_vm7, %v1485_v60  ;;  %v1520_v53 = vpop.permute.xlu1 %1519  ;;  %v1401_v47 = vpop.permute.xlu0 %1400  ;;  %vm1403_vm7 = vcmask 975744  }
 0x5d5   :  { %1493 = vst.msk [vmem:[#allocation5 + $0x1] sm:$0x1] %vm1344_vm8, %v1491_v21 }
 0x5d6   :  { %1505 = vst.msk [vmem:[#allocation5 + $0x1] sm:$0x1] %vm1357_vm4, %v1503_v13 }
 0x5d7   :  { %1511 = vst.msk [vmem:[#allocation5 + $0x1] sm:$0x1] %vm1364_vm0, %v1509_v22 }
 0x5d8   :  { %1516 = vst.msk [vmem:[#allocation5 + $0x1] sm:$0x1] %vm1370_vm13, %v1514_v24  ;;  %v1576_v57 = vpop.permute.xlu1 %1575  ;;  %v1342_v36 = vpop.permute.xlu0 %1341  ;;  %v4020_v24 = vld [vmem:[%s6160_s12] ss:$0 sm:$0xff] }
 0x5d9   :  { %1522 = vst.msk [vmem:[#allocation5 + $0x1] sm:$0x1] %vm1377_vm5, %v1520_v53 }
 0x5da   :  { %1578 = vst.msk [vmem:[#allocation5 + $0x3] sm:$0x1] %vm1311_vm2, %v1576_v57  ;;  %v1846_v57 = vld [vmem:[%s6162_s2] sm:$0x3]  ;;  %s6247_s2 = smov 40  }
 0x5db   :  { %1345 = vst.msk [vmem:[#allocation5] sm:$0x1] %vm1344_vm8, %v1342_v36  ;;  %vm1591_vm8 = vcmask 263424  }
 0x5dc   :  { %1534 = vst.msk [vmem:[#allocation5 + $0x1] sm:$0x1] %vm1390_vm12, %v5252_v12  ;;  %v1549_v58 = vpop.permute.xlu1 %1548  ;;  %v1408_v37 = vpop.permute.xlu0 %1407 }
 0x5dd   :  { %1358 = vst.msk [vmem:[#allocation5] sm:$0x1] %vm1357_vm4, %v5250_v11 }
 0x5de   :  { %1365 = vst.msk [vmem:[#allocation5] sm:$0x1] %vm1364_vm0, %v1362_v17  ;;  %vm1696_vm0 = vcmask 269312  }
 0x5df   :  { %1540 = vst.msk [vmem:[#allocation5 + $0x1] sm:$0x1] %vm1397_vm10, %v1538_v34 }
 0x5e0   :  { %1371 = vst.msk [vmem:[#allocation5] sm:$0x1] %vm1370_vm13, %v1368_v46  ;;  %v1589_v39 = vpop.permute.xlu0 %1588 }
 0x5e1   :  { %1545 = vst.msk [vmem:[#allocation5 + $0x1] sm:$0x1] %vm1403_vm7, %v1543_v23 }
 0x5e2   :  { %1378 = vst.msk [vmem:[#allocation5] sm:$0x1] %vm1377_vm5, %v1375_v33  ;;  %vm1865_vm5 = vcmask 58368  }
 0x5e3   :  { %1551 = vst.msk [vmem:[#allocation5 + $0x1] sm:$0x1] %vm1410_vm6, %v1549_v58 }
 0x5e4   :  { %1391 = vst.msk [vmem:[#allocation5] sm:$0x1] %vm1390_vm12, %v1388_v20  ;;  %v1776_v20 = vrot.slane %v1628_v61, %v4716_v50 }
 0x5e5   :  { %1398 = vst.msk [vmem:[#allocation5] sm:$0x1] %vm1397_vm10, %v1395_v52 }
 0x5e6   :  { %1404 = vst.msk [vmem:[#allocation5] sm:$0x1] %vm1403_vm7, %v1401_v47 }
 0x5e7   :  { %1411 = vst.msk [vmem:[#allocation5] sm:$0x1] %vm1410_vm6, %v1408_v37 }
 0x5e8   :  { %1592 = vst.msk [vmem:[#allocation5 + $0x2] sm:$0x3] %vm1591_vm8, %v1589_v39 }
 0x5ef   :  { %v4007_v43 = vld.sshfl [vmem:[#allocation5] sm:$0x33 pattern:$0x76325410] }
 0x5f0   :  { %v1602_v35 = vcombine.high %v4007_v43, %v4007_v43  ;;  %v1605_v44 = vpack.c.bf16 %v4007_v43, %v4007_v43 }
 0x5f2   :  { %v1606_v49 = vpack.c.bf16 %v1602_v35, %v1602_v35 }
 0x5f4   :  { %4019 = vmatprep.mubr.msk.bf16.mxu0 %vm1696_vm0, %v1606_v49 }
 0x5f5   :  { %1738 = vmatmul.mubr.bf16.vlgmr.msra.gmra.mrb[20].mxu0 %v1605_v44 }
 0x5f6   :  { %4145 = vmatprep.mubr.msk.bf16.mxu0 %vm4392_vm15, %v4384_v38  ;;  %4142 = vmatpush3.bf16.msra.mxu0 %v4279_v31  ;;  %vm2396_vm15 = vcmask 123968  }
 0x5f7   :  { %4143 = vmatprep.subr.bf16.mxu0 %v4384_v38 }
 0x5fa   :  { %4144 = vmatpush3.bf16.msra.mxu0 %v4280_v59 }
 0x6c8   :  { %v1739_v63 = vpop.f32.mrb[20].mxu0 }
 0x6c9   :  { %v1740_v0 = vadd.f32 %v1739_v63, %v1632_v62  ;;  %v1741_v2 = vpop.f32.mrb[21].mxu0  ;;  %v4402_v62 = vmov 112  }
 0x6ca   :  { %v1742_v3 = vpop.f32.mrb[22].mxu0  ;;  %4242 = vset.pattern.permute.xlu1 %v4402_v62 }
 0x6cb   :  { %v1745_v4 = vsel %vm389_vm11, %v1740_v0, 0.0  ;;  %v1752_v5 = vmul.f32 %v1740_v0, %v1740_v0  ;;  %v1743_v6 = vpop.f32.mrb[23].mxu0 }
 0x6cc   :  { %v1746_v28 = vrot.slane %v1745_v4, 4 }
 0x6cd   :  { %v1753_v7 = vsel %vm389_vm11, %v1752_v5, 0.0 }
 0x6ce   :  { %v1747_v55 = vadd.f32 %v1746_v28, %v1745_v4  ;;  %v1754_v38 = vrot.slane %v1753_v7, 4 }
 0x6d0   :  { %v1748_v51 = vrot.slane %v1747_v55, 2  ;;  %v1755_v56 = vadd.f32 %v1754_v38, %v1753_v7 }
 0x6d2   :  { %v1749_v9 = vadd.f32 %v1748_v51, %v1747_v55  ;;  %v1756_v54 = vrot.slane %v1755_v56, 2 }
 0x6d4   :  { %v1750_v11 = vrot.slane %v1749_v9, 1  ;;  %v1757_v48 = vadd.f32 %v1756_v54, %v1755_v56 }
 0x6d6   :  { %v1751_v12 = vadd.f32 %v1750_v11, %v1749_v9  ;;  %v1758_v60 = vrot.slane %v1757_v48, 1 }
 0x6d8   :  { %v1759_v10 = vadd.f32 %v1758_v60, %v1757_v48  ;;  %v1760_v13 = vmul.f32 0.5, %v1751_v12 }
 0x6da   :  { %v1761_v1 = vmul.f32 0.5, %v1759_v10  ;;  %v1762_v14 = vmul.f32 %v1760_v13, %v1760_v13  ;;  %v1764_v17 = vsub.f32 %v1740_v0, %v1760_v13 }
 0x6dc   :  { %v1763_v15 = vsub.f32 %v1761_v1, %v1762_v14 }
 0x6de   :  { %v1765_v16 = vadd.f32 1e-05, %v1763_v15 }
 0x6e0   :  { %4308 = vrsqrt.f32 %v1765_v16 }
 0x6ea   :  { %v4309_v46 = vpop.eup %4308 }
 0x6eb   :  { %v1767_v19 = vmul.f32 %v4309_v46, %v1764_v17 }
 0x6ed   :  { %v1772_v21 = vmul.f32 %v1771_v18, %v1767_v19 }
 0x6ef   :  { %v1777_v34 = vadd.f32 %v1776_v20, %v1772_v21 }
 0x6f1   :  { %v1778_v22 = vmax.f32 %v1777_v34, 0.0 }
 0x6f3   :  { %v1779_v23 = vpack.c.bf16 %v1778_v22, %v1778_v22 }
 0x6f5   :  { %4146 = vmatmul.mubr.msk.bf16.vlgmr.msra.gmra.mrb[24].mxu0 %vm280_vm9, %v1779_v23 }
 0x6f6   :  { %2581 = vmatprep.mubr.bf16.mxu0 %v4385_v40 }
 0x7c8   :  { %v1840_v25 = vpop.f32.mrb[24].mxu0 }
 0x7c9   :  { %v5309_v26 = vadd.f32 %v4020_v24, %v1840_v25  ;;  %v4147_v27 = vpop.f32.mrb[25].mxu0 }
 0x7ca   :  { %v1843_v29 = vpop.f32.mrb[26].mxu0 }
 0x7cb   :  { %1857 = vrot.lane.b32.xlu0 %v5309_v26, %s6224_s0  ;;  %v4148_v30 = vpop.f32.mrb[27].mxu0  ;;  %v1847_v32 = vmul.f32 0.5, %v5309_v26  ;;  %2395 = vst.msk [vmem:[%s6161_s23] sm:$0x3] %vm1865_vm5, %v5309_v26  ;;  %v5331_v47 = vmul.f32 %v5309_v26, %v5309_v26 }
 0x7cc   :  { %2397 = vst.msk [vmem:[%s6161_s23] sm:$0x3] %vm2396_vm15, %v5309_v26 }
 0x7cd   :  { %v1848_v33 = vmul.f32 1.442695, %v1847_v32  ;;  %v4403_v32 = vmov 113  }
 0x7cf   :  { %4310 = vpow2.f32 %v1848_v33 }
 0x7d9   :  { %v4311_v41 = vpop.eup %4310 }
 0x7da   :  { %1851 = vrot.lane.b32.xlu1 %v4311_v41, %s4401_s1 }
 0x83d   :  { %v1858_v52 = vpop.permute.xlu0 %1857 }
 0x83e   :  { %v5325_v53 = vmul.f32 %v1858_v52, %v5309_v26 }
 0x840   :  { %1862 = vrot.lane.b32.xlu0 %v5325_v53, %s6246_s7 }
 0x844   :  { %1890 = vrot.lane.b32.xlu0 %v5331_v47, %s6246_s7 }
 0x84c   :  { %v1852_v36 = vpop.permute.xlu1 %1851 }
 0x84d   :  { %v1854_v58 = vmul.f32 %v1852_v36, %v1846_v57 }
 0x84f   :  { %v5339_v37 = vadd.f32 %v1854_v58, %v5309_v26 }
 0x851   :  { %1906 = vrot.lane.b32.xlu1 %v5339_v37, %s6246_s7 }
 0x8b2   :  { %v1863_v35 = vpop.permute.xlu0 %1862 }
 0x8b3   :  { %v1866_v49 = vsel %vm1865_vm5, %v1863_v35, 0.0 }
 0x8b6   :  { %v1891_v59 = vpop.permute.xlu0 %1890 }
 0x8b7   :  { %v1893_v61 = vsel %vm1865_vm5, %v1891_v59, 0.0 }
 0x8c3   :  { %v1907_v39 = vpop.permute.xlu1 %1906 }
 0x8c4   :  { %v1909_v43 = vmul.f32 %v1907_v39, %v5309_v26 }
 0x8c6   :  { %1911 = vrot.lane.b32.xlu1 %v1909_v43, %s6246_s7 }
 0x8ea   :  { %1867 = vadd.xlane.f32.xlu1 %v1866_v49 }
 0x938   :  { %v1912_v44 = vpop.permute.xlu1 %1911 }
 0x939   :  { %v1914_v31 = vsel %vm1865_vm5, %v1912_v44, 0.0 }
 0x93a   :  { %1915 = vadd.xlane.f32.xlu0 %v1914_v31 }
 0x93e   :  { %1894 = vadd.xlane.f32.xlu0 %v1893_v61 }
 0x977   :  { %v1868_v63 = vpop.xlane.xlu1 %1867 }
 0x978   :  { %v1872_v0 = vand.u32 2147483647, %v1868_v63  ;;  %v1869_v9 = vmax.f32 %v1868_v63, 0.0  ;;  %vm1870_vm2 = vcmp.ne.f32.partialorder %v1868_v63, %v1868_v63 }
 0x97a   :  { %v1873_v2 = vsub.f32 0.0, %v1872_v0 }
 0x97c   :  { %v1874_v3 = vmul.f32 1.442695, %v1873_v2 }
 0x97e   :  { %4312 = vpow2.f32 %v1874_v3 }
 0x988   :  { %v4313_v4 = vpop.eup %4312 }
 0x989   :  { %v1876_v5 = vadd.f32 1.0, %v4313_v4  ;;  %v1879_v6 = vmul.f32 -0.5, %v4313_v4  ;;  %v1882_v55 = vand.u32 2147483647, %v4313_v4 }
 0x98b   :  { %4314 = vlog2.f32 %v1876_v5  ;;  %v1880_v7 = vadd.f32 1.0, %v1879_v6  ;;  %vm1883_vm12 = vcmp.lt.f32.partialorder %v1882_v55, 0.0004427343 }
 0x98d   :  { %v1881_v51 = vmul.f32 %v4313_v4, %v1880_v7 }
 0x995   :  { %v4315_v28 = vpop.eup %4314 }
 0x996   :  { %v1878_v38 = vmul.f32 0.6931472, %v4315_v28 }
 0x998   :  { %v1884_v56 = vsel %vm1883_vm12, %v1881_v51, %v1878_v38 }
 0x999   :  { %v1885_v54 = vadd.f32 %v1884_v56, %v1869_v9 }
 0x99b   :  { %v1886_v12 = vsel %vm1870_vm2, %v1868_v63, %v1885_v54 }
 0x99c   :  { %v1887_v10 = vadd.f32 -1.0, %v1886_v12 }
 0x99e   :  { %v1896_v13 = vsub.f32 %v1887_v10, %v1868_v63 }
 0x9a0   :  { %v1897_v14 = vmul.f32 %v1896_v13, %v5309_v26 }
 0x9c7   :  { %v1916_v11 = vpop.xlane.xlu0 %1915 }
 0x9c8   :  { %v1917_v48 = vadd.f32 %v1916_v11, %v5309_v26 }
 0x9ca   :  { %4316 = vtanh.f32 %v1917_v48 }
 0x9cb   :  { %v1895_v60 = vpop.xlane.xlu0 %1894 }
 0x9cc   :  { %4318 = vrcp.f32 %v1895_v60 }
 0x9d4   :  { %v5349_v1 = vpop.eup %4316 }
 0x9d5   :  { %1921 = vperm.xlu1 %4242, %v5349_v1  }
 0x9d6   :  { %v4319_v15 = vpop.eup %4318 }
 0x9d7   :  { %v1899_v16 = vmul.f32 %v4319_v15, %v1897_v14 }
 0x9d9   :  { %1901 = vrot.lane.b32.xlu0 %v1899_v16, %s4391_s30  ;;  %4243 = vset.pattern.permute.xlu1 %v4403_v32 }
 0x9dd   :  { %1950 = vrot.lane.b32.xlu0 %v5325_v53, %s6222_s4 }
 0x9e1   :  { %1975 = vrot.lane.b32.xlu0 %v5331_v47, %s6222_s4 }
 0xa4b   :  { %v1902_v17 = vpop.permute.xlu0 %1901 }
 0xa4c   :  { %v5359_v18 = vadd.f32 %v1902_v17, %v5309_v26  ;;  %v4404_v17 = vmov 114  }
 0xa4f   :  { %v1951_v23 = vpop.permute.xlu0 %1950 }
 0xa50   :  { %v1953_v24 = vsel %vm1865_vm5, %v1951_v23, 0.0 }
 0xa53   :  { %v1976_v29 = vpop.permute.xlu0 %1975 }
 0xa54   :  { %v1922_v46 = vpop.permute.xlu1 %1921  ;;  %v1978_v30 = vsel %vm1865_vm5, %v1976_v29, 0.0 }
 0xa55   :  { %v1924_v19 = vmul.f32 %v1922_v46, %v5359_v18 }
 0xa57   :  { %1926 = vrot.lane.b32.xlu1 %v1924_v19, %s4398_s5 }
 0xac9   :  { %v1927_v20 = vpop.permute.xlu1 %1926 }
 0xaca   :  { %v1929_v21 = vadd.f32 %v1927_v20, %v5339_v37 }
 0xacc   :  { %1991 = vrot.lane.b32.xlu1 %v1929_v21, %s6226_s28 }
 0xb3e   :  { %v1992_v34 = vpop.permute.xlu1 %1991 }
 0xb3f   :  { %v1994_v22 = vmul.f32 %v1992_v34, %v5309_v26 }
 0xb41   :  { %1996 = vrot.lane.b32.xlu1 %v1994_v22, %s6222_s4  ;;  %s6256_s4 = smov 16  }
 0xb65   :  { %1954 = vadd.xlane.f32.xlu1 %v1953_v24 }
 0xbb3   :  { %v1997_v25 = vpop.permute.xlu1 %1996 }
 0xbb4   :  { %v1999_v27 = vsel %vm1865_vm5, %v1997_v25, 0.0 }
 0xbb5   :  { %2000 = vadd.xlane.f32.xlu0 %v1999_v27 }
 0xbb9   :  { %1979 = vadd.xlane.f32.xlu0 %v1978_v30 }
 0xbf2   :  { %v1955_v33 = vpop.xlane.xlu1 %1954 }
 0xbf3   :  { %v1959_v41 = vand.u32 2147483647, %v1955_v33  ;;  %v1956_v61 = vmax.f32 %v1955_v33, 0.0  ;;  %vm1957_vm13 = vcmp.ne.f32.partialorder %v1955_v33, %v1955_v33 }
 0xbf5   :  { %v1960_v52 = vsub.f32 0.0, %v1959_v41 }
 0xbf7   :  { %v1961_v57 = vmul.f32 1.442695, %v1960_v52 }
 0xbf9   :  { %4320 = vpow2.f32 %v1961_v57 }
 0xc03   :  { %v4321_v36 = vpop.eup %4320 }
 0xc04   :  { %v1963_v58 = vadd.f32 1.0, %v4321_v36  ;;  %v1966_v39 = vmul.f32 -0.5, %v4321_v36  ;;  %v1969_v49 = vand.u32 2147483647, %v4321_v36 }
 0xc06   :  { %4322 = vlog2.f32 %v1963_v58  ;;  %v1967_v35 = vadd.f32 1.0, %v1966_v39  ;;  %vm1970_vm4 = vcmp.lt.f32.partialorder %v1969_v49, 0.0004427343 }
 0xc08   :  { %v1968_v31 = vmul.f32 %v4321_v36, %v1967_v35 }
 0xc10   :  { %v4323_v43 = vpop.eup %4322 }
 0xc11   :  { %v1965_v44 = vmul.f32 0.6931472, %v4323_v43 }
 0xc13   :  { %v1971_v59 = vsel %vm1970_vm4, %v1968_v31, %v1965_v44 }
 0xc14   :  { %v1972_v62 = vadd.f32 %v1971_v59, %v1956_v61 }
 0xc16   :  { %v1973_v2 = vsel %vm1957_vm13, %v1955_v33, %v1972_v62  ;;  %vm6251_vm13 = vcmask 57344  }
 0xc17   :  { %v1974_v4 = vadd.f32 -1.0, %v1973_v2 }
 0xc19   :  { %v1981_v5 = vsub.f32 %v1974_v4, %v1955_v33 }
 0xc1b   :  { %v1982_v28 = vmul.f32 %v1981_v5, %v5309_v26 }
 0xc42   :  { %v2001_v63 = vpop.xlane.xlu0 %2000 }
 0xc43   :  { %v2002_v0 = vadd.f32 %v2001_v63, %v5309_v26 }
 0xc45   :  { %4324 = vtanh.f32 %v2002_v0 }
 0xc46   :  { %v1980_v3 = vpop.xlane.xlu0 %1979 }
 0xc47   :  { %4326 = vrcp.f32 %v1980_v3 }
 0xc4f   :  { %v5371_v6 = vpop.eup %4324 }
 0xc50   :  { %2006 = vperm.xlu1 %4243, %v5371_v6  }
 0xc51   :  { %v4327_v7 = vpop.eup %4326 }
 0xc52   :  { %v1984_v55 = vmul.f32 %v4327_v7, %v1982_v28 }
 0xc54   :  { %1986 = vrot.lane.b32.xlu0 %v1984_v55, %s4391_s30  ;;  %4244 = vset.pattern.permute.xlu1 %v4404_v17 }
 0xc58   :  { %2039 = vrot.lane.b32.xlu0 %v5325_v53, %s6224_s0 }
 0xc5c   :  { %2064 = vrot.lane.b32.xlu0 %v5331_v47, %s6224_s0 }
 0xcc6   :  { %v1987_v38 = vpop.permute.xlu0 %1986 }
 0xcc7   :  { %v5381_v51 = vadd.f32 %v1987_v38, %v5309_v26 }
 0xcca   :  { %v2040_v60 = vpop.permute.xlu0 %2039 }
 0xccb   :  { %v2042_v10 = vsel %vm1865_vm5, %v2040_v60, 0.0 }
 0xcce   :  { %v2065_v15 = vpop.permute.xlu0 %2064 }
 0xccf   :  { %v2007_v56 = vpop.permute.xlu1 %2006  ;;  %v2067_v16 = vsel %vm1865_vm5, %v2065_v15, 0.0 }
 0xcd0   :  { %v2009_v9 = vmul.f32 %v2007_v56, %v5381_v51 }
 0xcd2   :  { %2011 = vrot.lane.b32.xlu1 %v2009_v9, %s4397_s25  ;;  %v4405_v9 = vmov 115  }
 0xd44   :  { %v2012_v54 = vpop.permute.xlu1 %2011 }
 0xd45   :  { %v2014_v11 = vadd.f32 %v2012_v54, %v1929_v21 }
 0xd47   :  { %2080 = vrot.lane.b32.xlu1 %v2014_v11, %s4391_s30 }
 0xdb9   :  { %v2081_v48 = vpop.permute.xlu1 %2080 }
 0xdba   :  { %v2083_v12 = vmul.f32 %v2081_v48, %v5309_v26 }
 0xdbc   :  { %2085 = vrot.lane.b32.xlu1 %v2083_v12, %s6224_s0  ;;  %s6254_s0 = smov 48  }
 0xde0   :  { %2043 = vadd.xlane.f32.xlu1 %v2042_v10 }
 0xe2e   :  { %v2086_v13 = vpop.permute.xlu1 %2085 }
 0xe2f   :  { %v2088_v14 = vsel %vm1865_vm5, %v2086_v13, 0.0 }
 0xe30   :  { %2089 = vadd.xlane.f32.xlu0 %v2088_v14 }
 0xe34   :  { %2068 = vadd.xlane.f32.xlu0 %v2067_v16 }
 0xe6d   :  { %v2044_v46 = vpop.xlane.xlu1 %2043 }
 0xe6e   :  { %v2048_v19 = vand.u32 2147483647, %v2044_v46  ;;  %v2045_v33 = vmax.f32 %v2044_v46, 0.0  ;;  %vm2046_vm7 = vcmp.ne.f32.partialorder %v2044_v46, %v2044_v46 }
 0xe70   :  { %v2049_v20 = vsub.f32 0.0, %v2048_v19 }
 0xe72   :  { %v2050_v21 = vmul.f32 1.442695, %v2049_v20 }
 0xe74   :  { %4328 = vpow2.f32 %v2050_v21 }
 0xe7e   :  { %v4329_v34 = vpop.eup %4328 }
 0xe7f   :  { %v2052_v22 = vadd.f32 1.0, %v4329_v34  ;;  %v2055_v23 = vmul.f32 -0.5, %v4329_v34  ;;  %v2058_v27 = vand.u32 2147483647, %v4329_v34 }
 0xe81   :  { %4330 = vlog2.f32 %v2052_v22  ;;  %v2056_v25 = vadd.f32 1.0, %v2055_v23  ;;  %vm2059_vm10 = vcmp.lt.f32.partialorder %v2058_v27, 0.0004427343 }
 0xe83   :  { %v2057_v30 = vmul.f32 %v4329_v34, %v2056_v25 }
 0xe8b   :  { %v4331_v24 = vpop.eup %4330 }
 0xe8c   :  { %v2054_v29 = vmul.f32 0.6931472, %v4331_v24 }
 0xe8e   :  { %v2060_v32 = vsel %vm2059_vm10, %v2057_v30, %v2054_v29  ;;  %vm6252_vm10 = vmmov %vm6251_vm13 }
 0xe8f   :  { %v2061_v41 = vadd.f32 %v2060_v32, %v2045_v33 }
 0xe91   :  { %v2062_v36 = vsel %vm2046_vm7, %v2044_v46, %v2061_v41  ;;  %vm6258_vm7 = vmmov %vm6252_vm10 }
 0xe92   :  { %v2063_v39 = vadd.f32 -1.0, %v2062_v36 }
 0xe94   :  { %v2070_v43 = vsub.f32 %v2063_v39, %v2044_v46 }
 0xe96   :  { %v2071_v49 = vmul.f32 %v2070_v43, %v5309_v26 }
 0xebd   :  { %v2090_v52 = vpop.xlane.xlu0 %2089 }
 0xebe   :  { %v2091_v57 = vadd.f32 %v2090_v52, %v5309_v26 }
 0xec0   :  { %4332 = vtanh.f32 %v2091_v57 }
 0xec1   :  { %v2069_v58 = vpop.xlane.xlu0 %2068 }
 0xec2   :  { %4334 = vrcp.f32 %v2069_v58 }
 0xeca   :  { %v5392_v35 = vpop.eup %4332 }
 0xecb   :  { %2095 = vperm.xlu1 %4244, %v5392_v35  }
 0xecc   :  { %v4335_v44 = vpop.eup %4334 }
 0xecd   :  { %v2073_v31 = vmul.f32 %v4335_v44, %v2071_v49 }
 0xecf   :  { %2075 = vrot.lane.b32.xlu0 %v2073_v31, %s4391_s30  ;;  %4245 = vset.pattern.permute.xlu1 %v4405_v9 }
 0xed3   :  { %2128 = vrot.lane.b32.xlu0 %v5325_v53, %s6247_s2 }
 0xed7   :  { %2153 = vrot.lane.b32.xlu0 %v5331_v47, %s6247_s2 }
 0xf41   :  { %v2076_v59 = vpop.permute.xlu0 %2075 }
 0xf42   :  { %v5402_v61 = vadd.f32 %v2076_v59, %v5309_v26 }
 0xf45   :  { %v2129_v5 = vpop.permute.xlu0 %2128 }
 0xf46   :  { %v2131_v28 = vsel %vm1865_vm5, %v2129_v5, 0.0 }
 0xf49   :  { %v2154_v38 = vpop.permute.xlu0 %2153 }
 0xf4a   :  { %v2096_v62 = vpop.permute.xlu1 %2095  ;;  %v2156_v56 = vsel %vm1865_vm5, %v2154_v38, 0.0 }
 0xf4b   :  { %v2098_v63 = vmul.f32 %v2096_v62, %v5402_v61 }
 0xf4d   :  { %2100 = vrot.lane.b32.xlu1 %v2098_v63, %s6248_s27 }
 0xfbf   :  { %v2101_v0 = vpop.permute.xlu1 %2100 }
 0xfc0   :  { %v2103_v2 = vadd.f32 %v2101_v0, %v2014_v11 }
 0xfc2   :  { %2169 = vrot.lane.b32.xlu1 %v2103_v2, %s6249_s10 }
0x1034   :  { %v2170_v3 = vpop.permute.xlu1 %2169 }
0x1035   :  { %v2172_v4 = vmul.f32 %v2170_v3, %v5309_v26 }
0x1037   :  { %2174 = vrot.lane.b32.xlu1 %v2172_v4, %s6247_s2 }
0x105b   :  { %2132 = vadd.xlane.f32.xlu1 %v2131_v28 }
0x10a9   :  { %v2175_v7 = vpop.permute.xlu1 %2174 }
0x10aa   :  { %v2177_v55 = vsel %vm1865_vm5, %v2175_v7, 0.0 }
0x10ab   :  { %2178 = vadd.xlane.f32.xlu0 %v2177_v55 }
0x10af   :  { %2157 = vadd.xlane.f32.xlu0 %v2156_v56 }
0x10e8   :  { %v2133_v54 = vpop.xlane.xlu1 %2132 }
0x10e9   :  { %v2137_v11 = vand.u32 2147483647, %v2133_v54  ;;  %v2134_v20 = vmax.f32 %v2133_v54, 0.0  ;;  %vm2135_vm0 = vcmp.ne.f32.partialorder %v2133_v54, %v2133_v54 }
0x10eb   :  { %v2138_v48 = vsub.f32 0.0, %v2137_v11 }
0x10ed   :  { %v2139_v12 = vmul.f32 1.442695, %v2138_v48 }
0x10ef   :  { %4336 = vpow2.f32 %v2139_v12 }
0x10f9   :  { %v4337_v60 = vpop.eup %4336 }
0x10fa   :  { %v2141_v10 = vadd.f32 1.0, %v4337_v60  ;;  %v2144_v13 = vmul.f32 -0.5, %v4337_v60  ;;  %v2147_v16 = vand.u32 2147483647, %v4337_v60 }
0x10fc   :  { %4338 = vlog2.f32 %v2141_v10  ;;  %v2145_v15 = vadd.f32 1.0, %v2144_v13  ;;  %vm2148_vm6 = vcmp.lt.f32.partialorder %v2147_v16, 0.0004427343 }
0x10fe   :  { %v2146_v46 = vmul.f32 %v4337_v60, %v2145_v15 }
0x1106   :  { %v4339_v14 = vpop.eup %4338 }
0x1107   :  { %v2143_v17 = vmul.f32 0.6931472, %v4339_v14 }
0x1109   :  { %v2149_v19 = vsel %vm2148_vm6, %v2146_v46, %v2143_v17  ;;  %vm6259_vm6 = vmmov %vm6258_vm7 }
0x110a   :  { %v2150_v21 = vadd.f32 %v2149_v19, %v2134_v20 }
0x110c   :  { %v2151_v23 = vsel %vm2135_vm0, %v2133_v54, %v2150_v21  ;;  %vm6260_vm0 = vmmov %vm6259_vm6 }
0x110d   :  { %v2152_v25 = vadd.f32 -1.0, %v2151_v23 }
0x110f   :  { %v2159_v27 = vsub.f32 %v2152_v25, %v2133_v54 }
0x1111   :  { %v2160_v30 = vmul.f32 %v2159_v27, %v5309_v26 }
0x1138   :  { %v2179_v34 = vpop.xlane.xlu0 %2178 }
0x1139   :  { %v2180_v22 = vadd.f32 %v2179_v34, %v5309_v26 }
0x113b   :  { %4340 = vtanh.f32 %v2180_v22 }
0x113c   :  { %v2158_v24 = vpop.xlane.xlu0 %2157 }
0x113d   :  { %4342 = vrcp.f32 %v2158_v24 }
0x1145   :  { %v5413_v29 = vpop.eup %4340 }
0x1146   :  { %2184 = vperm.xlu1 %4245, %v5413_v29  }
0x1147   :  { %v4343_v32 = vpop.eup %4342 }
0x1148   :  { %v2162_v33 = vmul.f32 %v4343_v32, %v2160_v30 }
0x114a   :  { %2164 = vrot.lane.b32.xlu0 %v2162_v33, %s4391_s30 }
0x114e   :  { %2217 = vrot.lane.b32.xlu0 %v5325_v53, %s6245_s26 }
0x1152   :  { %2242 = vrot.lane.b32.xlu0 %v5331_v47, %s6245_s26 }
0x11bc   :  { %v2165_v41 = vpop.permute.xlu0 %2164 }
0x11bd   :  { %v5423_v52 = vadd.f32 %v2165_v41, %v5309_v26 }
0x11c0   :  { %v2218_v44 = vpop.permute.xlu0 %2217 }
0x11c1   :  { %v2220_v31 = vsel %vm1865_vm5, %v2218_v44, 0.0 }
0x11c4   :  { %v2243_v63 = vpop.permute.xlu0 %2242 }
0x11c5   :  { %v2185_v57 = vpop.permute.xlu1 %2184  ;;  %v2245_v0 = vsel %vm1865_vm5, %v2243_v63, 0.0 }
0x11c6   :  { %v2187_v36 = vmul.f32 %v2185_v57, %v5423_v52 }
0x11c8   :  { %2189 = vrot.lane.b32.xlu1 %v2187_v36, %s6249_s10 }
0x123a   :  { %v2190_v58 = vpop.permute.xlu1 %2189 }
0x123b   :  { %v2192_v39 = vadd.f32 %v2190_v58, %v2103_v2  ;;  %v4406_v2 = vmov 116  }
0x123c   :  { %4246 = vset.pattern.permute.xlu1 %v4406_v2 }
0x123d   :  { %2258 = vrot.lane.b32.xlu1 %v2192_v39, %s6248_s27 }
0x12af   :  { %v2259_v43 = vpop.permute.xlu1 %2258 }
0x12b0   :  { %v2261_v49 = vmul.f32 %v2259_v43, %v5309_v26 }
0x12b2   :  { %2263 = vrot.lane.b32.xlu1 %v2261_v49, %s6245_s26 }
0x12d6   :  { %2221 = vadd.xlane.f32.xlu1 %v2220_v31 }
0x1324   :  { %v2264_v59 = vpop.permute.xlu1 %2263 }
0x1325   :  { %v2266_v62 = vsel %vm1865_vm5, %v2264_v59, 0.0 }
0x1326   :  { %2267 = vadd.xlane.f32.xlu0 %v2266_v62 }
0x132a   :  { %2246 = vadd.xlane.f32.xlu0 %v2245_v0 }
0x1363   :  { %v2222_v3 = vpop.xlane.xlu1 %2221 }
0x1364   :  { %v2226_v4 = vand.u32 2147483647, %v2222_v3  ;;  %v2223_v60 = vmax.f32 %v2222_v3, 0.0  ;;  %vm2224_vm12 = vcmp.ne.f32.partialorder %v2222_v3, %v2222_v3 }
0x1366   :  { %v2227_v5 = vsub.f32 0.0, %v2226_v4 }
0x1368   :  { %v2228_v28 = vmul.f32 1.442695, %v2227_v5 }
0x136a   :  { %4344 = vpow2.f32 %v2228_v28 }
0x1374   :  { %v4345_v7 = vpop.eup %4344 }
0x1375   :  { %v2230_v55 = vadd.f32 1.0, %v4345_v7  ;;  %v2233_v38 = vmul.f32 -0.5, %v4345_v7  ;;  %v2236_v54 = vand.u32 2147483647, %v4345_v7 }
0x1377   :  { %4346 = vlog2.f32 %v2230_v55  ;;  %v2234_v9 = vadd.f32 1.0, %v2233_v38  ;;  %vm2237_vm15 = vcmp.lt.f32.partialorder %v2236_v54, 0.0004427343 }
0x1379   :  { %v2235_v48 = vmul.f32 %v4345_v7, %v2234_v9 }
0x1381   :  { %v4347_v56 = vpop.eup %4346 }
0x1382   :  { %v2232_v11 = vmul.f32 0.6931472, %v4347_v56 }
0x1384   :  { %v2238_v12 = vsel %vm2237_vm15, %v2235_v48, %v2232_v11  ;;  %vm6261_vm15 = vmmov %vm6260_vm0 }
0x1385   :  { %v2239_v10 = vadd.f32 %v2238_v12, %v2223_v60 }
0x1387   :  { %v2240_v15 = vsel %vm2224_vm12, %v2222_v3, %v2239_v10  ;;  %vm6262_vm12 = vmmov %vm6260_vm0 }
0x1388   :  { %v2241_v17 = vadd.f32 -1.0, %v2240_v15 }
0x138a   :  { %v2248_v46 = vsub.f32 %v2241_v17, %v2222_v3 }
0x138c   :  { %v2249_v20 = vmul.f32 %v2248_v46, %v5309_v26 }
0x13b3   :  { %v2268_v13 = vpop.xlane.xlu0 %2267 }
0x13b4   :  { %v2269_v14 = vadd.f32 %v2268_v13, %v5309_v26 }
0x13b6   :  { %4348 = vtanh.f32 %v2269_v14  ;;  %v2415_v14 = vld [vmem:[%s6163_s13] sm:$0xf] }
0x13b7   :  { %v2247_v16 = vpop.xlane.xlu0 %2246  ;;  %v2425_v15 = vsel %vm472_vm14, %v2415_v14, 0 }
0x13b8   :  { %4350 = vrcp.f32 %v2247_v16  ;;  %4150 = vmatpush3.bf16.msra.mxu1 %v2425_v15 }
0x13c0   :  { %v5434_v19 = vpop.eup %4348 }
0x13c1   :  { %2273 = vperm.xlu1 %4246, %v5434_v19  }
0x13c2   :  { %v4351_v21 = vpop.eup %4350 }
0x13c3   :  { %v2251_v34 = vmul.f32 %v4351_v21, %v2249_v20 }
0x13c5   :  { %2253 = vrot.lane.b32.xlu0 %v2251_v34, %s4391_s30 }
0x13c9   :  { %2306 = vrot.lane.b32.xlu0 %v5325_v53, %s6250_s11 }
0x13cd   :  { %2331 = vrot.lane.b32.xlu0 %v5331_v47, %s6250_s11 }
0x1437   :  { %v2254_v22 = vpop.permute.xlu0 %2253 }
0x1438   :  { %v5444_v23 = vadd.f32 %v2254_v22, %v5309_v26 }
0x143b   :  { %v2307_v53 = vpop.permute.xlu0 %2306 }
0x143c   :  { %v2309_v47 = vsel %vm1865_vm5, %v2307_v53, 0.0 }
0x143f   :  { %v2332_v36 = vpop.permute.xlu0 %2331 }
0x1440   :  { %v2274_v24 = vpop.permute.xlu1 %2273  ;;  %v2334_v58 = vsel %vm1865_vm5, %v2332_v36, 0.0 }
0x1441   :  { %v2276_v25 = vmul.f32 %v2274_v24, %v5444_v23  ;;  %v4283_v24 = vld [vmem:[%s6164_s15 + $0x4] ss:$8 sps:$4 sm:$0xff]  }
0x1442   :  { %2549 = vmatprep.subr.bf16.mxu0 %v4283_v24 }
0x1443   :  { %2278 = vrot.lane.b32.xlu1 %v2276_v25, %s4391_s30  ;;  %v4286_v25 = vld [vmem:[%s6164_s15 + $0x14] ss:$8 sps:$4 sm:$0xff]  }
0x14b5   :  { %v2279_v27 = vpop.permute.xlu1 %2278 }
0x14b6   :  { %v2281_v30 = vadd.f32 %v2279_v27, %v2192_v39  ;;  %v4407_v39 = vmov 117   ;;  %v4284_v27 = vld [vmem:[%s6164_s15 + $0x10] ss:$8 sps:$4 sm:$0xff]  }
0x14b7   :  { %4247 = vset.pattern.permute.xlu1 %v4407_v39 }
0x14b8   :  { %2347 = vrot.lane.b32.xlu1 %v2281_v30, %s4397_s25 }
0x152a   :  { %v2348_v32 = vpop.permute.xlu1 %2347 }
0x152b   :  { %v2350_v33 = vmul.f32 %v2348_v32, %v5309_v26 }
0x152d   :  { %2352 = vrot.lane.b32.xlu1 %v2350_v33, %s6250_s11 }
0x1551   :  { %2310 = vadd.xlane.f32.xlu1 %v2309_v47 }
0x159f   :  { %v2353_v41 = vpop.permute.xlu1 %2352 }
0x15a0   :  { %v2355_v57 = vsel %vm1865_vm5, %v2353_v41, 0.0 }
0x15a1   :  { %2356 = vadd.xlane.f32.xlu0 %v2355_v57 }
0x15a5   :  { %2335 = vadd.xlane.f32.xlu0 %v2334_v58 }
0x15de   :  { %v2311_v43 = vpop.xlane.xlu1 %2310 }
0x15df   :  { %v2315_v49 = vand.u32 2147483647, %v2311_v43  ;;  %v2312_v7 = vmax.f32 %v2311_v43, 0.0  ;;  %vm2313_vm4 = vcmp.ne.f32.partialorder %v2311_v43, %v2311_v43 }
0x15e1   :  { %v2316_v44 = vsub.f32 0.0, %v2315_v49 }
0x15e3   :  { %v2317_v31 = vmul.f32 1.442695, %v2316_v44 }
0x15e5   :  { %4352 = vpow2.f32 %v2317_v31 }
0x15ef   :  { %v4353_v59 = vpop.eup %4352 }
0x15f0   :  { %v2319_v62 = vadd.f32 1.0, %v4353_v59  ;;  %v2322_v63 = vmul.f32 -0.5, %v4353_v59  ;;  %v2325_v3 = vand.u32 2147483647, %v4353_v59 }
0x15f2   :  { %4354 = vlog2.f32 %v2319_v62  ;;  %v2323_v2 = vadd.f32 1.0, %v2322_v63  ;;  %vm2326_vm2 = vcmp.lt.f32.partialorder %v2325_v3, 0.0004427343 }
0x15f4   :  { %v2324_v5 = vmul.f32 %v4353_v59, %v2323_v2 }
0x15fc   :  { %v4355_v0 = vpop.eup %4354 }
0x15fd   :  { %v2321_v4 = vmul.f32 0.6931472, %v4355_v0 }
0x15ff   :  { %v2327_v28 = vsel %vm2326_vm2, %v2324_v5, %v2321_v4  ;;  %vm6263_vm2 = vmmov %vm6260_vm0 }
0x1600   :  { %v2328_v55 = vadd.f32 %v2327_v28, %v2312_v7 }
0x1602   :  { %v2329_v9 = vsel %vm2313_vm4, %v2311_v43, %v2328_v55  ;;  %vm6264_vm4 = vmmov %vm6260_vm0 }
0x1603   :  { %v2330_v11 = vadd.f32 -1.0, %v2329_v9 }
0x1605   :  { %v2337_v48 = vsub.f32 %v2330_v11, %v2311_v43 }
0x1607   :  { %v2338_v60 = vmul.f32 %v2337_v48, %v5309_v26 }
0x162e   :  { %v2357_v38 = vpop.xlane.xlu0 %2356 }
0x162f   :  { %v2358_v56 = vadd.f32 %v2357_v38, %v5309_v26 }
0x1631   :  { %4356 = vtanh.f32 %v2358_v56 }
0x1632   :  { %v2336_v54 = vpop.xlane.xlu0 %2335 }
0x1633   :  { %4358 = vrcp.f32 %v2336_v54 }
0x163b   :  { %v5455_v12 = vpop.eup %4356 }
0x163c   :  { %2362 = vperm.xlu1 %4247, %v5455_v12  }
0x163d   :  { %v4359_v10 = vpop.eup %4358 }
0x163e   :  { %v2340_v13 = vmul.f32 %v4359_v10, %v2338_v60 }
0x1640   :  { %2342 = vrot.lane.b32.xlu0 %v2340_v13, %s4391_s30  ;;  %4248 = vset.pattern.permute.xlu1 %v4385_v40  ;;  %v4281_v40 = vld [vmem:[%s6164_s15] ss:$8 sps:$4 sm:$0xff]  }
0x1641   :  { %2550 = vmatpush1.bf16.msra.mxu0 %v4281_v40 }
0x1642   :  { %2551 = vmatprep.subr.bf16.mxu0 %v4286_v25 }
0x1645   :  { %2552 = vmatpush1.bf16.msra.mxu0 %v4284_v27 }
0x16b2   :  { %v2343_v16 = vpop.permute.xlu0 %2342 }
0x16b3   :  { %v5466_v17 = vadd.f32 %v2343_v16, %v5309_v26  ;;  %v5499_v16 = vld [vmem:[%s6166_s16] sm:$0x77]  ;;  %s6253_s16 = smov 72  }
0x16bb   :  { %v2363_v46 = vpop.permute.xlu1 %2362 }
0x16bc   :  { %v2365_v20 = vmul.f32 %v2363_v46, %v5466_v17  ;;  %v2514_v46 = vsub.s32 4, %v4633_v42 }
0x16be   :  { %2367 = vrot.lane.b32.xlu1 %v2365_v20, %s6226_s28  ;;  %v2511_v20 = vrot.slane %v5499_v16, %v4644_v45  ;;  %s6255_s28 = smov 56  }
0x1730   :  { %v2368_v21 = vpop.permute.xlu1 %2367 }
0x1731   :  { %v5470_v34 = vadd.f32 %v2368_v21, %v2281_v30  ;;  %v2416_v30 = vld [vmem:[%s6165_s14] sm:$0x7]  ;;  %v2515_v21 = vrot.slane %v5499_v16, %v2514_v46 }
0x1732   :  { %v2420_v32 = vrot.slane %v2416_v30, %v4644_v45  ;;  %v2493_v54 = vrot.slane %v2416_v30, %v4713_v8  ;;  %v2498_v60 = vrot.slane %v2416_v30, %v4716_v50 }
0x1733   :  { %v2414_v22 = vpack.c.bf16 %v5470_v34, %v5470_v34  ;;  %v2525_v40 = vrot.slane %v2515_v21, %v4644_v45 }
0x1735   :  { %4152 = vmatmul.mubr.msk.bf16.vlgmr.msra.gmra.mrb[16].mxu1 %vm1208_vm1, %v2414_v22  ;;  %v2521_v22 = vrot.slane %v2511_v20, %v4644_v45 }
0x1808   :  { %v2461_v33 = vpop.f32.mrb[16].mxu1 }
0x1809   :  { %v2462_v53 = vadd.f32 %v2461_v33, %v2420_v32  ;;  %v4153_v47 = vpop.f32.mrb[17].mxu1 }
0x180a   :  { %v2464_v41 = vpop.f32.mrb[18].mxu1 }
0x180b   :  { %v2467_v57 = vsel %vm389_vm11, %v2462_v53, 0.0  ;;  %v2474_v36 = vmul.f32 %v2462_v53, %v2462_v53  ;;  %v4154_v58 = vpop.f32.mrb[19].mxu1 }
0x180c   :  { %v2468_v39 = vrot.slane %v2467_v57, 4 }
0x180d   :  { %v2475_v43 = vsel %vm389_vm11, %v2474_v36, 0.0 }
0x180e   :  { %v2469_v49 = vadd.f32 %v2468_v39, %v2467_v57  ;;  %v2476_v44 = vrot.slane %v2475_v43, 4 }
0x1810   :  { %v2470_v31 = vrot.slane %v2469_v49, 2  ;;  %v2477_v59 = vadd.f32 %v2476_v44, %v2475_v43 }
0x1812   :  { %v2471_v62 = vadd.f32 %v2470_v31, %v2469_v49  ;;  %v2478_v63 = vrot.slane %v2477_v59, 2 }
0x1814   :  { %v2472_v0 = vrot.slane %v2471_v62, 1  ;;  %v2479_v2 = vadd.f32 %v2478_v63, %v2477_v59 }
0x1816   :  { %v2473_v3 = vadd.f32 %v2472_v0, %v2471_v62  ;;  %v2480_v4 = vrot.slane %v2479_v2, 1 }
0x1818   :  { %v2481_v5 = vadd.f32 %v2480_v4, %v2479_v2  ;;  %v2482_v28 = vmul.f32 0.5, %v2473_v3 }
0x181a   :  { %v2483_v7 = vmul.f32 0.5, %v2481_v5  ;;  %v2484_v55 = vmul.f32 %v2482_v28, %v2482_v28  ;;  %v2486_v9 = vsub.f32 %v2462_v53, %v2482_v28 }
0x181c   :  { %v2485_v38 = vsub.f32 %v2483_v7, %v2484_v55 }
0x181e   :  { %v2487_v56 = vadd.f32 1e-05, %v2485_v38 }
0x1820   :  { %4360 = vrsqrt.f32 %v2487_v56 }
0x182a   :  { %v4361_v11 = vpop.eup %4360 }
0x182b   :  { %v2489_v48 = vmul.f32 %v4361_v11, %v2486_v9 }
0x182d   :  { %v2494_v10 = vmul.f32 %v2493_v54, %v2489_v48 }
0x182f   :  { %v2499_v13 = vadd.f32 %v2498_v60, %v2494_v10 }
0x1831   :  { %v2500_v14 = vmax.f32 %v2499_v13, 0.0 }
0x1833   :  { %v2501_v15 = vpack.c.bf16 %v2500_v14, %v2500_v14 }
0x1835   :  { %4029 = vmatmul.mubr.msk.bf16.vlgmr.msra.gmra.mrb[28].mxu0 %vm280_vm9, %v2501_v15 }
0x1908   :  { %v2583_v24 = vpop.f32.mrb[28].mxu0 }
0x1909   :  { %v2584_v25 = vadd.f32 %v2583_v24, %v2521_v22  ;;  %v2585_v27 = vpop.f32.mrb[29].mxu0 }
0x190a   :  { %v2586_v30 = vadd.f32 %v2585_v27, %v2525_v40  ;;  %v2587_v32 = vpop.f32.mrb[30].mxu0 }
0x190b   :  { %v2590_v33 = vsel %vm535_vm3, %v2584_v25, 0.0  ;;  %v2604_v53 = vmul.f32 %v2584_v25, %v2584_v25  ;;  %v2588_v47 = vpop.f32.mrb[31].mxu0  ;;  %v2642_v32 = vsub.s32 5, %v4633_v42 }
0x190c   :  { %v2591_v41 = vrot.slane %v2590_v33, 4  ;;  %v2597_v57 = vsel %vm389_vm11, %v2586_v30, 0.0  ;;  %v2605_v36 = vmul.f32 %v2586_v30, %v2586_v30 }
0x190d   :  { %v2606_v58 = vsel %vm535_vm3, %v2604_v53, 0.0  ;;  %v2598_v39 = vrot.slane %v2597_v57, 4  ;;  %v2639_v53 = vrot.slane %v5499_v16, %v4713_v8  ;;  %v2643_v47 = vrot.slane %v5499_v16, %v2642_v32 }
0x190e   :  { %v2592_v43 = vadd.f32 %v2591_v41, %v2590_v33  ;;  %v2607_v49 = vrot.slane %v2606_v58, 4  ;;  %v2613_v44 = vsel %vm389_vm11, %v2605_v36, 0.0  ;;  %v2662_v33 = vsub.s32 6, %v4633_v42 }
0x190f   :  { %v2599_v31 = vadd.f32 %v2598_v39, %v2597_v57  ;;  %v2614_v59 = vrot.slane %v2613_v44, 4  ;;  %v2659_v41 = vrot.slane %v5499_v16, %v4716_v50  ;;  %vm2762_vm3 = vcmask 58369  }
0x1910   :  { %v2593_v62 = vrot.slane %v2592_v43, 2  ;;  %v2608_v63 = vadd.f32 %v2607_v49, %v2606_v58  ;;  %v2663_v57 = vrot.slane %v5499_v16, %v2662_v33  ;;  %v2649_v58 = vrot.slane %v2639_v53, %v4713_v8  ;;  %v4287_v53 = vld [vmem:[%s6167_s17] sm:$0xff]  }
0x1911   :  { %v2600_v0 = vrot.slane %v2599_v31, 2  ;;  %v2615_v2 = vadd.f32 %v2614_v59, %v2613_v44  ;;  %v2653_v49 = vrot.slane %v2643_v47, %v4713_v8  ;;  %v2669_v42 = vrot.slane %v2659_v41, %v4716_v50  ;;  %4155 = vmatprep.subr.bf16.mxu1 %v4287_v53  ;;  %v4288_v47 = vld [vmem:[%s6167_s17 + $0x8] sm:$0xff]   ;;  %v4289_v41 = vld [vmem:[%s6167_s17 + $0x10] sm:$0xff]  }
0x1912   :  { %v2594_v3 = vadd.f32 %v2593_v62, %v2592_v43  ;;  %v2609_v4 = vrot.slane %v2608_v63, 2  ;;  %v2673_v62 = vrot.slane %v2663_v57, %v4716_v50  ;;  %4156 = vmatpush3.bf16.msra.mxu1 %v4287_v53  ;;  %v4290_v57 = vld [vmem:[%s6167_s17 + $0x18] ss:$0 sps:$4 sm:$0xff]  }
0x1913   :  { %v2601_v5 = vadd.f32 %v2600_v0, %v2599_v31  ;;  %v2616_v28 = vrot.slane %v2615_v2, 2  ;;  %4157 = vmatprep.subr.bf16.mxu1 %v4288_v47 }
0x1914   :  { %v2595_v7 = vrot.slane %v2594_v3, 1  ;;  %v2610_v55 = vadd.f32 %v2609_v4, %v2608_v63 }
0x1915   :  { %v2602_v38 = vrot.slane %v2601_v5, 1  ;;  %v2617_v56 = vadd.f32 %v2616_v28, %v2615_v2 }
0x1916   :  { %v2596_v9 = vadd.f32 %v2595_v7, %v2594_v3  ;;  %v2611_v54 = vrot.slane %v2610_v55, 1  ;;  %4158 = vmatpush3.bf16.msra.mxu1 %v4288_v47 }
0x1917   :  { %v2603_v11 = vadd.f32 %v2602_v38, %v2601_v5  ;;  %v2618_v48 = vrot.slane %v2617_v56, 1  ;;  %4159 = vmatprep.subr.bf16.mxu1 %v4289_v41 }
0x1918   :  { %v2612_v60 = vadd.f32 %v2611_v54, %v2610_v55  ;;  %v2620_v10 = vmul.f32 0.5, %v2596_v9 }
0x1919   :  { %v2619_v13 = vadd.f32 %v2618_v48, %v2617_v56  ;;  %v2621_v14 = vmul.f32 0.5, %v2603_v11 }
0x191a   :  { %v2622_v15 = vmul.f32 0.5, %v2612_v60  ;;  %v2624_v46 = vmul.f32 %v2620_v10, %v2620_v10  ;;  %v2628_v36 = vsub.f32 %v2584_v25, %v2620_v10  ;;  %4160 = vmatpush3.bf16.msra.mxu1 %v4289_v41 }
0x191b   :  { %v2623_v20 = vmul.f32 0.5, %v2619_v13  ;;  %v2625_v21 = vmul.f32 %v2621_v14, %v2621_v14  ;;  %v2629_v43 = vsub.f32 %v2586_v30, %v2621_v14  ;;  %4210 = vmatprep.subr.msk.bf16.mxu1 %vm472_vm14, %v4290_v57 }
0x191c   :  { %v2626_v22 = vsub.f32 %v2622_v15, %v2624_v46 }
0x191d   :  { %v2627_v40 = vsub.f32 %v2623_v20, %v2625_v21 }
0x191e   :  { %v2630_v24 = vadd.f32 1e-05, %v2626_v22 }
0x191f   :  { %v2631_v27 = vadd.f32 1e-05, %v2627_v40 }
0x1920   :  { %4362 = vrsqrt.f32 %v2630_v24 }
0x1921   :  { %4364 = vrsqrt.f32 %v2631_v27 }
0x192a   :  { %v4363_v39 = vpop.eup %4362 }
0x192b   :  { %v4365_v44 = vpop.eup %4364  ;;  %v2634_v31 = vmul.f32 %v4363_v39, %v2628_v36  ;;  %v3074_v36 = vsel %vm472_vm14, %v4290_v57, 0  ;;  %vm2811_vm14 = vcmask 130113  }
0x192c   :  { %v2635_v59 = vmul.f32 %v4365_v44, %v2629_v43  ;;  %4162 = vmatpush3.bf16.msra.mxu1 %v3074_v36 }
0x192d   :  { %v2654_v63 = vmul.f32 %v2649_v58, %v2634_v31 }
0x192e   :  { %v2655_v0 = vmul.f32 %v2653_v49, %v2635_v59 }
0x192f   :  { %v2674_v2 = vadd.f32 %v2669_v42, %v2654_v63 }
0x1930   :  { %v2675_v3 = vadd.f32 %v2673_v62, %v2655_v0 }
0x1931   :  { %v2676_v16 = vmax.f32 %v2674_v2, 0.0 }
0x1932   :  { %v2677_v25 = vmax.f32 %v2675_v3, 0.0 }
0x1933   :  { %2686 = vst.msk [vmem:[#allocation6 + $0x6] sm:$0x1] %vm6251_vm13, %v2676_v16  ;;  %2692 = vrot.lane.b32.xlu0 %v2676_v16, %s4398_s5  ;;  %2688 = vrot.lane.b32.xlu1 %v2676_v16, %s4401_s1  ;;  %vm6265_vm13 = vmmov %vm6260_vm0 }
0x1934   :  { %2763 = vst.msk [vmem:[#allocation6 + $0x25] sm:$0x2] %vm2762_vm3, %v2676_v16  ;;  %2779 = vst.msk [vmem:[#allocation6 + $0x35] sm:$0x2] %vm2762_vm3, %v2677_v25 }
0x1935   :  { %2748 = vst.msk [vmem:[#allocation6 + $0x16] sm:$0x1] %vm6252_vm10, %v2677_v25  ;;  %vm6266_vm10 = vmmov %vm6260_vm0 }
0x1937   :  { %2700 = vrot.lane.b32.xlu0 %v2676_v16, %s6248_s27  ;;  %2696 = vrot.lane.b32.xlu1 %v2676_v16, %s4397_s25  ;;  %s4411_s27 = smov 124  }
0x193b   :  { %2708 = vrot.lane.b32.xlu0 %v2676_v16, %s4391_s30  ;;  %2704 = vrot.lane.b32.xlu1 %v2676_v16, %s6249_s10  ;;  %s6257_s30 = smov 8   ;;  %s4412_s10 = smov 123  }
0x193f   :  { %2716 = vrot.lane.b32.xlu0 %v2676_v16, %s6246_s7  ;;  %2712 = vrot.lane.b32.xlu1 %v2676_v16, %s6253_s16 }
0x1943   :  { %2724 = vrot.lane.b32.xlu0 %v2676_v16, %s6254_s0  ;;  %2720 = vrot.lane.b32.xlu1 %v2676_v16, %s6255_s28 }
0x1947   :  { %2732 = vrot.lane.b32.xlu0 %v2676_v16, %s6245_s26  ;;  %2728 = vrot.lane.b32.xlu1 %v2676_v16, %s6247_s2 }
0x194b   :  { %2740 = vrot.lane.b32.xlu0 %v2676_v16, %s6256_s4  ;;  %2736 = vrot.lane.b32.xlu1 %v2676_v16, %s6250_s11 }
0x194f   :  { %2750 = vrot.lane.b32.xlu0 %v2677_v25, %s4401_s1  ;;  %2744 = vrot.lane.b32.xlu1 %v2676_v16, %s6257_s30 }
0x1953   :  { %2758 = vrot.lane.b32.xlu0 %v2677_v25, %s4397_s25  ;;  %2754 = vrot.lane.b32.xlu1 %v2677_v25, %s4398_s5 }
0x19a5   :  { %v2693_v30 = vpop.permute.xlu0 %2692  ;;  %v2689_v4 = vpop.permute.xlu1 %2688 }
0x19a6   :  { %2695 = vst.msk [vmem:[#allocation6 + $0x8] sm:$0x1] %vm6258_vm7, %v2693_v30  ;;  %vm6267_vm7 = vmmov %vm6260_vm0 }
0x19a7   :  { %2765 = vst.msk [vmem:[#allocation6 + $0x27] sm:$0x2] %vm2762_vm3, %v2693_v30  ;;  %2764 = vst.msk [vmem:[#allocation6 + $0x26] sm:$0x2] %vm2762_vm3, %v2689_v4 }
0x19a8   :  { %2691 = vst.msk [vmem:[#allocation6 + $0x7] sm:$0x1] %vm6259_vm6, %v2689_v4  ;;  %vm6268_vm6 = vmmov %vm6260_vm0 }
0x19a9   :  { %v2701_v5 = vpop.permute.xlu0 %2700  ;;  %v2697_v28 = vpop.permute.xlu1 %2696 }
0x19aa   :  { %2703 = vst.msk [vmem:[#allocation6 + $0xa] sm:$0x1] %vm6260_vm0, %v2701_v5 }
0x19ab   :  { %2767 = vst.msk [vmem:[#allocation6 + $0x29] sm:$0x2] %vm2762_vm3, %v2701_v5  ;;  %2766 = vst.msk [vmem:[#allocation6 + $0x28] sm:$0x2] %vm2762_vm3, %v2697_v28 }
0x19ac   :  { %2699 = vst.msk [vmem:[#allocation6 + $0x9] sm:$0x1] %vm6261_vm15, %v2697_v28  ;;  %vm6269_vm15 = vmmov %vm6260_vm0 }
0x19ad   :  { %v2709_v7 = vpop.permute.xlu0 %2708  ;;  %v2705_v55 = vpop.permute.xlu1 %2704 }
0x19ae   :  { %v5555_v56 = vld [vmem:[#allocation6 + $0x20] sm:$0xff]  ;;  %2711 = vst.msk [vmem:[#allocation6 + $0xc] sm:$0x1] %vm6262_vm12, %v2709_v7  ;;  %vm6270_vm12 = vmmov %vm6260_vm0 }
0x19af   :  { %v5553_v38 = vld [vmem:[#allocation6] sm:$0xff]  ;;  %2769 = vst.msk [vmem:[#allocation6 + $0x2b] sm:$0x2] %vm2762_vm3, %v2709_v7  ;;  %2768 = vst.msk [vmem:[#allocation6 + $0x2a] sm:$0x2] %vm2762_vm3, %v2705_v55 }
0x19b0   :  { %2707 = vst.msk [vmem:[#allocation6 + $0xb] sm:$0x1] %vm6263_vm2, %v2705_v55  ;;  %2799 = vrot.lane.b32.xlu1 %v5553_v38, %s6257_s30  ;;  %vm6271_vm2 = vmmov %vm6260_vm0 }
0x19b1   :  { %2791 = vst.msk [vmem:[#allocation7] sm:$0xff] %vm1208_vm1, %v5553_v38  ;;  %2912 = vst.msk [vmem:[#allocation7 + $0x1a] sm:$0xff] %vm1208_vm1, %v5555_v56  ;;  %v2717_v9 = vpop.permute.xlu0 %2716  ;;  %v2713_v54 = vpop.permute.xlu1 %2712 }
0x19b2   :  { %2719 = vst.msk [vmem:[#allocation6 + $0xe] sm:$0x1] %vm6264_vm4, %v2717_v9  ;;  %vm6272_vm4 = vmmov %vm6260_vm0 }
0x19b3   :  { %2771 = vst.msk [vmem:[#allocation6 + $0x2d] sm:$0x2] %vm2762_vm3, %v2717_v9  ;;  %2770 = vst.msk [vmem:[#allocation6 + $0x2c] sm:$0x2] %vm2762_vm3, %v2713_v54 }
0x19b4   :  { %2715 = vst.msk [vmem:[#allocation6 + $0xd] sm:$0x1] %vm6265_vm13, %v2713_v54  ;;  %2818 = vrot.lane.b32.xlu1 %v5553_v38, %s6256_s4  ;;  %vm6273_vm13 = vmmov %vm6260_vm0 }
0x19b5   :  { %v2725_v11 = vpop.permute.xlu0 %2724  ;;  %v2721_v48 = vpop.permute.xlu1 %2720 }
0x19b6   :  { %2727 = vst.msk [vmem:[#allocation6 + $0x10] sm:$0x1] %vm6266_vm10, %v2725_v11  ;;  %vm6274_vm10 = vmmov %vm6260_vm0 }
0x19b7   :  { %2773 = vst.msk [vmem:[#allocation6 + $0x2f] sm:$0x2] %vm2762_vm3, %v2725_v11  ;;  %2772 = vst.msk [vmem:[#allocation6 + $0x2e] sm:$0x2] %vm2762_vm3, %v2721_v48 }
0x19b8   :  { %2723 = vst.msk [vmem:[#allocation6 + $0xf] sm:$0x1] %vm6267_vm7, %v2721_v48  ;;  %vm2832_vm7 = vcmask 195712  }
0x19b9   :  { %v2733_v60 = vpop.permute.xlu0 %2732  ;;  %v2729_v10 = vpop.permute.xlu1 %2728 }
0x19ba   :  { %2735 = vst.msk [vmem:[#allocation6 + $0x12] sm:$0x1] %vm6268_vm6, %v2733_v60  ;;  %vm2849_vm6 = vcmask 261315  }
0x19bb   :  { %2775 = vst.msk [vmem:[#allocation6 + $0x31] sm:$0x2] %vm2762_vm3, %v2733_v60  ;;  %2774 = vst.msk [vmem:[#allocation6 + $0x30] sm:$0x2] %vm2762_vm3, %v2729_v10 }
0x19bc   :  { %2731 = vst.msk [vmem:[#allocation6 + $0x11] sm:$0x1] %vm6260_vm0, %v2729_v10  ;;  %vm2851_vm0 = vcmask 261312  }
0x19bd   :  { %v2741_v13 = vpop.permute.xlu0 %2740  ;;  %v2737_v14 = vpop.permute.xlu1 %2736 }
0x19be   :  { %v2788_v46 = vld [vmem:[#allocation6 + $0x28] sm:$0xff]  ;;  %2743 = vst.msk [vmem:[#allocation6 + $0x14] sm:$0x1] %vm6269_vm15, %v2741_v13  ;;  %vm2868_vm15 = vcmask 326916  }
0x19bf   :  { %v2784_v15 = vld [vmem:[#allocation6 + $0x8] sm:$0xff]  ;;  %2777 = vst.msk [vmem:[#allocation6 + $0x33] sm:$0x2] %vm2762_vm3, %v2741_v13  ;;  %2776 = vst.msk [vmem:[#allocation6 + $0x32] sm:$0x2] %vm2762_vm3, %v2737_v14  ;;  %2922 = vrot.lane.b32.xlu1 %v2788_v46, %s6257_s30 }
0x19c0   :  { %2739 = vst.msk [vmem:[#allocation6 + $0x13] sm:$0x1] %vm6270_vm12, %v2737_v14  ;;  %2801 = vrot.lane.b32.xlu0 %v2784_v15, %s6257_s30  ;;  %vm2870_vm12 = vcmask 326912  }
0x19c1   :  { %2792 = vst.msk [vmem:[#allocation7 + $0x8] sm:$0xff] %vm1208_vm1, %v2784_v15  ;;  %2913 = vst.msk [vmem:[#allocation7 + $0x22] sm:$0xff] %vm1208_vm1, %v2788_v46  ;;  %v2751_v20 = vpop.permute.xlu0 %2750  ;;  %v2745_v21 = vpop.permute.xlu1 %2744 }
0x19c2   :  { %2753 = vst.msk [vmem:[#allocation6 + $0x17] sm:$0x1] %vm6271_vm2, %v2751_v20  ;;  %vm2887_vm2 = vcmask 392517  }
0x19c3   :  { %2780 = vst.msk [vmem:[#allocation6 + $0x36] sm:$0x2] %vm2762_vm3, %v2751_v20  ;;  %2778 = vst.msk [vmem:[#allocation6 + $0x34] sm:$0x2] %vm2762_vm3, %v2745_v21  ;;  %2837 = vrot.lane.b32.xlu1 %v5553_v38, %s6250_s11 }
0x19c4   :  { %2747 = vst.msk [vmem:[#allocation6 + $0x15] sm:$0x1] %vm6272_vm4, %v2745_v21  ;;  %2820 = vrot.lane.b32.xlu0 %v2784_v15, %s6256_s4  ;;  %vm2889_vm4 = vcmask 392512  }
0x19c5   :  { %v2759_v22 = vpop.permute.xlu0 %2758  ;;  %v2755_v40 = vpop.permute.xlu1 %2754 }
0x19c6   :  { %2761 = vst.msk [vmem:[#allocation6 + $0x19] sm:$0x1] %vm6273_vm13, %v2759_v22  ;;  %vm2906_vm13 = vcmask 458118  }
0x19c7   :  { %2782 = vst.msk [vmem:[#allocation6 + $0x38] sm:$0x2] %vm2762_vm3, %v2759_v22  ;;  %2781 = vst.msk [vmem:[#allocation6 + $0x37] sm:$0x2] %vm2762_vm3, %v2755_v40  ;;  %2938 = vrot.lane.b32.xlu1 %v2788_v46, %s6256_s4  ;;  %vm2813_vm3 = vcmask 130112  }
0x19c8   :  { %2757 = vst.msk [vmem:[#allocation6 + $0x18] sm:$0x1] %vm6274_vm10, %v2755_v40  ;;  %2920 = vrot.lane.b32.xlu0 %v5555_v56, %s6257_s30  ;;  %vm2908_vm10 = vcmask 458112  }
0x19ca   :  { %v2789_v27 = vld [vmem:[#allocation6 + $0x30] sm:$0xff] }
0x19cb   :  { %v2785_v24 = vld [vmem:[#allocation6 + $0x10] sm:$0xff]  ;;  %2856 = vrot.lane.b32.xlu1 %v5553_v38, %s6245_s26  ;;  %2914 = vst.msk [vmem:[#allocation7 + $0x2a] sm:$0xff] %vm1208_vm1, %v2789_v27 }
0x19cc   :  { %2839 = vrot.lane.b32.xlu0 %v2784_v15, %s6250_s11  ;;  %2793 = vst.msk [vmem:[#allocation7 + $0x10] sm:$0xff] %vm1208_vm1, %v2785_v24  ;;  %vm2830_vm1 = vcmask 195714  }
0x19ce   :  { %v2790_v33 = vld [vmem:[#allocation6 + $0x38] sm:$0xff] }
0x19cf   :  { %v2786_v32 = vld [vmem:[#allocation6 + $0x18] sm:$0xff]  ;;  %2954 = vrot.lane.b32.xlu1 %v2788_v46, %s6250_s11  ;;  %2915 = vst.msk [vmem:[#allocation7 + $0x32] sm:$0x3] %vm1865_vm5, %v2790_v33 }
0x19d0   :  { %2936 = vrot.lane.b32.xlu0 %v5555_v56, %s6256_s4  ;;  %2794 = vst.msk [vmem:[#allocation7 + $0x18] sm:$0x3] %vm1865_vm5, %v2786_v32 }
0x19d3   :  { %2875 = vrot.lane.b32.xlu1 %v5553_v38, %s6247_s2 }
0x19d4   :  { %2858 = vrot.lane.b32.xlu0 %v2784_v15, %s6245_s26 }
0x19d7   :  { %2970 = vrot.lane.b32.xlu1 %v2788_v46, %s6245_s26 }
0x19d8   :  { %2952 = vrot.lane.b32.xlu0 %v5555_v56, %s6250_s11 }
0x19db   :  { %2894 = vrot.lane.b32.xlu1 %v5553_v38, %s6254_s0 }
0x19dc   :  { %2877 = vrot.lane.b32.xlu0 %v2784_v15, %s6247_s2 }
0x19df   :  { %2986 = vrot.lane.b32.xlu1 %v2788_v46, %s6247_s2 }
0x19e0   :  { %2968 = vrot.lane.b32.xlu0 %v5555_v56, %s6245_s26 }
0x19e3   :  { %3000 = vrot.lane.b32.xlu1 %v5555_v56, %s6254_s0 }
0x19e4   :  { %2896 = vrot.lane.b32.xlu0 %v2784_v15, %s6254_s0 }
0x19e7   :  { %2803 = vrot.lane.b32.xlu1 %v2785_v24, %s6257_s30 }
0x19e8   :  { %2984 = vrot.lane.b32.xlu0 %v5555_v56, %s6247_s2 }
0x19eb   :  { %2822 = vrot.lane.b32.xlu1 %v2785_v24, %s6256_s4 }
0x19ec   :  { %3002 = vrot.lane.b32.xlu0 %v2788_v46, %s6254_s0 }
0x19ef   :  { %2841 = vrot.lane.b32.xlu1 %v2785_v24, %s6250_s11 }
0x19f0   :  { %2805 = vrot.lane.b32.xlu0 %v2786_v32, %s6257_s30 }
0x19f3   :  { %2860 = vrot.lane.b32.xlu1 %v2785_v24, %s6245_s26 }
0x19f4   :  { %2824 = vrot.lane.b32.xlu0 %v2786_v32, %s6256_s4 }
0x19f7   :  { %2879 = vrot.lane.b32.xlu1 %v2785_v24, %s6247_s2 }
0x19f8   :  { %2843 = vrot.lane.b32.xlu0 %v2786_v32, %s6250_s11 }
0x19fb   :  { %2898 = vrot.lane.b32.xlu1 %v2785_v24, %s6254_s0 }
0x19fc   :  { %2862 = vrot.lane.b32.xlu0 %v2786_v32, %s6245_s26 }
0x19ff   :  { %2924 = vrot.lane.b32.xlu1 %v2789_v27, %s6257_s30 }
0x1a00   :  { %2881 = vrot.lane.b32.xlu0 %v2786_v32, %s6247_s2 }
0x1a03   :  { %2940 = vrot.lane.b32.xlu1 %v2789_v27, %s6256_s4 }
0x1a04   :  { %2900 = vrot.lane.b32.xlu0 %v2786_v32, %s6254_s0 }
0x1a07   :  { %2956 = vrot.lane.b32.xlu1 %v2789_v27, %s6250_s11 }
0x1a08   :  { %2926 = vrot.lane.b32.xlu0 %v2790_v33, %s6257_s30 }
0x1a0b   :  { %2972 = vrot.lane.b32.xlu1 %v2789_v27, %s6245_s26 }
0x1a0c   :  { %2942 = vrot.lane.b32.xlu0 %v2790_v33, %s6256_s4 }
0x1a0f   :  { %2988 = vrot.lane.b32.xlu1 %v2789_v27, %s6247_s2 }
0x1a10   :  { %2958 = vrot.lane.b32.xlu0 %v2790_v33, %s6250_s11 }
0x1a13   :  { %3004 = vrot.lane.b32.xlu1 %v2789_v27, %s6254_s0 }
0x1a14   :  { %2974 = vrot.lane.b32.xlu0 %v2790_v33, %s6245_s26 }
0x1a18   :  { %2990 = vrot.lane.b32.xlu0 %v2790_v33, %s6247_s2 }
0x1a1c   :  { %3006 = vrot.lane.b32.xlu0 %v2790_v33, %s6254_s0 }
0x1a22   :  { %v2800_v58 = vpop.permute.xlu1 %2799 }
0x1a23   :  { %2812 = vst.msk [vmem:[#allocation7 - $0x1] sm:$0xfe] %vm2811_vm14, %v2800_v58 }
0x1a26   :  { %v2819_v39 = vpop.permute.xlu1 %2818 }
0x1a27   :  { %2831 = vst.msk [vmem:[#allocation7 - $0x2] sm:$0xfc] %vm2830_vm1, %v2819_v39 }
0x1a31   :  { %v2923_v49 = vpop.permute.xlu1 %2922 }
0x1a32   :  { %v2802_v43 = vpop.permute.xlu0 %2801  ;;  %2933 = vst.msk [vmem:[#allocation7 + $0x21] sm:$0xff] %vm2813_vm3, %v2923_v49 }
0x1a33   :  { %2814 = vst.msk [vmem:[#allocation7 + $0x7] sm:$0xff] %vm2813_vm3, %v2802_v43 }
0x1a35   :  { %v2838_v31 = vpop.permute.xlu1 %2837 }
0x1a36   :  { %v2821_v44 = vpop.permute.xlu0 %2820  ;;  %2850 = vst.msk [vmem:[#allocation7 - $0x3] sm:$0xf8] %vm2849_vm6, %v2838_v31 }
0x1a37   :  { %2833 = vst.msk [vmem:[#allocation7 + $0x6] sm:$0xff] %vm2832_vm7, %v2821_v44 }
0x1a39   :  { %v2939_v59 = vpop.permute.xlu1 %2938 }
0x1a3a   :  { %v2921_v42 = vpop.permute.xlu0 %2920 }
0x1a3b   :  { %2932 = vst.msk [vmem:[#allocation7 + $0x19] sm:$0xfe] %vm2811_vm14, %v2921_v42  ;;  %vm2816_vm14 = vcmask 124992  }
0x1a3c   :  { %2949 = vst.msk [vmem:[#allocation7 + $0x20] sm:$0xff] %vm2832_vm7, %v2939_v59 }
0x1a3d   :  { %v2857_v63 = vpop.permute.xlu1 %2856 }
0x1a3e   :  { %v2840_v62 = vpop.permute.xlu0 %2839  ;;  %2869 = vst.msk [vmem:[#allocation7 - $0x4] sm:$0xf0] %vm2868_vm15, %v2857_v63 }
0x1a3f   :  { %2852 = vst.msk [vmem:[#allocation7 + $0x5] sm:$0xff] %vm2851_vm0, %v2840_v62 }
0x1a41   :  { %v2955_v2 = vpop.permute.xlu1 %2954 }
0x1a42   :  { %v2937_v0 = vpop.permute.xlu0 %2936 }
0x1a43   :  { %2948 = vst.msk [vmem:[#allocation7 + $0x18] sm:$0xfc] %vm2830_vm1, %v2937_v0  ;;  %vm2835_vm1 = vcmask 191616  }
0x1a44   :  { %2965 = vst.msk [vmem:[#allocation7 + $0x1f] sm:$0xff] %vm2851_vm0, %v2955_v2 }
0x1a45   :  { %v2876_v16 = vpop.permute.xlu1 %2875 }
0x1a46   :  { %v2859_v3 = vpop.permute.xlu0 %2858  ;;  %2888 = vst.msk [vmem:[#allocation7 - $0x5] sm:$0xe0] %vm2887_vm2, %v2876_v16  ;;  %v5721_v16 = vld [vmem:[#allocation8 + $0x40] sm:$0xf] }
0x1a47   :  { %2871 = vst.msk [vmem:[#allocation7 + $0x4] sm:$0xff] %vm2870_vm12, %v2859_v3  ;;  %3358 = vrot.lane.b32.xlu0 %v5721_v16, %s6256_s4 }
0x1a49   :  { %v2971_v30 = vpop.permute.xlu1 %2970 }
0x1a4a   :  { %v2953_v25 = vpop.permute.xlu0 %2952 }
0x1a4b   :  { %2964 = vst.msk [vmem:[#allocation7 + $0x17] sm:$0xf8] %vm2849_vm6, %v2953_v25  ;;  %vm2854_vm6 = vcmask 258240   ;;  %3379 = vrot.lane.b32.xlu0 %v5721_v16, %s6245_s26  ;;  %v5732_v25 = vld [vmem:[%s6168_s18] sm:$0x7] }
0x1a4c   :  { %2981 = vst.msk [vmem:[#allocation7 + $0x1e] sm:$0xff] %vm2870_vm12, %v2971_v30  ;;  %v3038_v30 = vrot.slane %v5732_v25, %v4644_v45 }
0x1a4d   :  { %v2895_v5 = vpop.permute.xlu1 %2894 }
0x1a4e   :  { %v2878_v4 = vpop.permute.xlu0 %2877  ;;  %2907 = vst.msk [vmem:[#allocation7 - $0x6] sm:$0xc0] %vm2906_vm13, %v2895_v5 }
0x1a4f   :  { %2890 = vst.msk [vmem:[#allocation7 + $0x3] sm:$0xff] %vm2889_vm4, %v2878_v4  ;;  %3398 = vrot.lane.b32.xlu0 %v5721_v16, %s6254_s0 }
0x1a51   :  { %v2987_v7 = vpop.permute.xlu1 %2986 }
0x1a52   :  { %v2969_v28 = vpop.permute.xlu0 %2968 }
0x1a53   :  { %2980 = vst.msk [vmem:[#allocation7 + $0x16] sm:$0xf0] %vm2868_vm15, %v2969_v28  ;;  %vm2873_vm15 = vcmask 324864  }
0x1a54   :  { %2997 = vst.msk [vmem:[#allocation7 + $0x1d] sm:$0xff] %vm2889_vm4, %v2987_v7 }
0x1a55   :  { %v3001_v38 = vpop.permute.xlu1 %3000 }
0x1a56   :  { %v2897_v55 = vpop.permute.xlu0 %2896 }
0x1a57   :  { %2909 = vst.msk [vmem:[#allocation7 + $0x2] sm:$0xff] %vm2908_vm10, %v2897_v55 }
0x1a59   :  { %v2804_v9 = vpop.permute.xlu1 %2803 }
0x1a5a   :  { %v2985_v56 = vpop.permute.xlu0 %2984  ;;  %2815 = vst.msk [vmem:[#allocation7 + $0xf] sm:$0xff] %vm2813_vm3, %v2804_v9 }
0x1a5b   :  { %2996 = vst.msk [vmem:[#allocation7 + $0x15] sm:$0xe0] %vm2887_vm2, %v2985_v56  ;;  %vm2892_vm2 = vcmask 391488  }
0x1a5c   :  { %3012 = vst.msk [vmem:[#allocation7 + $0x14] sm:$0xc0] %vm2906_vm13, %v3001_v38  ;;  %vm3060_vm13 = vcmask 457728  }
0x1a5d   :  { %v2823_v11 = vpop.permute.xlu1 %2822 }
0x1a5e   :  { %v3003_v54 = vpop.permute.xlu0 %3002  ;;  %2834 = vst.msk [vmem:[#allocation7 + $0xe] sm:$0xff] %vm2832_vm7, %v2823_v11  ;;  %v3016_v27 = vld [vmem:[#allocation7] sm:$0xff] }
0x1a5f   :  { %3013 = vst.msk [vmem:[#allocation7 + $0x1c] sm:$0xff] %vm2908_vm10, %v3003_v54 }
0x1a61   :  { %v2842_v60 = vpop.permute.xlu1 %2841 }
0x1a62   :  { %v2806_v48 = vpop.permute.xlu0 %2805  ;;  %2853 = vst.msk [vmem:[#allocation7 + $0xd] sm:$0xff] %vm2851_vm0, %v2842_v60 }
0x1a63   :  { %2817 = vst.msk [vmem:[#allocation7 + $0x17] sm:$0x7] %vm2816_vm14, %v2806_v48 }
0x1a65   :  { %v2861_v13 = vpop.permute.xlu1 %2860 }
0x1a66   :  { %v2825_v10 = vpop.permute.xlu0 %2824  ;;  %2872 = vst.msk [vmem:[#allocation7 + $0xc] sm:$0xff] %vm2870_vm12, %v2861_v13 }
0x1a67   :  { %2836 = vst.msk [vmem:[#allocation7 + $0x16] sm:$0xf] %vm2835_vm1, %v2825_v10 }
0x1a69   :  { %v2880_v15 = vpop.permute.xlu1 %2879 }
0x1a6a   :  { %v2844_v14 = vpop.permute.xlu0 %2843  ;;  %2891 = vst.msk [vmem:[#allocation7 + $0xb] sm:$0xff] %vm2889_vm4, %v2880_v15 }
0x1a6b   :  { %2855 = vst.msk [vmem:[#allocation7 + $0x15] sm:$0x1f] %vm2854_vm6, %v2844_v14 }
0x1a6d   :  { %v2899_v20 = vpop.permute.xlu1 %2898 }
0x1a6e   :  { %v2863_v46 = vpop.permute.xlu0 %2862  ;;  %2910 = vst.msk [vmem:[#allocation7 + $0xa] sm:$0xff] %vm2908_vm10, %v2899_v20 }
0x1a6f   :  { %2874 = vst.msk [vmem:[#allocation7 + $0x14] sm:$0x3f] %vm2873_vm15, %v2863_v46 }
0x1a71   :  { %v2925_v22 = vpop.permute.xlu1 %2924 }
0x1a72   :  { %v2882_v21 = vpop.permute.xlu0 %2881  ;;  %2934 = vst.msk [vmem:[#allocation7 + $0x29] sm:$0xff] %vm2813_vm3, %v2925_v22  ;;  %vm6275_vm3 = vcmask 130048  }
0x1a73   :  { %2893 = vst.msk [vmem:[#allocation7 + $0x13] sm:$0x7f] %vm2892_vm2, %v2882_v21 }
0x1a75   :  { %v2941_v24 = vpop.permute.xlu1 %2940  ;;  %v3017_v32 = vld [vmem:[#allocation7 + $0x8] sm:$0xff] }
0x1a76   :  { %v2901_v40 = vpop.permute.xlu0 %2900  ;;  %2950 = vst.msk [vmem:[#allocation7 + $0x28] sm:$0xff] %vm2832_vm7, %v2941_v24  ;;  %v3023_v33 = vpack.c.bf16 %v3017_v32, %v3016_v27  ;;  %vm6276_vm7 = vmmov %vm6275_vm3 }
0x1a77   :  { %2911 = vst.msk [vmem:[#allocation7 + $0x12] sm:$0xff] %vm2908_vm10, %v2901_v40 }
0x1a78   :  { %4163 = vmatprep.mubr.msk.bf16.mxu1 %vm3060_vm13, %v3023_v33 }
0x1a79   :  { %v2957_v47 = vpop.permute.xlu1 %2956 }
0x1a7a   :  { %v2927_v53 = vpop.permute.xlu0 %2926  ;;  %2966 = vst.msk [vmem:[#allocation7 + $0x27] sm:$0xff] %vm2851_vm0, %v2957_v47  ;;  %vm6277_vm0 = vmmov %vm6275_vm3 }
0x1a7b   :  { %2935 = vst.msk [vmem:[#allocation7 + $0x31] sm:$0x7] %vm2816_vm14, %v2927_v53  ;;  %vm6281_vm14 = vmmov %vm6277_vm0 }
0x1a7d   :  { %v2973_v57 = vpop.permute.xlu1 %2972 }
0x1a7e   :  { %v2943_v41 = vpop.permute.xlu0 %2942  ;;  %v3018_v36 = vld [vmem:[#allocation7 + $0x10] sm:$0xff]  ;;  %v3019_v58 = vld [vmem:[#allocation7 + $0x18] sm:$0xff]  ;;  %2982 = vst.msk [vmem:[#allocation7 + $0x26] sm:$0xff] %vm2870_vm12, %v2973_v57  ;;  %vm6278_vm12 = vmmov %vm6277_vm0 }
0x1a7f   :  { %2951 = vst.msk [vmem:[#allocation7 + $0x30] sm:$0xf] %vm2835_vm1, %v2943_v41  ;;  %v3024_v39 = vpack.c.bf16 %v3019_v58, %v3018_v36  ;;  %vm6282_vm1 = vmmov %vm6277_vm0 }
0x1a81   :  { %4164 = vmatmul.mubr.msk.bf16.vlgmr.msra.gmra.mrb[20].mxu1 %vm3060_vm13, %v3024_v39  ;;  %v2989_v49 = vpop.permute.xlu1 %2988 }
0x1a82   :  { %v2959_v43 = vpop.permute.xlu0 %2958  ;;  %2998 = vst.msk [vmem:[#allocation7 + $0x25] sm:$0xff] %vm2889_vm4, %v2989_v49  ;;  %vm6279_vm4 = vmmov %vm6277_vm0 }
0x1a83   :  { %2967 = vst.msk [vmem:[#allocation7 + $0x2f] sm:$0x1f] %vm2854_vm6, %v2959_v43  ;;  %vm6283_vm6 = vmmov %vm6277_vm0 }
0x1a85   :  { %v3005_v31 = vpop.permute.xlu1 %3004 }
0x1a86   :  { %v2975_v44 = vpop.permute.xlu0 %2974  ;;  %3014 = vst.msk [vmem:[#allocation7 + $0x24] sm:$0xff] %vm2908_vm10, %v3005_v31 }
0x1a87   :  { %2983 = vst.msk [vmem:[#allocation7 + $0x2e] sm:$0x3f] %vm2873_vm15, %v2975_v44  ;;  %vm6284_vm15 = vmmov %vm6277_vm0 }
0x1a8a   :  { %v2991_v42 = vpop.permute.xlu0 %2990 }
0x1a8b   :  { %2999 = vst.msk [vmem:[#allocation7 + $0x2d] sm:$0x7f] %vm2892_vm2, %v2991_v42  ;;  %vm6285_vm2 = vmmov %vm6277_vm0 }
0x1a8d   :  { %v3020_v62 = vld [vmem:[#allocation7 + $0x20] sm:$0xff] }
0x1a8e   :  { %v3007_v59 = vpop.permute.xlu0 %3006 }
0x1a8f   :  { %3015 = vst.msk [vmem:[#allocation7 + $0x2c] sm:$0xff] %vm2908_vm10, %v3007_v59  ;;  %vm6280_vm10 = vmmov %vm6277_vm0 }
0x1a96   :  { %v3021_v63 = vld [vmem:[#allocation7 + $0x28] sm:$0xff]  ;;  %v3022_v0 = vld [vmem:[#allocation7 + $0x30] sm:$0xf] }
0x1a97   :  { %v3025_v2 = vpack.c.bf16 %v3021_v63, %v3020_v62  ;;  %v3026_v3 = vpack.c.bf16 %v3022_v0, %v3022_v0 }
0x1a99   :  { %4167 = vmatprep.mubr.msk.bf16.mxu1 %vm3060_vm13, %v3025_v2 }
0x1a9a   :  { %4168 = vmatmul.mubr.msk.bf16.gmra.mrb[24].mxu1 %vm3060_vm13, %v3026_v3  ;;  %vm6286_vm13 = vcmask 125952  }
0x1b54   :  { %v4165_v4 = vpop.f32.mrb[20].mxu1 }
0x1b55   :  { %v3110_v5 = vpop.f32.mrb[21].mxu1  ;;  %v5736_v28 = vadd.f32 %v4165_v4, %v3038_v30 }
0x1b56   :  { %v5738_v7 = vadd.f32 %v3110_v5, %v3038_v30  ;;  %v4166_v55 = vpop.f32.mrb[22].mxu1 }
0x1b57   :  { %v3113_v38 = vpop.f32.mrb[23].mxu1  ;;  %v5742_v9 = vadd.f32 %v4166_v55, %v3038_v30  ;;  %v3161_v11 = vmul.f32 %v5736_v28, %v5736_v28  ;;  %v3143_v14 = vsel %vm6277_vm0, %v5736_v28, 0.0 }
0x1b58   :  { %v3159_v56 = vmul.f32 %v5738_v7, %v5738_v7  ;;  %v5744_v54 = vadd.f32 %v3113_v38, %v3038_v30  ;;  %v3140_v48 = vsel %vm6275_vm3, %v5738_v7, 0.0  ;;  %vm6287_vm3 = vmmov %vm6277_vm0  ;;  %vm3246_vm0 = vcmask 123904  }
0x1b59   :  { %v3162_v46 = vmul.f32 %v5742_v9, %v5742_v9  ;;  %v3169_v40 = vsel %vm6280_vm10, %v3161_v11, 0.0  ;;  %v3145_v24 = vsel %vm6281_vm14, %v5742_v9, 0.0  ;;  %vm6291_vm10 = vmmov %vm6282_vm1 }
0x1b5a   :  { %v3141_v60 = vsel %vm6276_vm7, %v5744_v54, 0.0  ;;  %v3160_v10 = vmul.f32 %v5744_v54, %v5744_v54  ;;  %v3166_v15 = vsel %vm6278_vm12, %v3159_v56, 0.0  ;;  %vm6288_vm7 = vmmov %vm6286_vm13  ;;  %vm6289_vm12 = vcmask 130050  }
0x1b5b   :  { %v3142_v13 = vadd.f32 %v3141_v60, %v3140_v48  ;;  %v3171_v33 = vsel %vm6282_vm1, %v3162_v46, 0.0  ;;  %vm6292_vm14 = vmmov %vm6282_vm1 }
0x1b5c   :  { %v3167_v20 = vsel %vm6279_vm4, %v3160_v10, 0.0  ;;  %vm6290_vm4 = vmmov %vm6282_vm1 }
0x1b5d   :  { %v3144_v21 = vadd.f32 %v3143_v14, %v3142_v13  ;;  %v3168_v22 = vadd.f32 %v3167_v20, %v3166_v15 }
0x1b5f   :  { %v3170_v27 = vadd.f32 %v3169_v40, %v3168_v22  ;;  %v3146_v32 = vadd.f32 %v3145_v24, %v3144_v21 }
0x1b61   :  { %v3172_v53 = vadd.f32 %v3171_v33, %v3170_v27 }
0x1b6d   :  { %v4169_v47 = vpop.f32.mrb[24].mxu1 }
0x1b6e   :  { %v3126_v41 = vpop.f32.mrb[25].mxu1  ;;  %v3135_v57 = vadd.f32 %v4169_v47, %v3038_v30 }
0x1b6f   :  { %v3127_v36 = vadd.f32 %v3126_v41, %v3038_v30  ;;  %v4170_v58 = vpop.f32.mrb[26].mxu1 }
0x1b70   :  { %v3129_v39 = vpop.f32.mrb[27].mxu1  ;;  %v3165_v42 = vmul.f32 %v3135_v57, %v3135_v57  ;;  %v3151_v3 = vsel %vm6286_vm13, %v3135_v57, 0.0  ;;  %vm6296_vm13 = vmmov %vm6282_vm1 }
0x1b71   :  { %v3147_v43 = vsel %vm6283_vm6, %v3127_v36, 0.0  ;;  %v3163_v49 = vmul.f32 %v3127_v36, %v3127_v36  ;;  %v3130_v44 = vadd.f32 %v3129_v39, %v3038_v30  ;;  %vm6293_vm6 = vmmov %vm6282_vm1 }
0x1b72   :  { %v3148_v31 = vadd.f32 %v3147_v43, %v3146_v32  ;;  %v3177_v38 = vsel %vm6288_vm7, %v3165_v42, 0.0 }
0x1b73   :  { %v3173_v59 = vsel %vm6284_vm15, %v3163_v49, 0.0  ;;  %v3149_v62 = vsel %vm6285_vm2, %v3130_v44, 0.0  ;;  %v3164_v63 = vmul.f32 %v3130_v44, %v3130_v44  ;;  %vm6294_vm15 = vmmov %vm6288_vm7  ;;  %vm3369_vm7 = vcmask 254080  }
0x1b74   :  { %v3174_v0 = vadd.f32 %v3173_v59, %v3172_v53  ;;  %v3150_v2 = vadd.f32 %v3149_v62, %v3148_v31  ;;  %v3208_v31 = vrot.slane %v5732_v25, %v4713_v8  ;;  %v3219_v59 = vrot.slane %v5732_v25, %v4716_v50  ;;  %vm6295_vm2 = vmmov %vm6282_vm1 }
0x1b75   :  { %v3175_v4 = vsel %vm6287_vm3, %v3164_v63, 0.0  ;;  %vm6297_vm3 = vcmask 128000  }
0x1b76   :  { %v3152_v5 = vadd.f32 %v3151_v3, %v3150_v2  ;;  %v3176_v55 = vadd.f32 %v3175_v4, %v3174_v0 }
0x1b78   :  { %v3153_v56 = vrot.slane %v3152_v5, 4  ;;  %v3178_v11 = vadd.f32 %v3177_v38, %v3176_v55 }
0x1b7a   :  { %v3154_v30 = vadd.f32 %v3153_v56, %v3152_v5  ;;  %v3179_v48 = vrot.slane %v3178_v11, 4 }
0x1b7c   :  { %v3155_v60 = vrot.slane %v3154_v30, 2  ;;  %v3180_v10 = vadd.f32 %v3179_v48, %v3178_v11 }
0x1b7e   :  { %v3156_v13 = vadd.f32 %v3155_v60, %v3154_v30  ;;  %v3181_v14 = vrot.slane %v3180_v10, 2 }
0x1b80   :  { %v3157_v15 = vrot.slane %v3156_v13, 1  ;;  %v3182_v46 = vadd.f32 %v3181_v14, %v3180_v10 }
0x1b82   :  { %v3158_v20 = vadd.f32 %v3157_v15, %v3156_v13  ;;  %v3183_v21 = vrot.slane %v3182_v46, 1 }
0x1b84   :  { %v3184_v22 = vadd.f32 %v3183_v21, %v3182_v46  ;;  %v3185_v40 = vmul.f32 0.01923077, %v3158_v20 }
0x1b86   :  { %v3186_v24 = vmul.f32 0.01923077, %v3184_v22  ;;  %v3187_v27 = vmul.f32 %v3185_v40, %v3185_v40  ;;  %v3189_v32 = vsub.f32 %v5738_v7, %v3185_v40  ;;  %v3190_v33 = vsub.f32 %v5744_v54, %v3185_v40 }
0x1b87   :  { %v3191_v53 = vsub.f32 %v5736_v28, %v3185_v40  ;;  %v3192_v47 = vsub.f32 %v5742_v9, %v3185_v40  ;;  %v3193_v41 = vsub.f32 %v3127_v36, %v3185_v40  ;;  %v3194_v58 = vsub.f32 %v3130_v44, %v3185_v40 }
0x1b88   :  { %v3188_v39 = vsub.f32 %v3186_v24, %v3187_v27  ;;  %v3195_v43 = vsub.f32 %v3135_v57, %v3185_v40 }
0x1b8a   :  { %v3196_v49 = vadd.f32 1e-05, %v3188_v39  ;;  %v4293_v39 = vld [vmem:[%s6169_s19 + $0x10] sm:$0xff]  }
0x1b8c   :  { %4366 = vrsqrt.f32 %v3196_v49  ;;  %v4295_v49 = vld [vmem:[%s6169_s19 + $0x20] sm:$0xff]  }
0x1b96   :  { %v4367_v42 = vpop.eup %4366 }
0x1b97   :  { %v3198_v7 = vmul.f32 %v4367_v42, %v3189_v32  ;;  %v3199_v62 = vmul.f32 %v4367_v42, %v3190_v33  ;;  %v3200_v54 = vmul.f32 %v4367_v42, %v3191_v53  ;;  %v3201_v63 = vmul.f32 %v4367_v42, %v3192_v47  ;;  %v3359_v47 = vpop.permute.xlu0 %3358 }
0x1b98   :  { %v3202_v28 = vmul.f32 %v4367_v42, %v3193_v41  ;;  %v3203_v0 = vmul.f32 %v4367_v42, %v3194_v58  ;;  %v3204_v9 = vmul.f32 %v4367_v42, %v3195_v43  ;;  %v4291_v41 = vld [vmem:[%s6169_s19] sm:$0xff]   ;;  %v4292_v58 = vld [vmem:[%s6169_s19 + $0x8] sm:$0xff]   ;;  %v4294_v43 = vld [vmem:[%s6169_s19 + $0x18] sm:$0xff]  }
0x1b99   :  { %v3212_v36 = vmul.f32 %v3208_v31, %v3201_v63  ;;  %v3209_v44 = vmul.f32 %v3208_v31, %v3198_v7  ;;  %v3210_v2 = vmul.f32 %v3208_v31, %v3199_v62  ;;  %v3211_v57 = vmul.f32 %v3208_v31, %v3200_v54  ;;  %4171 = vmatprep.subr.bf16.mxu0 %v4291_v41 }
0x1b9a   :  { %v3213_v3 = vmul.f32 %v3208_v31, %v3202_v28  ;;  %v3214_v4 = vmul.f32 %v3208_v31, %v3203_v0  ;;  %v3215_v5 = vmul.f32 %v3208_v31, %v3204_v9  ;;  %4172 = vmatpush3.bf16.msra.mxu0 %v4291_v41 }
0x1b9b   :  { %v3223_v55 = vadd.f32 %v3219_v59, %v3212_v36  ;;  %v3220_v38 = vadd.f32 %v3219_v59, %v3209_v44  ;;  %v3221_v56 = vadd.f32 %v3219_v59, %v3210_v2  ;;  %v3222_v11 = vadd.f32 %v3219_v59, %v3211_v57  ;;  %4173 = vmatprep.subr.bf16.mxu0 %v4292_v58  ;;  %v3380_v31 = vpop.permute.xlu0 %3379 }
0x1b9c   :  { %v3224_v30 = vadd.f32 %v3219_v59, %v3213_v3  ;;  %v3225_v25 = vadd.f32 %v3219_v59, %v3214_v4  ;;  %v3226_v48 = vadd.f32 %v3219_v59, %v3215_v5 }
0x1b9d   :  { %v3230_v60 = vmax.f32 %v3223_v55, 0.0  ;;  %v3227_v10 = vmax.f32 %v3220_v38, 0.0  ;;  %v3228_v13 = vmax.f32 %v3221_v56, 0.0  ;;  %v3229_v14 = vmax.f32 %v3222_v11, 0.0 }
0x1b9e   :  { %v3231_v15 = vmax.f32 %v3224_v30, 0.0  ;;  %v3232_v46 = vmax.f32 %v3225_v25, 0.0  ;;  %v3233_v20 = vmax.f32 %v3226_v48, 0.0  ;;  %4174 = vmatpush3.bf16.msra.mxu0 %v4292_v58 }
0x1b9f   :  { %3248 = vst.msk [vmem:[#allocation8 + $0x24] sm:$0xfc] %vm6289_vm12, %v3230_v60  ;;  %4175 = vmatprep.subr.bf16.mxu0 %v4293_v39  ;;  %v5844_v42 = vpop.permute.xlu0 %3398 }
0x1ba0   :  { %3243 = vst.msk [vmem:[#allocation8 + $0x4] sm:$0xff] %vm6290_vm4, %v3227_v10 }
0x1ba1   :  { %3244 = vst.msk [vmem:[#allocation8 + $0xc] sm:$0xff] %vm6291_vm10, %v3228_v13 }
0x1ba2   :  { %3245 = vst.msk [vmem:[#allocation8 + $0x14] sm:$0xff] %vm6292_vm14, %v3229_v14  ;;  %4176 = vmatpush3.bf16.msra.mxu0 %v4293_v39 }
0x1ba3   :  { %3247 = vst.msk [vmem:[#allocation8 + $0x1c] sm:$0x3] %vm3246_vm0, %v3230_v60  ;;  %vm6298_vm0 = vmmov %vm6282_vm1  ;;  %4177 = vmatprep.subr.bf16.mxu0 %v4294_v43 }
0x1ba4   :  { %3249 = vst.msk [vmem:[#allocation8 + $0x2c] sm:$0xff] %vm6282_vm1, %v3231_v15  ;;  %vm6299_vm4 = vmmov %vm6298_vm0  ;;  %vm6302_vm1 = vcmask 261248  }
0x1ba5   :  { %3250 = vst.msk [vmem:[#allocation8 + $0x34] sm:$0xff] %vm6293_vm6, %v3232_v46  ;;  %vm6300_vm10 = vmmov %vm6298_vm0  ;;  %vm6303_vm6 = vcmask 261249  }
0x1ba6   :  { %3251 = vst.msk [vmem:[#allocation8 + $0x3c] sm:$0xf] %vm6294_vm15, %v3233_v20  ;;  %v3256_v27 = vld [vmem:[#allocation8 + $0x20] sm:$0xff]  ;;  %vm6301_vm14 = vmmov %vm6298_vm0  ;;  %4178 = vmatpush3.bf16.msra.mxu0 %v4294_v43  ;;  %vm6304_vm15 = vcmask 260224  }
0x1ba7   :  { %v3252_v22 = vld [vmem:[#allocation8] sm:$0xff]  ;;  %3342 = vst.msk [vmem:[#allocation9 + $0x1c] sm:$0xfc] %vm6289_vm12, %v3256_v27  ;;  %4179 = vmatprep.subr.bf16.mxu0 %v4295_v49  ;;  %vm6310_vm12 = vcmask 523651  }
0x1ba8   :  { %v3253_v21 = vld [vmem:[#allocation8 + $0x8] sm:$0xff]  ;;  %3269 = vrot.lane.b32.xlu1 %v3252_v22, %s6256_s4  ;;  %3261 = vst.msk [vmem:[#allocation9] sm:$0xff] %vm6296_vm13, %v3252_v22  ;;  %vm6306_vm13 = vcmask 392448  }
0x1ba9   :  { %3271 = vrot.lane.b32.xlu0 %v3253_v21, %s6256_s4  ;;  %3262 = vst.msk [vmem:[#allocation9 + $0x8] sm:$0xff] %vm6295_vm2, %v3253_v21  ;;  %v3254_v24 = vld [vmem:[#allocation8 + $0x10] sm:$0xff]  ;;  %vm6305_vm2 = vmmov %vm6302_vm1 }
0x1baa   :  { %v3255_v40 = vld [vmem:[#allocation8 + $0x18] sm:$0xff]  ;;  %3263 = vst.msk [vmem:[#allocation9 + $0x10] sm:$0xff] %vm6298_vm0, %v3254_v24  ;;  %4180 = vmatpush3.bf16.msra.mxu0 %v4295_v49  ;;  %vm6309_vm0 = vmmov %vm6306_vm13 }
0x1bab   :  { %3264 = vst.msk [vmem:[#allocation9 + $0x18] sm:$0x3f] %vm6297_vm3, %v3255_v40  ;;  %v3257_v33 = vld [vmem:[#allocation8 + $0x28] sm:$0xff]  ;;  %vm6307_vm3 = vcmask 392450  }
0x1bac   :  { %v3258_v32 = vld [vmem:[#allocation8 + $0x30] sm:$0xff]  ;;  %3343 = vst.msk [vmem:[#allocation9 + $0x24] sm:$0xff] %vm6300_vm10, %v3257_v33  ;;  %3273 = vrot.lane.b32.xlu1 %v3254_v24, %s6256_s4  ;;  %vm6312_vm10 = vcmask 523648  }
0x1bad   :  { %3344 = vst.msk [vmem:[#allocation9 + $0x2c] sm:$0xff] %vm6299_vm4, %v3258_v32  ;;  %v3259_v53 = vld [vmem:[#allocation8 + $0x38] sm:$0xff]  ;;  %3275 = vrot.lane.b32.xlu0 %v3255_v40, %s6256_s4  ;;  %vm6311_vm4 = vmmov %vm6309_vm0 }
0x1bae   :  { %3345 = vst.msk [vmem:[#allocation9 + $0x34] sm:$0xff] %vm6301_vm14, %v3259_v53  ;;  %vm6313_vm14 = vmmov %vm6312_vm10 }
0x1baf   :  { %3370 = vst.msk [vmem:[#allocation9 + $0x3b] sm:$0x1] %vm3369_vm7, %v3359_v47  ;;  %vm6308_vm7 = vcmask 261251  }
0x1bb0   :  { %3285 = vrot.lane.b32.xlu1 %v3252_v22, %s6245_s26 }
0x1bb1   :  { %3287 = vrot.lane.b32.xlu0 %v3253_v21, %s6245_s26 }
0x1bb4   :  { %3289 = vrot.lane.b32.xlu1 %v3254_v24, %s6245_s26 }
0x1bb5   :  { %3350 = vrot.lane.b32.xlu0 %v3256_v27, %s6256_s4 }
0x1bb8   :  { %3291 = vrot.lane.b32.xlu1 %v3255_v40, %s6245_s26 }
0x1bb9   :  { %3302 = vrot.lane.b32.xlu0 %v3252_v22, %s6254_s0 }
0x1bbc   :  { %3304 = vrot.lane.b32.xlu1 %v3253_v21, %s6254_s0 }
0x1bbd   :  { %3306 = vrot.lane.b32.xlu0 %v3254_v24, %s6254_s0 }
0x1bc0   :  { %3371 = vrot.lane.b32.xlu1 %v3256_v27, %s6245_s26 }
0x1bc1   :  { %3308 = vrot.lane.b32.xlu0 %v3255_v40, %s6254_s0 }
0x1bc4   :  { %3310 = vrot.lane.b32.xlu1 %v3256_v27, %s6254_s0 }
0x1bc5   :  { %3322 = vrot.lane.b32.xlu0 %v3252_v22, %s6246_s7 }
0x1bc8   :  { %3324 = vrot.lane.b32.xlu1 %v3253_v21, %s6246_s7 }
0x1bc9   :  { %3326 = vrot.lane.b32.xlu0 %v3254_v24, %s6246_s7 }
0x1bcc   :  { %3328 = vrot.lane.b32.xlu1 %v3255_v40, %s6246_s7 }
0x1bcd   :  { %3330 = vrot.lane.b32.xlu0 %v3256_v27, %s6246_s7 }
0x1bd0   :  { %3352 = vrot.lane.b32.xlu1 %v3257_v33, %s6256_s4 }
0x1bd1   :  { %3354 = vrot.lane.b32.xlu0 %v3258_v32, %s6256_s4 }
0x1bd4   :  { %3356 = vrot.lane.b32.xlu1 %v3259_v53, %s6256_s4 }
0x1bd5   :  { %3375 = vrot.lane.b32.xlu0 %v3258_v32, %s6245_s26 }
0x1bd8   :  { %3373 = vrot.lane.b32.xlu1 %v3257_v33, %s6245_s26 }
0x1bd9   :  { %3394 = vrot.lane.b32.xlu0 %v3258_v32, %s6254_s0 }
0x1bdc   :  { %3377 = vrot.lane.b32.xlu1 %v3259_v53, %s6245_s26 }
0x1bdd   :  { %3412 = vrot.lane.b32.xlu0 %v3258_v32, %s6246_s7 }
0x1be0   :  { %3392 = vrot.lane.b32.xlu1 %v3257_v33, %s6254_s0 }
0x1be1   :  { %3416 = vrot.lane.b32.xlu0 %v5721_v16, %s6246_s7 }
0x1be4   :  { %3396 = vrot.lane.b32.xlu1 %v3259_v53, %s6254_s0 }
0x1be8   :  { %3410 = vrot.lane.b32.xlu1 %v3257_v33, %s6246_s7 }
0x1bec   :  { %3414 = vrot.lane.b32.xlu1 %v3259_v53, %s6246_s7 }
0x1bf0   :  { %1933 = vrot.lane.b32.xlu1 %v5359_v18, %s6254_s0 }
0x1c1a   :  { %v3270_v7 = vpop.permute.xlu1 %3269 }
0x1c1b   :  { %v3272_v59 = vpop.permute.xlu0 %3271  ;;  %3281 = vst.msk [vmem:[#allocation9 - $0x1] sm:$0xfe] %vm6303_vm6, %v3270_v7  ;;  %vm6315_vm6 = vcmask 392452  }
0x1c1c   :  { %3282 = vst.msk [vmem:[#allocation9 + $0x7] sm:$0xff] %vm6302_vm1, %v3272_v59  ;;  %vm6314_vm1 = vmmov %vm6312_vm10 }
0x1c1e   :  { %v3274_v16 = vpop.permute.xlu1 %3273 }
0x1c1f   :  { %v3276_v62 = vpop.permute.xlu0 %3275  ;;  %3283 = vst.msk [vmem:[#allocation9 + $0xf] sm:$0xff] %vm6305_vm2, %v3274_v16  ;;  %vm6317_vm2 = vcmask 516480  }
0x1c20   :  { %3284 = vst.msk [vmem:[#allocation9 + $0x17] sm:$0x7f] %vm6304_vm15, %v3276_v62  ;;  %vm6316_vm15 = vcmask 654852  }
0x1c22   :  { %v3286_v63 = vpop.permute.xlu1 %3285 }
0x1c23   :  { %v3288_v54 = vpop.permute.xlu0 %3287  ;;  %3297 = vst.msk [vmem:[#allocation9 - $0x2] sm:$0xfc] %vm6307_vm3, %v3286_v63  ;;  %vm6319_vm3 = vcmask 654848  }
0x1c24   :  { %3298 = vst.msk [vmem:[#allocation9 + $0x6] sm:$0xff] %vm6306_vm13, %v3288_v54  ;;  %vm6318_vm13 = vcmask 523653   ;;  %v5895_v54 = vld [vmem:[%s6170_s20] sm:$0x7]  ;;  %s4408_s20 = smov 127  }
0x1c25   :  { %v3454_v63 = vrot.slane %v5895_v54, %v4644_v45 }
0x1c26   :  { %v3290_v28 = vpop.permute.xlu1 %3289 }
0x1c27   :  { %v3351_v18 = vpop.permute.xlu0 %3350  ;;  %3299 = vst.msk [vmem:[#allocation9 + $0xe] sm:$0xff] %vm6309_vm0, %v3290_v28  ;;  %vm6321_vm0 = vcmask 648704  }
0x1c28   :  { %3365 = vst.msk [vmem:[#allocation9 + $0x1b] sm:$0xf8] %vm6308_vm7, %v3351_v18  ;;  %vm6320_vm7 = vmmov %vm6319_vm3 }
0x1c2a   :  { %v3292_v9 = vpop.permute.xlu1 %3291 }
0x1c2b   :  { %v3303_v0 = vpop.permute.xlu0 %3302  ;;  %3300 = vst.msk [vmem:[#allocation9 + $0x16] sm:$0xff] %vm6311_vm4, %v3292_v9  ;;  %vm6323_vm4 = vmmov %vm6319_vm3 }
0x1c2c   :  { %3317 = vst.msk [vmem:[#allocation9 - $0x3] sm:$0xf8] %vm6310_vm12, %v3303_v0  ;;  %vm6322_vm12 = vcmask 654854  }
0x1c2e   :  { %v3305_v44 = vpop.permute.xlu1 %3304 }
0x1c2f   :  { %v3307_v36 = vpop.permute.xlu0 %3306  ;;  %3318 = vst.msk [vmem:[#allocation9 + $0x5] sm:$0xff] %vm6313_vm14, %v3305_v44  ;;  %vm6324_vm14 = vcmask 261248  }
0x1c30   :  { %3319 = vst.msk [vmem:[#allocation9 + $0xd] sm:$0xff] %vm6312_vm10, %v3307_v36  ;;  %vm3485_vm10 = vcmask 654336  }
0x1c32   :  { %v3372_v57 = vpop.permute.xlu1 %3371 }
0x1c33   :  { %v3309_v2 = vpop.permute.xlu0 %3308  ;;  %3386 = vst.msk [vmem:[#allocation9 + $0x1a] sm:$0xf0] %vm6315_vm6, %v3372_v57  ;;  %vm3390_vm6 = vcmask 386304  }
0x1c34   :  { %3320 = vst.msk [vmem:[#allocation9 + $0x15] sm:$0xff] %vm6314_vm1, %v3309_v2  ;;  %vm6325_vm1 = vmmov %vm6324_vm14 }
0x1c36   :  { %v3311_v4 = vpop.permute.xlu1 %3310 }
0x1c37   :  { %v3323_v3 = vpop.permute.xlu0 %3322  ;;  %3321 = vst.msk [vmem:[#allocation9 + $0x1d] sm:$0x1] %vm6317_vm2, %v3311_v4  ;;  %vm6327_vm2 = vmmov %vm6325_vm1 }
0x1c38   :  { %3337 = vst.msk [vmem:[#allocation9 - $0x4] sm:$0xf0] %vm6316_vm15, %v3323_v3  ;;  %vm6326_vm15 = vcmask 392448  }
0x1c39   :  { %3404 = vst.msk [vmem:[#allocation9 + $0x19] sm:$0xe0] %vm6318_vm13, %v3311_v4  ;;  %vm6328_vm13 = vmmov %vm6326_vm15 }
0x1c3a   :  { %v3325_v55 = vpop.permute.xlu1 %3324 }
0x1c3b   :  { %v3327_v5 = vpop.permute.xlu0 %3326  ;;  %3338 = vst.msk [vmem:[#allocation9 + $0x4] sm:$0xff] %vm6320_vm7, %v3325_v55  ;;  %vm3408_vm7 = vcmask 518528  }
0x1c3c   :  { %3339 = vst.msk [vmem:[#allocation9 + $0xc] sm:$0xff] %vm6319_vm3, %v3327_v5  ;;  %vm6329_vm3 = vcmask 523648  }
0x1c3e   :  { %v3329_v56 = vpop.permute.xlu1 %3328 }
0x1c3f   :  { %v3331_v38 = vpop.permute.xlu0 %3330  ;;  %3340 = vst.msk [vmem:[#allocation9 + $0x14] sm:$0xff] %vm6323_vm4, %v3329_v56 }
0x1c40   :  { %3341 = vst.msk [vmem:[#allocation9 + $0x1c] sm:$0x3] %vm6321_vm0, %v3331_v38  ;;  %vm6330_vm0 = vmmov %vm6328_vm13 }
0x1c41   :  { %3422 = vst.msk [vmem:[#allocation9 + $0x18] sm:$0xc0] %vm6322_vm12, %v3331_v38  ;;  %vm6331_vm12 = vmmov %vm6329_vm3 }
0x1c42   :  { %v3353_v30 = vpop.permute.xlu1 %3352  ;;  %v3428_v25 = vld [vmem:[#allocation9] sm:$0xff] }
0x1c43   :  { %v3355_v11 = vpop.permute.xlu0 %3354  ;;  %v3429_v48 = vld [vmem:[#allocation9 + $0x8] sm:$0xff]  ;;  %3366 = vst.msk [vmem:[#allocation9 + $0x23] sm:$0xff] %vm6325_vm1, %v3353_v30  ;;  %vm6332_vm1 = vmmov %vm6329_vm3 }
0x1c44   :  { %3367 = vst.msk [vmem:[#allocation9 + $0x2b] sm:$0xff] %vm6324_vm14, %v3355_v11  ;;  %v3436_v60 = vpack.c.bf16 %v3429_v48, %v3428_v25  ;;  %vm3426_vm14 = vcmask 650752  }
0x1c46   :  { %4181 = vmatprep.mubr.msk.bf16.mxu0 %vm3485_vm10, %v3436_v60  ;;  %v3357_v13 = vpop.permute.xlu1 %3356  ;;  %v3430_v14 = vld [vmem:[#allocation9 + $0x10] sm:$0xff] }
0x1c47   :  { %v3376_v10 = vpop.permute.xlu0 %3375  ;;  %3368 = vst.msk [vmem:[#allocation9 + $0x33] sm:$0xff] %vm6327_vm2, %v3357_v13 }
0x1c48   :  { %v3431_v15 = vld [vmem:[#allocation9 + $0x18] sm:$0xff]  ;;  %3388 = vst.msk [vmem:[#allocation9 + $0x2a] sm:$0xff] %vm6326_vm15, %v3376_v10  ;;  %vm6334_vm15 = vmmov %vm6323_vm4 }
0x1c49   :  { %v3437_v46 = vpack.c.bf16 %v3431_v15, %v3430_v14  ;;  %3391 = vst.msk [vmem:[#allocation9 + $0x3a] sm:$0x3] %vm3390_vm6, %v3380_v31  ;;  %vm6333_vm6 = vmmov %vm6323_vm4 }
0x1c4a   :  { %v3374_v21 = vpop.permute.xlu1 %3373 }
0x1c4b   :  { %4182 = vmatmul.mubr.msk.bf16.vlgmr.msra.gmra.mrb[32].mxu0 %vm3485_vm10, %v3437_v46  ;;  %v3395_v20 = vpop.permute.xlu0 %3394  ;;  %3387 = vst.msk [vmem:[#allocation9 + $0x22] sm:$0xff] %vm6328_vm13, %v3374_v21  ;;  %vm3681_vm13 = vcmask 261126  }
0x1c4c   :  { %3406 = vst.msk [vmem:[#allocation9 + $0x29] sm:$0xff] %vm6329_vm3, %v3395_v20  ;;  %vm3679_vm3 = vcmask 259072  }
0x1c4e   :  { %v3378_v22 = vpop.permute.xlu1 %3377 }
0x1c4f   :  { %3389 = vst.msk [vmem:[#allocation9 + $0x32] sm:$0xff] %vm6330_vm0, %v3378_v22  ;;  %v3413_v40 = vpop.permute.xlu0 %3412  ;;  %vm6338_vm0 = vcmask 261122  }
0x1c50   :  { %3409 = vst.msk [vmem:[#allocation9 + $0x39] sm:$0x7] %vm3408_vm7, %v5844_v42 }
0x1c52   :  { %v3393_v24 = vpop.permute.xlu1 %3392 }
0x1c53   :  { %3405 = vst.msk [vmem:[#allocation9 + $0x21] sm:$0xff] %vm6331_vm12, %v3393_v24  ;;  %v3417_v27 = vpop.permute.xlu0 %3416  ;;  %vm6339_vm12 = vcmask 523520  }
0x1c54   :  { %3424 = vst.msk [vmem:[#allocation9 + $0x28] sm:$0xff] %vm6323_vm4, %v3413_v40  ;;  %vm6340_vm4 = vmmov %vm6339_vm12 }
0x1c56   :  { %v3397_v32 = vpop.permute.xlu1 %3396 }
0x1c57   :  { %3407 = vst.msk [vmem:[#allocation9 + $0x31] sm:$0xff] %vm6332_vm1, %v3397_v32  ;;  %vm3725_vm1 = vcmask 516352  }
0x1c58   :  { %3427 = vst.msk [vmem:[#allocation9 + $0x38] sm:$0xf] %vm3426_vm14, %v3417_v27  ;;  %vm6341_vm14 = vmmov %vm6340_vm4 }
0x1c5a   :  { %v3411_v33 = vpop.permute.xlu1 %3410 }
0x1c5b   :  { %3423 = vst.msk [vmem:[#allocation9 + $0x20] sm:$0xff] %vm6333_vm6, %v3411_v33  ;;  %v3433_v58 = vld [vmem:[#allocation9 + $0x28] sm:$0xff]  ;;  %vm3768_vm6 = vcmask 523523  }
0x1c5e   :  { %v3415_v53 = vpop.permute.xlu1 %3414 }
0x1c5f   :  { %3425 = vst.msk [vmem:[#allocation9 + $0x30] sm:$0xff] %vm6334_vm15, %v3415_v53  ;;  %v3435_v49 = vld [vmem:[#allocation9 + $0x38] sm:$0xf]  ;;  %vm6342_vm15 = vcmask 785920  }
0x1c62   :  { %v1934_v47 = vpop.permute.xlu1 %1933  ;;  %v3432_v41 = vld [vmem:[#allocation9 + $0x20] sm:$0xff] }
0x1c63   :  { %v1936_v39 = vmul.f32 %v1934_v47, %v5309_v26  ;;  %v3438_v43 = vpack.c.bf16 %v3433_v58, %v3432_v41 }
0x1c65   :  { %1938 = vrot.lane.b32.xlu0 %v1936_v39, %s6246_s7  ;;  %4185 = vmatprep.mubr.msk.bf16.mxu0 %vm3485_vm10, %v3438_v43 }
0x1c66   :  { %v3434_v31 = vld [vmem:[#allocation9 + $0x30] sm:$0xff] }
0x1c67   :  { %v3439_v42 = vpack.c.bf16 %v3435_v49, %v3434_v31 }
0x1c69   :  { %2018 = vrot.lane.b32.xlu0 %v5381_v51, %s6254_s0  ;;  %4186 = vmatmul.mubr.msk.bf16.gmra.mrb[36].mxu0 %vm3485_vm10, %v3439_v42  ;;  %vm6335_vm10 = vcmask 257024  }
0x1c6a   :  { %vm6336_vm2 = vmmov %vm6335_vm10 }
0x1c6b   :  { %vm6337_vm7 = vmmov %vm6336_vm2 }
0x1cd7   :  { %v1939_v59 = vpop.permute.xlu0 %1938 }
0x1cd8   :  { %v1941_v7 = vsel %vm1865_vm5, %v1939_v59, 0.0 }
0x1cd9   :  { %1942 = vadd.xlane.f32.xlu1 %v1941_v7 }
0x1cdb   :  { %v2019_v62 = vpop.permute.xlu0 %2018 }
0x1cdc   :  { %v2021_v16 = vmul.f32 %v2019_v62, %v5309_v26 }
0x1cde   :  { %2023 = vrot.lane.b32.xlu0 %v2021_v16, %s6255_s28  ;;  %s4409_s28 = smov 126  }
0x1d1e   :  { %v4183_v51 = vpop.f32.mrb[32].mxu0 }
0x1d1f   :  { %v3532_v18 = vpop.f32.mrb[33].mxu0  ;;  %v5899_v28 = vadd.f32 %v4183_v51, %v3454_v63 }
0x1d20   :  { %v5901_v0 = vadd.f32 %v3532_v18, %v3454_v63  ;;  %v4184_v9 = vpop.f32.mrb[34].mxu0 }
0x1d21   :  { %v3535_v36 = vpop.f32.mrb[35].mxu0  ;;  %v5905_v2 = vadd.f32 %v4184_v9, %v3454_v63  ;;  %v3586_v3 = vmul.f32 %v5899_v28, %v5899_v28  ;;  %v3566_v38 = vsel %vm280_vm9, %v5899_v28, 0.0 }
0x1d22   :  { %v3584_v44 = vmul.f32 %v5901_v0, %v5901_v0  ;;  %v5907_v57 = vadd.f32 %v3535_v36, %v3454_v63  ;;  %v3563_v45 = vsel %vm280_vm9, %v5901_v0, 0.0 }
0x1d23   :  { %v3587_v11 = vmul.f32 %v5905_v2, %v5905_v2  ;;  %v3595_v60 = vsel %vm280_vm9, %v3586_v3, 0.0  ;;  %v3568_v10 = vsel %vm280_vm9, %v5905_v2, 0.0 }
0x1d24   :  { %v3564_v4 = vsel %vm280_vm9, %v5907_v57, 0.0  ;;  %v3585_v5 = vmul.f32 %v5907_v57, %v5907_v57  ;;  %v3592_v56 = vsel %vm280_vm9, %v3584_v44, 0.0 }
0x1d25   :  { %v3565_v55 = vadd.f32 %v3564_v4, %v3563_v45  ;;  %v3597_v15 = vsel %vm280_vm9, %v3587_v11, 0.0 }
0x1d26   :  { %v3593_v30 = vsel %vm280_vm9, %v3585_v5, 0.0 }
0x1d27   :  { %v3567_v25 = vadd.f32 %v3566_v38, %v3565_v55  ;;  %v3594_v48 = vadd.f32 %v3593_v30, %v3592_v56 }
0x1d29   :  { %v3596_v13 = vadd.f32 %v3595_v60, %v3594_v48  ;;  %v3569_v14 = vadd.f32 %v3568_v10, %v3567_v25 }
0x1d2b   :  { %v3598_v46 = vadd.f32 %v3597_v15, %v3596_v13 }
0x1d3c   :  { %v4187_v20 = vpop.f32.mrb[36].mxu0 }
0x1d3d   :  { %v3548_v21 = vpop.f32.mrb[37].mxu0  ;;  %v3557_v22 = vadd.f32 %v4187_v20, %v3454_v63 }
0x1d3e   :  { %v3549_v40 = vadd.f32 %v3548_v21, %v3454_v63  ;;  %v4188_v24 = vpop.f32.mrb[38].mxu0 }
0x1d3f   :  { %v3551_v27 = vpop.f32.mrb[39].mxu0  ;;  %v5928_v53 = vadd.f32 %v4188_v24, %v3454_v63  ;;  %v3590_v58 = vmul.f32 %v3557_v22, %v3557_v22  ;;  %v3574_v59 = vsel %vm280_vm9, %v3557_v22, 0.0 }
0x1d40   :  { %v3570_v32 = vsel %vm280_vm9, %v3549_v40, 0.0  ;;  %v3588_v33 = vmul.f32 %v3549_v40, %v3549_v40  ;;  %v3552_v47 = vadd.f32 %v3551_v27, %v3454_v63 }
0x1d41   :  { %v3571_v41 = vadd.f32 %v3570_v32, %v3569_v14  ;;  %v3591_v7 = vmul.f32 %v5928_v53, %v5928_v53  ;;  %v3603_v63 = vsel %vm280_vm9, %v3590_v58, 0.0  ;;  %v3576_v18 = vsel %vm6335_vm10, %v5928_v53, 0.0  ;;  %vm6343_vm10 = vmmov %vm6342_vm15 }
0x1d42   :  { %v3599_v39 = vsel %vm280_vm9, %v3588_v33, 0.0  ;;  %v3572_v43 = vsel %vm280_vm9, %v3552_v47, 0.0  ;;  %v3589_v49 = vmul.f32 %v3552_v47, %v3552_v47 }
0x1d43   :  { %v3600_v31 = vadd.f32 %v3599_v39, %v3598_v46  ;;  %v3573_v42 = vadd.f32 %v3572_v43, %v3571_v41  ;;  %v3605_v44 = vsel %vm6336_vm2, %v3591_v7, 0.0  ;;  %vm6344_vm2 = vmmov %vm6340_vm4 }
0x1d44   :  { %v3601_v62 = vsel %vm280_vm9, %v3589_v49, 0.0 }
0x1d45   :  { %v3575_v16 = vadd.f32 %v3574_v59, %v3573_v42  ;;  %v3602_v51 = vadd.f32 %v3601_v62, %v3600_v31  ;;  %v3638_v31 = vrot.slane %v5895_v54, %v4713_v8 }
0x1d47   :  { %v3577_v9 = vadd.f32 %v3576_v18, %v3575_v16  ;;  %v3604_v36 = vadd.f32 %v3603_v63, %v3602_v51 }
0x1d49   :  { %v3578_v3 = vrot.slane %v3577_v9, 4  ;;  %v3606_v45 = vadd.f32 %v3605_v44, %v3604_v36 }
0x1d4b   :  { %v3579_v4 = vadd.f32 %v3578_v3, %v3577_v9  ;;  %v3607_v5 = vrot.slane %v3606_v45, 4 }
0x1d4d   :  { %v3580_v55 = vrot.slane %v3579_v4, 2  ;;  %v3608_v38 = vadd.f32 %v3607_v5, %v3606_v45 }
0x1d4f   :  { %v3581_v56 = vadd.f32 %v3580_v55, %v3579_v4  ;;  %v3609_v11 = vrot.slane %v3608_v38, 2 }
0x1d50   :  { %v2024_v30 = vpop.permute.xlu0 %2023 }
0x1d51   :  { %v3582_v25 = vrot.slane %v3581_v56, 1  ;;  %v3610_v48 = vadd.f32 %v3609_v11, %v3608_v38  ;;  %v2026_v60 = vsel %vm1865_vm5, %v2024_v30, 0.0 }
0x1d52   :  { %2027 = vadd.xlane.f32.xlu0 %v2026_v60 }
0x1d53   :  { %v3583_v10 = vadd.f32 %v3582_v25, %v3581_v56  ;;  %v3611_v13 = vrot.slane %v3610_v48, 1 }
0x1d55   :  { %v3612_v14 = vadd.f32 %v3611_v13, %v3610_v48  ;;  %v3613_v15 = vmul.f32 0.016666668, %v3583_v10 }
0x1d57   :  { %v3614_v46 = vmul.f32 0.016666668, %v3612_v14  ;;  %v3615_v20 = vmul.f32 %v3613_v15, %v3613_v15  ;;  %v3620_v21 = vsub.f32 %v5905_v2, %v3613_v15  ;;  %v3621_v24 = vsub.f32 %v3549_v40, %v3613_v15 }
0x1d58   :  { %v3622_v27 = vsub.f32 %v3552_v47, %v3613_v15  ;;  %v3623_v32 = vsub.f32 %v3557_v22, %v3613_v15  ;;  %v3617_v33 = vsub.f32 %v5901_v0, %v3613_v15  ;;  %v3618_v41 = vsub.f32 %v5907_v57, %v3613_v15 }
0x1d59   :  { %v3616_v58 = vsub.f32 %v3614_v46, %v3615_v20  ;;  %v3619_v39 = vsub.f32 %v5899_v28, %v3613_v15  ;;  %v3624_v43 = vsub.f32 %v5928_v53, %v3613_v15  ;;  %v3650_v2 = vrot.slane %v5895_v54, %v4716_v50 }
0x1d5b   :  { %v3625_v49 = vadd.f32 1e-05, %v3616_v58 }
0x1d5d   :  { %4368 = vrsqrt.f32 %v3625_v49 }
0x1d67   :  { %v4369_v42 = vpop.eup %4368 }
0x1d68   :  { %v3630_v40 = vmul.f32 %v4369_v42, %v3620_v21  ;;  %v3631_v22 = vmul.f32 %v4369_v42, %v3621_v24  ;;  %v3632_v47 = vmul.f32 %v4369_v42, %v3622_v27  ;;  %v3633_v0 = vmul.f32 %v4369_v42, %v3623_v32  ;;  %2107 = vrot.lane.b32.xlu0 %v5402_v61, %s6254_s0 }
0x1d69   :  { %v3627_v57 = vmul.f32 %v4369_v42, %v3617_v33  ;;  %v3628_v28 = vmul.f32 %v4369_v42, %v3618_v41  ;;  %v3629_v59 = vmul.f32 %v4369_v42, %v3619_v39  ;;  %v3634_v11 = vmul.f32 %v4369_v42, %v3624_v43 }
0x1d6a   :  { %v3642_v53 = vmul.f32 %v3638_v31, %v3630_v40  ;;  %v3643_v7 = vmul.f32 %v3638_v31, %v3631_v22  ;;  %v3644_v62 = vmul.f32 %v3638_v31, %v3632_v47  ;;  %v3645_v16 = vmul.f32 %v3638_v31, %v3633_v0  ;;  %v1943_v40 = vpop.xlane.xlu1 %1942 }
0x1d6b   :  { %v3639_v8 = vmul.f32 %v3638_v31, %v3627_v57  ;;  %v3640_v51 = vmul.f32 %v3638_v31, %v3628_v28  ;;  %v3641_v63 = vmul.f32 %v3638_v31, %v3629_v59  ;;  %v3646_v30 = vmul.f32 %v3638_v31, %v3634_v11 }
0x1d6c   :  { %v3654_v18 = vadd.f32 %v3650_v2, %v3642_v53  ;;  %v3655_v50 = vadd.f32 %v3650_v2, %v3643_v7  ;;  %v3656_v54 = vadd.f32 %v3650_v2, %v3644_v62  ;;  %v3657_v9 = vadd.f32 %v3650_v2, %v3645_v16 }
0x1d6d   :  { %v3651_v36 = vadd.f32 %v3650_v2, %v3639_v8  ;;  %v3652_v44 = vadd.f32 %v3650_v2, %v3640_v51  ;;  %v3653_v3 = vadd.f32 %v3650_v2, %v3641_v63  ;;  %v3658_v25 = vadd.f32 %v3650_v2, %v3646_v30 }
0x1d6e   :  { %v3662_v61 = vmax.f32 %v3654_v18, 0.0  ;;  %v3663_v45 = vmax.f32 %v3655_v50, 0.0  ;;  %v3664_v4 = vmax.f32 %v3656_v54, 0.0  ;;  %v3665_v5 = vmax.f32 %v3657_v9, 0.0 }
0x1d6f   :  { %v3659_v55 = vmax.f32 %v3651_v36, 0.0  ;;  %v3660_v38 = vmax.f32 %v3652_v44, 0.0  ;;  %v3661_v56 = vmax.f32 %v3653_v3, 0.0  ;;  %v3666_v48 = vmax.f32 %v3658_v25, 0.0 }
0x1d70   :  { %3682 = vst.msk [vmem:[#allocation10 + $0x1e] sm:$0xc0] %vm3681_vm13, %v3662_v61  ;;  %v2015_v27 = vmul.f32 %v5371_v6, %v5371_v6  ;;  %v1930_v2 = vmul.f32 %v5349_v1, %v5349_v1  ;;  %v2104_v16 = vmul.f32 %v5392_v35, %v5392_v35  ;;  %vm6345_vm13 = vmmov %vm6344_vm2 }
0x1d71   :  { %3683 = vst.msk [vmem:[#allocation10 + $0x26] sm:$0xff] %vm280_vm9, %v3663_v45  ;;  %3684 = vst.msk [vmem:[#allocation10 + $0x2e] sm:$0xff] %vm280_vm9, %v3664_v4  ;;  %v2193_v45 = vmul.f32 %v5413_v29, %v5413_v29 }
0x1d72   :  { %3685 = vst.msk [vmem:[#allocation10 + $0x36] sm:$0xff] %vm280_vm9, %v3665_v5  ;;  %3676 = vst.msk [vmem:[#allocation10 + $0x2] sm:$0xff] %vm280_vm9, %v3659_v55  ;;  %v2016_v32 = vsub.f32 1.0, %v2015_v27  ;;  %v1931_v6 = vsub.f32 1.0, %v1930_v2  ;;  %v2105_v8 = vsub.f32 1.0, %v2104_v16 }
0x1d73   :  { %3680 = vst.msk [vmem:[#allocation10 + $0x1a] sm:$0x3f] %vm3679_vm3, %v3662_v61  ;;  %v2194_v4 = vsub.f32 1.0, %v2193_v45  ;;  %vm6346_vm3 = vmmov %vm6343_vm10 }
0x1d74   :  { %3677 = vst.msk [vmem:[#allocation10 + $0xa] sm:$0xff] %vm280_vm9, %v3660_v38  ;;  %3678 = vst.msk [vmem:[#allocation10 + $0x12] sm:$0xff] %vm280_vm9, %v3661_v56  ;;  %v1944_v22 = vmul.f32 %v1943_v40, %v1931_v6 }
0x1d75   :  { %3686 = vst.msk [vmem:[#allocation10 + $0x3e] sm:$0xf] %vm6337_vm7, %v3666_v48  ;;  %vm6347_vm7 = vcmask 785922  }
0x1d76   :  { %v1945_v47 = vadd.f32 1.0, %v1944_v22 }
0x1d78   :  { %v5959_v60 = vld [vmem:[#allocation10 + $0x20] sm:$0xff]  ;;  %v5961_v10 = vld [vmem:[#allocation10 + $0x28] sm:$0xff]  ;;  %v1946_v0 = vand.u32 2147483647, %v1945_v47  ;;  %v2371_v47 = vmul.f32 %v5455_v12, %v5455_v12  ;;  %v4298_v12 = vld [vmem:[%s6171_s21 + $0x10] sm:$0xff]  }
0x1d79   :  { %v5964_v13 = vld [vmem:[#allocation10 + $0x30] sm:$0xff]  ;;  %v5966_v14 = vld [vmem:[#allocation10] sm:$0xff]  ;;  %3747 = vst.msk [vmem:[#allocation11 + $0x1e] sm:$0xfc] %vm6338_vm0, %v5959_v60  ;;  %vm6348_vm0 = vmmov %vm6346_vm3 }
0x1d7a   :  { %3748 = vst.msk [vmem:[#allocation11 + $0x26] sm:$0xff] %vm280_vm9, %v5961_v10  ;;  %3749 = vst.msk [vmem:[#allocation11 + $0x2e] sm:$0xff] %vm280_vm9, %v5964_v13 }
0x1d7b   :  { %v5968_v15 = vld [vmem:[#allocation10 + $0x8] sm:$0xff]  ;;  %v5970_v46 = vld [vmem:[#allocation10 + $0x10] sm:$0xff]  ;;  %3696 = vst.msk [vmem:[#allocation11] sm:$0xff] %vm280_vm9, %v5966_v14  ;;  %v5984_v20 = vld [vmem:[#allocation10 + $0x18] sm:$0xff] }
0x1d7c   :  { %3697 = vst.msk [vmem:[#allocation11 + $0x8] sm:$0xff] %vm280_vm9, %v5968_v15  ;;  %3698 = vst.msk [vmem:[#allocation11 + $0x10] sm:$0xff] %vm280_vm9, %v5970_v46  ;;  %v5988_v21 = vld [vmem:[#allocation10 + $0x38] sm:$0xff]  ;;  %v5990_v24 = vld [vmem:[#allocation10 + $0x40] sm:$0xf] }
0x1d7d   :  { %3699 = vst.msk [vmem:[#allocation11 + $0x18] sm:$0xff] %vm280_vm9, %v5984_v20  ;;  %3750 = vst.msk [vmem:[#allocation11 + $0x36] sm:$0xff] %vm280_vm9, %v5988_v21  ;;  %vm2401_vm9 = vcmask 189568  }
0x1d7e   :  { %3751 = vst.msk [vmem:[#allocation11 + $0x3e] sm:$0x3] %vm389_vm11, %v5990_v24  ;;  %vm2407_vm11 = vcmask 255168  }
0x1ddf   :  { %v2028_v33 = vpop.xlane.xlu0 %2027 }
0x1de0   :  { %v2029_v41 = vmul.f32 %v2028_v33, %v2016_v32  ;;  %v2282_v32 = vmul.f32 %v5434_v19, %v5434_v19 }
0x1de2   :  { %v2030_v58 = vadd.f32 1.0, %v2029_v41  ;;  %v2283_v33 = vsub.f32 1.0, %v2282_v32 }
0x1de3   :  { %v2108_v31 = vpop.permute.xlu0 %2107 }
0x1de4   :  { %v2031_v39 = vand.u32 2147483647, %v2030_v58  ;;  %v2110_v42 = vmul.f32 %v2108_v31, %v5309_v26 }
0x1de6   :  { %4370 = vlog2.f32 %v2031_v39 }
0x1de7   :  { %4372 = vlog2.f32 %v1946_v0  ;;  %v2372_v0 = vsub.f32 1.0, %v2371_v47 }
0x1df0   :  { %v4371_v43 = vpop.eup %4370 }
0x1df1   :  { %v2033_v49 = vmul.f32 0.6931472, %v4371_v43  ;;  %v4373_v57 = vpop.eup %4372 }
0x1df2   :  { %v1948_v28 = vmul.f32 0.6931472, %v4373_v57 }
0x1df3   :  { %2035 = vrot.lane.b32.xlu1 %v2033_v49, %s4408_s20 }
0x1df7   :  { %2112 = vrot.lane.b32.xlu1 %v2110_v42, %s6254_s0 }
0x1e65   :  { %v2036_v59 = vpop.permute.xlu1 %2035 }
0x1e66   :  { %v2038_v53 = vadd.f32 %v2036_v59, %v1948_v28 }
0x1e69   :  { %v2113_v7 = vpop.permute.xlu1 %2112 }
0x1e6a   :  { %v2115_v62 = vsel %vm1865_vm5, %v2113_v7, 0.0 }
0x1e6b   :  { %2116 = vadd.xlane.f32.xlu1 %v2115_v62  ;;  %v4301_v62 = vld [vmem:[%s6171_s21 + $0x28] sm:$0xff]  }
0x1ef8   :  { %v2117_v51 = vpop.xlane.xlu1 %2116 }
0x1ef9   :  { %v2118_v1 = vmul.f32 %v2117_v51, %v2105_v8 }
0x1efb   :  { %v2119_v63 = vadd.f32 1.0, %v2118_v1 }
0x1efd   :  { %v2120_v18 = vand.u32 2147483647, %v2119_v63 }
0x1eff   :  { %4374 = vlog2.f32 %v2120_v18 }
0x1f09   :  { %v4375_v50 = vpop.eup %4374 }
0x1f0a   :  { %v2122_v54 = vmul.f32 0.6931472, %v4375_v50 }
0x1f0c   :  { %2124 = vrot.lane.b32.xlu0 %v2122_v54, %s4409_s28 }
0x1f10   :  { %2196 = vrot.lane.b32.xlu0 %v5423_v52, %s6254_s0 }
0x1f7e   :  { %v2125_v9 = vpop.permute.xlu0 %2124 }
0x1f7f   :  { %v2127_v36 = vadd.f32 %v2125_v9, %v2038_v53 }
0x1f82   :  { %v2197_v44 = vpop.permute.xlu0 %2196 }
0x1f83   :  { %v2199_v3 = vmul.f32 %v2197_v44, %v5309_v26 }
0x1f85   :  { %2201 = vrot.lane.b32.xlu0 %v2199_v3, %s6247_s2  ;;  %s4410_s2 = smov 125  }
0x1ff7   :  { %v2202_v35 = vpop.permute.xlu0 %2201 }
0x1ff8   :  { %v2204_v61 = vsel %vm1865_vm5, %v2202_v35, 0.0 }
0x1ff9   :  { %2205 = vadd.xlane.f32.xlu0 %v2204_v61 }
0x200f   :  { %2285 = vrot.lane.b32.xlu0 %v5444_v23, %s6254_s0 }
0x2086   :  { %v2206_v5 = vpop.xlane.xlu0 %2205 }
0x2087   :  { %v2207_v52 = vmul.f32 %v2206_v5, %v2194_v4 }
0x2089   :  { %v2208_v55 = vadd.f32 1.0, %v2207_v52 }
0x208a   :  { %v2286_v30 = vpop.permute.xlu0 %2285 }
0x208b   :  { %v2209_v38 = vand.u32 2147483647, %v2208_v55  ;;  %v2288_v25 = vmul.f32 %v2286_v30, %v5309_v26 }
0x208d   :  { %4376 = vlog2.f32 %v2209_v38 }
0x2097   :  { %v4377_v56 = vpop.eup %4376 }
0x2098   :  { %v2211_v11 = vmul.f32 0.6931472, %v4377_v56 }
0x209a   :  { %2213 = vrot.lane.b32.xlu1 %v2211_v11, %s4410_s2 }
0x209e   :  { %2290 = vrot.lane.b32.xlu1 %v2288_v25, %s6245_s26 }
0x210c   :  { %v2214_v48 = vpop.permute.xlu1 %2213 }
0x210d   :  { %v2216_v23 = vadd.f32 %v2214_v48, %v2127_v36 }
0x2110   :  { %v2291_v27 = vpop.permute.xlu1 %2290 }
0x2111   :  { %v2293_v29 = vsel %vm1865_vm5, %v2291_v27, 0.0 }
0x2112   :  { %2294 = vadd.xlane.f32.xlu1 %v2293_v29 }
0x219f   :  { %v2295_v41 = vpop.xlane.xlu1 %2294 }
0x21a0   :  { %v2296_v58 = vmul.f32 %v2295_v41, %v2283_v33 }
0x21a2   :  { %v2297_v39 = vadd.f32 1.0, %v2296_v58 }
0x21a4   :  { %v2298_v43 = vand.u32 2147483647, %v2297_v39 }
0x21a6   :  { %4378 = vlog2.f32 %v2298_v43 }
0x21b0   :  { %v4379_v49 = vpop.eup %4378 }
0x21b1   :  { %v2300_v31 = vmul.f32 0.6931472, %v4379_v49 }
0x21b3   :  { %2302 = vrot.lane.b32.xlu0 %v2300_v31, %s4411_s27 }
0x21b7   :  { %2374 = vrot.lane.b32.xlu0 %v5466_v17, %s6254_s0 }
0x2225   :  { %v2303_v42 = vpop.permute.xlu0 %2302 }
0x2226   :  { %v2305_v2 = vadd.f32 %v2303_v42, %v2216_v23 }
0x2229   :  { %v2375_v40 = vpop.permute.xlu0 %2374 }
0x222a   :  { %v2377_v6 = vmul.f32 %v2375_v40, %v5309_v26  ;;  %v4296_v26 = vld [vmem:[%s6171_s21] sm:$0xff]  }
0x222b   :  { %4189 = vmatprep.subr.bf16.mxu1 %v4296_v26 }
0x222c   :  { %2379 = vrot.lane.b32.xlu0 %v2377_v6, %s6250_s11  ;;  %4190 = vmatpush3.bf16.msra.mxu1 %v4296_v26 }
0x229e   :  { %v2380_v19 = vpop.permute.xlu0 %2379 }
0x229f   :  { %v2382_v22 = vsel %vm1865_vm5, %v2380_v19, 0.0  ;;  %vm3720_vm5 = vcmask 523521  }
0x22a0   :  { %2383 = vadd.xlane.f32.xlu0 %v2382_v22 }
0x232d   :  { %v2384_v57 = vpop.xlane.xlu0 %2383 }
0x232e   :  { %v2385_v28 = vmul.f32 %v2384_v57, %v2372_v0 }
0x2330   :  { %v2386_v59 = vadd.f32 1.0, %v2385_v28 }
0x2332   :  { %v2387_v53 = vand.u32 2147483647, %v2386_v59 }
0x2334   :  { %4380 = vlog2.f32 %v2387_v53 }
0x233e   :  { %v4381_v17 = vpop.eup %4380 }
0x233f   :  { %v2389_v7 = vmul.f32 0.6931472, %v4381_v17 }
0x2341   :  { %2391 = vrot.lane.b32.xlu1 %v2389_v7, %s4412_s10 }
0x2345   :  { %2398 = vrot.lane.b32.xlu1 %v5339_v37, %s6256_s4  ;;  %v4297_v37 = vld [vmem:[%s6171_s21 + $0x8] sm:$0xff]  }
0x2346   :  { %4191 = vmatprep.subr.bf16.mxu1 %v4297_v37 }
0x2347   :  { %4192 = vmatpush3.bf16.msra.mxu1 %v4297_v37 }
0x2348   :  { %4193 = vmatprep.subr.bf16.mxu1 %v4298_v12 }
0x2349   :  { %2404 = vrot.lane.b32.xlu1 %v5470_v34, %s6250_s11  ;;  %v4299_v34 = vld [vmem:[%s6171_s21 + $0x18] sm:$0xff]  }
0x234b   :  { %4194 = vmatpush3.bf16.msra.mxu1 %v4298_v12 }
0x234c   :  { %4195 = vmatprep.subr.bf16.mxu1 %v4299_v34 }
0x234d   :  { %3705 = vrot.lane.b32.xlu1 %v5966_v14, %s6245_s26 }
0x234f   :  { %4196 = vmatpush3.bf16.msra.mxu1 %v4299_v34 }
0x2351   :  { %3707 = vrot.lane.b32.xlu1 %v5968_v15, %s6245_s26 }
0x2355   :  { %3709 = vrot.lane.b32.xlu1 %v5970_v46, %s6245_s26 }
0x2359   :  { %3711 = vrot.lane.b32.xlu1 %v5984_v20, %s6245_s26 }
0x235d   :  { %3713 = vrot.lane.b32.xlu1 %v5959_v60, %s6245_s26 }
0x2361   :  { %3729 = vrot.lane.b32.xlu1 %v5968_v15, %s6246_s7 }
0x2365   :  { %3733 = vrot.lane.b32.xlu1 %v5984_v20, %s6246_s7  ;;  %v4300_v20 = vld [vmem:[%s6171_s21 + $0x20] sm:$0xff]  }
0x2366   :  { %4197 = vmatprep.subr.bf16.mxu1 %v4300_v20 }
0x2367   :  { %4198 = vmatpush3.bf16.msra.mxu1 %v4300_v20 }
0x2368   :  { %4199 = vmatprep.subr.bf16.mxu1 %v4301_v62 }
0x2369   :  { %3756 = vrot.lane.b32.xlu1 %v5961_v10, %s6245_s26 }
0x236b   :  { %4200 = vmatpush3.bf16.msra.mxu1 %v4301_v62 }
0x236d   :  { %3760 = vrot.lane.b32.xlu1 %v5988_v21, %s6245_s26 }
0x2371   :  { %3775 = vrot.lane.b32.xlu1 %v5961_v10, %s6246_s7 }
0x2375   :  { %3779 = vrot.lane.b32.xlu1 %v5988_v21, %s6246_s7 }
0x23b3   :  { %v2392_v10 = vpop.permute.xlu1 %2391 }
0x23b4   :  { %v2394_v15 = vadd.f32 %v2392_v10, %v2305_v2 }
0x23b6   :  { %2410 = vrot.lane.b32.xlu0 %v2394_v15, %s6254_s0 }
0x23b7   :  { %v2399_v21 = vpop.permute.xlu1 %2398 }
0x23b8   :  { %2402 = vst.msk [vmem:[%s6161_s23] sm:$0x3] %vm2401_vm9, %v2399_v21  ;;  %vm3787_vm9 = vcmask 785924  }
0x23ba   :  { %3727 = vrot.lane.b32.xlu0 %v5966_v14, %s6246_s7 }
0x23bb   :  { %v2405_v16 = vpop.permute.xlu1 %2404 }
0x23bc   :  { %2408 = vst.msk [vmem:[%s6161_s23] sm:$0x3] %vm2407_vm11, %v2405_v16  ;;  %vm6349_vm11 = vcmask 779776  }
0x23be   :  { %3731 = vrot.lane.b32.xlu0 %v5970_v46, %s6246_s7  ;;  %v30_v46 = vstv %s6172_s22 }
0x23bf   :  { %v3706_v8 = vpop.permute.xlu1 %3705  ;;  %31 = vst [vmem:[#allocation12] sm:$0x1] %v30_v46 }
0x23c0   :  { %3721 = vst.msk [vmem:[#allocation11 - $0x1] sm:$0xfe] %vm3720_vm5, %v3706_v8  ;;  %vm3863_vm5 = vcmask 785408  }
0x23c2   :  { %3735 = vrot.lane.b32.xlu0 %v5959_v60, %s6246_s7 }
0x23c3   :  { %v3708_v14 = vpop.permute.xlu1 %3707 }
0x23c4   :  { %3722 = vst.msk [vmem:[#allocation11 + $0x7] sm:$0xff] %vm6339_vm12, %v3708_v14  ;;  %vm6350_vm12 = vmmov %vm6344_vm2 }
0x23c6   :  { %3758 = vrot.lane.b32.xlu0 %v5964_v13, %s6245_s26  ;;  %v4047_v50 = vld [vmem:[#allocation12] ss:$0 sm:$0xff] }
0x23c7   :  { %v3710_v51 = vpop.permute.xlu1 %3709  ;;  %3824 = vperm.xlu1 %4248, %v4047_v50  }
0x23c8   :  { %3723 = vst.msk [vmem:[#allocation11 + $0xf] sm:$0xff] %vm6340_vm4, %v3710_v51  ;;  %vm3773_vm4 = vcmask 518400  }
0x23ca   :  { %3762 = vrot.lane.b32.xlu0 %v5990_v24, %s6245_s26 }
0x23cb   :  { %v3712_v1 = vpop.permute.xlu1 %3711 }
0x23cc   :  { %3724 = vst.msk [vmem:[#allocation11 + $0x17] sm:$0xff] %vm6341_vm14, %v3712_v1  ;;  %vm6352_vm14 = vmmov %vm6348_vm0 }
0x23ce   :  { %3777 = vrot.lane.b32.xlu0 %v5964_v13, %s6246_s7 }
0x23cf   :  { %v3714_v60 = vpop.permute.xlu1 %3713 }
0x23d0   :  { %3726 = vst.msk [vmem:[#allocation11 + $0x1f] sm:$0x1] %vm3725_vm1, %v3714_v60  ;;  %vm6353_vm1 = vcmask 781824  }
0x23d1   :  { %3769 = vst.msk [vmem:[#allocation11 + $0x1d] sm:$0xf8] %vm3768_vm6, %v3714_v60  ;;  %vm6354_vm6 = vcmask 31744  }
0x23d2   :  { %3781 = vrot.lane.b32.xlu0 %v5990_v24, %s6246_s7 }
0x23d3   :  { %v3730_v63 = vpop.permute.xlu1 %3729 }
0x23d4   :  { %3743 = vst.msk [vmem:[#allocation11 + $0x6] sm:$0xff] %vm6342_vm15, %v3730_v63  ;;  %vm6355_vm15 = vmmov %vm6354_vm6 }
0x23d7   :  { %v3734_v18 = vpop.permute.xlu1 %3733 }
0x23d8   :  { %3745 = vst.msk [vmem:[#allocation11 + $0x16] sm:$0xff] %vm6343_vm10, %v3734_v18  ;;  %vm6356_vm10 = vmmov %vm6354_vm6 }
0x23db   :  { %v3757_v13 = vpop.permute.xlu1 %3756 }
0x23dc   :  { %3770 = vst.msk [vmem:[#allocation11 + $0x25] sm:$0xff] %vm6344_vm2, %v3757_v13  ;;  %vm6357_vm2 = vmmov %vm6354_vm6 }
0x23df   :  { %v3761_v54 = vpop.permute.xlu1 %3760 }
0x23e0   :  { %3772 = vst.msk [vmem:[#allocation11 + $0x35] sm:$0xff] %vm6345_vm13, %v3761_v54  ;;  %vm6358_vm13 = vmmov %vm6357_vm2 }
0x23e3   :  { %v3776_v9 = vpop.permute.xlu1 %3775 }
0x23e4   :  { %3789 = vst.msk [vmem:[#allocation11 + $0x24] sm:$0xff] %vm6346_vm3, %v3776_v9  ;;  %vm6359_vm3 = vmmov %vm6357_vm2 }
0x23e7   :  { %v3780_v4 = vpop.permute.xlu1 %3779 }
0x2428   :  { %v2411_v36 = vpop.permute.xlu0 %2410 }
0x2429   :  { %2413 = vst.msk [vmem:[%s6161_s23] sm:$0x3] %vm1591_vm8, %v2411_v36  ;;  %vm6351_vm8 = vmmov %vm6348_vm0 }
0x242c   :  { %v3728_v24 = vpop.permute.xlu0 %3727 }
0x242d   :  { %3742 = vst.msk [vmem:[#allocation11 - $0x2] sm:$0xfc] %vm6347_vm7, %v3728_v24  ;;  %vm6360_vm7 = vmmov %vm6357_vm2 }
0x2430   :  { %v3732_v44 = vpop.permute.xlu0 %3731 }
0x2431   :  { %3744 = vst.msk [vmem:[#allocation11 + $0xe] sm:$0xff] %vm6348_vm0, %v3732_v44  ;;  %vm6361_vm0 = vmmov %vm6357_vm2 }
0x2434   :  { %v3736_v3 = vpop.permute.xlu0 %3735  ;;  %v3793_v61 = vld [vmem:[#allocation11] sm:$0xff] }
0x2435   :  { %3746 = vst.msk [vmem:[#allocation11 + $0x1e] sm:$0x3] %vm6349_vm11, %v3736_v3 }
0x2436   :  { %3788 = vst.msk [vmem:[#allocation11 + $0x1c] sm:$0xf0] %vm3787_vm9, %v3736_v3 }
0x2438   :  { %v3759_v35 = vpop.permute.xlu0 %3758  ;;  %v3794_v45 = vld [vmem:[#allocation11 + $0x8] sm:$0xff]  ;;  %v3795_v55 = vld [vmem:[#allocation11 + $0x10] sm:$0xff] }
0x2439   :  { %3771 = vst.msk [vmem:[#allocation11 + $0x2d] sm:$0xff] %vm6350_vm12, %v3759_v35  ;;  %v3801_v5 = vpack.c.bf16 %v3794_v45, %v3793_v61 }
0x243a   :  { %3791 = vst.msk [vmem:[#allocation11 + $0x34] sm:$0xff] %vm6351_vm8, %v3780_v4 }
0x243b   :  { %4201 = vmatprep.mubr.msk.bf16.mxu1 %vm3863_vm5, %v3801_v5 }
0x243c   :  { %v3763_v52 = vpop.permute.xlu0 %3762  ;;  %v3796_v38 = vld [vmem:[#allocation11 + $0x18] sm:$0xff] }
0x243d   :  { %3774 = vst.msk [vmem:[#allocation11 + $0x3d] sm:$0x7] %vm3773_vm4, %v3763_v52  ;;  %v3802_v56 = vpack.c.bf16 %v3796_v38, %v3795_v55  ;;  %v3797_v25 = vld [vmem:[#allocation11 + $0x20] sm:$0xff] }
0x243f   :  { %4202 = vmatmul.mubr.msk.bf16.vlgmr.msra.gmra.mrb[28].mxu1 %vm3863_vm5, %v3802_v56 }
0x2440   :  { %v3778_v11 = vpop.permute.xlu0 %3777 }
0x2441   :  { %3790 = vst.msk [vmem:[#allocation11 + $0x2c] sm:$0xff] %vm6352_vm14, %v3778_v11 }
0x2444   :  { %v3782_v30 = vpop.permute.xlu0 %3781 }
0x2445   :  { %3792 = vst.msk [vmem:[#allocation11 + $0x3c] sm:$0xf] %vm6353_vm1, %v3782_v30 }
0x2446   :  { %v3825_v33 = vpop.permute.xlu1 %3824 }
0x2448   :  { %v3798_v48 = vld [vmem:[#allocation11 + $0x28] sm:$0xff]  ;;  %v3799_v27 = vld [vmem:[#allocation11 + $0x30] sm:$0xff] }
0x2449   :  { %v3803_v23 = vpack.c.bf16 %v3798_v48, %v3797_v25 }
0x244b   :  { %4205 = vmatprep.mubr.msk.bf16.mxu1 %vm3863_vm5, %v3803_v23 }
0x244c   :  { %v3800_v29 = vld [vmem:[#allocation11 + $0x38] sm:$0xff] }
0x244d   :  { %v3804_v32 = vpack.c.bf16 %v3800_v29, %v3799_v27 }
0x244f   :  { %4206 = vmatmul.mubr.msk.bf16.gmra.mrb[32].mxu1 %vm3863_vm5, %v3804_v32 }
0x2512   :  { %v4203_v41 = vpop.f32.mrb[28].mxu1 }
0x2513   :  { %v3919_v58 = vadd.f32 %v4203_v41, %v3825_v33  ;;  %v3910_v39 = vpop.f32.mrb[29].mxu1 }
0x2514   :  { %v3911_v43 = vadd.f32 %v3910_v39, %v3825_v33  ;;  %v4204_v49 = vpop.f32.mrb[30].mxu1 }
0x2515   :  { %3943 = vst.msk [vmem:[%s6173_s24 + $0x10] sm:$0xff] %vm6354_vm6, %v3919_v58  ;;  %v3922_v31 = vadd.f32 %v4204_v49, %v3825_v33  ;;  %v3913_v42 = vpop.f32.mrb[31].mxu1 }
0x2516   :  { %3941 = vst.msk [vmem:[%s6173_s24] sm:$0xff] %vm6355_vm15, %v3911_v43  ;;  %v3914_v2 = vadd.f32 %v3913_v42, %v3825_v33 }
0x2517   :  { %3944 = vst.msk [vmem:[%s6173_s24 + $0x18] sm:$0xff] %vm6356_vm10, %v3922_v31 }
0x2518   :  { %3942 = vst.msk [vmem:[%s6173_s24 + $0x8] sm:$0xff] %vm6357_vm2, %v3914_v2 }
0x2522   :  { %v4207_v40 = vpop.f32.mrb[32].mxu1 }
0x2523   :  { %v3935_v6 = vadd.f32 %v4207_v40, %v3825_v33  ;;  %v3926_v19 = vpop.f32.mrb[33].mxu1 }
0x2524   :  { %v3927_v22 = vadd.f32 %v3926_v19, %v3825_v33  ;;  %v4208_v47 = vpop.f32.mrb[34].mxu1 }
0x2525   :  { %3947 = vst.msk [vmem:[%s6173_s24 + $0x30] sm:$0xff] %vm6358_vm13, %v3935_v6  ;;  %v3938_v0 = vadd.f32 %v4208_v47, %v3825_v33  ;;  %v3929_v57 = vpop.f32.mrb[35].mxu1 }
0x2526   :  { %3945 = vst.msk [vmem:[%s6173_s24 + $0x20] sm:$0xff] %vm6359_vm3, %v3927_v22  ;;  %v3930_v28 = vadd.f32 %v3929_v57, %v3825_v33 }
0x2527   :  { %3948 = vst.msk [vmem:[%s6173_s24 + $0x38] sm:$0xff] %vm6360_vm7, %v3938_v0 }
0x2528   :  { %3946 = vst.msk [vmem:[%s6173_s24 + $0x28] sm:$0xff] %vm6361_vm0, %v3930_v28 }

</bundles_post_ra>
